<compile_context>
chip_gen: v7x
topology: tpu7x:2x2x1
jax: 0.10.0
libtpu: 0.0.40
codegen_flags: <defaults>
</compile_context>

<pallas_src>
import functools

import numpy as np
import jax
import jax.numpy as jnp
from jax.experimental import pallas as pl
from jax.experimental.pallas import tpu as pltpu


def _gelu_tanh(x):
    c = 0.7978845608028654  # sqrt(2/pi)
    return 0.5 * x * (1.0 + jnp.tanh(c * (x + 0.044715 * x * x * x)))


# --------------------------------------------------------------------------------------
# Static phase plan for the transposed conv (per spatial axis).
#   y[s*q + rho] = sum_j x[q + m - j] * w[r + s*j],  r = (rho + p) % s,  m = (rho + p)//s
# --------------------------------------------------------------------------------------
def _axis_phase_plan(D, K, s):
    p = K // 2
    Do = (D - 1) * s - 2 * p + K
    NQ = -(-Do // s)                       # common q-grid (ceil); overhang cropped later
    phases = []
    all_offs = []
    for rho in range(s):
        r = (rho + p) % s
        m = (rho + p) // s
        ks = list(range(r, K, s))          # taps of this phase
        offs = [m - j for j in range(len(ks))]
        valid = -(-(Do - rho) // s) if Do > rho else 0
        phases.append((tuple(ks), tuple(offs), valid))
        all_offs.extend(offs)
    padf = max(0, -min(all_offs)) if all_offs else 0
    padb = max(0, max(all_offs) + NQ - D) if all_offs else 0
    return Do, NQ, padf, padb, phases


# --------------------------------------------------------------------------------------
# Kernel 1: depthwise ConvTranspose3d + bias + GroupNorm, lanes = (w, c) merged.
# Grid = (N,).  Output layout (1, s^3*NQd, NQh, NQw*C), phase-major (flat == old layout).
# --------------------------------------------------------------------------------------
def _make_dwconvt_gn_kernel(phase_specs, NQd, NQh, Xw, C, count, eps):
    inv_n = 1.0 / float(count)
    n_phases = len(phase_specs)

    def kernel(x_ref, w_ref, b_ref, g_ref, bt_ref, gs_ref, gb_ref, o_ref, scr_ref):
        b_row = b_ref[...]                                       # (1, Xw), bias tiled over w
        s1 = jnp.zeros((1, Xw), jnp.float32)                     # per-(w,c) lane sums
        s2 = jnp.zeros((1, Xw), jnp.float32)

        # Phase loop: ONE slab live at a time; biased slab -> f32 VMEM scratch.
        for pidx, (taps, (vd, vh, vw)) in enumerate(phase_specs):
            acc = None
            for (t, od, oh, wi) in taps:                         # statically unrolled taps
                xs = x_ref[0, wi, od:od + NQd, oh:oh + NQh, :]   # (NQd, NQh, Xw)
                contrib = xs * w_ref[t:t + 1, :]                 # lane-wise FMA (f32)
                acc = contrib if acc is None else acc + contrib
            if acc is None:
                acc = jnp.zeros((NQd, NQh, Xw), jnp.float32)
            acc = acc + b_row

            # validity mask (static per phase) — no odd-shaped slices
            if vd == NQd and vh == NQh and vw * C == Xw:
                valid = acc
            else:
                md = jax.lax.broadcasted_iota(jnp.int32, (NQd, NQh, Xw), 0) < vd
                mh = jax.lax.broadcasted_iota(jnp.int32, (NQd, NQh, Xw), 1) < vh
                ml = jax.lax.broadcasted_iota(jnp.int32, (NQd, NQh, Xw), 2) < (vw * C)
                valid = jnp.where(md & mh & ml, acc, 0.0)
            s1 = s1 + jnp.sum(valid, axis=(0, 1))
            s2 = s2 + jnp.sum(valid * valid, axis=(0, 1))

            scr_ref[pidx * NQd:(pidx + 1) * NQd] = acc

        # Per-channel GroupNorm stats: reduce the NQw lane-groups with a tiny constant
        # group-sum matmul (gs: (Xw, C)); broadcast scale/shift back with gb: (C, Xw).
        mu = jnp.dot(s1, gs_ref[...], preferred_element_type=jnp.float32) * inv_n   # (1, C)
        ex2 = jnp.dot(s2, gs_ref[...], preferred_element_type=jnp.float32) * inv_n
        var = jnp.maximum(ex2 - mu * mu, 0.0)
        rstd = jax.lax.rsqrt(var + eps)
        scale_c = g_ref[...] * rstd                              # (1, C)
        shift_c = bt_ref[...] - mu * scale_c                     # (1, C)
        scale_t = jnp.dot(scale_c, gb_ref[...], preferred_element_type=jnp.float32)  # (1, Xw)
        shift_t = jnp.dot(shift_c, gb_ref[...], preferred_element_type=jnp.float32)

        # Normalize each phase slab and emit the lane-dense output.
        for pidx in range(n_phases):
            y = scr_ref[pidx * NQd:(pidx + 1) * NQd] * scale_t + shift_t
            o_ref[0, pidx * NQd:(pidx + 1) * NQd] = y.astype(o_ref.dtype)

    return kernel


# --------------------------------------------------------------------------------------
# Kernel 2: row-folded pointwise MLP (the two 1x1x1 convs) with block-diagonal weights.
# Rows are independent -> parallel grid over folded-row tiles; weights stay resident.
# --------------------------------------------------------------------------------------
def _pointwise_mlp_kernel(z_ref, w2_ref, b2_ref, w3_ref, b3_ref, o_ref):
    h = jnp.dot(z_ref[...], w2_ref[...], preferred_element_type=jnp.float32) + b2_ref[...]
    h = _gelu_tanh(h)                                            # f32 (v5e-safe)
    h = h.astype(w3_ref.dtype)
    o = jnp.dot(h, w3_ref[...], preferred_element_type=jnp.float32) + b3_ref[...]
    o_ref[...] = o.astype(o_ref.dtype)


def mednext_up_block_forward(x, params, *, kernel_size, stride,
                             interm_dtype=jnp.bfloat16):
    N, C, D, H, W = x.shape
    K, s = kernel_size, stride

    Dod, NQd, pfd, pbd, phd = _axis_phase_plan(D, K, s)
    Doh, NQh, pfh, pbh, phh = _axis_phase_plan(H, K, s)
    Dow, NQw, pfw, pbw, phw = _axis_phase_plan(W, K, s)
    Xw = NQw * C

    # ---- glue on the small pre-upsample tensor: channels-last, halo pad, merge W into
    #      lanes, and build pre-shifted copies for the distinct W-tap offsets -----------
    x_cl = jnp.transpose(x, (0, 2, 3, 4, 1)).astype(interm_dtype)
    x_cl = jnp.pad(x_cl, ((0, 0), (pfd, pbd), (pfh, pbh), (pfw, pbw), (0, 0)))
    Dp, Hp, Wp = D + pfd + pbd, H + pfh + pbh, W + pfw + pbw
    xm = x_cl.reshape(N, Dp, Hp, Wp * C)
    woffs = sorted({pfw + off for (_k, offs, _v) in phw for off in offs}) or [0]
    widx = {o: i for i, o in enumerate(woffs)}
    n_woff = len(woffs)
    xw = jnp.stack([xm[:, :, :, o * C:o * C + Xw] for o in woffs], axis=1)
    # xw: (N, n_woff, Dp, Hp, Xw)

    # depthwise tap weights / bias, tiled over the NQw lane groups (wrapper-side)
    w_taps = jnp.transpose(params["w_dw"][:, 0].reshape(C, K ** 3)).astype(jnp.float32)
    w_tiled = jnp.tile(w_taps, (1, NQw))                                # (K^3, Xw)
    b_tiled = jnp.tile(params["b_dw"].reshape(1, C).astype(jnp.float32), (1, NQw))
    g_vec = params["gn_w"].reshape(1, C).astype(jnp.float32)
    bt_vec = params["gn_b"].reshape(1, C).astype(jnp.float32)
    gsum = jnp.tile(jnp.eye(C, dtype=jnp.float32), (NQw, 1))            # (Xw, C)
    gbrd = jnp.transpose(gsum)                                          # (C, Xw)

    # static per-phase tap plan: (flat tap index, padded D/H offsets, W-copy index)
    phase_specs = []
    for rd in range(s):
        ks_d, off_d, v_d = phd[rd]
        for rh in range(s):
            ks_h, off_h, v_h = phh[rh]
            for rw in range(s):
                ks_w, off_w, v_w = phw[rw]
                taps = []
                for kd, od in zip(ks_d, off_d):
                    for kh, oh in zip(ks_h, off_h):
                        for kw, ow in zip(ks_w, off_w):
                            taps.append((kd * K * K + kh * K + kw,
                                         pfd + od, pfh + oh, widx[pfw + ow]))
                phase_specs.append((tuple(taps), (v_d, v_h, v_w)))

    s3 = s ** 3
    count = Dod * Doh * Dow
    kern1 = _make_dwconvt_gn_kernel(tuple(phase_specs), NQd, NQh, Xw, C, count, 1e-5)

    y = pl.pallas_call(
        kern1,
        out_shape=jax.ShapeDtypeStruct((N, s3 * NQd, NQh, Xw), interm_dtype),
        grid=(N,),
        in_specs=[
            pl.BlockSpec((1, n_woff, Dp, Hp, Xw), lambda n: (n, 0, 0, 0, 0)),
            pl.BlockSpec((K ** 3, Xw), lambda n: (0, 0)),
            pl.BlockSpec((1, Xw), lambda n: (0, 0)),
            pl.BlockSpec((1, C), lambda n: (0, 0)),
            pl.BlockSpec((1, C), lambda n: (0, 0)),
            pl.BlockSpec((Xw, C), lambda n: (0, 0)),
            pl.BlockSpec((C, Xw), lambda n: (0, 0)),
        ],
        out_specs=pl.BlockSpec((1, s3 * NQd, NQh, Xw), lambda n: (n, 0, 0, 0)),
        scratch_shapes=[pltpu.VMEM((s3 * NQd, NQh, Xw), jnp.float32)],
        compiler_params=pltpu.CompilerParams(
            dimension_semantics=("parallel",),
            vmem_limit_bytes=48 * 1024 * 1024),
    )(xw, w_tiled, b_tiled, g_vec, bt_vec, gsum, gbrd)

    # ---- pointwise MLP on rows (flat layout of y); row-fold -> lane-dense blocks ------
    w2, b2, w3, b3 = params["w2"], params["b2"], params["w3"], params["b3"]
    Chid, Cout = w2.shape[0], w3.shape[0]
    M = N * s3 * NQd * NQh * NQw

    f = 1
    if min(C, Cout) < 128:
        while f * min(C, Cout) < 128 and f < 256:
            f *= 2
    while f > 1 and M % f != 0:
        f //= 2
    Mf = M // f

    target_rows = 2048                      # ~2048 original rows per tile
    TMf = max(8, target_rows // f)
    if TMf >= Mf:
        TMf = Mf
    grid2 = pl.cdiv(Mf, TMf)

    z = y.reshape(Mf, f * C)                # free: flat layout identical

    eyef = jnp.eye(f, dtype=jnp.float32)
    w2_bd = jnp.kron(eyef, jnp.transpose(w2).astype(jnp.float32)).astype(interm_dtype)
    w3_bd = jnp.kron(eyef, jnp.transpose(w3).astype(jnp.float32)).astype(interm_dtype)
    b2_bd = jnp.tile(b2.reshape(1, Chid).astype(jnp.float32), (1, f))
    b3_bd = jnp.tile(b3.reshape(1, Cout).astype(jnp.float32), (1, f))

    o = pl.pallas_call(
        _pointwise_mlp_kernel,
        out_shape=jax.ShapeDtypeStruct((Mf, f * Cout), jnp.float32),
        grid=(grid2,),
        in_specs=[
            pl.BlockSpec((TMf, f * C), lambda i: (i, 0)),
            pl.BlockSpec((f * C, f * Chid), lambda i: (0, 0)),
            pl.BlockSpec((1, f * Chid), lambda i: (0, 0)),
            pl.BlockSpec((f * Chid, f * Cout), lambda i: (0, 0)),
            pl.BlockSpec((1, f * Cout), lambda i: (0, 0)),
        ],
        out_specs=pl.BlockSpec((TMf, f * Cout), lambda i: (i, 0)),
        compiler_params=pltpu.CompilerParams(dimension_semantics=("parallel",)),
    )(z, w2_bd, b2_bd, w3_bd, b3_bd)

    # ---- single XLA layout op on the final (smallest) tensor:
    #      un-scramble phase-major -> NCDHW, crop the q-grid overhang, front pad by 1.
    o = o.reshape(N, s, s, s, NQd, NQh, NQw, Cout)
    o = jnp.transpose(o, (0, 7, 4, 1, 5, 2, 6, 3))     # (N, Cout, qd, rd, qh, rh, qw, rw)
    o = o.reshape(N, Cout, NQd * s, NQh * s, NQw * s)
    o = o[:, :, :Dod, :Doh, :Dow]
    return jnp.pad(o, ((0, 0), (0, 0), (1, 0), (1, 0), (1, 0)))


# --------------------------------------------------------------------------------------
# Pure NumPy reference (direct scatter definition of ConvTranspose3d), for verification.
# --------------------------------------------------------------------------------------
def reference_forward(x, params, kernel_size, stride):
    x = np.asarray(x, np.float64)
    w_dw = np.asarray(params["w_dw"], np.float64)
    b_dw = np.asarray(params["b_dw"], np.float64)
    gn_w = np.asarray(params["gn_w"], np.float64)
    gn_b = np.asarray(params["gn_b"], np.float64)
    w2 = np.asarray(params["w2"], np.float64)
    b2 = np.asarray(params["b2"], np.float64)
    w3 = np.asarray(params["w3"], np.float64)
    b3 = np.asarray(params["b3"], np.float64)

    N, C, D, H, W = x.shape
    K, s = kernel_size, stride
    p = K // 2
    Do = (D - 1) * s - 2 * p + K
    Ho = (H - 1) * s - 2 * p + K
    Wo = (W - 1) * s - 2 * p + K

    y = np.zeros((N, C, Do, Ho, Wo), np.float64)
    for idd in range(D):
        for kd in range(K):
            od = idd * s - p + kd
            if od < 0 or od >= Do:
                continue
            for ih in range(H):
                for kh in range(K):
                    oh = ih * s - p + kh
                    if oh < 0 or oh >= Ho:
                        continue
                    for iw in range(W):
                        for kw in range(K):
                            ow = iw * s - p + kw
                            if ow < 0 or ow >= Wo:
                                continue
                            y[:, :, od, oh, ow] += (
                                x[:, :, idd, ih, iw] * w_dw[:, 0, kd, kh, kw])
    y += b_dw[None, :, None, None, None]

    mu = y.mean(axis=(2, 3, 4), keepdims=True)
    var = ((y - mu) ** 2).mean(axis=(2, 3, 4), keepdims=True)
    yn = (y - mu) / np.sqrt(var + 1e-5)
    yn = gn_w[None, :, None, None, None] * yn + gn_b[None, :, None, None, None]

    h = np.einsum("oc,ncdhw->nodhw", w2, yn) + b2[None, :, None, None, None]
    h = 0.5 * h * (1.0 + np.tanh(0.7978845608028654 * (h + 0.044715 * h ** 3)))
    o = np.einsum("oc,ncdhw->nodhw", w3, h) + b3[None, :, None, None, None]
    return np.pad(o, ((0, 0), (0, 0), (1, 0), (1, 0), (1, 0)))


if __name__ == "__main__":
    key = jax.random.PRNGKey(0)
    N, Cin, Cout = 2, 4, 2
    D = H = W = 4
    K, s, exp_r = 5, 2, 4
    Chid = exp_r * Cin

    ks = jax.random.split(key, 9)
    x = jax.random.normal(ks[0], (N, Cin, D, H, W), jnp.float32)
    params = dict(
        w_dw=0.1 * jax.random.normal(ks[1], (Cin, 1, K, K, K), jnp.float32),
        b_dw=0.1 * jax.random.normal(ks[2], (Cin,), jnp.float32),
        gn_w=1.0 + 0.1 * jax.random.normal(ks[3], (Cin,), jnp.float32),
        gn_b=0.1 * jax.random.normal(ks[4], (Cin,), jnp.float32),
        w2=0.2 * jax.random.normal(ks[5], (Chid, Cin), jnp.float32),
        b2=0.1 * jax.random.normal(ks[6], (Chid,), jnp.float32),
        w3=0.2 * jax.random.normal(ks[7], (Cout, Chid), jnp.float32),
        b3=0.1 * jax.random.normal(ks[8], (Cout,), jnp.float32),
    )

    ref = reference_forward(np.asarray(x),
                            {k: np.asarray(v) for k, v in params.items()}, K, s)

    # f32 intermediate path (tight numerical check of the kernel structure)
    fwd32 = jax.jit(functools.partial(mednext_up_block_forward,
                                      kernel_size=K, stride=s,
                                      interm_dtype=jnp.float32))
    out32 = jax.block_until_ready(fwd32(x, params))
    assert out32.shape == ref.shape, (out32.shape, ref.shape)
    np.testing.assert_allclose(np.asarray(out32), ref, rtol=5e-4, atol=5e-4)

    # bf16 path (performance configuration: bf16 input / intermediate / MXU operands)
    fwd16 = jax.jit(functools.partial(mednext_up_block_forward,
                                      kernel_size=K, stride=s,
                                      interm_dtype=jnp.bfloat16))
    out16 = jax.block_until_ready(fwd16(x, params))
    assert out16.shape == ref.shape, (out16.shape, ref.shape)
    np.testing.assert_allclose(np.asarray(out16), ref, rtol=3e-2, atol=3e-2)

    print("KERNEL_OK")
</pallas_src>

<mosaic_0001>
module attributes {stable_mosaic.version = 11 : i64} {
  func.func @kernel(%arg0: i32, %arg1: memref<1x3x6x6x16xf32, #tpu.memory_space<vmem>>, %arg2: memref<125x16xf32, #tpu.memory_space<vmem>>, %arg3: memref<1x16xf32, #tpu.memory_space<vmem>>, %arg4: memref<1x4xf32, #tpu.memory_space<vmem>>, %arg5: memref<1x4xf32, #tpu.memory_space<vmem>>, %arg6: memref<16x4xf32, #tpu.memory_space<vmem>>, %arg7: memref<4x16xf32, #tpu.memory_space<vmem>>, %arg8: memref<1x32x4x16xf32, #tpu.memory_space<vmem>>, %arg9: memref<32x4x16xf32, #tpu.memory_space<vmem>>) attributes {dimension_semantics = [#tpu.dimension_semantics<parallel>], iteration_bounds = array<i64: 2>, scalar_prefetch = 0 : i64, scratch_operands = 1 : i64, tpu.core_type = #tpu.core_type<tc>, window_params = [{transform_indices = @transform_0, window_bounds = array<i64: 1, 3, 6, 6, 16>}, {pipeline_mode = #tpu.pipeline_mode<synchronous>, transform_indices = @transform_1, window_bounds = array<i64: 125, 16>}, {pipeline_mode = #tpu.pipeline_mode<synchronous>, transform_indices = @transform_2, window_bounds = array<i64: 1, 16>}, {pipeline_mode = #tpu.pipeline_mode<synchronous>, transform_indices = @transform_3, window_bounds = array<i64: 1, 4>}, {pipeline_mode = #tpu.pipeline_mode<synchronous>, transform_indices = @transform_4, window_bounds = array<i64: 1, 4>}, {pipeline_mode = #tpu.pipeline_mode<synchronous>, transform_indices = @transform_5, window_bounds = array<i64: 16, 4>}, {pipeline_mode = #tpu.pipeline_mode<synchronous>, transform_indices = @transform_6, window_bounds = array<i64: 4, 16>}, {transform_indices = @transform_7, window_bounds = array<i64: 1, 32, 4, 16>}]} {
    %c0 = arith.constant 0 : index
    %c0_0 = arith.constant 0 : index
    %0 = vector.load %arg3[%c0, %c0_0] : memref<1x16xf32, #tpu.memory_space<vmem>>, vector<1x16xf32>
    %cst = arith.constant 0.000000e+00 : f32
    %1 = vector.broadcast %cst : f32 to vector<1x16xf32>
    %cst_1 = arith.constant 0.000000e+00 : f32
    %2 = vector.broadcast %cst_1 : f32 to vector<1x16xf32>
    %c0_2 = arith.constant 0 : index
    %c2 = arith.constant 2 : index
    %c2_3 = arith.constant 2 : index
    %c2_4 = arith.constant 2 : index
    %c0_5 = arith.constant 0 : index
    %3 = vector.load %arg1[%c0_2, %c2, %c2_3, %c2_4, %c0_5] : memref<1x3x6x6x16xf32, #tpu.memory_space<vmem>>, vector<1x1x4x4x16xf32>
    %4 = vector.shape_cast %3 : vector<1x1x4x4x16xf32> to vector<4x4x16xf32>
    %c0_6 = arith.constant 0 : index
    %c0_7 = arith.constant 0 : index
    %5 = vector.load %arg2[%c0_6, %c0_7] : memref<125x16xf32, #tpu.memory_space<vmem>>, vector<1x16xf32>
    %6 = vector.shape_cast %5 : vector<1x16xf32> to vector<1x1x16xf32>
    %7 = vector.broadcast %6 : vector<1x1x16xf32> to vector<4x4x16xf32>
    %8 = arith.mulf %4, %7 : vector<4x4x16xf32>
    %c0_8 = arith.constant 0 : index
    %c1 = arith.constant 1 : index
    %c2_9 = arith.constant 2 : index
    %c2_10 = arith.constant 2 : index
    %c0_11 = arith.constant 0 : index
    %9 = vector.load %arg1[%c0_8, %c1, %c2_9, %c2_10, %c0_11] : memref<1x3x6x6x16xf32, #tpu.memory_space<vmem>>, vector<1x1x4x4x16xf32>
    %10 = vector.shape_cast %9 : vector<1x1x4x4x16xf32> to vector<4x4x16xf32>
    %c2_12 = arith.constant 2 : index
    %c0_13 = arith.constant 0 : index
    %11 = vector.load %arg2[%c2_12, %c0_13] : memref<125x16xf32, #tpu.memory_space<vmem>>, vector<1x16xf32>
    %12 = vector.shape_cast %11 : vector<1x16xf32> to vector<1x1x16xf32>
    %13 = vector.broadcast %12 : vector<1x1x16xf32> to vector<4x4x16xf32>
    %14 = arith.mulf %10, %13 : vector<4x4x16xf32>
    %15 = arith.addf %8, %14 : vector<4x4x16xf32>
    %c0_14 = arith.constant 0 : index
    %c0_15 = arith.constant 0 : index
    %c2_16 = arith.constant 2 : index
    %c2_17 = arith.constant 2 : index
    %c0_18 = arith.constant 0 : index
    %16 = vector.load %arg1[%c0_14, %c0_15, %c2_16, %c2_17, %c0_18] : memref<1x3x6x6x16xf32, #tpu.memory_space<vmem>>, vector<1x1x4x4x16xf32>
    %17 = vector.shape_cast %16 : vector<1x1x4x4x16xf32> to vector<4x4x16xf32>
    %c4 = arith.constant 4 : index
    %c0_19 = arith.constant 0 : index
    %18 = vector.load %arg2[%c4, %c0_19] : memref<125x16xf32, #tpu.memory_space<vmem>>, vector<1x16xf32>
    %19 = vector.shape_cast %18 : vector<1x16xf32> to vector<1x1x16xf32>
    %20 = vector.broadcast %19 : vector<1x1x16xf32> to vector<4x4x16xf32>
    %21 = arith.mulf %17, %20 : vector<4x4x16xf32>
    %22 = arith.addf %15, %21 : vector<4x4x16xf32>
    %c0_20 = arith.constant 0 : index
    %c2_21 = arith.constant 2 : index
    %c2_22 = arith.constant 2 : index
    %c1_23 = arith.constant 1 : index
    %c0_24 = arith.constant 0 : index
    %23 = vector.load %arg1[%c0_20, %c2_21, %c2_22, %c1_23, %c0_24] : memref<1x3x6x6x16xf32, #tpu.memory_space<vmem>>, vector<1x1x4x4x16xf32>
    %24 = vector.shape_cast %23 : vector<1x1x4x4x16xf32> to vector<4x4x16xf32>
    %c10 = arith.constant 10 : index
    %c0_25 = arith.constant 0 : index
    %25 = vector.load %arg2[%c10, %c0_25] : memref<125x16xf32, #tpu.memory_space<vmem>>, vector<1x16xf32>
    %26 = vector.shape_cast %25 : vector<1x16xf32> to vector<1x1x16xf32>
    %27 = vector.broadcast %26 : vector<1x1x16xf32> to vector<4x4x16xf32>
    %28 = arith.mulf %24, %27 : vector<4x4x16xf32>
    %29 = arith.addf %22, %28 : vector<4x4x16xf32>
    %c0_26 = arith.constant 0 : index
    %c1_27 = arith.constant 1 : index
    %c2_28 = arith.constant 2 : index
    %c1_29 = arith.constant 1 : index
    %c0_30 = arith.constant 0 : index
    %30 = vector.load %arg1[%c0_26, %c1_27, %c2_28, %c1_29, %c0_30] : memref<1x3x6x6x16xf32, #tpu.memory_space<vmem>>, vector<1x1x4x4x16xf32>
    %31 = vector.shape_cast %30 : vector<1x1x4x4x16xf32> to vector<4x4x16xf32>
    %c12 = arith.constant 12 : index
    %c0_31 = arith.constant 0 : index
    %32 = vector.load %arg2[%c12, %c0_31] : memref<125x16xf32, #tpu.memory_space<vmem>>, vector<1x16xf32>
    %33 = vector.shape_cast %32 : vector<1x16xf32> to vector<1x1x16xf32>
    %34 = vector.broadcast %33 : vector<1x1x16xf32> to vector<4x4x16xf32>
    %35 = arith.mulf %31, %34 : vector<4x4x16xf32>
    %36 = arith.addf %29, %35 : vector<4x4x16xf32>
    %c0_32 = arith.constant 0 : index
    %c0_33 = arith.constant 0 : index
    %c2_34 = arith.constant 2 : index
    %c1_35 = arith.constant 1 : index
    %c0_36 = arith.constant 0 : index
    %37 = vector.load %arg1[%c0_32, %c0_33, %c2_34, %c1_35, %c0_36] : memref<1x3x6x6x16xf32, #tpu.memory_space<vmem>>, vector<1x1x4x4x16xf32>
    %38 = vector.shape_cast %37 : vector<1x1x4x4x16xf32> to vector<4x4x16xf32>
    %c14 = arith.constant 14 : index
    %c0_37 = arith.constant 0 : index
    %39 = vector.load %arg2[%c14, %c0_37] : memref<125x16xf32, #tpu.memory_space<vmem>>, vector<1x16xf32>
    %40 = vector.shape_cast %39 : vector<1x16xf32> to vector<1x1x16xf32>
    %41 = vector.broadcast %40 : vector<1x1x16xf32> to vector<4x4x16xf32>
    %42 = arith.mulf %38, %41 : vector<4x4x16xf32>
    %43 = arith.addf %36, %42 : vector<4x4x16xf32>
    %c0_38 = arith.constant 0 : index
    %c2_39 = arith.constant 2 : index
    %c2_40 = arith.constant 2 : index
    %c0_41 = arith.constant 0 : index
    %c0_42 = arith.constant 0 : index
    %44 = vector.load %arg1[%c0_38, %c2_39, %c2_40, %c0_41, %c0_42] : memref<1x3x6x6x16xf32, #tpu.memory_space<vmem>>, vector<1x1x4x4x16xf32>
    %45 = vector.shape_cast %44 : vector<1x1x4x4x16xf32> to vector<4x4x16xf32>
    %c20 = arith.constant 20 : index
    %c0_43 = arith.constant 0 : index
    %46 = vector.load %arg2[%c20, %c0_43] : memref<125x16xf32, #tpu.memory_space<vmem>>, vector<1x16xf32>
    %47 = vector.shape_cast %46 : vector<1x16xf32> to vector<1x1x16xf32>
    %48 = vector.broadcast %47 : vector<1x1x16xf32> to vector<4x4x16xf32>
    %49 = arith.mulf %45, %48 : vector<4x4x16xf32>
    %50 = arith.addf %43, %49 : vector<4x4x16xf32>
    %c0_44 = arith.constant 0 : index
    %c1_45 = arith.constant 1 : index
    %c2_46 = arith.constant 2 : index
    %c0_47 = arith.constant 0 : index
    %c0_48 = arith.constant 0 : index
    %51 = vector.load %arg1[%c0_44, %c1_45, %c2_46, %c0_47, %c0_48] : memref<1x3x6x6x16xf32, #tpu.memory_space<vmem>>, vector<1x1x4x4x16xf32>
    %52 = vector.shape_cast %51 : vector<1x1x4x4x16xf32> to vector<4x4x16xf32>
    %c22 = arith.constant 22 : index
    %c0_49 = arith.constant 0 : index
    %53 = vector.load %arg2[%c22, %c0_49] : memref<125x16xf32, #tpu.memory_space<vmem>>, vector<1x16xf32>
    %54 = vector.shape_cast %53 : vector<1x16xf32> to vector<1x1x16xf32>
    %55 = vector.broadcast %54 : vector<1x1x16xf32> to vector<4x4x16xf32>
    %56 = arith.mulf %52, %55 : vector<4x4x16xf32>
    %57 = arith.addf %50, %56 : vector<4x4x16xf32>
    %c0_50 = arith.constant 0 : index
    %c0_51 = arith.constant 0 : index
    %c2_52 = arith.constant 2 : index
    %c0_53 = arith.constant 0 : index
    %c0_54 = arith.constant 0 : index
    %58 = vector.load %arg1[%c0_50, %c0_51, %c2_52, %c0_53, %c0_54] : memref<1x3x6x6x16xf32, #tpu.memory_space<vmem>>, vector<1x1x4x4x16xf32>
    %59 = vector.shape_cast %58 : vector<1x1x4x4x16xf32> to vector<4x4x16xf32>
    %c24 = arith.constant 24 : index
    %c0_55 = arith.constant 0 : index
    %60 = vector.load %arg2[%c24, %c0_55] : memref<125x16xf32, #tpu.memory_space<vmem>>, vector<1x16xf32>
    %61 = vector.shape_cast %60 : vector<1x16xf32> to vector<1x1x16xf32>
    %62 = vector.broadcast %61 : vector<1x1x16xf32> to vector<4x4x16xf32>
    %63 = arith.mulf %59, %62 : vector<4x4x16xf32>
    %64 = arith.addf %57, %63 : vector<4x4x16xf32>
    %c0_56 = arith.constant 0 : index
    %c2_57 = arith.constant 2 : index
    %c1_58 = arith.constant 1 : index
    %c2_59 = arith.constant 2 : index
    %c0_60 = arith.constant 0 : index
    %65 = vector.load %arg1[%c0_56, %c2_57, %c1_58, %c2_59, %c0_60] : memref<1x3x6x6x16xf32, #tpu.memory_space<vmem>>, vector<1x1x4x4x16xf32>
    %66 = vector.shape_cast %65 : vector<1x1x4x4x16xf32> to vector<4x4x16xf32>
    %c50 = arith.constant 50 : index
    %c0_61 = arith.constant 0 : index
    %67 = vector.load %arg2[%c50, %c0_61] : memref<125x16xf32, #tpu.memory_space<vmem>>, vector<1x16xf32>
    %68 = vector.shape_cast %67 : vector<1x16xf32> to vector<1x1x16xf32>
    %69 = vector.broadcast %68 : vector<1x1x16xf32> to vector<4x4x16xf32>
    %70 = arith.mulf %66, %69 : vector<4x4x16xf32>
    %71 = arith.addf %64, %70 : vector<4x4x16xf32>
    %c0_62 = arith.constant 0 : index
    %c1_63 = arith.constant 1 : index
    %c1_64 = arith.constant 1 : index
    %c2_65 = arith.constant 2 : index
    %c0_66 = arith.constant 0 : index
    %72 = vector.load %arg1[%c0_62, %c1_63, %c1_64, %c2_65, %c0_66] : memref<1x3x6x6x16xf32, #tpu.memory_space<vmem>>, vector<1x1x4x4x16xf32>
    %73 = vector.shape_cast %72 : vector<1x1x4x4x16xf32> to vector<4x4x16xf32>
    %c52 = arith.constant 52 : index
    %c0_67 = arith.constant 0 : index
    %74 = vector.load %arg2[%c52, %c0_67] : memref<125x16xf32, #tpu.memory_space<vmem>>, vector<1x16xf32>
    %75 = vector.shape_cast %74 : vector<1x16xf32> to vector<1x1x16xf32>
    %76 = vector.broadcast %75 : vector<1x1x16xf32> to vector<4x4x16xf32>
    %77 = arith.mulf %73, %76 : vector<4x4x16xf32>
    %78 = arith.addf %71, %77 : vector<4x4x16xf32>
    %c0_68 = arith.constant 0 : index
    %c0_69 = arith.constant 0 : index
    %c1_70 = arith.constant 1 : index
    %c2_71 = arith.constant 2 : index
    %c0_72 = arith.constant 0 : index
    %79 = vector.load %arg1[%c0_68, %c0_69, %c1_70, %c2_71, %c0_72] : memref<1x3x6x6x16xf32, #tpu.memory_space<vmem>>, vector<1x1x4x4x16xf32>
    %80 = vector.shape_cast %79 : vector<1x1x4x4x16xf32> to vector<4x4x16xf32>
    %c54 = arith.constant 54 : index
    %c0_73 = arith.constant 0 : index
    %81 = vector.load %arg2[%c54, %c0_73] : memref<125x16xf32, #tpu.memory_space<vmem>>, vector<1x16xf32>
    %82 = vector.shape_cast %81 : vector<1x16xf32> to vector<1x1x16xf32>
    %83 = vector.broadcast %82 : vector<1x1x16xf32> to vector<4x4x16xf32>
    %84 = arith.mulf %80, %83 : vector<4x4x16xf32>
    %85 = arith.addf %78, %84 : vector<4x4x16xf32>
    %c0_74 = arith.constant 0 : index
    %c2_75 = arith.constant 2 : index
    %c1_76 = arith.constant 1 : index
    %c1_77 = arith.constant 1 : index
    %c0_78 = arith.constant 0 : index
    %86 = vector.load %arg1[%c0_74, %c2_75, %c1_76, %c1_77, %c0_78] : memref<1x3x6x6x16xf32, #tpu.memory_space<vmem>>, vector<1x1x4x4x16xf32>
    %87 = vector.shape_cast %86 : vector<1x1x4x4x16xf32> to vector<4x4x16xf32>
    %c60 = arith.constant 60 : index
    %c0_79 = arith.constant 0 : index
    %88 = vector.load %arg2[%c60, %c0_79] : memref<125x16xf32, #tpu.memory_space<vmem>>, vector<1x16xf32>
    %89 = vector.shape_cast %88 : vector<1x16xf32> to vector<1x1x16xf32>
    %90 = vector.broadcast %89 : vector<1x1x16xf32> to vector<4x4x16xf32>
    %91 = arith.mulf %87, %90 : vector<4x4x16xf32>
    %92 = arith.addf %85, %91 : vector<4x4x16xf32>
    %c0_80 = arith.constant 0 : index
    %c1_81 = arith.constant 1 : index
    %c1_82 = arith.constant 1 : index
    %c1_83 = arith.constant 1 : index
    %c0_84 = arith.constant 0 : index
    %93 = vector.load %arg1[%c0_80, %c1_81, %c1_82, %c1_83, %c0_84] : memref<1x3x6x6x16xf32, #tpu.memory_space<vmem>>, vector<1x1x4x4x16xf32>
    %94 = vector.shape_cast %93 : vector<1x1x4x4x16xf32> to vector<4x4x16xf32>
    %c62 = arith.constant 62 : index
    %c0_85 = arith.constant 0 : index
    %95 = vector.load %arg2[%c62, %c0_85] : memref<125x16xf32, #tpu.memory_space<vmem>>, vector<1x16xf32>
    %96 = vector.shape_cast %95 : vector<1x16xf32> to vector<1x1x16xf32>
    %97 = vector.broadcast %96 : vector<1x1x16xf32> to vector<4x4x16xf32>
    %98 = arith.mulf %94, %97 : vector<4x4x16xf32>
    %99 = arith.addf %92, %98 : vector<4x4x16xf32>
    %c0_86 = arith.constant 0 : index
    %c0_87 = arith.constant 0 : index
    %c1_88 = arith.constant 1 : index
    %c1_89 = arith.constant 1 : index
    %c0_90 = arith.constant 0 : index
    %100 = vector.load %arg1[%c0_86, %c0_87, %c1_88, %c1_89, %c0_90] : memref<1x3x6x6x16xf32, #tpu.memory_space<vmem>>, vector<1x1x4x4x16xf32>
    %101 = vector.shape_cast %100 : vector<1x1x4x4x16xf32> to vector<4x4x16xf32>
    %c64 = arith.constant 64 : index
    %c0_91 = arith.constant 0 : index
    %102 = vector.load %arg2[%c64, %c0_91] : memref<125x16xf32, #tpu.memory_space<vmem>>, vector<1x16xf32>
    %103 = vector.shape_cast %102 : vector<1x16xf32> to vector<1x1x16xf32>
    %104 = vector.broadcast %103 : vector<1x1x16xf32> to vector<4x4x16xf32>
    %105 = arith.mulf %101, %104 : vector<4x4x16xf32>
    %106 = arith.addf %99, %105 : vector<4x4x16xf32>
    %c0_92 = arith.constant 0 : index
    %c2_93 = arith.constant 2 : index
    %c1_94 = arith.constant 1 : index
    %c0_95 = arith.constant 0 : index
    %c0_96 = arith.constant 0 : index
    %107 = vector.load %arg1[%c0_92, %c2_93, %c1_94, %c0_95, %c0_96] : memref<1x3x6x6x16xf32, #tpu.memory_space<vmem>>, vector<1x1x4x4x16xf32>
    %108 = vector.shape_cast %107 : vector<1x1x4x4x16xf32> to vector<4x4x16xf32>
    %c70 = arith.constant 70 : index
    %c0_97 = arith.constant 0 : index
    %109 = vector.load %arg2[%c70, %c0_97] : memref<125x16xf32, #tpu.memory_space<vmem>>, vector<1x16xf32>
    %110 = vector.shape_cast %109 : vector<1x16xf32> to vector<1x1x16xf32>
    %111 = vector.broadcast %110 : vector<1x1x16xf32> to vector<4x4x16xf32>
    %112 = arith.mulf %108, %111 : vector<4x4x16xf32>
    %113 = arith.addf %106, %112 : vector<4x4x16xf32>
    %c0_98 = arith.constant 0 : index
    %c1_99 = arith.constant 1 : index
    %c1_100 = arith.constant 1 : index
    %c0_101 = arith.constant 0 : index
    %c0_102 = arith.constant 0 : index
    %114 = vector.load %arg1[%c0_98, %c1_99, %c1_100, %c0_101, %c0_102] : memref<1x3x6x6x16xf32, #tpu.memory_space<vmem>>, vector<1x1x4x4x16xf32>
    %115 = vector.shape_cast %114 : vector<1x1x4x4x16xf32> to vector<4x4x16xf32>
    %c72 = arith.constant 72 : index
    %c0_103 = arith.constant 0 : index
    %116 = vector.load %arg2[%c72, %c0_103] : memref<125x16xf32, #tpu.memory_space<vmem>>, vector<1x16xf32>
    %117 = vector.shape_cast %116 : vector<1x16xf32> to vector<1x1x16xf32>
    %118 = vector.broadcast %117 : vector<1x1x16xf32> to vector<4x4x16xf32>
    %119 = arith.mulf %115, %118 : vector<4x4x16xf32>
    %120 = arith.addf %113, %119 : vector<4x4x16xf32>
    %c0_104 = arith.constant 0 : index
    %c0_105 = arith.constant 0 : index
    %c1_106 = arith.constant 1 : index
    %c0_107 = arith.constant 0 : index
    %c0_108 = arith.constant 0 : index
    %121 = vector.load %arg1[%c0_104, %c0_105, %c1_106, %c0_107, %c0_108] : memref<1x3x6x6x16xf32, #tpu.memory_space<vmem>>, vector<1x1x4x4x16xf32>
    %122 = vector.shape_cast %121 : vector<1x1x4x4x16xf32> to vector<4x4x16xf32>
    %c74 = arith.constant 74 : index
    %c0_109 = arith.constant 0 : index
    %123 = vector.load %arg2[%c74, %c0_109] : memref<125x16xf32, #tpu.memory_space<vmem>>, vector<1x16xf32>
    %124 = vector.shape_cast %123 : vector<1x16xf32> to vector<1x1x16xf32>
    %125 = vector.broadcast %124 : vector<1x1x16xf32> to vector<4x4x16xf32>
    %126 = arith.mulf %122, %125 : vector<4x4x16xf32>
    %127 = arith.addf %120, %126 : vector<4x4x16xf32>
    %c0_110 = arith.constant 0 : index
    %c2_111 = arith.constant 2 : index
    %c0_112 = arith.constant 0 : index
    %c2_113 = arith.constant 2 : index
    %c0_114 = arith.constant 0 : index
    %128 = vector.load %arg1[%c0_110, %c2_111, %c0_112, %c2_113, %c0_114] : memref<1x3x6x6x16xf32, #tpu.memory_space<vmem>>, vector<1x1x4x4x16xf32>
    %129 = vector.shape_cast %128 : vector<1x1x4x4x16xf32> to vector<4x4x16xf32>
    %c100 = arith.constant 100 : index
    %c0_115 = arith.constant 0 : index
    %130 = vector.load %arg2[%c100, %c0_115] : memref<125x16xf32, #tpu.memory_space<vmem>>, vector<1x16xf32>
    %131 = vector.shape_cast %130 : vector<1x16xf32> to vector<1x1x16xf32>
    %132 = vector.broadcast %131 : vector<1x1x16xf32> to vector<4x4x16xf32>
    %133 = arith.mulf %129, %132 : vector<4x4x16xf32>
    %134 = arith.addf %127, %133 : vector<4x4x16xf32>
    %c0_116 = arith.constant 0 : index
    %c1_117 = arith.constant 1 : index
    %c0_118 = arith.constant 0 : index
    %c2_119 = arith.constant 2 : index
    %c0_120 = arith.constant 0 : index
    %135 = vector.load %arg1[%c0_116, %c1_117, %c0_118, %c2_119, %c0_120] : memref<1x3x6x6x16xf32, #tpu.memory_space<vmem>>, vector<1x1x4x4x16xf32>
    %136 = vector.shape_cast %135 : vector<1x1x4x4x16xf32> to vector<4x4x16xf32>
    %c102 = arith.constant 102 : index
    %c0_121 = arith.constant 0 : index
    %137 = vector.load %arg2[%c102, %c0_121] : memref<125x16xf32, #tpu.memory_space<vmem>>, vector<1x16xf32>
    %138 = vector.shape_cast %137 : vector<1x16xf32> to vector<1x1x16xf32>
    %139 = vector.broadcast %138 : vector<1x1x16xf32> to vector<4x4x16xf32>
    %140 = arith.mulf %136, %139 : vector<4x4x16xf32>
    %141 = arith.addf %134, %140 : vector<4x4x16xf32>
    %c0_122 = arith.constant 0 : index
    %c0_123 = arith.constant 0 : index
    %c0_124 = arith.constant 0 : index
    %c2_125 = arith.constant 2 : index
    %c0_126 = arith.constant 0 : index
    %142 = vector.load %arg1[%c0_122, %c0_123, %c0_124, %c2_125, %c0_126] : memref<1x3x6x6x16xf32, #tpu.memory_space<vmem>>, vector<1x1x4x4x16xf32>
    %143 = vector.shape_cast %142 : vector<1x1x4x4x16xf32> to vector<4x4x16xf32>
    %c104 = arith.constant 104 : index
    %c0_127 = arith.constant 0 : index
    %144 = vector.load %arg2[%c104, %c0_127] : memref<125x16xf32, #tpu.memory_space<vmem>>, vector<1x16xf32>
    %145 = vector.shape_cast %144 : vector<1x16xf32> to vector<1x1x16xf32>
    %146 = vector.broadcast %145 : vector<1x1x16xf32> to vector<4x4x16xf32>
    %147 = arith.mulf %143, %146 : vector<4x4x16xf32>
    %148 = arith.addf %141, %147 : vector<4x4x16xf32>
    %c0_128 = arith.constant 0 : index
    %c2_129 = arith.constant 2 : index
    %c0_130 = arith.constant 0 : index
    %c1_131 = arith.constant 1 : index
    %c0_132 = arith.constant 0 : index
    %149 = vector.load %arg1[%c0_128, %c2_129, %c0_130, %c1_131, %c0_132] : memref<1x3x6x6x16xf32, #tpu.memory_space<vmem>>, vector<1x1x4x4x16xf32>
    %150 = vector.shape_cast %149 : vector<1x1x4x4x16xf32> to vector<4x4x16xf32>
    %c110 = arith.constant 110 : index
    %c0_133 = arith.constant 0 : index
    %151 = vector.load %arg2[%c110, %c0_133] : memref<125x16xf32, #tpu.memory_space<vmem>>, vector<1x16xf32>
    %152 = vector.shape_cast %151 : vector<1x16xf32> to vector<1x1x16xf32>
    %153 = vector.broadcast %152 : vector<1x1x16xf32> to vector<4x4x16xf32>
    %154 = arith.mulf %150, %153 : vector<4x4x16xf32>
    %155 = arith.addf %148, %154 : vector<4x4x16xf32>
    %c0_134 = arith.constant 0 : index
    %c1_135 = arith.constant 1 : index
    %c0_136 = arith.constant 0 : index
    %c1_137 = arith.constant 1 : index
    %c0_138 = arith.constant 0 : index
    %156 = vector.load %arg1[%c0_134, %c1_135, %c0_136, %c1_137, %c0_138] : memref<1x3x6x6x16xf32, #tpu.memory_space<vmem>>, vector<1x1x4x4x16xf32>
    %157 = vector.shape_cast %156 : vector<1x1x4x4x16xf32> to vector<4x4x16xf32>
    %c112 = arith.constant 112 : index
    %c0_139 = arith.constant 0 : index
    %158 = vector.load %arg2[%c112, %c0_139] : memref<125x16xf32, #tpu.memory_space<vmem>>, vector<1x16xf32>
    %159 = vector.shape_cast %158 : vector<1x16xf32> to vector<1x1x16xf32>
    %160 = vector.broadcast %159 : vector<1x1x16xf32> to vector<4x4x16xf32>
    %161 = arith.mulf %157, %160 : vector<4x4x16xf32>
    %162 = arith.addf %155, %161 : vector<4x4x16xf32>
    %c0_140 = arith.constant 0 : index
    %c0_141 = arith.constant 0 : index
    %c0_142 = arith.constant 0 : index
    %c1_143 = arith.constant 1 : index
    %c0_144 = arith.constant 0 : index
    %163 = vector.load %arg1[%c0_140, %c0_141, %c0_142, %c1_143, %c0_144] : memref<1x3x6x6x16xf32, #tpu.memory_space<vmem>>, vector<1x1x4x4x16xf32>
    %164 = vector.shape_cast %163 : vector<1x1x4x4x16xf32> to vector<4x4x16xf32>
    %c114 = arith.constant 114 : index
    %c0_145 = arith.constant 0 : index
    %165 = vector.load %arg2[%c114, %c0_145] : memref<125x16xf32, #tpu.memory_space<vmem>>, vector<1x16xf32>
    %166 = vector.shape_cast %165 : vector<1x16xf32> to vector<1x1x16xf32>
    %167 = vector.broadcast %166 : vector<1x1x16xf32> to vector<4x4x16xf32>
    %168 = arith.mulf %164, %167 : vector<4x4x16xf32>
    %169 = arith.addf %162, %168 : vector<4x4x16xf32>
    %c0_146 = arith.constant 0 : index
    %c2_147 = arith.constant 2 : index
    %c0_148 = arith.constant 0 : index
    %c0_149 = arith.constant 0 : index
    %c0_150 = arith.constant 0 : index
    %170 = vector.load %arg1[%c0_146, %c2_147, %c0_148, %c0_149, %c0_150] : memref<1x3x6x6x16xf32, #tpu.memory_space<vmem>>, vector<1x1x4x4x16xf32>
    %171 = vector.shape_cast %170 : vector<1x1x4x4x16xf32> to vector<4x4x16xf32>
    %c120 = arith.constant 120 : index
    %c0_151 = arith.constant 0 : index
    %172 = vector.load %arg2[%c120, %c0_151] : memref<125x16xf32, #tpu.memory_space<vmem>>, vector<1x16xf32>
    %173 = vector.shape_cast %172 : vector<1x16xf32> to vector<1x1x16xf32>
    %174 = vector.broadcast %173 : vector<1x1x16xf32> to vector<4x4x16xf32>
    %175 = arith.mulf %171, %174 : vector<4x4x16xf32>
    %176 = arith.addf %169, %175 : vector<4x4x16xf32>
    %c0_152 = arith.constant 0 : index
    %c1_153 = arith.constant 1 : index
    %c0_154 = arith.constant 0 : index
    %c0_155 = arith.constant 0 : index
    %c0_156 = arith.constant 0 : index
    %177 = vector.load %arg1[%c0_152, %c1_153, %c0_154, %c0_155, %c0_156] : memref<1x3x6x6x16xf32, #tpu.memory_space<vmem>>, vector<1x1x4x4x16xf32>
    %178 = vector.shape_cast %177 : vector<1x1x4x4x16xf32> to vector<4x4x16xf32>
    %c122 = arith.constant 122 : index
    %c0_157 = arith.constant 0 : index
    %179 = vector.load %arg2[%c122, %c0_157] : memref<125x16xf32, #tpu.memory_space<vmem>>, vector<1x16xf32>
    %180 = vector.shape_cast %179 : vector<1x16xf32> to vector<1x1x16xf32>
    %181 = vector.broadcast %180 : vector<1x1x16xf32> to vector<4x4x16xf32>
    %182 = arith.mulf %178, %181 : vector<4x4x16xf32>
    %183 = arith.addf %176, %182 : vector<4x4x16xf32>
    %c0_158 = arith.constant 0 : index
    %c0_159 = arith.constant 0 : index
    %c0_160 = arith.constant 0 : index
    %c0_161 = arith.constant 0 : index
    %c0_162 = arith.constant 0 : index
    %184 = vector.load %arg1[%c0_158, %c0_159, %c0_160, %c0_161, %c0_162] : memref<1x3x6x6x16xf32, #tpu.memory_space<vmem>>, vector<1x1x4x4x16xf32>
    %185 = vector.shape_cast %184 : vector<1x1x4x4x16xf32> to vector<4x4x16xf32>
    %c124 = arith.constant 124 : index
    %c0_163 = arith.constant 0 : index
    %186 = vector.load %arg2[%c124, %c0_163] : memref<125x16xf32, #tpu.memory_space<vmem>>, vector<1x16xf32>
    %187 = vector.shape_cast %186 : vector<1x16xf32> to vector<1x1x16xf32>
    %188 = vector.broadcast %187 : vector<1x1x16xf32> to vector<4x4x16xf32>
    %189 = arith.mulf %185, %188 : vector<4x4x16xf32>
    %190 = arith.addf %183, %189 : vector<4x4x16xf32>
    %191 = vector.shape_cast %0 : vector<1x16xf32> to vector<1x1x16xf32>
    %192 = vector.broadcast %191 : vector<1x1x16xf32> to vector<4x4x16xf32>
    %193 = arith.addf %190, %192 : vector<4x4x16xf32>
    %cst_164 = arith.constant dense<0.000000e+00> : vector<16xf32>
    %194 = vector.multi_reduction <add>, %193, %cst_164 [0, 1] : vector<4x4x16xf32> to vector<16xf32>
    %195 = vector.shape_cast %194 : vector<16xf32> to vector<1x16xf32>
    %196 = arith.addf %1, %195 : vector<1x16xf32>
    %197 = arith.mulf %193, %193 : vector<4x4x16xf32>
    %cst_165 = arith.constant dense<0.000000e+00> : vector<16xf32>
    %198 = vector.multi_reduction <add>, %197, %cst_165 [0, 1] : vector<4x4x16xf32> to vector<16xf32>
    %199 = vector.shape_cast %198 : vector<16xf32> to vector<1x16xf32>
    %200 = arith.addf %2, %199 : vector<1x16xf32>
    %c0_166 = arith.constant 0 : index
    %c0_167 = arith.constant 0 : index
    %c0_168 = arith.constant 0 : index
    %201 = vector.load %arg9[%c0_166, %c0_167, %c0_168] : memref<32x4x16xf32, #tpu.memory_space<vmem>>, vector<4x4x16xf32>
    tpu.vector_store %arg9[%c0_166, %c0_167, %c0_168], %193 {strides = array<i32>} : memref<32x4x16xf32, #tpu.memory_space<vmem>>, vector<4x4x16xf32>,
    %c0_169 = arith.constant 0 : index
    %c2_170 = arith.constant 2 : index
    %c2_171 = arith.constant 2 : index
    %c2_172 = arith.constant 2 : index
    %c0_173 = arith.constant 0 : index
    %202 = vector.load %arg1[%c0_169, %c2_170, %c2_171, %c2_172, %c0_173] : memref<1x3x6x6x16xf32, #tpu.memory_space<vmem>>, vector<1x1x4x4x16xf32>
    %203 = vector.shape_cast %202 : vector<1x1x4x4x16xf32> to vector<4x4x16xf32>
    %c1_174 = arith.constant 1 : index
    %c0_175 = arith.constant 0 : index
    %204 = vector.load %arg2[%c1_174, %c0_175] : memref<125x16xf32, #tpu.memory_space<vmem>>, vector<1x16xf32>
    %205 = vector.shape_cast %204 : vector<1x16xf32> to vector<1x1x16xf32>
    %206 = vector.broadcast %205 : vector<1x1x16xf32> to vector<4x4x16xf32>
    %207 = arith.mulf %203, %206 : vector<4x4x16xf32>
    %c0_176 = arith.constant 0 : index
    %c1_177 = arith.constant 1 : index
    %c2_178 = arith.constant 2 : index
    %c2_179 = arith.constant 2 : index
    %c0_180 = arith.constant 0 : index
    %208 = vector.load %arg1[%c0_176, %c1_177, %c2_178, %c2_179, %c0_180] : memref<1x3x6x6x16xf32, #tpu.memory_space<vmem>>, vector<1x1x4x4x16xf32>
    %209 = vector.shape_cast %208 : vector<1x1x4x4x16xf32> to vector<4x4x16xf32>
    %c3 = arith.constant 3 : index
    %c0_181 = arith.constant 0 : index
    %210 = vector.load %arg2[%c3, %c0_181] : memref<125x16xf32, #tpu.memory_space<vmem>>, vector<1x16xf32>
    %211 = vector.shape_cast %210 : vector<1x16xf32> to vector<1x1x16xf32>
    %212 = vector.broadcast %211 : vector<1x1x16xf32> to vector<4x4x16xf32>
    %213 = arith.mulf %209, %212 : vector<4x4x16xf32>
    %214 = arith.addf %207, %213 : vector<4x4x16xf32>
    %c0_182 = arith.constant 0 : index
    %c2_183 = arith.constant 2 : index
    %c2_184 = arith.constant 2 : index
    %c1_185 = arith.constant 1 : index
    %c0_186 = arith.constant 0 : index
    %215 = vector.load %arg1[%c0_182, %c2_183, %c2_184, %c1_185, %c0_186] : memref<1x3x6x6x16xf32, #tpu.memory_space<vmem>>, vector<1x1x4x4x16xf32>
    %216 = vector.shape_cast %215 : vector<1x1x4x4x16xf32> to vector<4x4x16xf32>
    %c11 = arith.constant 11 : index
    %c0_187 = arith.constant 0 : index
    %217 = vector.load %arg2[%c11, %c0_187] : memref<125x16xf32, #tpu.memory_space<vmem>>, vector<1x16xf32>
    %218 = vector.shape_cast %217 : vector<1x16xf32> to vector<1x1x16xf32>
    %219 = vector.broadcast %218 : vector<1x1x16xf32> to vector<4x4x16xf32>
    %220 = arith.mulf %216, %219 : vector<4x4x16xf32>
    %221 = arith.addf %214, %220 : vector<4x4x16xf32>
    %c0_188 = arith.constant 0 : index
    %c1_189 = arith.constant 1 : index
    %c2_190 = arith.constant 2 : index
    %c1_191 = arith.constant 1 : index
    %c0_192 = arith.constant 0 : index
    %222 = vector.load %arg1[%c0_188, %c1_189, %c2_190, %c1_191, %c0_192] : memref<1x3x6x6x16xf32, #tpu.memory_space<vmem>>, vector<1x1x4x4x16xf32>
    %223 = vector.shape_cast %222 : vector<1x1x4x4x16xf32> to vector<4x4x16xf32>
    %c13 = arith.constant 13 : index
    %c0_193 = arith.constant 0 : index
    %224 = vector.load %arg2[%c13, %c0_193] : memref<125x16xf32, #tpu.memory_space<vmem>>, vector<1x16xf32>
    %225 = vector.shape_cast %224 : vector<1x16xf32> to vector<1x1x16xf32>
    %226 = vector.broadcast %225 : vector<1x1x16xf32> to vector<4x4x16xf32>
    %227 = arith.mulf %223, %226 : vector<4x4x16xf32>
    %228 = arith.addf %221, %227 : vector<4x4x16xf32>
    %c0_194 = arith.constant 0 : index
    %c2_195 = arith.constant 2 : index
    %c2_196 = arith.constant 2 : index
    %c0_197 = arith.constant 0 : index
    %c0_198 = arith.constant 0 : index
    %229 = vector.load %arg1[%c0_194, %c2_195, %c2_196, %c0_197, %c0_198] : memref<1x3x6x6x16xf32, #tpu.memory_space<vmem>>, vector<1x1x4x4x16xf32>
    %230 = vector.shape_cast %229 : vector<1x1x4x4x16xf32> to vector<4x4x16xf32>
    %c21 = arith.constant 21 : index
    %c0_199 = arith.constant 0 : index
    %231 = vector.load %arg2[%c21, %c0_199] : memref<125x16xf32, #tpu.memory_space<vmem>>, vector<1x16xf32>
    %232 = vector.shape_cast %231 : vector<1x16xf32> to vector<1x1x16xf32>
    %233 = vector.broadcast %232 : vector<1x1x16xf32> to vector<4x4x16xf32>
    %234 = arith.mulf %230, %233 : vector<4x4x16xf32>
    %235 = arith.addf %228, %234 : vector<4x4x16xf32>
    %c0_200 = arith.constant 0 : index
    %c1_201 = arith.constant 1 : index
    %c2_202 = arith.constant 2 : index
    %c0_203 = arith.constant 0 : index
    %c0_204 = arith.constant 0 : index
    %236 = vector.load %arg1[%c0_200, %c1_201, %c2_202, %c0_203, %c0_204] : memref<1x3x6x6x16xf32, #tpu.memory_space<vmem>>, vector<1x1x4x4x16xf32>
    %237 = vector.shape_cast %236 : vector<1x1x4x4x16xf32> to vector<4x4x16xf32>
    %c23 = arith.constant 23 : index
    %c0_205 = arith.constant 0 : index
    %238 = vector.load %arg2[%c23, %c0_205] : memref<125x16xf32, #tpu.memory_space<vmem>>, vector<1x16xf32>
    %239 = vector.shape_cast %238 : vector<1x16xf32> to vector<1x1x16xf32>
    %240 = vector.broadcast %239 : vector<1x1x16xf32> to vector<4x4x16xf32>
    %241 = arith.mulf %237, %240 : vector<4x4x16xf32>
    %242 = arith.addf %235, %241 : vector<4x4x16xf32>
    %c0_206 = arith.constant 0 : index
    %c2_207 = arith.constant 2 : index
    %c1_208 = arith.constant 1 : index
    %c2_209 = arith.constant 2 : index
    %c0_210 = arith.constant 0 : index
    %243 = vector.load %arg1[%c0_206, %c2_207, %c1_208, %c2_209, %c0_210] : memref<1x3x6x6x16xf32, #tpu.memory_space<vmem>>, vector<1x1x4x4x16xf32>
    %244 = vector.shape_cast %243 : vector<1x1x4x4x16xf32> to vector<4x4x16xf32>
    %c51 = arith.constant 51 : index
    %c0_211 = arith.constant 0 : index
    %245 = vector.load %arg2[%c51, %c0_211] : memref<125x16xf32, #tpu.memory_space<vmem>>, vector<1x16xf32>
    %246 = vector.shape_cast %245 : vector<1x16xf32> to vector<1x1x16xf32>
    %247 = vector.broadcast %246 : vector<1x1x16xf32> to vector<4x4x16xf32>
    %248 = arith.mulf %244, %247 : vector<4x4x16xf32>
    %249 = arith.addf %242, %248 : vector<4x4x16xf32>
    %c0_212 = arith.constant 0 : index
    %c1_213 = arith.constant 1 : index
    %c1_214 = arith.constant 1 : index
    %c2_215 = arith.constant 2 : index
    %c0_216 = arith.constant 0 : index
    %250 = vector.load %arg1[%c0_212, %c1_213, %c1_214, %c2_215, %c0_216] : memref<1x3x6x6x16xf32, #tpu.memory_space<vmem>>, vector<1x1x4x4x16xf32>
    %251 = vector.shape_cast %250 : vector<1x1x4x4x16xf32> to vector<4x4x16xf32>
    %c53 = arith.constant 53 : index
    %c0_217 = arith.constant 0 : index
    %252 = vector.load %arg2[%c53, %c0_217] : memref<125x16xf32, #tpu.memory_space<vmem>>, vector<1x16xf32>
    %253 = vector.shape_cast %252 : vector<1x16xf32> to vector<1x1x16xf32>
    %254 = vector.broadcast %253 : vector<1x1x16xf32> to vector<4x4x16xf32>
    %255 = arith.mulf %251, %254 : vector<4x4x16xf32>
    %256 = arith.addf %249, %255 : vector<4x4x16xf32>
    %c0_218 = arith.constant 0 : index
    %c2_219 = arith.constant 2 : index
    %c1_220 = arith.constant 1 : index
    %c1_221 = arith.constant 1 : index
    %c0_222 = arith.constant 0 : index
    %257 = vector.load %arg1[%c0_218, %c2_219, %c1_220, %c1_221, %c0_222] : memref<1x3x6x6x16xf32, #tpu.memory_space<vmem>>, vector<1x1x4x4x16xf32>
    %258 = vector.shape_cast %257 : vector<1x1x4x4x16xf32> to vector<4x4x16xf32>
    %c61 = arith.constant 61 : index
    %c0_223 = arith.constant 0 : index
    %259 = vector.load %arg2[%c61, %c0_223] : memref<125x16xf32, #tpu.memory_space<vmem>>, vector<1x16xf32>
    %260 = vector.shape_cast %259 : vector<1x16xf32> to vector<1x1x16xf32>
    %261 = vector.broadcast %260 : vector<1x1x16xf32> to vector<4x4x16xf32>
    %262 = arith.mulf %258, %261 : vector<4x4x16xf32>
    %263 = arith.addf %256, %262 : vector<4x4x16xf32>
    %c0_224 = arith.constant 0 : index
    %c1_225 = arith.constant 1 : index
    %c1_226 = arith.constant 1 : index
    %c1_227 = arith.constant 1 : index
    %c0_228 = arith.constant 0 : index
    %264 = vector.load %arg1[%c0_224, %c1_225, %c1_226, %c1_227, %c0_228] : memref<1x3x6x6x16xf32, #tpu.memory_space<vmem>>, vector<1x1x4x4x16xf32>
    %265 = vector.shape_cast %264 : vector<1x1x4x4x16xf32> to vector<4x4x16xf32>
    %c63 = arith.constant 63 : index
    %c0_229 = arith.constant 0 : index
    %266 = vector.load %arg2[%c63, %c0_229] : memref<125x16xf32, #tpu.memory_space<vmem>>, vector<1x16xf32>
    %267 = vector.shape_cast %266 : vector<1x16xf32> to vector<1x1x16xf32>
    %268 = vector.broadcast %267 : vector<1x1x16xf32> to vector<4x4x16xf32>
    %269 = arith.mulf %265, %268 : vector<4x4x16xf32>
    %270 = arith.addf %263, %269 : vector<4x4x16xf32>
    %c0_230 = arith.constant 0 : index
    %c2_231 = arith.constant 2 : index
    %c1_232 = arith.constant 1 : index
    %c0_233 = arith.constant 0 : index
    %c0_234 = arith.constant 0 : index
    %271 = vector.load %arg1[%c0_230, %c2_231, %c1_232, %c0_233, %c0_234] : memref<1x3x6x6x16xf32, #tpu.memory_space<vmem>>, vector<1x1x4x4x16xf32>
    %272 = vector.shape_cast %271 : vector<1x1x4x4x16xf32> to vector<4x4x16xf32>
    %c71 = arith.constant 71 : index
    %c0_235 = arith.constant 0 : index
    %273 = vector.load %arg2[%c71, %c0_235] : memref<125x16xf32, #tpu.memory_space<vmem>>, vector<1x16xf32>
    %274 = vector.shape_cast %273 : vector<1x16xf32> to vector<1x1x16xf32>
    %275 = vector.broadcast %274 : vector<1x1x16xf32> to vector<4x4x16xf32>
    %276 = arith.mulf %272, %275 : vector<4x4x16xf32>
    %277 = arith.addf %270, %276 : vector<4x4x16xf32>
    %c0_236 = arith.constant 0 : index
    %c1_237 = arith.constant 1 : index
    %c1_238 = arith.constant 1 : index
    %c0_239 = arith.constant 0 : index
    %c0_240 = arith.constant 0 : index
    %278 = vector.load %arg1[%c0_236, %c1_237, %c1_238, %c0_239, %c0_240] : memref<1x3x6x6x16xf32, #tpu.memory_space<vmem>>, vector<1x1x4x4x16xf32>
    %279 = vector.shape_cast %278 : vector<1x1x4x4x16xf32> to vector<4x4x16xf32>
    %c73 = arith.constant 73 : index
    %c0_241 = arith.constant 0 : index
    %280 = vector.load %arg2[%c73, %c0_241] : memref<125x16xf32, #tpu.memory_space<vmem>>, vector<1x16xf32>
    %281 = vector.shape_cast %280 : vector<1x16xf32> to vector<1x1x16xf32>
    %282 = vector.broadcast %281 : vector<1x1x16xf32> to vector<4x4x16xf32>
    %283 = arith.mulf %279, %282 : vector<4x4x16xf32>
    %284 = arith.addf %277, %283 : vector<4x4x16xf32>
    %c0_242 = arith.constant 0 : index
    %c2_243 = arith.constant 2 : index
    %c0_244 = arith.constant 0 : index
    %c2_245 = arith.constant 2 : index
    %c0_246 = arith.constant 0 : index
    %285 = vector.load %arg1[%c0_242, %c2_243, %c0_244, %c2_245, %c0_246] : memref<1x3x6x6x16xf32, #tpu.memory_space<vmem>>, vector<1x1x4x4x16xf32>
    %286 = vector.shape_cast %285 : vector<1x1x4x4x16xf32> to vector<4x4x16xf32>
    %c101 = arith.constant 101 : index
    %c0_247 = arith.constant 0 : index
    %287 = vector.load %arg2[%c101, %c0_247] : memref<125x16xf32, #tpu.memory_space<vmem>>, vector<1x16xf32>
    %288 = vector.shape_cast %287 : vector<1x16xf32> to vector<1x1x16xf32>
    %289 = vector.broadcast %288 : vector<1x1x16xf32> to vector<4x4x16xf32>
    %290 = arith.mulf %286, %289 : vector<4x4x16xf32>
    %291 = arith.addf %284, %290 : vector<4x4x16xf32>
    %c0_248 = arith.constant 0 : index
    %c1_249 = arith.constant 1 : index
    %c0_250 = arith.constant 0 : index
    %c2_251 = arith.constant 2 : index
    %c0_252 = arith.constant 0 : index
    %292 = vector.load %arg1[%c0_248, %c1_249, %c0_250, %c2_251, %c0_252] : memref<1x3x6x6x16xf32, #tpu.memory_space<vmem>>, vector<1x1x4x4x16xf32>
    %293 = vector.shape_cast %292 : vector<1x1x4x4x16xf32> to vector<4x4x16xf32>
    %c103 = arith.constant 103 : index
    %c0_253 = arith.constant 0 : index
    %294 = vector.load %arg2[%c103, %c0_253] : memref<125x16xf32, #tpu.memory_space<vmem>>, vector<1x16xf32>
    %295 = vector.shape_cast %294 : vector<1x16xf32> to vector<1x1x16xf32>
    %296 = vector.broadcast %295 : vector<1x1x16xf32> to vector<4x4x16xf32>
    %297 = arith.mulf %293, %296 : vector<4x4x16xf32>
    %298 = arith.addf %291, %297 : vector<4x4x16xf32>
    %c0_254 = arith.constant 0 : index
    %c2_255 = arith.constant 2 : index
    %c0_256 = arith.constant 0 : index
    %c1_257 = arith.constant 1 : index
    %c0_258 = arith.constant 0 : index
    %299 = vector.load %arg1[%c0_254, %c2_255, %c0_256, %c1_257, %c0_258] : memref<1x3x6x6x16xf32, #tpu.memory_space<vmem>>, vector<1x1x4x4x16xf32>
    %300 = vector.shape_cast %299 : vector<1x1x4x4x16xf32> to vector<4x4x16xf32>
    %c111 = arith.constant 111 : index
    %c0_259 = arith.constant 0 : index
    %301 = vector.load %arg2[%c111, %c0_259] : memref<125x16xf32, #tpu.memory_space<vmem>>, vector<1x16xf32>
    %302 = vector.shape_cast %301 : vector<1x16xf32> to vector<1x1x16xf32>
    %303 = vector.broadcast %302 : vector<1x1x16xf32> to vector<4x4x16xf32>
    %304 = arith.mulf %300, %303 : vector<4x4x16xf32>
    %305 = arith.addf %298, %304 : vector<4x4x16xf32>
    %c0_260 = arith.constant 0 : index
    %c1_261 = arith.constant 1 : index
    %c0_262 = arith.constant 0 : index
    %c1_263 = arith.constant 1 : index
    %c0_264 = arith.constant 0 : index
    %306 = vector.load %arg1[%c0_260, %c1_261, %c0_262, %c1_263, %c0_264] : memref<1x3x6x6x16xf32, #tpu.memory_space<vmem>>, vector<1x1x4x4x16xf32>
    %307 = vector.shape_cast %306 : vector<1x1x4x4x16xf32> to vector<4x4x16xf32>
    %c113 = arith.constant 113 : index
    %c0_265 = arith.constant 0 : index
    %308 = vector.load %arg2[%c113, %c0_265] : memref<125x16xf32, #tpu.memory_space<vmem>>, vector<1x16xf32>
    %309 = vector.shape_cast %308 : vector<1x16xf32> to vector<1x1x16xf32>
    %310 = vector.broadcast %309 : vector<1x1x16xf32> to vector<4x4x16xf32>
    %311 = arith.mulf %307, %310 : vector<4x4x16xf32>
    %312 = arith.addf %305, %311 : vector<4x4x16xf32>
    %c0_266 = arith.constant 0 : index
    %c2_267 = arith.constant 2 : index
    %c0_268 = arith.constant 0 : index
    %c0_269 = arith.constant 0 : index
    %c0_270 = arith.constant 0 : index
    %313 = vector.load %arg1[%c0_266, %c2_267, %c0_268, %c0_269, %c0_270] : memref<1x3x6x6x16xf32, #tpu.memory_space<vmem>>, vector<1x1x4x4x16xf32>
    %314 = vector.shape_cast %313 : vector<1x1x4x4x16xf32> to vector<4x4x16xf32>
    %c121 = arith.constant 121 : index
    %c0_271 = arith.constant 0 : index
    %315 = vector.load %arg2[%c121, %c0_271] : memref<125x16xf32, #tpu.memory_space<vmem>>, vector<1x16xf32>
    %316 = vector.shape_cast %315 : vector<1x16xf32> to vector<1x1x16xf32>
    %317 = vector.broadcast %316 : vector<1x1x16xf32> to vector<4x4x16xf32>
    %318 = arith.mulf %314, %317 : vector<4x4x16xf32>
    %319 = arith.addf %312, %318 : vector<4x4x16xf32>
    %c0_272 = arith.constant 0 : index
    %c1_273 = arith.constant 1 : index
    %c0_274 = arith.constant 0 : index
    %c0_275 = arith.constant 0 : index
    %c0_276 = arith.constant 0 : index
    %320 = vector.load %arg1[%c0_272, %c1_273, %c0_274, %c0_275, %c0_276] : memref<1x3x6x6x16xf32, #tpu.memory_space<vmem>>, vector<1x1x4x4x16xf32>
    %321 = vector.shape_cast %320 : vector<1x1x4x4x16xf32> to vector<4x4x16xf32>
    %c123 = arith.constant 123 : index
    %c0_277 = arith.constant 0 : index
    %322 = vector.load %arg2[%c123, %c0_277] : memref<125x16xf32, #tpu.memory_space<vmem>>, vector<1x16xf32>
    %323 = vector.shape_cast %322 : vector<1x16xf32> to vector<1x1x16xf32>
    %324 = vector.broadcast %323 : vector<1x1x16xf32> to vector<4x4x16xf32>
    %325 = arith.mulf %321, %324 : vector<4x4x16xf32>
    %326 = arith.addf %319, %325 : vector<4x4x16xf32>
    %327 = vector.shape_cast %0 : vector<1x16xf32> to vector<1x1x16xf32>
    %328 = vector.broadcast %327 : vector<1x1x16xf32> to vector<4x4x16xf32>
    %329 = arith.addf %326, %328 : vector<4x4x16xf32>
    %330 = tpu.iota {dimensions = array<i32: 0>} : vector<4x4x16xi32>
    %c4_i32 = arith.constant 4 : i32
    %331 = vector.broadcast %c4_i32 : i32 to vector<4x4x16xi32>
    %332 = arith.cmpi slt, %330, %331 : vector<4x4x16xi32>
    %333 = tpu.iota {dimensions = array<i32: 1>} : vector<4x4x16xi32>
    %c4_i32_278 = arith.constant 4 : i32
    %334 = vector.broadcast %c4_i32_278 : i32 to vector<4x4x16xi32>
    %335 = arith.cmpi slt, %333, %334 : vector<4x4x16xi32>
    %336 = tpu.iota {dimensions = array<i32: 2>} : vector<4x4x16xi32>
    %c12_i32 = arith.constant 12 : i32
    %337 = vector.broadcast %c12_i32 : i32 to vector<4x4x16xi32>
    %338 = arith.cmpi slt, %336, %337 : vector<4x4x16xi32>
    %339 = arith.andi %332, %335 : vector<4x4x16xi1>
    %340 = arith.andi %339, %338 : vector<4x4x16xi1>
    %cst_279 = arith.constant 0.000000e+00 : f32
    %341 = vector.broadcast %cst_279 : f32 to vector<4x4x16xf32>
    %342 = arith.select %340, %329, %341 : vector<4x4x16xi1>, vector<4x4x16xf32>
    %cst_280 = arith.constant dense<0.000000e+00> : vector<16xf32>
    %343 = vector.multi_reduction <add>, %342, %cst_280 [0, 1] : vector<4x4x16xf32> to vector<16xf32>
    %344 = vector.shape_cast %343 : vector<16xf32> to vector<1x16xf32>
    %345 = arith.addf %196, %344 : vector<1x16xf32>
    %346 = arith.mulf %342, %342 : vector<4x4x16xf32>
    %cst_281 = arith.constant dense<0.000000e+00> : vector<16xf32>
    %347 = vector.multi_reduction <add>, %346, %cst_281 [0, 1] : vector<4x4x16xf32> to vector<16xf32>
    %348 = vector.shape_cast %347 : vector<16xf32> to vector<1x16xf32>
    %349 = arith.addf %200, %348 : vector<1x16xf32>
    %c4_282 = arith.constant 4 : index
    %c0_283 = arith.constant 0 : index
    %c0_284 = arith.constant 0 : index
    %350 = vector.load %arg9[%c4_282, %c0_283, %c0_284] : memref<32x4x16xf32, #tpu.memory_space<vmem>>, vector<4x4x16xf32>
    tpu.vector_store %arg9[%c4_282, %c0_283, %c0_284], %329 {strides = array<i32>} : memref<32x4x16xf32, #tpu.memory_space<vmem>>, vector<4x4x16xf32>,
    %c0_285 = arith.constant 0 : index
    %c2_286 = arith.constant 2 : index
    %c2_287 = arith.constant 2 : index
    %c2_288 = arith.constant 2 : index
    %c0_289 = arith.constant 0 : index
    %351 = vector.load %arg1[%c0_285, %c2_286, %c2_287, %c2_288, %c0_289] : memref<1x3x6x6x16xf32, #tpu.memory_space<vmem>>, vector<1x1x4x4x16xf32>
    %352 = vector.shape_cast %351 : vector<1x1x4x4x16xf32> to vector<4x4x16xf32>
    %c5 = arith.constant 5 : index
    %c0_290 = arith.constant 0 : index
    %353 = vector.load %arg2[%c5, %c0_290] : memref<125x16xf32, #tpu.memory_space<vmem>>, vector<1x16xf32>
    %354 = vector.shape_cast %353 : vector<1x16xf32> to vector<1x1x16xf32>
    %355 = vector.broadcast %354 : vector<1x1x16xf32> to vector<4x4x16xf32>
    %356 = arith.mulf %352, %355 : vector<4x4x16xf32>
    %c0_291 = arith.constant 0 : index
    %c1_292 = arith.constant 1 : index
    %c2_293 = arith.constant 2 : index
    %c2_294 = arith.constant 2 : index
    %c0_295 = arith.constant 0 : index
    %357 = vector.load %arg1[%c0_291, %c1_292, %c2_293, %c2_294, %c0_295] : memref<1x3x6x6x16xf32, #tpu.memory_space<vmem>>, vector<1x1x4x4x16xf32>
    %358 = vector.shape_cast %357 : vector<1x1x4x4x16xf32> to vector<4x4x16xf32>
    %c7 = arith.constant 7 : index
    %c0_296 = arith.constant 0 : index
    %359 = vector.load %arg2[%c7, %c0_296] : memref<125x16xf32, #tpu.memory_space<vmem>>, vector<1x16xf32>
    %360 = vector.shape_cast %359 : vector<1x16xf32> to vector<1x1x16xf32>
    %361 = vector.broadcast %360 : vector<1x1x16xf32> to vector<4x4x16xf32>
    %362 = arith.mulf %358, %361 : vector<4x4x16xf32>
    %363 = arith.addf %356, %362 : vector<4x4x16xf32>
    %c0_297 = arith.constant 0 : index
    %c0_298 = arith.constant 0 : index
    %c2_299 = arith.constant 2 : index
    %c2_300 = arith.constant 2 : index
    %c0_301 = arith.constant 0 : index
    %364 = vector.load %arg1[%c0_297, %c0_298, %c2_299, %c2_300, %c0_301] : memref<1x3x6x6x16xf32, #tpu.memory_space<vmem>>, vector<1x1x4x4x16xf32>
    %365 = vector.shape_cast %364 : vector<1x1x4x4x16xf32> to vector<4x4x16xf32>
    %c9 = arith.constant 9 : index
    %c0_302 = arith.constant 0 : index
    %366 = vector.load %arg2[%c9, %c0_302] : memref<125x16xf32, #tpu.memory_space<vmem>>, vector<1x16xf32>
    %367 = vector.shape_cast %366 : vector<1x16xf32> to vector<1x1x16xf32>
    %368 = vector.broadcast %367 : vector<1x1x16xf32> to vector<4x4x16xf32>
    %369 = arith.mulf %365, %368 : vector<4x4x16xf32>
    %370 = arith.addf %363, %369 : vector<4x4x16xf32>
    %c0_303 = arith.constant 0 : index
    %c2_304 = arith.constant 2 : index
    %c2_305 = arith.constant 2 : index
    %c1_306 = arith.constant 1 : index
    %c0_307 = arith.constant 0 : index
    %371 = vector.load %arg1[%c0_303, %c2_304, %c2_305, %c1_306, %c0_307] : memref<1x3x6x6x16xf32, #tpu.memory_space<vmem>>, vector<1x1x4x4x16xf32>
    %372 = vector.shape_cast %371 : vector<1x1x4x4x16xf32> to vector<4x4x16xf32>
    %c15 = arith.constant 15 : index
    %c0_308 = arith.constant 0 : index
    %373 = vector.load %arg2[%c15, %c0_308] : memref<125x16xf32, #tpu.memory_space<vmem>>, vector<1x16xf32>
    %374 = vector.shape_cast %373 : vector<1x16xf32> to vector<1x1x16xf32>
    %375 = vector.broadcast %374 : vector<1x1x16xf32> to vector<4x4x16xf32>
    %376 = arith.mulf %372, %375 : vector<4x4x16xf32>
    %377 = arith.addf %370, %376 : vector<4x4x16xf32>
    %c0_309 = arith.constant 0 : index
    %c1_310 = arith.constant 1 : index
    %c2_311 = arith.constant 2 : index
    %c1_312 = arith.constant 1 : index
    %c0_313 = arith.constant 0 : index
    %378 = vector.load %arg1[%c0_309, %c1_310, %c2_311, %c1_312, %c0_313] : memref<1x3x6x6x16xf32, #tpu.memory_space<vmem>>, vector<1x1x4x4x16xf32>
    %379 = vector.shape_cast %378 : vector<1x1x4x4x16xf32> to vector<4x4x16xf32>
    %c17 = arith.constant 17 : index
    %c0_314 = arith.constant 0 : index
    %380 = vector.load %arg2[%c17, %c0_314] : memref<125x16xf32, #tpu.memory_space<vmem>>, vector<1x16xf32>
    %381 = vector.shape_cast %380 : vector<1x16xf32> to vector<1x1x16xf32>
    %382 = vector.broadcast %381 : vector<1x1x16xf32> to vector<4x4x16xf32>
    %383 = arith.mulf %379, %382 : vector<4x4x16xf32>
    %384 = arith.addf %377, %383 : vector<4x4x16xf32>
    %c0_315 = arith.constant 0 : index
    %c0_316 = arith.constant 0 : index
    %c2_317 = arith.constant 2 : index
    %c1_318 = arith.constant 1 : index
    %c0_319 = arith.constant 0 : index
    %385 = vector.load %arg1[%c0_315, %c0_316, %c2_317, %c1_318, %c0_319] : memref<1x3x6x6x16xf32, #tpu.memory_space<vmem>>, vector<1x1x4x4x16xf32>
    %386 = vector.shape_cast %385 : vector<1x1x4x4x16xf32> to vector<4x4x16xf32>
    %c19 = arith.constant 19 : index
    %c0_320 = arith.constant 0 : index
    %387 = vector.load %arg2[%c19, %c0_320] : memref<125x16xf32, #tpu.memory_space<vmem>>, vector<1x16xf32>
    %388 = vector.shape_cast %387 : vector<1x16xf32> to vector<1x1x16xf32>
    %389 = vector.broadcast %388 : vector<1x1x16xf32> to vector<4x4x16xf32>
    %390 = arith.mulf %386, %389 : vector<4x4x16xf32>
    %391 = arith.addf %384, %390 : vector<4x4x16xf32>
    %c0_321 = arith.constant 0 : index
    %c2_322 = arith.constant 2 : index
    %c1_323 = arith.constant 1 : index
    %c2_324 = arith.constant 2 : index
    %c0_325 = arith.constant 0 : index
    %392 = vector.load %arg1[%c0_321, %c2_322, %c1_323, %c2_324, %c0_325] : memref<1x3x6x6x16xf32, #tpu.memory_space<vmem>>, vector<1x1x4x4x16xf32>
    %393 = vector.shape_cast %392 : vector<1x1x4x4x16xf32> to vector<4x4x16xf32>
    %c55 = arith.constant 55 : index
    %c0_326 = arith.constant 0 : index
    %394 = vector.load %arg2[%c55, %c0_326] : memref<125x16xf32, #tpu.memory_space<vmem>>, vector<1x16xf32>
    %395 = vector.shape_cast %394 : vector<1x16xf32> to vector<1x1x16xf32>
    %396 = vector.broadcast %395 : vector<1x1x16xf32> to vector<4x4x16xf32>
    %397 = arith.mulf %393, %396 : vector<4x4x16xf32>
    %398 = arith.addf %391, %397 : vector<4x4x16xf32>
    %c0_327 = arith.constant 0 : index
    %c1_328 = arith.constant 1 : index
    %c1_329 = arith.constant 1 : index
    %c2_330 = arith.constant 2 : index
    %c0_331 = arith.constant 0 : index
    %399 = vector.load %arg1[%c0_327, %c1_328, %c1_329, %c2_330, %c0_331] : memref<1x3x6x6x16xf32, #tpu.memory_space<vmem>>, vector<1x1x4x4x16xf32>
    %400 = vector.shape_cast %399 : vector<1x1x4x4x16xf32> to vector<4x4x16xf32>
    %c57 = arith.constant 57 : index
    %c0_332 = arith.constant 0 : index
    %401 = vector.load %arg2[%c57, %c0_332] : memref<125x16xf32, #tpu.memory_space<vmem>>, vector<1x16xf32>
    %402 = vector.shape_cast %401 : vector<1x16xf32> to vector<1x1x16xf32>
    %403 = vector.broadcast %402 : vector<1x1x16xf32> to vector<4x4x16xf32>
    %404 = arith.mulf %400, %403 : vector<4x4x16xf32>
    %405 = arith.addf %398, %404 : vector<4x4x16xf32>
    %c0_333 = arith.constant 0 : index
    %c0_334 = arith.constant 0 : index
    %c1_335 = arith.constant 1 : index
    %c2_336 = arith.constant 2 : index
    %c0_337 = arith.constant 0 : index
    %406 = vector.load %arg1[%c0_333, %c0_334, %c1_335, %c2_336, %c0_337] : memref<1x3x6x6x16xf32, #tpu.memory_space<vmem>>, vector<1x1x4x4x16xf32>
    %407 = vector.shape_cast %406 : vector<1x1x4x4x16xf32> to vector<4x4x16xf32>
    %c59 = arith.constant 59 : index
    %c0_338 = arith.constant 0 : index
    %408 = vector.load %arg2[%c59, %c0_338] : memref<125x16xf32, #tpu.memory_space<vmem>>, vector<1x16xf32>
    %409 = vector.shape_cast %408 : vector<1x16xf32> to vector<1x1x16xf32>
    %410 = vector.broadcast %409 : vector<1x1x16xf32> to vector<4x4x16xf32>
    %411 = arith.mulf %407, %410 : vector<4x4x16xf32>
    %412 = arith.addf %405, %411 : vector<4x4x16xf32>
    %c0_339 = arith.constant 0 : index
    %c2_340 = arith.constant 2 : index
    %c1_341 = arith.constant 1 : index
    %c1_342 = arith.constant 1 : index
    %c0_343 = arith.constant 0 : index
    %413 = vector.load %arg1[%c0_339, %c2_340, %c1_341, %c1_342, %c0_343] : memref<1x3x6x6x16xf32, #tpu.memory_space<vmem>>, vector<1x1x4x4x16xf32>
    %414 = vector.shape_cast %413 : vector<1x1x4x4x16xf32> to vector<4x4x16xf32>
    %c65 = arith.constant 65 : index
    %c0_344 = arith.constant 0 : index
    %415 = vector.load %arg2[%c65, %c0_344] : memref<125x16xf32, #tpu.memory_space<vmem>>, vector<1x16xf32>
    %416 = vector.shape_cast %415 : vector<1x16xf32> to vector<1x1x16xf32>
    %417 = vector.broadcast %416 : vector<1x1x16xf32> to vector<4x4x16xf32>
    %418 = arith.mulf %414, %417 : vector<4x4x16xf32>
    %419 = arith.addf %412, %418 : vector<4x4x16xf32>
    %c0_345 = arith.constant 0 : index
    %c1_346 = arith.constant 1 : index
    %c1_347 = arith.constant 1 : index
    %c1_348 = arith.constant 1 : index
    %c0_349 = arith.constant 0 : index
    %420 = vector.load %arg1[%c0_345, %c1_346, %c1_347, %c1_348, %c0_349] : memref<1x3x6x6x16xf32, #tpu.memory_space<vmem>>, vector<1x1x4x4x16xf32>
    %421 = vector.shape_cast %420 : vector<1x1x4x4x16xf32> to vector<4x4x16xf32>
    %c67 = arith.constant 67 : index
    %c0_350 = arith.constant 0 : index
    %422 = vector.load %arg2[%c67, %c0_350] : memref<125x16xf32, #tpu.memory_space<vmem>>, vector<1x16xf32>
    %423 = vector.shape_cast %422 : vector<1x16xf32> to vector<1x1x16xf32>
    %424 = vector.broadcast %423 : vector<1x1x16xf32> to vector<4x4x16xf32>
    %425 = arith.mulf %421, %424 : vector<4x4x16xf32>
    %426 = arith.addf %419, %425 : vector<4x4x16xf32>
    %c0_351 = arith.constant 0 : index
    %c0_352 = arith.constant 0 : index
    %c1_353 = arith.constant 1 : index
    %c1_354 = arith.constant 1 : index
    %c0_355 = arith.constant 0 : index
    %427 = vector.load %arg1[%c0_351, %c0_352, %c1_353, %c1_354, %c0_355] : memref<1x3x6x6x16xf32, #tpu.memory_space<vmem>>, vector<1x1x4x4x16xf32>
    %428 = vector.shape_cast %427 : vector<1x1x4x4x16xf32> to vector<4x4x16xf32>
    %c69 = arith.constant 69 : index
    %c0_356 = arith.constant 0 : index
    %429 = vector.load %arg2[%c69, %c0_356] : memref<125x16xf32, #tpu.memory_space<vmem>>, vector<1x16xf32>
    %430 = vector.shape_cast %429 : vector<1x16xf32> to vector<1x1x16xf32>
    %431 = vector.broadcast %430 : vector<1x1x16xf32> to vector<4x4x16xf32>
    %432 = arith.mulf %428, %431 : vector<4x4x16xf32>
    %433 = arith.addf %426, %432 : vector<4x4x16xf32>
    %c0_357 = arith.constant 0 : index
    %c2_358 = arith.constant 2 : index
    %c0_359 = arith.constant 0 : index
    %c2_360 = arith.constant 2 : index
    %c0_361 = arith.constant 0 : index
    %434 = vector.load %arg1[%c0_357, %c2_358, %c0_359, %c2_360, %c0_361] : memref<1x3x6x6x16xf32, #tpu.memory_space<vmem>>, vector<1x1x4x4x16xf32>
    %435 = vector.shape_cast %434 : vector<1x1x4x4x16xf32> to vector<4x4x16xf32>
    %c105 = arith.constant 105 : index
    %c0_362 = arith.constant 0 : index
    %436 = vector.load %arg2[%c105, %c0_362] : memref<125x16xf32, #tpu.memory_space<vmem>>, vector<1x16xf32>
    %437 = vector.shape_cast %436 : vector<1x16xf32> to vector<1x1x16xf32>
    %438 = vector.broadcast %437 : vector<1x1x16xf32> to vector<4x4x16xf32>
    %439 = arith.mulf %435, %438 : vector<4x4x16xf32>
    %440 = arith.addf %433, %439 : vector<4x4x16xf32>
    %c0_363 = arith.constant 0 : index
    %c1_364 = arith.constant 1 : index
    %c0_365 = arith.constant 0 : index
    %c2_366 = arith.constant 2 : index
    %c0_367 = arith.constant 0 : index
    %441 = vector.load %arg1[%c0_363, %c1_364, %c0_365, %c2_366, %c0_367] : memref<1x3x6x6x16xf32, #tpu.memory_space<vmem>>, vector<1x1x4x4x16xf32>
    %442 = vector.shape_cast %441 : vector<1x1x4x4x16xf32> to vector<4x4x16xf32>
    %c107 = arith.constant 107 : index
    %c0_368 = arith.constant 0 : index
    %443 = vector.load %arg2[%c107, %c0_368] : memref<125x16xf32, #tpu.memory_space<vmem>>, vector<1x16xf32>
    %444 = vector.shape_cast %443 : vector<1x16xf32> to vector<1x1x16xf32>
    %445 = vector.broadcast %444 : vector<1x1x16xf32> to vector<4x4x16xf32>
    %446 = arith.mulf %442, %445 : vector<4x4x16xf32>
    %447 = arith.addf %440, %446 : vector<4x4x16xf32>
    %c0_369 = arith.constant 0 : index
    %c0_370 = arith.constant 0 : index
    %c0_371 = arith.constant 0 : index
    %c2_372 = arith.constant 2 : index
    %c0_373 = arith.constant 0 : index
    %448 = vector.load %arg1[%c0_369, %c0_370, %c0_371, %c2_372, %c0_373] : memref<1x3x6x6x16xf32, #tpu.memory_space<vmem>>, vector<1x1x4x4x16xf32>
    %449 = vector.shape_cast %448 : vector<1x1x4x4x16xf32> to vector<4x4x16xf32>
    %c109 = arith.constant 109 : index
    %c0_374 = arith.constant 0 : index
    %450 = vector.load %arg2[%c109, %c0_374] : memref<125x16xf32, #tpu.memory_space<vmem>>, vector<1x16xf32>
    %451 = vector.shape_cast %450 : vector<1x16xf32> to vector<1x1x16xf32>
    %452 = vector.broadcast %451 : vector<1x1x16xf32> to vector<4x4x16xf32>
    %453 = arith.mulf %449, %452 : vector<4x4x16xf32>
    %454 = arith.addf %447, %453 : vector<4x4x16xf32>
    %c0_375 = arith.constant 0 : index
    %c2_376 = arith.constant 2 : index
    %c0_377 = arith.constant 0 : index
    %c1_378 = arith.constant 1 : index
    %c0_379 = arith.constant 0 : index
    %455 = vector.load %arg1[%c0_375, %c2_376, %c0_377, %c1_378, %c0_379] : memref<1x3x6x6x16xf32, #tpu.memory_space<vmem>>, vector<1x1x4x4x16xf32>
    %456 = vector.shape_cast %455 : vector<1x1x4x4x16xf32> to vector<4x4x16xf32>
    %c115 = arith.constant 115 : index
    %c0_380 = arith.constant 0 : index
    %457 = vector.load %arg2[%c115, %c0_380] : memref<125x16xf32, #tpu.memory_space<vmem>>, vector<1x16xf32>
    %458 = vector.shape_cast %457 : vector<1x16xf32> to vector<1x1x16xf32>
    %459 = vector.broadcast %458 : vector<1x1x16xf32> to vector<4x4x16xf32>
    %460 = arith.mulf %456, %459 : vector<4x4x16xf32>
    %461 = arith.addf %454, %460 : vector<4x4x16xf32>
    %c0_381 = arith.constant 0 : index
    %c1_382 = arith.constant 1 : index
    %c0_383 = arith.constant 0 : index
    %c1_384 = arith.constant 1 : index
    %c0_385 = arith.constant 0 : index
    %462 = vector.load %arg1[%c0_381, %c1_382, %c0_383, %c1_384, %c0_385] : memref<1x3x6x6x16xf32, #tpu.memory_space<vmem>>, vector<1x1x4x4x16xf32>
    %463 = vector.shape_cast %462 : vector<1x1x4x4x16xf32> to vector<4x4x16xf32>
    %c117 = arith.constant 117 : index
    %c0_386 = arith.constant 0 : index
    %464 = vector.load %arg2[%c117, %c0_386] : memref<125x16xf32, #tpu.memory_space<vmem>>, vector<1x16xf32>
    %465 = vector.shape_cast %464 : vector<1x16xf32> to vector<1x1x16xf32>
    %466 = vector.broadcast %465 : vector<1x1x16xf32> to vector<4x4x16xf32>
    %467 = arith.mulf %463, %466 : vector<4x4x16xf32>
    %468 = arith.addf %461, %467 : vector<4x4x16xf32>
    %c0_387 = arith.constant 0 : index
    %c0_388 = arith.constant 0 : index
    %c0_389 = arith.constant 0 : index
    %c1_390 = arith.constant 1 : index
    %c0_391 = arith.constant 0 : index
    %469 = vector.load %arg1[%c0_387, %c0_388, %c0_389, %c1_390, %c0_391] : memref<1x3x6x6x16xf32, #tpu.memory_space<vmem>>, vector<1x1x4x4x16xf32>
    %470 = vector.shape_cast %469 : vector<1x1x4x4x16xf32> to vector<4x4x16xf32>
    %c119 = arith.constant 119 : index
    %c0_392 = arith.constant 0 : index
    %471 = vector.load %arg2[%c119, %c0_392] : memref<125x16xf32, #tpu.memory_space<vmem>>, vector<1x16xf32>
    %472 = vector.shape_cast %471 : vector<1x16xf32> to vector<1x1x16xf32>
    %473 = vector.broadcast %472 : vector<1x1x16xf32> to vector<4x4x16xf32>
    %474 = arith.mulf %470, %473 : vector<4x4x16xf32>
    %475 = arith.addf %468, %474 : vector<4x4x16xf32>
    %476 = vector.shape_cast %0 : vector<1x16xf32> to vector<1x1x16xf32>
    %477 = vector.broadcast %476 : vector<1x1x16xf32> to vector<4x4x16xf32>
    %478 = arith.addf %475, %477 : vector<4x4x16xf32>
    %479 = tpu.iota {dimensions = array<i32: 0>} : vector<4x4x16xi32>
    %c4_i32_393 = arith.constant 4 : i32
    %480 = vector.broadcast %c4_i32_393 : i32 to vector<4x4x16xi32>
    %481 = arith.cmpi slt, %479, %480 : vector<4x4x16xi32>
    %482 = tpu.iota {dimensions = array<i32: 1>} : vector<4x4x16xi32>
    %c3_i32 = arith.constant 3 : i32
    %483 = vector.broadcast %c3_i32 : i32 to vector<4x4x16xi32>
    %484 = arith.cmpi slt, %482, %483 : vector<4x4x16xi32>
    %485 = tpu.iota {dimensions = array<i32: 2>} : vector<4x4x16xi32>
    %c16_i32 = arith.constant 16 : i32
    %486 = vector.broadcast %c16_i32 : i32 to vector<4x4x16xi32>
    %487 = arith.cmpi slt, %485, %486 : vector<4x4x16xi32>
    %488 = arith.andi %481, %484 : vector<4x4x16xi1>
    %489 = arith.andi %488, %487 : vector<4x4x16xi1>
    %cst_394 = arith.constant 0.000000e+00 : f32
    %490 = vector.broadcast %cst_394 : f32 to vector<4x4x16xf32>
    %491 = arith.select %489, %478, %490 : vector<4x4x16xi1>, vector<4x4x16xf32>
    %cst_395 = arith.constant dense<0.000000e+00> : vector<16xf32>
    %492 = vector.multi_reduction <add>, %491, %cst_395 [0, 1] : vector<4x4x16xf32> to vector<16xf32>
    %493 = vector.shape_cast %492 : vector<16xf32> to vector<1x16xf32>
    %494 = arith.addf %345, %493 : vector<1x16xf32>
    %495 = arith.mulf %491, %491 : vector<4x4x16xf32>
    %cst_396 = arith.constant dense<0.000000e+00> : vector<16xf32>
    %496 = vector.multi_reduction <add>, %495, %cst_396 [0, 1] : vector<4x4x16xf32> to vector<16xf32>
    %497 = vector.shape_cast %496 : vector<16xf32> to vector<1x16xf32>
    %498 = arith.addf %349, %497 : vector<1x16xf32>
    %c8 = arith.constant 8 : index
    %c0_397 = arith.constant 0 : index
    %c0_398 = arith.constant 0 : index
    %499 = vector.load %arg9[%c8, %c0_397, %c0_398] : memref<32x4x16xf32, #tpu.memory_space<vmem>>, vector<4x4x16xf32>
    tpu.vector_store %arg9[%c8, %c0_397, %c0_398], %478 {strides = array<i32>} : memref<32x4x16xf32, #tpu.memory_space<vmem>>, vector<4x4x16xf32>,
    %c0_399 = arith.constant 0 : index
    %c2_400 = arith.constant 2 : index
    %c2_401 = arith.constant 2 : index
    %c2_402 = arith.constant 2 : index
    %c0_403 = arith.constant 0 : index
    %500 = vector.load %arg1[%c0_399, %c2_400, %c2_401, %c2_402, %c0_403] : memref<1x3x6x6x16xf32, #tpu.memory_space<vmem>>, vector<1x1x4x4x16xf32>
    %501 = vector.shape_cast %500 : vector<1x1x4x4x16xf32> to vector<4x4x16xf32>
    %c6 = arith.constant 6 : index
    %c0_404 = arith.constant 0 : index
    %502 = vector.load %arg2[%c6, %c0_404] : memref<125x16xf32, #tpu.memory_space<vmem>>, vector<1x16xf32>
    %503 = vector.shape_cast %502 : vector<1x16xf32> to vector<1x1x16xf32>
    %504 = vector.broadcast %503 : vector<1x1x16xf32> to vector<4x4x16xf32>
    %505 = arith.mulf %501, %504 : vector<4x4x16xf32>
    %c0_405 = arith.constant 0 : index
    %c1_406 = arith.constant 1 : index
    %c2_407 = arith.constant 2 : index
    %c2_408 = arith.constant 2 : index
    %c0_409 = arith.constant 0 : index
    %506 = vector.load %arg1[%c0_405, %c1_406, %c2_407, %c2_408, %c0_409] : memref<1x3x6x6x16xf32, #tpu.memory_space<vmem>>, vector<1x1x4x4x16xf32>
    %507 = vector.shape_cast %506 : vector<1x1x4x4x16xf32> to vector<4x4x16xf32>
    %c8_410 = arith.constant 8 : index
    %c0_411 = arith.constant 0 : index
    %508 = vector.load %arg2[%c8_410, %c0_411] : memref<125x16xf32, #tpu.memory_space<vmem>>, vector<1x16xf32>
    %509 = vector.shape_cast %508 : vector<1x16xf32> to vector<1x1x16xf32>
    %510 = vector.broadcast %509 : vector<1x1x16xf32> to vector<4x4x16xf32>
    %511 = arith.mulf %507, %510 : vector<4x4x16xf32>
    %512 = arith.addf %505, %511 : vector<4x4x16xf32>
    %c0_412 = arith.constant 0 : index
    %c2_413 = arith.constant 2 : index
    %c2_414 = arith.constant 2 : index
    %c1_415 = arith.constant 1 : index
    %c0_416 = arith.constant 0 : index
    %513 = vector.load %arg1[%c0_412, %c2_413, %c2_414, %c1_415, %c0_416] : memref<1x3x6x6x16xf32, #tpu.memory_space<vmem>>, vector<1x1x4x4x16xf32>
    %514 = vector.shape_cast %513 : vector<1x1x4x4x16xf32> to vector<4x4x16xf32>
    %c16 = arith.constant 16 : index
    %c0_417 = arith.constant 0 : index
    %515 = vector.load %arg2[%c16, %c0_417] : memref<125x16xf32, #tpu.memory_space<vmem>>, vector<1x16xf32>
    %516 = vector.shape_cast %515 : vector<1x16xf32> to vector<1x1x16xf32>
    %517 = vector.broadcast %516 : vector<1x1x16xf32> to vector<4x4x16xf32>
    %518 = arith.mulf %514, %517 : vector<4x4x16xf32>
    %519 = arith.addf %512, %518 : vector<4x4x16xf32>
    %c0_418 = arith.constant 0 : index
    %c1_419 = arith.constant 1 : index
    %c2_420 = arith.constant 2 : index
    %c1_421 = arith.constant 1 : index
    %c0_422 = arith.constant 0 : index
    %520 = vector.load %arg1[%c0_418, %c1_419, %c2_420, %c1_421, %c0_422] : memref<1x3x6x6x16xf32, #tpu.memory_space<vmem>>, vector<1x1x4x4x16xf32>
    %521 = vector.shape_cast %520 : vector<1x1x4x4x16xf32> to vector<4x4x16xf32>
    %c18 = arith.constant 18 : index
    %c0_423 = arith.constant 0 : index
    %522 = vector.load %arg2[%c18, %c0_423] : memref<125x16xf32, #tpu.memory_space<vmem>>, vector<1x16xf32>
    %523 = vector.shape_cast %522 : vector<1x16xf32> to vector<1x1x16xf32>
    %524 = vector.broadcast %523 : vector<1x1x16xf32> to vector<4x4x16xf32>
    %525 = arith.mulf %521, %524 : vector<4x4x16xf32>
    %526 = arith.addf %519, %525 : vector<4x4x16xf32>
    %c0_424 = arith.constant 0 : index
    %c2_425 = arith.constant 2 : index
    %c1_426 = arith.constant 1 : index
    %c2_427 = arith.constant 2 : index
    %c0_428 = arith.constant 0 : index
    %527 = vector.load %arg1[%c0_424, %c2_425, %c1_426, %c2_427, %c0_428] : memref<1x3x6x6x16xf32, #tpu.memory_space<vmem>>, vector<1x1x4x4x16xf32>
    %528 = vector.shape_cast %527 : vector<1x1x4x4x16xf32> to vector<4x4x16xf32>
    %c56 = arith.constant 56 : index
    %c0_429 = arith.constant 0 : index
    %529 = vector.load %arg2[%c56, %c0_429] : memref<125x16xf32, #tpu.memory_space<vmem>>, vector<1x16xf32>
    %530 = vector.shape_cast %529 : vector<1x16xf32> to vector<1x1x16xf32>
    %531 = vector.broadcast %530 : vector<1x1x16xf32> to vector<4x4x16xf32>
    %532 = arith.mulf %528, %531 : vector<4x4x16xf32>
    %533 = arith.addf %526, %532 : vector<4x4x16xf32>
    %c0_430 = arith.constant 0 : index
    %c1_431 = arith.constant 1 : index
    %c1_432 = arith.constant 1 : index
    %c2_433 = arith.constant 2 : index
    %c0_434 = arith.constant 0 : index
    %534 = vector.load %arg1[%c0_430, %c1_431, %c1_432, %c2_433, %c0_434] : memref<1x3x6x6x16xf32, #tpu.memory_space<vmem>>, vector<1x1x4x4x16xf32>
    %535 = vector.shape_cast %534 : vector<1x1x4x4x16xf32> to vector<4x4x16xf32>
    %c58 = arith.constant 58 : index
    %c0_435 = arith.constant 0 : index
    %536 = vector.load %arg2[%c58, %c0_435] : memref<125x16xf32, #tpu.memory_space<vmem>>, vector<1x16xf32>
    %537 = vector.shape_cast %536 : vector<1x16xf32> to vector<1x1x16xf32>
    %538 = vector.broadcast %537 : vector<1x1x16xf32> to vector<4x4x16xf32>
    %539 = arith.mulf %535, %538 : vector<4x4x16xf32>
    %540 = arith.addf %533, %539 : vector<4x4x16xf32>
    %c0_436 = arith.constant 0 : index
    %c2_437 = arith.constant 2 : index
    %c1_438 = arith.constant 1 : index
    %c1_439 = arith.constant 1 : index
    %c0_440 = arith.constant 0 : index
    %541 = vector.load %arg1[%c0_436, %c2_437, %c1_438, %c1_439, %c0_440] : memref<1x3x6x6x16xf32, #tpu.memory_space<vmem>>, vector<1x1x4x4x16xf32>
    %542 = vector.shape_cast %541 : vector<1x1x4x4x16xf32> to vector<4x4x16xf32>
    %c66 = arith.constant 66 : index
    %c0_441 = arith.constant 0 : index
    %543 = vector.load %arg2[%c66, %c0_441] : memref<125x16xf32, #tpu.memory_space<vmem>>, vector<1x16xf32>
    %544 = vector.shape_cast %543 : vector<1x16xf32> to vector<1x1x16xf32>
    %545 = vector.broadcast %544 : vector<1x1x16xf32> to vector<4x4x16xf32>
    %546 = arith.mulf %542, %545 : vector<4x4x16xf32>
    %547 = arith.addf %540, %546 : vector<4x4x16xf32>
    %c0_442 = arith.constant 0 : index
    %c1_443 = arith.constant 1 : index
    %c1_444 = arith.constant 1 : index
    %c1_445 = arith.constant 1 : index
    %c0_446 = arith.constant 0 : index
    %548 = vector.load %arg1[%c0_442, %c1_443, %c1_444, %c1_445, %c0_446] : memref<1x3x6x6x16xf32, #tpu.memory_space<vmem>>, vector<1x1x4x4x16xf32>
    %549 = vector.shape_cast %548 : vector<1x1x4x4x16xf32> to vector<4x4x16xf32>
    %c68 = arith.constant 68 : index
    %c0_447 = arith.constant 0 : index
    %550 = vector.load %arg2[%c68, %c0_447] : memref<125x16xf32, #tpu.memory_space<vmem>>, vector<1x16xf32>
    %551 = vector.shape_cast %550 : vector<1x16xf32> to vector<1x1x16xf32>
    %552 = vector.broadcast %551 : vector<1x1x16xf32> to vector<4x4x16xf32>
    %553 = arith.mulf %549, %552 : vector<4x4x16xf32>
    %554 = arith.addf %547, %553 : vector<4x4x16xf32>
    %c0_448 = arith.constant 0 : index
    %c2_449 = arith.constant 2 : index
    %c0_450 = arith.constant 0 : index
    %c2_451 = arith.constant 2 : index
    %c0_452 = arith.constant 0 : index
    %555 = vector.load %arg1[%c0_448, %c2_449, %c0_450, %c2_451, %c0_452] : memref<1x3x6x6x16xf32, #tpu.memory_space<vmem>>, vector<1x1x4x4x16xf32>
    %556 = vector.shape_cast %555 : vector<1x1x4x4x16xf32> to vector<4x4x16xf32>
    %c106 = arith.constant 106 : index
    %c0_453 = arith.constant 0 : index
    %557 = vector.load %arg2[%c106, %c0_453] : memref<125x16xf32, #tpu.memory_space<vmem>>, vector<1x16xf32>
    %558 = vector.shape_cast %557 : vector<1x16xf32> to vector<1x1x16xf32>
    %559 = vector.broadcast %558 : vector<1x1x16xf32> to vector<4x4x16xf32>
    %560 = arith.mulf %556, %559 : vector<4x4x16xf32>
    %561 = arith.addf %554, %560 : vector<4x4x16xf32>
    %c0_454 = arith.constant 0 : index
    %c1_455 = arith.constant 1 : index
    %c0_456 = arith.constant 0 : index
    %c2_457 = arith.constant 2 : index
    %c0_458 = arith.constant 0 : index
    %562 = vector.load %arg1[%c0_454, %c1_455, %c0_456, %c2_457, %c0_458] : memref<1x3x6x6x16xf32, #tpu.memory_space<vmem>>, vector<1x1x4x4x16xf32>
    %563 = vector.shape_cast %562 : vector<1x1x4x4x16xf32> to vector<4x4x16xf32>
    %c108 = arith.constant 108 : index
    %c0_459 = arith.constant 0 : index
    %564 = vector.load %arg2[%c108, %c0_459] : memref<125x16xf32, #tpu.memory_space<vmem>>, vector<1x16xf32>
    %565 = vector.shape_cast %564 : vector<1x16xf32> to vector<1x1x16xf32>
    %566 = vector.broadcast %565 : vector<1x1x16xf32> to vector<4x4x16xf32>
    %567 = arith.mulf %563, %566 : vector<4x4x16xf32>
    %568 = arith.addf %561, %567 : vector<4x4x16xf32>
    %c0_460 = arith.constant 0 : index
    %c2_461 = arith.constant 2 : index
    %c0_462 = arith.constant 0 : index
    %c1_463 = arith.constant 1 : index
    %c0_464 = arith.constant 0 : index
    %569 = vector.load %arg1[%c0_460, %c2_461, %c0_462, %c1_463, %c0_464] : memref<1x3x6x6x16xf32, #tpu.memory_space<vmem>>, vector<1x1x4x4x16xf32>
    %570 = vector.shape_cast %569 : vector<1x1x4x4x16xf32> to vector<4x4x16xf32>
    %c116 = arith.constant 116 : index
    %c0_465 = arith.constant 0 : index
    %571 = vector.load %arg2[%c116, %c0_465] : memref<125x16xf32, #tpu.memory_space<vmem>>, vector<1x16xf32>
    %572 = vector.shape_cast %571 : vector<1x16xf32> to vector<1x1x16xf32>
    %573 = vector.broadcast %572 : vector<1x1x16xf32> to vector<4x4x16xf32>
    %574 = arith.mulf %570, %573 : vector<4x4x16xf32>
    %575 = arith.addf %568, %574 : vector<4x4x16xf32>
    %c0_466 = arith.constant 0 : index
    %c1_467 = arith.constant 1 : index
    %c0_468 = arith.constant 0 : index
    %c1_469 = arith.constant 1 : index
    %c0_470 = arith.constant 0 : index
    %576 = vector.load %arg1[%c0_466, %c1_467, %c0_468, %c1_469, %c0_470] : memref<1x3x6x6x16xf32, #tpu.memory_space<vmem>>, vector<1x1x4x4x16xf32>
    %577 = vector.shape_cast %576 : vector<1x1x4x4x16xf32> to vector<4x4x16xf32>
    %c118 = arith.constant 118 : index
    %c0_471 = arith.constant 0 : index
    %578 = vector.load %arg2[%c118, %c0_471] : memref<125x16xf32, #tpu.memory_space<vmem>>, vector<1x16xf32>
    %579 = vector.shape_cast %578 : vector<1x16xf32> to vector<1x1x16xf32>
    %580 = vector.broadcast %579 : vector<1x1x16xf32> to vector<4x4x16xf32>
    %581 = arith.mulf %577, %580 : vector<4x4x16xf32>
    %582 = arith.addf %575, %581 : vector<4x4x16xf32>
    %583 = vector.shape_cast %0 : vector<1x16xf32> to vector<1x1x16xf32>
    %584 = vector.broadcast %583 : vector<1x1x16xf32> to vector<4x4x16xf32>
    %585 = arith.addf %582, %584 : vector<4x4x16xf32>
    %586 = tpu.iota {dimensions = array<i32: 0>} : vector<4x4x16xi32>
    %c4_i32_472 = arith.constant 4 : i32
    %587 = vector.broadcast %c4_i32_472 : i32 to vector<4x4x16xi32>
    %588 = arith.cmpi slt, %586, %587 : vector<4x4x16xi32>
    %589 = tpu.iota {dimensions = array<i32: 1>} : vector<4x4x16xi32>
    %c3_i32_473 = arith.constant 3 : i32
    %590 = vector.broadcast %c3_i32_473 : i32 to vector<4x4x16xi32>
    %591 = arith.cmpi slt, %589, %590 : vector<4x4x16xi32>
    %592 = tpu.iota {dimensions = array<i32: 2>} : vector<4x4x16xi32>
    %c12_i32_474 = arith.constant 12 : i32
    %593 = vector.broadcast %c12_i32_474 : i32 to vector<4x4x16xi32>
    %594 = arith.cmpi slt, %592, %593 : vector<4x4x16xi32>
    %595 = arith.andi %588, %591 : vector<4x4x16xi1>
    %596 = arith.andi %595, %594 : vector<4x4x16xi1>
    %cst_475 = arith.constant 0.000000e+00 : f32
    %597 = vector.broadcast %cst_475 : f32 to vector<4x4x16xf32>
    %598 = arith.select %596, %585, %597 : vector<4x4x16xi1>, vector<4x4x16xf32>
    %cst_476 = arith.constant dense<0.000000e+00> : vector<16xf32>
    %599 = vector.multi_reduction <add>, %598, %cst_476 [0, 1] : vector<4x4x16xf32> to vector<16xf32>
    %600 = vector.shape_cast %599 : vector<16xf32> to vector<1x16xf32>
    %601 = arith.addf %494, %600 : vector<1x16xf32>
    %602 = arith.mulf %598, %598 : vector<4x4x16xf32>
    %cst_477 = arith.constant dense<0.000000e+00> : vector<16xf32>
    %603 = vector.multi_reduction <add>, %602, %cst_477 [0, 1] : vector<4x4x16xf32> to vector<16xf32>
    %604 = vector.shape_cast %603 : vector<16xf32> to vector<1x16xf32>
    %605 = arith.addf %498, %604 : vector<1x16xf32>
    %c12_478 = arith.constant 12 : index
    %c0_479 = arith.constant 0 : index
    %c0_480 = arith.constant 0 : index
    %606 = vector.load %arg9[%c12_478, %c0_479, %c0_480] : memref<32x4x16xf32, #tpu.memory_space<vmem>>, vector<4x4x16xf32>
    tpu.vector_store %arg9[%c12_478, %c0_479, %c0_480], %585 {strides = array<i32>} : memref<32x4x16xf32, #tpu.memory_space<vmem>>, vector<4x4x16xf32>,
    %c0_481 = arith.constant 0 : index
    %c2_482 = arith.constant 2 : index
    %c2_483 = arith.constant 2 : index
    %c2_484 = arith.constant 2 : index
    %c0_485 = arith.constant 0 : index
    %607 = vector.load %arg1[%c0_481, %c2_482, %c2_483, %c2_484, %c0_485] : memref<1x3x6x6x16xf32, #tpu.memory_space<vmem>>, vector<1x1x4x4x16xf32>
    %608 = vector.shape_cast %607 : vector<1x1x4x4x16xf32> to vector<4x4x16xf32>
    %c25 = arith.constant 25 : index
    %c0_486 = arith.constant 0 : index
    %609 = vector.load %arg2[%c25, %c0_486] : memref<125x16xf32, #tpu.memory_space<vmem>>, vector<1x16xf32>
    %610 = vector.shape_cast %609 : vector<1x16xf32> to vector<1x1x16xf32>
    %611 = vector.broadcast %610 : vector<1x1x16xf32> to vector<4x4x16xf32>
    %612 = arith.mulf %608, %611 : vector<4x4x16xf32>
    %c0_487 = arith.constant 0 : index
    %c1_488 = arith.constant 1 : index
    %c2_489 = arith.constant 2 : index
    %c2_490 = arith.constant 2 : index
    %c0_491 = arith.constant 0 : index
    %613 = vector.load %arg1[%c0_487, %c1_488, %c2_489, %c2_490, %c0_491] : memref<1x3x6x6x16xf32, #tpu.memory_space<vmem>>, vector<1x1x4x4x16xf32>
    %614 = vector.shape_cast %613 : vector<1x1x4x4x16xf32> to vector<4x4x16xf32>
    %c27 = arith.constant 27 : index
    %c0_492 = arith.constant 0 : index
    %615 = vector.load %arg2[%c27, %c0_492] : memref<125x16xf32, #tpu.memory_space<vmem>>, vector<1x16xf32>
    %616 = vector.shape_cast %615 : vector<1x16xf32> to vector<1x1x16xf32>
    %617 = vector.broadcast %616 : vector<1x1x16xf32> to vector<4x4x16xf32>
    %618 = arith.mulf %614, %617 : vector<4x4x16xf32>
    %619 = arith.addf %612, %618 : vector<4x4x16xf32>
    %c0_493 = arith.constant 0 : index
    %c0_494 = arith.constant 0 : index
    %c2_495 = arith.constant 2 : index
    %c2_496 = arith.constant 2 : index
    %c0_497 = arith.constant 0 : index
    %620 = vector.load %arg1[%c0_493, %c0_494, %c2_495, %c2_496, %c0_497] : memref<1x3x6x6x16xf32, #tpu.memory_space<vmem>>, vector<1x1x4x4x16xf32>
    %621 = vector.shape_cast %620 : vector<1x1x4x4x16xf32> to vector<4x4x16xf32>
    %c29 = arith.constant 29 : index
    %c0_498 = arith.constant 0 : index
    %622 = vector.load %arg2[%c29, %c0_498] : memref<125x16xf32, #tpu.memory_space<vmem>>, vector<1x16xf32>
    %623 = vector.shape_cast %622 : vector<1x16xf32> to vector<1x1x16xf32>
    %624 = vector.broadcast %623 : vector<1x1x16xf32> to vector<4x4x16xf32>
    %625 = arith.mulf %621, %624 : vector<4x4x16xf32>
    %626 = arith.addf %619, %625 : vector<4x4x16xf32>
    %c0_499 = arith.constant 0 : index
    %c2_500 = arith.constant 2 : index
    %c2_501 = arith.constant 2 : index
    %c1_502 = arith.constant 1 : index
    %c0_503 = arith.constant 0 : index
    %627 = vector.load %arg1[%c0_499, %c2_500, %c2_501, %c1_502, %c0_503] : memref<1x3x6x6x16xf32, #tpu.memory_space<vmem>>, vector<1x1x4x4x16xf32>
    %628 = vector.shape_cast %627 : vector<1x1x4x4x16xf32> to vector<4x4x16xf32>
    %c35 = arith.constant 35 : index
    %c0_504 = arith.constant 0 : index
    %629 = vector.load %arg2[%c35, %c0_504] : memref<125x16xf32, #tpu.memory_space<vmem>>, vector<1x16xf32>
    %630 = vector.shape_cast %629 : vector<1x16xf32> to vector<1x1x16xf32>
    %631 = vector.broadcast %630 : vector<1x1x16xf32> to vector<4x4x16xf32>
    %632 = arith.mulf %628, %631 : vector<4x4x16xf32>
    %633 = arith.addf %626, %632 : vector<4x4x16xf32>
    %c0_505 = arith.constant 0 : index
    %c1_506 = arith.constant 1 : index
    %c2_507 = arith.constant 2 : index
    %c1_508 = arith.constant 1 : index
    %c0_509 = arith.constant 0 : index
    %634 = vector.load %arg1[%c0_505, %c1_506, %c2_507, %c1_508, %c0_509] : memref<1x3x6x6x16xf32, #tpu.memory_space<vmem>>, vector<1x1x4x4x16xf32>
    %635 = vector.shape_cast %634 : vector<1x1x4x4x16xf32> to vector<4x4x16xf32>
    %c37 = arith.constant 37 : index
    %c0_510 = arith.constant 0 : index
    %636 = vector.load %arg2[%c37, %c0_510] : memref<125x16xf32, #tpu.memory_space<vmem>>, vector<1x16xf32>
    %637 = vector.shape_cast %636 : vector<1x16xf32> to vector<1x1x16xf32>
    %638 = vector.broadcast %637 : vector<1x1x16xf32> to vector<4x4x16xf32>
    %639 = arith.mulf %635, %638 : vector<4x4x16xf32>
    %640 = arith.addf %633, %639 : vector<4x4x16xf32>
    %c0_511 = arith.constant 0 : index
    %c0_512 = arith.constant 0 : index
    %c2_513 = arith.constant 2 : index
    %c1_514 = arith.constant 1 : index
    %c0_515 = arith.constant 0 : index
    %641 = vector.load %arg1[%c0_511, %c0_512, %c2_513, %c1_514, %c0_515] : memref<1x3x6x6x16xf32, #tpu.memory_space<vmem>>, vector<1x1x4x4x16xf32>
    %642 = vector.shape_cast %641 : vector<1x1x4x4x16xf32> to vector<4x4x16xf32>
    %c39 = arith.constant 39 : index
    %c0_516 = arith.constant 0 : index
    %643 = vector.load %arg2[%c39, %c0_516] : memref<125x16xf32, #tpu.memory_space<vmem>>, vector<1x16xf32>
    %644 = vector.shape_cast %643 : vector<1x16xf32> to vector<1x1x16xf32>
    %645 = vector.broadcast %644 : vector<1x1x16xf32> to vector<4x4x16xf32>
    %646 = arith.mulf %642, %645 : vector<4x4x16xf32>
    %647 = arith.addf %640, %646 : vector<4x4x16xf32>
    %c0_517 = arith.constant 0 : index
    %c2_518 = arith.constant 2 : index
    %c2_519 = arith.constant 2 : index
    %c0_520 = arith.constant 0 : index
    %c0_521 = arith.constant 0 : index
    %648 = vector.load %arg1[%c0_517, %c2_518, %c2_519, %c0_520, %c0_521] : memref<1x3x6x6x16xf32, #tpu.memory_space<vmem>>, vector<1x1x4x4x16xf32>
    %649 = vector.shape_cast %648 : vector<1x1x4x4x16xf32> to vector<4x4x16xf32>
    %c45 = arith.constant 45 : index
    %c0_522 = arith.constant 0 : index
    %650 = vector.load %arg2[%c45, %c0_522] : memref<125x16xf32, #tpu.memory_space<vmem>>, vector<1x16xf32>
    %651 = vector.shape_cast %650 : vector<1x16xf32> to vector<1x1x16xf32>
    %652 = vector.broadcast %651 : vector<1x1x16xf32> to vector<4x4x16xf32>
    %653 = arith.mulf %649, %652 : vector<4x4x16xf32>
    %654 = arith.addf %647, %653 : vector<4x4x16xf32>
    %c0_523 = arith.constant 0 : index
    %c1_524 = arith.constant 1 : index
    %c2_525 = arith.constant 2 : index
    %c0_526 = arith.constant 0 : index
    %c0_527 = arith.constant 0 : index
    %655 = vector.load %arg1[%c0_523, %c1_524, %c2_525, %c0_526, %c0_527] : memref<1x3x6x6x16xf32, #tpu.memory_space<vmem>>, vector<1x1x4x4x16xf32>
    %656 = vector.shape_cast %655 : vector<1x1x4x4x16xf32> to vector<4x4x16xf32>
    %c47 = arith.constant 47 : index
    %c0_528 = arith.constant 0 : index
    %657 = vector.load %arg2[%c47, %c0_528] : memref<125x16xf32, #tpu.memory_space<vmem>>, vector<1x16xf32>
    %658 = vector.shape_cast %657 : vector<1x16xf32> to vector<1x1x16xf32>
    %659 = vector.broadcast %658 : vector<1x1x16xf32> to vector<4x4x16xf32>
    %660 = arith.mulf %656, %659 : vector<4x4x16xf32>
    %661 = arith.addf %654, %660 : vector<4x4x16xf32>
    %c0_529 = arith.constant 0 : index
    %c0_530 = arith.constant 0 : index
    %c2_531 = arith.constant 2 : index
    %c0_532 = arith.constant 0 : index
    %c0_533 = arith.constant 0 : index
    %662 = vector.load %arg1[%c0_529, %c0_530, %c2_531, %c0_532, %c0_533] : memref<1x3x6x6x16xf32, #tpu.memory_space<vmem>>, vector<1x1x4x4x16xf32>
    %663 = vector.shape_cast %662 : vector<1x1x4x4x16xf32> to vector<4x4x16xf32>
    %c49 = arith.constant 49 : index
    %c0_534 = arith.constant 0 : index
    %664 = vector.load %arg2[%c49, %c0_534] : memref<125x16xf32, #tpu.memory_space<vmem>>, vector<1x16xf32>
    %665 = vector.shape_cast %664 : vector<1x16xf32> to vector<1x1x16xf32>
    %666 = vector.broadcast %665 : vector<1x1x16xf32> to vector<4x4x16xf32>
    %667 = arith.mulf %663, %666 : vector<4x4x16xf32>
    %668 = arith.addf %661, %667 : vector<4x4x16xf32>
    %c0_535 = arith.constant 0 : index
    %c2_536 = arith.constant 2 : index
    %c1_537 = arith.constant 1 : index
    %c2_538 = arith.constant 2 : index
    %c0_539 = arith.constant 0 : index
    %669 = vector.load %arg1[%c0_535, %c2_536, %c1_537, %c2_538, %c0_539] : memref<1x3x6x6x16xf32, #tpu.memory_space<vmem>>, vector<1x1x4x4x16xf32>
    %670 = vector.shape_cast %669 : vector<1x1x4x4x16xf32> to vector<4x4x16xf32>
    %c75 = arith.constant 75 : index
    %c0_540 = arith.constant 0 : index
    %671 = vector.load %arg2[%c75, %c0_540] : memref<125x16xf32, #tpu.memory_space<vmem>>, vector<1x16xf32>
    %672 = vector.shape_cast %671 : vector<1x16xf32> to vector<1x1x16xf32>
    %673 = vector.broadcast %672 : vector<1x1x16xf32> to vector<4x4x16xf32>
    %674 = arith.mulf %670, %673 : vector<4x4x16xf32>
    %675 = arith.addf %668, %674 : vector<4x4x16xf32>
    %c0_541 = arith.constant 0 : index
    %c1_542 = arith.constant 1 : index
    %c1_543 = arith.constant 1 : index
    %c2_544 = arith.constant 2 : index
    %c0_545 = arith.constant 0 : index
    %676 = vector.load %arg1[%c0_541, %c1_542, %c1_543, %c2_544, %c0_545] : memref<1x3x6x6x16xf32, #tpu.memory_space<vmem>>, vector<1x1x4x4x16xf32>
    %677 = vector.shape_cast %676 : vector<1x1x4x4x16xf32> to vector<4x4x16xf32>
    %c77 = arith.constant 77 : index
    %c0_546 = arith.constant 0 : index
    %678 = vector.load %arg2[%c77, %c0_546] : memref<125x16xf32, #tpu.memory_space<vmem>>, vector<1x16xf32>
    %679 = vector.shape_cast %678 : vector<1x16xf32> to vector<1x1x16xf32>
    %680 = vector.broadcast %679 : vector<1x1x16xf32> to vector<4x4x16xf32>
    %681 = arith.mulf %677, %680 : vector<4x4x16xf32>
    %682 = arith.addf %675, %681 : vector<4x4x16xf32>
    %c0_547 = arith.constant 0 : index
    %c0_548 = arith.constant 0 : index
    %c1_549 = arith.constant 1 : index
    %c2_550 = arith.constant 2 : index
    %c0_551 = arith.constant 0 : index
    %683 = vector.load %arg1[%c0_547, %c0_548, %c1_549, %c2_550, %c0_551] : memref<1x3x6x6x16xf32, #tpu.memory_space<vmem>>, vector<1x1x4x4x16xf32>
    %684 = vector.shape_cast %683 : vector<1x1x4x4x16xf32> to vector<4x4x16xf32>
    %c79 = arith.constant 79 : index
    %c0_552 = arith.constant 0 : index
    %685 = vector.load %arg2[%c79, %c0_552] : memref<125x16xf32, #tpu.memory_space<vmem>>, vector<1x16xf32>
    %686 = vector.shape_cast %685 : vector<1x16xf32> to vector<1x1x16xf32>
    %687 = vector.broadcast %686 : vector<1x1x16xf32> to vector<4x4x16xf32>
    %688 = arith.mulf %684, %687 : vector<4x4x16xf32>
    %689 = arith.addf %682, %688 : vector<4x4x16xf32>
    %c0_553 = arith.constant 0 : index
    %c2_554 = arith.constant 2 : index
    %c1_555 = arith.constant 1 : index
    %c1_556 = arith.constant 1 : index
    %c0_557 = arith.constant 0 : index
    %690 = vector.load %arg1[%c0_553, %c2_554, %c1_555, %c1_556, %c0_557] : memref<1x3x6x6x16xf32, #tpu.memory_space<vmem>>, vector<1x1x4x4x16xf32>
    %691 = vector.shape_cast %690 : vector<1x1x4x4x16xf32> to vector<4x4x16xf32>
    %c85 = arith.constant 85 : index
    %c0_558 = arith.constant 0 : index
    %692 = vector.load %arg2[%c85, %c0_558] : memref<125x16xf32, #tpu.memory_space<vmem>>, vector<1x16xf32>
    %693 = vector.shape_cast %692 : vector<1x16xf32> to vector<1x1x16xf32>
    %694 = vector.broadcast %693 : vector<1x1x16xf32> to vector<4x4x16xf32>
    %695 = arith.mulf %691, %694 : vector<4x4x16xf32>
    %696 = arith.addf %689, %695 : vector<4x4x16xf32>
    %c0_559 = arith.constant 0 : index
    %c1_560 = arith.constant 1 : index
    %c1_561 = arith.constant 1 : index
    %c1_562 = arith.constant 1 : index
    %c0_563 = arith.constant 0 : index
    %697 = vector.load %arg1[%c0_559, %c1_560, %c1_561, %c1_562, %c0_563] : memref<1x3x6x6x16xf32, #tpu.memory_space<vmem>>, vector<1x1x4x4x16xf32>
    %698 = vector.shape_cast %697 : vector<1x1x4x4x16xf32> to vector<4x4x16xf32>
    %c87 = arith.constant 87 : index
    %c0_564 = arith.constant 0 : index
    %699 = vector.load %arg2[%c87, %c0_564] : memref<125x16xf32, #tpu.memory_space<vmem>>, vector<1x16xf32>
    %700 = vector.shape_cast %699 : vector<1x16xf32> to vector<1x1x16xf32>
    %701 = vector.broadcast %700 : vector<1x1x16xf32> to vector<4x4x16xf32>
    %702 = arith.mulf %698, %701 : vector<4x4x16xf32>
    %703 = arith.addf %696, %702 : vector<4x4x16xf32>
    %c0_565 = arith.constant 0 : index
    %c0_566 = arith.constant 0 : index
    %c1_567 = arith.constant 1 : index
    %c1_568 = arith.constant 1 : index
    %c0_569 = arith.constant 0 : index
    %704 = vector.load %arg1[%c0_565, %c0_566, %c1_567, %c1_568, %c0_569] : memref<1x3x6x6x16xf32, #tpu.memory_space<vmem>>, vector<1x1x4x4x16xf32>
    %705 = vector.shape_cast %704 : vector<1x1x4x4x16xf32> to vector<4x4x16xf32>
    %c89 = arith.constant 89 : index
    %c0_570 = arith.constant 0 : index
    %706 = vector.load %arg2[%c89, %c0_570] : memref<125x16xf32, #tpu.memory_space<vmem>>, vector<1x16xf32>
    %707 = vector.shape_cast %706 : vector<1x16xf32> to vector<1x1x16xf32>
    %708 = vector.broadcast %707 : vector<1x1x16xf32> to vector<4x4x16xf32>
    %709 = arith.mulf %705, %708 : vector<4x4x16xf32>
    %710 = arith.addf %703, %709 : vector<4x4x16xf32>
    %c0_571 = arith.constant 0 : index
    %c2_572 = arith.constant 2 : index
    %c1_573 = arith.constant 1 : index
    %c0_574 = arith.constant 0 : index
    %c0_575 = arith.constant 0 : index
    %711 = vector.load %arg1[%c0_571, %c2_572, %c1_573, %c0_574, %c0_575] : memref<1x3x6x6x16xf32, #tpu.memory_space<vmem>>, vector<1x1x4x4x16xf32>
    %712 = vector.shape_cast %711 : vector<1x1x4x4x16xf32> to vector<4x4x16xf32>
    %c95 = arith.constant 95 : index
    %c0_576 = arith.constant 0 : index
    %713 = vector.load %arg2[%c95, %c0_576] : memref<125x16xf32, #tpu.memory_space<vmem>>, vector<1x16xf32>
    %714 = vector.shape_cast %713 : vector<1x16xf32> to vector<1x1x16xf32>
    %715 = vector.broadcast %714 : vector<1x1x16xf32> to vector<4x4x16xf32>
    %716 = arith.mulf %712, %715 : vector<4x4x16xf32>
    %717 = arith.addf %710, %716 : vector<4x4x16xf32>
    %c0_577 = arith.constant 0 : index
    %c1_578 = arith.constant 1 : index
    %c1_579 = arith.constant 1 : index
    %c0_580 = arith.constant 0 : index
    %c0_581 = arith.constant 0 : index
    %718 = vector.load %arg1[%c0_577, %c1_578, %c1_579, %c0_580, %c0_581] : memref<1x3x6x6x16xf32, #tpu.memory_space<vmem>>, vector<1x1x4x4x16xf32>
    %719 = vector.shape_cast %718 : vector<1x1x4x4x16xf32> to vector<4x4x16xf32>
    %c97 = arith.constant 97 : index
    %c0_582 = arith.constant 0 : index
    %720 = vector.load %arg2[%c97, %c0_582] : memref<125x16xf32, #tpu.memory_space<vmem>>, vector<1x16xf32>
    %721 = vector.shape_cast %720 : vector<1x16xf32> to vector<1x1x16xf32>
    %722 = vector.broadcast %721 : vector<1x1x16xf32> to vector<4x4x16xf32>
    %723 = arith.mulf %719, %722 : vector<4x4x16xf32>
    %724 = arith.addf %717, %723 : vector<4x4x16xf32>
    %c0_583 = arith.constant 0 : index
    %c0_584 = arith.constant 0 : index
    %c1_585 = arith.constant 1 : index
    %c0_586 = arith.constant 0 : index
    %c0_587 = arith.constant 0 : index
    %725 = vector.load %arg1[%c0_583, %c0_584, %c1_585, %c0_586, %c0_587] : memref<1x3x6x6x16xf32, #tpu.memory_space<vmem>>, vector<1x1x4x4x16xf32>
    %726 = vector.shape_cast %725 : vector<1x1x4x4x16xf32> to vector<4x4x16xf32>
    %c99 = arith.constant 99 : index
    %c0_588 = arith.constant 0 : index
    %727 = vector.load %arg2[%c99, %c0_588] : memref<125x16xf32, #tpu.memory_space<vmem>>, vector<1x16xf32>
    %728 = vector.shape_cast %727 : vector<1x16xf32> to vector<1x1x16xf32>
    %729 = vector.broadcast %728 : vector<1x1x16xf32> to vector<4x4x16xf32>
    %730 = arith.mulf %726, %729 : vector<4x4x16xf32>
    %731 = arith.addf %724, %730 : vector<4x4x16xf32>
    %732 = vector.shape_cast %0 : vector<1x16xf32> to vector<1x1x16xf32>
    %733 = vector.broadcast %732 : vector<1x1x16xf32> to vector<4x4x16xf32>
    %734 = arith.addf %731, %733 : vector<4x4x16xf32>
    %735 = tpu.iota {dimensions = array<i32: 0>} : vector<4x4x16xi32>
    %c3_i32_589 = arith.constant 3 : i32
    %736 = vector.broadcast %c3_i32_589 : i32 to vector<4x4x16xi32>
    %737 = arith.cmpi slt, %735, %736 : vector<4x4x16xi32>
    %738 = tpu.iota {dimensions = array<i32: 1>} : vector<4x4x16xi32>
    %c4_i32_590 = arith.constant 4 : i32
    %739 = vector.broadcast %c4_i32_590 : i32 to vector<4x4x16xi32>
    %740 = arith.cmpi slt, %738, %739 : vector<4x4x16xi32>
    %741 = tpu.iota {dimensions = array<i32: 2>} : vector<4x4x16xi32>
    %c16_i32_591 = arith.constant 16 : i32
    %742 = vector.broadcast %c16_i32_591 : i32 to vector<4x4x16xi32>
    %743 = arith.cmpi slt, %741, %742 : vector<4x4x16xi32>
    %744 = arith.andi %737, %740 : vector<4x4x16xi1>
    %745 = arith.andi %744, %743 : vector<4x4x16xi1>
    %cst_592 = arith.constant 0.000000e+00 : f32
    %746 = vector.broadcast %cst_592 : f32 to vector<4x4x16xf32>
    %747 = arith.select %745, %734, %746 : vector<4x4x16xi1>, vector<4x4x16xf32>
    %cst_593 = arith.constant dense<0.000000e+00> : vector<16xf32>
    %748 = vector.multi_reduction <add>, %747, %cst_593 [0, 1] : vector<4x4x16xf32> to vector<16xf32>
    %749 = vector.shape_cast %748 : vector<16xf32> to vector<1x16xf32>
    %750 = arith.addf %601, %749 : vector<1x16xf32>
    %751 = arith.mulf %747, %747 : vector<4x4x16xf32>
    %cst_594 = arith.constant dense<0.000000e+00> : vector<16xf32>
    %752 = vector.multi_reduction <add>, %751, %cst_594 [0, 1] : vector<4x4x16xf32> to vector<16xf32>
    %753 = vector.shape_cast %752 : vector<16xf32> to vector<1x16xf32>
    %754 = arith.addf %605, %753 : vector<1x16xf32>
    %c16_595 = arith.constant 16 : index
    %c0_596 = arith.constant 0 : index
    %c0_597 = arith.constant 0 : index
    %755 = vector.load %arg9[%c16_595, %c0_596, %c0_597] : memref<32x4x16xf32, #tpu.memory_space<vmem>>, vector<4x4x16xf32>
    tpu.vector_store %arg9[%c16_595, %c0_596, %c0_597], %734 {strides = array<i32>} : memref<32x4x16xf32, #tpu.memory_space<vmem>>, vector<4x4x16xf32>,
    %c0_598 = arith.constant 0 : index
    %c2_599 = arith.constant 2 : index
    %c2_600 = arith.constant 2 : index
    %c2_601 = arith.constant 2 : index
    %c0_602 = arith.constant 0 : index
    %756 = vector.load %arg1[%c0_598, %c2_599, %c2_600, %c2_601, %c0_602] : memref<1x3x6x6x16xf32, #tpu.memory_space<vmem>>, vector<1x1x4x4x16xf32>
    %757 = vector.shape_cast %756 : vector<1x1x4x4x16xf32> to vector<4x4x16xf32>
    %c26 = arith.constant 26 : index
    %c0_603 = arith.constant 0 : index
    %758 = vector.load %arg2[%c26, %c0_603] : memref<125x16xf32, #tpu.memory_space<vmem>>, vector<1x16xf32>
    %759 = vector.shape_cast %758 : vector<1x16xf32> to vector<1x1x16xf32>
    %760 = vector.broadcast %759 : vector<1x1x16xf32> to vector<4x4x16xf32>
    %761 = arith.mulf %757, %760 : vector<4x4x16xf32>
    %c0_604 = arith.constant 0 : index
    %c1_605 = arith.constant 1 : index
    %c2_606 = arith.constant 2 : index
    %c2_607 = arith.constant 2 : index
    %c0_608 = arith.constant 0 : index
    %762 = vector.load %arg1[%c0_604, %c1_605, %c2_606, %c2_607, %c0_608] : memref<1x3x6x6x16xf32, #tpu.memory_space<vmem>>, vector<1x1x4x4x16xf32>
    %763 = vector.shape_cast %762 : vector<1x1x4x4x16xf32> to vector<4x4x16xf32>
    %c28 = arith.constant 28 : index
    %c0_609 = arith.constant 0 : index
    %764 = vector.load %arg2[%c28, %c0_609] : memref<125x16xf32, #tpu.memory_space<vmem>>, vector<1x16xf32>
    %765 = vector.shape_cast %764 : vector<1x16xf32> to vector<1x1x16xf32>
    %766 = vector.broadcast %765 : vector<1x1x16xf32> to vector<4x4x16xf32>
    %767 = arith.mulf %763, %766 : vector<4x4x16xf32>
    %768 = arith.addf %761, %767 : vector<4x4x16xf32>
    %c0_610 = arith.constant 0 : index
    %c2_611 = arith.constant 2 : index
    %c2_612 = arith.constant 2 : index
    %c1_613 = arith.constant 1 : index
    %c0_614 = arith.constant 0 : index
    %769 = vector.load %arg1[%c0_610, %c2_611, %c2_612, %c1_613, %c0_614] : memref<1x3x6x6x16xf32, #tpu.memory_space<vmem>>, vector<1x1x4x4x16xf32>
    %770 = vector.shape_cast %769 : vector<1x1x4x4x16xf32> to vector<4x4x16xf32>
    %c36 = arith.constant 36 : index
    %c0_615 = arith.constant 0 : index
    %771 = vector.load %arg2[%c36, %c0_615] : memref<125x16xf32, #tpu.memory_space<vmem>>, vector<1x16xf32>
    %772 = vector.shape_cast %771 : vector<1x16xf32> to vector<1x1x16xf32>
    %773 = vector.broadcast %772 : vector<1x1x16xf32> to vector<4x4x16xf32>
    %774 = arith.mulf %770, %773 : vector<4x4x16xf32>
    %775 = arith.addf %768, %774 : vector<4x4x16xf32>
    %c0_616 = arith.constant 0 : index
    %c1_617 = arith.constant 1 : index
    %c2_618 = arith.constant 2 : index
    %c1_619 = arith.constant 1 : index
    %c0_620 = arith.constant 0 : index
    %776 = vector.load %arg1[%c0_616, %c1_617, %c2_618, %c1_619, %c0_620] : memref<1x3x6x6x16xf32, #tpu.memory_space<vmem>>, vector<1x1x4x4x16xf32>
    %777 = vector.shape_cast %776 : vector<1x1x4x4x16xf32> to vector<4x4x16xf32>
    %c38 = arith.constant 38 : index
    %c0_621 = arith.constant 0 : index
    %778 = vector.load %arg2[%c38, %c0_621] : memref<125x16xf32, #tpu.memory_space<vmem>>, vector<1x16xf32>
    %779 = vector.shape_cast %778 : vector<1x16xf32> to vector<1x1x16xf32>
    %780 = vector.broadcast %779 : vector<1x1x16xf32> to vector<4x4x16xf32>
    %781 = arith.mulf %777, %780 : vector<4x4x16xf32>
    %782 = arith.addf %775, %781 : vector<4x4x16xf32>
    %c0_622 = arith.constant 0 : index
    %c2_623 = arith.constant 2 : index
    %c2_624 = arith.constant 2 : index
    %c0_625 = arith.constant 0 : index
    %c0_626 = arith.constant 0 : index
    %783 = vector.load %arg1[%c0_622, %c2_623, %c2_624, %c0_625, %c0_626] : memref<1x3x6x6x16xf32, #tpu.memory_space<vmem>>, vector<1x1x4x4x16xf32>
    %784 = vector.shape_cast %783 : vector<1x1x4x4x16xf32> to vector<4x4x16xf32>
    %c46 = arith.constant 46 : index
    %c0_627 = arith.constant 0 : index
    %785 = vector.load %arg2[%c46, %c0_627] : memref<125x16xf32, #tpu.memory_space<vmem>>, vector<1x16xf32>
    %786 = vector.shape_cast %785 : vector<1x16xf32> to vector<1x1x16xf32>
    %787 = vector.broadcast %786 : vector<1x1x16xf32> to vector<4x4x16xf32>
    %788 = arith.mulf %784, %787 : vector<4x4x16xf32>
    %789 = arith.addf %782, %788 : vector<4x4x16xf32>
    %c0_628 = arith.constant 0 : index
    %c1_629 = arith.constant 1 : index
    %c2_630 = arith.constant 2 : index
    %c0_631 = arith.constant 0 : index
    %c0_632 = arith.constant 0 : index
    %790 = vector.load %arg1[%c0_628, %c1_629, %c2_630, %c0_631, %c0_632] : memref<1x3x6x6x16xf32, #tpu.memory_space<vmem>>, vector<1x1x4x4x16xf32>
    %791 = vector.shape_cast %790 : vector<1x1x4x4x16xf32> to vector<4x4x16xf32>
    %c48 = arith.constant 48 : index
    %c0_633 = arith.constant 0 : index
    %792 = vector.load %arg2[%c48, %c0_633] : memref<125x16xf32, #tpu.memory_space<vmem>>, vector<1x16xf32>
    %793 = vector.shape_cast %792 : vector<1x16xf32> to vector<1x1x16xf32>
    %794 = vector.broadcast %793 : vector<1x1x16xf32> to vector<4x4x16xf32>
    %795 = arith.mulf %791, %794 : vector<4x4x16xf32>
    %796 = arith.addf %789, %795 : vector<4x4x16xf32>
    %c0_634 = arith.constant 0 : index
    %c2_635 = arith.constant 2 : index
    %c1_636 = arith.constant 1 : index
    %c2_637 = arith.constant 2 : index
    %c0_638 = arith.constant 0 : index
    %797 = vector.load %arg1[%c0_634, %c2_635, %c1_636, %c2_637, %c0_638] : memref<1x3x6x6x16xf32, #tpu.memory_space<vmem>>, vector<1x1x4x4x16xf32>
    %798 = vector.shape_cast %797 : vector<1x1x4x4x16xf32> to vector<4x4x16xf32>
    %c76 = arith.constant 76 : index
    %c0_639 = arith.constant 0 : index
    %799 = vector.load %arg2[%c76, %c0_639] : memref<125x16xf32, #tpu.memory_space<vmem>>, vector<1x16xf32>
    %800 = vector.shape_cast %799 : vector<1x16xf32> to vector<1x1x16xf32>
    %801 = vector.broadcast %800 : vector<1x1x16xf32> to vector<4x4x16xf32>
    %802 = arith.mulf %798, %801 : vector<4x4x16xf32>
    %803 = arith.addf %796, %802 : vector<4x4x16xf32>
    %c0_640 = arith.constant 0 : index
    %c1_641 = arith.constant 1 : index
    %c1_642 = arith.constant 1 : index
    %c2_643 = arith.constant 2 : index
    %c0_644 = arith.constant 0 : index
    %804 = vector.load %arg1[%c0_640, %c1_641, %c1_642, %c2_643, %c0_644] : memref<1x3x6x6x16xf32, #tpu.memory_space<vmem>>, vector<1x1x4x4x16xf32>
    %805 = vector.shape_cast %804 : vector<1x1x4x4x16xf32> to vector<4x4x16xf32>
    %c78 = arith.constant 78 : index
    %c0_645 = arith.constant 0 : index
    %806 = vector.load %arg2[%c78, %c0_645] : memref<125x16xf32, #tpu.memory_space<vmem>>, vector<1x16xf32>
    %807 = vector.shape_cast %806 : vector<1x16xf32> to vector<1x1x16xf32>
    %808 = vector.broadcast %807 : vector<1x1x16xf32> to vector<4x4x16xf32>
    %809 = arith.mulf %805, %808 : vector<4x4x16xf32>
    %810 = arith.addf %803, %809 : vector<4x4x16xf32>
    %c0_646 = arith.constant 0 : index
    %c2_647 = arith.constant 2 : index
    %c1_648 = arith.constant 1 : index
    %c1_649 = arith.constant 1 : index
    %c0_650 = arith.constant 0 : index
    %811 = vector.load %arg1[%c0_646, %c2_647, %c1_648, %c1_649, %c0_650] : memref<1x3x6x6x16xf32, #tpu.memory_space<vmem>>, vector<1x1x4x4x16xf32>
    %812 = vector.shape_cast %811 : vector<1x1x4x4x16xf32> to vector<4x4x16xf32>
    %c86 = arith.constant 86 : index
    %c0_651 = arith.constant 0 : index
    %813 = vector.load %arg2[%c86, %c0_651] : memref<125x16xf32, #tpu.memory_space<vmem>>, vector<1x16xf32>
    %814 = vector.shape_cast %813 : vector<1x16xf32> to vector<1x1x16xf32>
    %815 = vector.broadcast %814 : vector<1x1x16xf32> to vector<4x4x16xf32>
    %816 = arith.mulf %812, %815 : vector<4x4x16xf32>
    %817 = arith.addf %810, %816 : vector<4x4x16xf32>
    %c0_652 = arith.constant 0 : index
    %c1_653 = arith.constant 1 : index
    %c1_654 = arith.constant 1 : index
    %c1_655 = arith.constant 1 : index
    %c0_656 = arith.constant 0 : index
    %818 = vector.load %arg1[%c0_652, %c1_653, %c1_654, %c1_655, %c0_656] : memref<1x3x6x6x16xf32, #tpu.memory_space<vmem>>, vector<1x1x4x4x16xf32>
    %819 = vector.shape_cast %818 : vector<1x1x4x4x16xf32> to vector<4x4x16xf32>
    %c88 = arith.constant 88 : index
    %c0_657 = arith.constant 0 : index
    %820 = vector.load %arg2[%c88, %c0_657] : memref<125x16xf32, #tpu.memory_space<vmem>>, vector<1x16xf32>
    %821 = vector.shape_cast %820 : vector<1x16xf32> to vector<1x1x16xf32>
    %822 = vector.broadcast %821 : vector<1x1x16xf32> to vector<4x4x16xf32>
    %823 = arith.mulf %819, %822 : vector<4x4x16xf32>
    %824 = arith.addf %817, %823 : vector<4x4x16xf32>
    %c0_658 = arith.constant 0 : index
    %c2_659 = arith.constant 2 : index
    %c1_660 = arith.constant 1 : index
    %c0_661 = arith.constant 0 : index
    %c0_662 = arith.constant 0 : index
    %825 = vector.load %arg1[%c0_658, %c2_659, %c1_660, %c0_661, %c0_662] : memref<1x3x6x6x16xf32, #tpu.memory_space<vmem>>, vector<1x1x4x4x16xf32>
    %826 = vector.shape_cast %825 : vector<1x1x4x4x16xf32> to vector<4x4x16xf32>
    %c96 = arith.constant 96 : index
    %c0_663 = arith.constant 0 : index
    %827 = vector.load %arg2[%c96, %c0_663] : memref<125x16xf32, #tpu.memory_space<vmem>>, vector<1x16xf32>
    %828 = vector.shape_cast %827 : vector<1x16xf32> to vector<1x1x16xf32>
    %829 = vector.broadcast %828 : vector<1x1x16xf32> to vector<4x4x16xf32>
    %830 = arith.mulf %826, %829 : vector<4x4x16xf32>
    %831 = arith.addf %824, %830 : vector<4x4x16xf32>
    %c0_664 = arith.constant 0 : index
    %c1_665 = arith.constant 1 : index
    %c1_666 = arith.constant 1 : index
    %c0_667 = arith.constant 0 : index
    %c0_668 = arith.constant 0 : index
    %832 = vector.load %arg1[%c0_664, %c1_665, %c1_666, %c0_667, %c0_668] : memref<1x3x6x6x16xf32, #tpu.memory_space<vmem>>, vector<1x1x4x4x16xf32>
    %833 = vector.shape_cast %832 : vector<1x1x4x4x16xf32> to vector<4x4x16xf32>
    %c98 = arith.constant 98 : index
    %c0_669 = arith.constant 0 : index
    %834 = vector.load %arg2[%c98, %c0_669] : memref<125x16xf32, #tpu.memory_space<vmem>>, vector<1x16xf32>
    %835 = vector.shape_cast %834 : vector<1x16xf32> to vector<1x1x16xf32>
    %836 = vector.broadcast %835 : vector<1x1x16xf32> to vector<4x4x16xf32>
    %837 = arith.mulf %833, %836 : vector<4x4x16xf32>
    %838 = arith.addf %831, %837 : vector<4x4x16xf32>
    %839 = vector.shape_cast %0 : vector<1x16xf32> to vector<1x1x16xf32>
    %840 = vector.broadcast %839 : vector<1x1x16xf32> to vector<4x4x16xf32>
    %841 = arith.addf %838, %840 : vector<4x4x16xf32>
    %842 = tpu.iota {dimensions = array<i32: 0>} : vector<4x4x16xi32>
    %c3_i32_670 = arith.constant 3 : i32
    %843 = vector.broadcast %c3_i32_670 : i32 to vector<4x4x16xi32>
    %844 = arith.cmpi slt, %842, %843 : vector<4x4x16xi32>
    %845 = tpu.iota {dimensions = array<i32: 1>} : vector<4x4x16xi32>
    %c4_i32_671 = arith.constant 4 : i32
    %846 = vector.broadcast %c4_i32_671 : i32 to vector<4x4x16xi32>
    %847 = arith.cmpi slt, %845, %846 : vector<4x4x16xi32>
    %848 = tpu.iota {dimensions = array<i32: 2>} : vector<4x4x16xi32>
    %c12_i32_672 = arith.constant 12 : i32
    %849 = vector.broadcast %c12_i32_672 : i32 to vector<4x4x16xi32>
    %850 = arith.cmpi slt, %848, %849 : vector<4x4x16xi32>
    %851 = arith.andi %844, %847 : vector<4x4x16xi1>
    %852 = arith.andi %851, %850 : vector<4x4x16xi1>
    %cst_673 = arith.constant 0.000000e+00 : f32
    %853 = vector.broadcast %cst_673 : f32 to vector<4x4x16xf32>
    %854 = arith.select %852, %841, %853 : vector<4x4x16xi1>, vector<4x4x16xf32>
    %cst_674 = arith.constant dense<0.000000e+00> : vector<16xf32>
    %855 = vector.multi_reduction <add>, %854, %cst_674 [0, 1] : vector<4x4x16xf32> to vector<16xf32>
    %856 = vector.shape_cast %855 : vector<16xf32> to vector<1x16xf32>
    %857 = arith.addf %750, %856 : vector<1x16xf32>
    %858 = arith.mulf %854, %854 : vector<4x4x16xf32>
    %cst_675 = arith.constant dense<0.000000e+00> : vector<16xf32>
    %859 = vector.multi_reduction <add>, %858, %cst_675 [0, 1] : vector<4x4x16xf32> to vector<16xf32>
    %860 = vector.shape_cast %859 : vector<16xf32> to vector<1x16xf32>
    %861 = arith.addf %754, %860 : vector<1x16xf32>
    %c20_676 = arith.constant 20 : index
    %c0_677 = arith.constant 0 : index
    %c0_678 = arith.constant 0 : index
    %862 = vector.load %arg9[%c20_676, %c0_677, %c0_678] : memref<32x4x16xf32, #tpu.memory_space<vmem>>, vector<4x4x16xf32>
    tpu.vector_store %arg9[%c20_676, %c0_677, %c0_678], %841 {strides = array<i32>} : memref<32x4x16xf32, #tpu.memory_space<vmem>>, vector<4x4x16xf32>,
    %c0_679 = arith.constant 0 : index
    %c2_680 = arith.constant 2 : index
    %c2_681 = arith.constant 2 : index
    %c2_682 = arith.constant 2 : index
    %c0_683 = arith.constant 0 : index
    %863 = vector.load %arg1[%c0_679, %c2_680, %c2_681, %c2_682, %c0_683] : memref<1x3x6x6x16xf32, #tpu.memory_space<vmem>>, vector<1x1x4x4x16xf32>
    %864 = vector.shape_cast %863 : vector<1x1x4x4x16xf32> to vector<4x4x16xf32>
    %c30 = arith.constant 30 : index
    %c0_684 = arith.constant 0 : index
    %865 = vector.load %arg2[%c30, %c0_684] : memref<125x16xf32, #tpu.memory_space<vmem>>, vector<1x16xf32>
    %866 = vector.shape_cast %865 : vector<1x16xf32> to vector<1x1x16xf32>
    %867 = vector.broadcast %866 : vector<1x1x16xf32> to vector<4x4x16xf32>
    %868 = arith.mulf %864, %867 : vector<4x4x16xf32>
    %c0_685 = arith.constant 0 : index
    %c1_686 = arith.constant 1 : index
    %c2_687 = arith.constant 2 : index
    %c2_688 = arith.constant 2 : index
    %c0_689 = arith.constant 0 : index
    %869 = vector.load %arg1[%c0_685, %c1_686, %c2_687, %c2_688, %c0_689] : memref<1x3x6x6x16xf32, #tpu.memory_space<vmem>>, vector<1x1x4x4x16xf32>
    %870 = vector.shape_cast %869 : vector<1x1x4x4x16xf32> to vector<4x4x16xf32>
    %c32 = arith.constant 32 : index
    %c0_690 = arith.constant 0 : index
    %871 = vector.load %arg2[%c32, %c0_690] : memref<125x16xf32, #tpu.memory_space<vmem>>, vector<1x16xf32>
    %872 = vector.shape_cast %871 : vector<1x16xf32> to vector<1x1x16xf32>
    %873 = vector.broadcast %872 : vector<1x1x16xf32> to vector<4x4x16xf32>
    %874 = arith.mulf %870, %873 : vector<4x4x16xf32>
    %875 = arith.addf %868, %874 : vector<4x4x16xf32>
    %c0_691 = arith.constant 0 : index
    %c0_692 = arith.constant 0 : index
    %c2_693 = arith.constant 2 : index
    %c2_694 = arith.constant 2 : index
    %c0_695 = arith.constant 0 : index
    %876 = vector.load %arg1[%c0_691, %c0_692, %c2_693, %c2_694, %c0_695] : memref<1x3x6x6x16xf32, #tpu.memory_space<vmem>>, vector<1x1x4x4x16xf32>
    %877 = vector.shape_cast %876 : vector<1x1x4x4x16xf32> to vector<4x4x16xf32>
    %c34 = arith.constant 34 : index
    %c0_696 = arith.constant 0 : index
    %878 = vector.load %arg2[%c34, %c0_696] : memref<125x16xf32, #tpu.memory_space<vmem>>, vector<1x16xf32>
    %879 = vector.shape_cast %878 : vector<1x16xf32> to vector<1x1x16xf32>
    %880 = vector.broadcast %879 : vector<1x1x16xf32> to vector<4x4x16xf32>
    %881 = arith.mulf %877, %880 : vector<4x4x16xf32>
    %882 = arith.addf %875, %881 : vector<4x4x16xf32>
    %c0_697 = arith.constant 0 : index
    %c2_698 = arith.constant 2 : index
    %c2_699 = arith.constant 2 : index
    %c1_700 = arith.constant 1 : index
    %c0_701 = arith.constant 0 : index
    %883 = vector.load %arg1[%c0_697, %c2_698, %c2_699, %c1_700, %c0_701] : memref<1x3x6x6x16xf32, #tpu.memory_space<vmem>>, vector<1x1x4x4x16xf32>
    %884 = vector.shape_cast %883 : vector<1x1x4x4x16xf32> to vector<4x4x16xf32>
    %c40 = arith.constant 40 : index
    %c0_702 = arith.constant 0 : index
    %885 = vector.load %arg2[%c40, %c0_702] : memref<125x16xf32, #tpu.memory_space<vmem>>, vector<1x16xf32>
    %886 = vector.shape_cast %885 : vector<1x16xf32> to vector<1x1x16xf32>
    %887 = vector.broadcast %886 : vector<1x1x16xf32> to vector<4x4x16xf32>
    %888 = arith.mulf %884, %887 : vector<4x4x16xf32>
    %889 = arith.addf %882, %888 : vector<4x4x16xf32>
    %c0_703 = arith.constant 0 : index
    %c1_704 = arith.constant 1 : index
    %c2_705 = arith.constant 2 : index
    %c1_706 = arith.constant 1 : index
    %c0_707 = arith.constant 0 : index
    %890 = vector.load %arg1[%c0_703, %c1_704, %c2_705, %c1_706, %c0_707] : memref<1x3x6x6x16xf32, #tpu.memory_space<vmem>>, vector<1x1x4x4x16xf32>
    %891 = vector.shape_cast %890 : vector<1x1x4x4x16xf32> to vector<4x4x16xf32>
    %c42 = arith.constant 42 : index
    %c0_708 = arith.constant 0 : index
    %892 = vector.load %arg2[%c42, %c0_708] : memref<125x16xf32, #tpu.memory_space<vmem>>, vector<1x16xf32>
    %893 = vector.shape_cast %892 : vector<1x16xf32> to vector<1x1x16xf32>
    %894 = vector.broadcast %893 : vector<1x1x16xf32> to vector<4x4x16xf32>
    %895 = arith.mulf %891, %894 : vector<4x4x16xf32>
    %896 = arith.addf %889, %895 : vector<4x4x16xf32>
    %c0_709 = arith.constant 0 : index
    %c0_710 = arith.constant 0 : index
    %c2_711 = arith.constant 2 : index
    %c1_712 = arith.constant 1 : index
    %c0_713 = arith.constant 0 : index
    %897 = vector.load %arg1[%c0_709, %c0_710, %c2_711, %c1_712, %c0_713] : memref<1x3x6x6x16xf32, #tpu.memory_space<vmem>>, vector<1x1x4x4x16xf32>
    %898 = vector.shape_cast %897 : vector<1x1x4x4x16xf32> to vector<4x4x16xf32>
    %c44 = arith.constant 44 : index
    %c0_714 = arith.constant 0 : index
    %899 = vector.load %arg2[%c44, %c0_714] : memref<125x16xf32, #tpu.memory_space<vmem>>, vector<1x16xf32>
    %900 = vector.shape_cast %899 : vector<1x16xf32> to vector<1x1x16xf32>
    %901 = vector.broadcast %900 : vector<1x1x16xf32> to vector<4x4x16xf32>
    %902 = arith.mulf %898, %901 : vector<4x4x16xf32>
    %903 = arith.addf %896, %902 : vector<4x4x16xf32>
    %c0_715 = arith.constant 0 : index
    %c2_716 = arith.constant 2 : index
    %c1_717 = arith.constant 1 : index
    %c2_718 = arith.constant 2 : index
    %c0_719 = arith.constant 0 : index
    %904 = vector.load %arg1[%c0_715, %c2_716, %c1_717, %c2_718, %c0_719] : memref<1x3x6x6x16xf32, #tpu.memory_space<vmem>>, vector<1x1x4x4x16xf32>
    %905 = vector.shape_cast %904 : vector<1x1x4x4x16xf32> to vector<4x4x16xf32>
    %c80 = arith.constant 80 : index
    %c0_720 = arith.constant 0 : index
    %906 = vector.load %arg2[%c80, %c0_720] : memref<125x16xf32, #tpu.memory_space<vmem>>, vector<1x16xf32>
    %907 = vector.shape_cast %906 : vector<1x16xf32> to vector<1x1x16xf32>
    %908 = vector.broadcast %907 : vector<1x1x16xf32> to vector<4x4x16xf32>
    %909 = arith.mulf %905, %908 : vector<4x4x16xf32>
    %910 = arith.addf %903, %909 : vector<4x4x16xf32>
    %c0_721 = arith.constant 0 : index
    %c1_722 = arith.constant 1 : index
    %c1_723 = arith.constant 1 : index
    %c2_724 = arith.constant 2 : index
    %c0_725 = arith.constant 0 : index
    %911 = vector.load %arg1[%c0_721, %c1_722, %c1_723, %c2_724, %c0_725] : memref<1x3x6x6x16xf32, #tpu.memory_space<vmem>>, vector<1x1x4x4x16xf32>
    %912 = vector.shape_cast %911 : vector<1x1x4x4x16xf32> to vector<4x4x16xf32>
    %c82 = arith.constant 82 : index
    %c0_726 = arith.constant 0 : index
    %913 = vector.load %arg2[%c82, %c0_726] : memref<125x16xf32, #tpu.memory_space<vmem>>, vector<1x16xf32>
    %914 = vector.shape_cast %913 : vector<1x16xf32> to vector<1x1x16xf32>
    %915 = vector.broadcast %914 : vector<1x1x16xf32> to vector<4x4x16xf32>
    %916 = arith.mulf %912, %915 : vector<4x4x16xf32>
    %917 = arith.addf %910, %916 : vector<4x4x16xf32>
    %c0_727 = arith.constant 0 : index
    %c0_728 = arith.constant 0 : index
    %c1_729 = arith.constant 1 : index
    %c2_730 = arith.constant 2 : index
    %c0_731 = arith.constant 0 : index
    %918 = vector.load %arg1[%c0_727, %c0_728, %c1_729, %c2_730, %c0_731] : memref<1x3x6x6x16xf32, #tpu.memory_space<vmem>>, vector<1x1x4x4x16xf32>
    %919 = vector.shape_cast %918 : vector<1x1x4x4x16xf32> to vector<4x4x16xf32>
    %c84 = arith.constant 84 : index
    %c0_732 = arith.constant 0 : index
    %920 = vector.load %arg2[%c84, %c0_732] : memref<125x16xf32, #tpu.memory_space<vmem>>, vector<1x16xf32>
    %921 = vector.shape_cast %920 : vector<1x16xf32> to vector<1x1x16xf32>
    %922 = vector.broadcast %921 : vector<1x1x16xf32> to vector<4x4x16xf32>
    %923 = arith.mulf %919, %922 : vector<4x4x16xf32>
    %924 = arith.addf %917, %923 : vector<4x4x16xf32>
    %c0_733 = arith.constant 0 : index
    %c2_734 = arith.constant 2 : index
    %c1_735 = arith.constant 1 : index
    %c1_736 = arith.constant 1 : index
    %c0_737 = arith.constant 0 : index
    %925 = vector.load %arg1[%c0_733, %c2_734, %c1_735, %c1_736, %c0_737] : memref<1x3x6x6x16xf32, #tpu.memory_space<vmem>>, vector<1x1x4x4x16xf32>
    %926 = vector.shape_cast %925 : vector<1x1x4x4x16xf32> to vector<4x4x16xf32>
    %c90 = arith.constant 90 : index
    %c0_738 = arith.constant 0 : index
    %927 = vector.load %arg2[%c90, %c0_738] : memref<125x16xf32, #tpu.memory_space<vmem>>, vector<1x16xf32>
    %928 = vector.shape_cast %927 : vector<1x16xf32> to vector<1x1x16xf32>
    %929 = vector.broadcast %928 : vector<1x1x16xf32> to vector<4x4x16xf32>
    %930 = arith.mulf %926, %929 : vector<4x4x16xf32>
    %931 = arith.addf %924, %930 : vector<4x4x16xf32>
    %c0_739 = arith.constant 0 : index
    %c1_740 = arith.constant 1 : index
    %c1_741 = arith.constant 1 : index
    %c1_742 = arith.constant 1 : index
    %c0_743 = arith.constant 0 : index
    %932 = vector.load %arg1[%c0_739, %c1_740, %c1_741, %c1_742, %c0_743] : memref<1x3x6x6x16xf32, #tpu.memory_space<vmem>>, vector<1x1x4x4x16xf32>
    %933 = vector.shape_cast %932 : vector<1x1x4x4x16xf32> to vector<4x4x16xf32>
    %c92 = arith.constant 92 : index
    %c0_744 = arith.constant 0 : index
    %934 = vector.load %arg2[%c92, %c0_744] : memref<125x16xf32, #tpu.memory_space<vmem>>, vector<1x16xf32>
    %935 = vector.shape_cast %934 : vector<1x16xf32> to vector<1x1x16xf32>
    %936 = vector.broadcast %935 : vector<1x1x16xf32> to vector<4x4x16xf32>
    %937 = arith.mulf %933, %936 : vector<4x4x16xf32>
    %938 = arith.addf %931, %937 : vector<4x4x16xf32>
    %c0_745 = arith.constant 0 : index
    %c0_746 = arith.constant 0 : index
    %c1_747 = arith.constant 1 : index
    %c1_748 = arith.constant 1 : index
    %c0_749 = arith.constant 0 : index
    %939 = vector.load %arg1[%c0_745, %c0_746, %c1_747, %c1_748, %c0_749] : memref<1x3x6x6x16xf32, #tpu.memory_space<vmem>>, vector<1x1x4x4x16xf32>
    %940 = vector.shape_cast %939 : vector<1x1x4x4x16xf32> to vector<4x4x16xf32>
    %c94 = arith.constant 94 : index
    %c0_750 = arith.constant 0 : index
    %941 = vector.load %arg2[%c94, %c0_750] : memref<125x16xf32, #tpu.memory_space<vmem>>, vector<1x16xf32>
    %942 = vector.shape_cast %941 : vector<1x16xf32> to vector<1x1x16xf32>
    %943 = vector.broadcast %942 : vector<1x1x16xf32> to vector<4x4x16xf32>
    %944 = arith.mulf %940, %943 : vector<4x4x16xf32>
    %945 = arith.addf %938, %944 : vector<4x4x16xf32>
    %946 = vector.shape_cast %0 : vector<1x16xf32> to vector<1x1x16xf32>
    %947 = vector.broadcast %946 : vector<1x1x16xf32> to vector<4x4x16xf32>
    %948 = arith.addf %945, %947 : vector<4x4x16xf32>
    %949 = tpu.iota {dimensions = array<i32: 0>} : vector<4x4x16xi32>
    %c3_i32_751 = arith.constant 3 : i32
    %950 = vector.broadcast %c3_i32_751 : i32 to vector<4x4x16xi32>
    %951 = arith.cmpi slt, %949, %950 : vector<4x4x16xi32>
    %952 = tpu.iota {dimensions = array<i32: 1>} : vector<4x4x16xi32>
    %c3_i32_752 = arith.constant 3 : i32
    %953 = vector.broadcast %c3_i32_752 : i32 to vector<4x4x16xi32>
    %954 = arith.cmpi slt, %952, %953 : vector<4x4x16xi32>
    %955 = tpu.iota {dimensions = array<i32: 2>} : vector<4x4x16xi32>
    %c16_i32_753 = arith.constant 16 : i32
    %956 = vector.broadcast %c16_i32_753 : i32 to vector<4x4x16xi32>
    %957 = arith.cmpi slt, %955, %956 : vector<4x4x16xi32>
    %958 = arith.andi %951, %954 : vector<4x4x16xi1>
    %959 = arith.andi %958, %957 : vector<4x4x16xi1>
    %cst_754 = arith.constant 0.000000e+00 : f32
    %960 = vector.broadcast %cst_754 : f32 to vector<4x4x16xf32>
    %961 = arith.select %959, %948, %960 : vector<4x4x16xi1>, vector<4x4x16xf32>
    %cst_755 = arith.constant dense<0.000000e+00> : vector<16xf32>
    %962 = vector.multi_reduction <add>, %961, %cst_755 [0, 1] : vector<4x4x16xf32> to vector<16xf32>
    %963 = vector.shape_cast %962 : vector<16xf32> to vector<1x16xf32>
    %964 = arith.addf %857, %963 : vector<1x16xf32>
    %965 = arith.mulf %961, %961 : vector<4x4x16xf32>
    %cst_756 = arith.constant dense<0.000000e+00> : vector<16xf32>
    %966 = vector.multi_reduction <add>, %965, %cst_756 [0, 1] : vector<4x4x16xf32> to vector<16xf32>
    %967 = vector.shape_cast %966 : vector<16xf32> to vector<1x16xf32>
    %968 = arith.addf %861, %967 : vector<1x16xf32>
    %c24_757 = arith.constant 24 : index
    %c0_758 = arith.constant 0 : index
    %c0_759 = arith.constant 0 : index
    %969 = vector.load %arg9[%c24_757, %c0_758, %c0_759] : memref<32x4x16xf32, #tpu.memory_space<vmem>>, vector<4x4x16xf32>
    tpu.vector_store %arg9[%c24_757, %c0_758, %c0_759], %948 {strides = array<i32>} : memref<32x4x16xf32, #tpu.memory_space<vmem>>, vector<4x4x16xf32>,
    %c0_760 = arith.constant 0 : index
    %c2_761 = arith.constant 2 : index
    %c2_762 = arith.constant 2 : index
    %c2_763 = arith.constant 2 : index
    %c0_764 = arith.constant 0 : index
    %970 = vector.load %arg1[%c0_760, %c2_761, %c2_762, %c2_763, %c0_764] : memref<1x3x6x6x16xf32, #tpu.memory_space<vmem>>, vector<1x1x4x4x16xf32>
    %971 = vector.shape_cast %970 : vector<1x1x4x4x16xf32> to vector<4x4x16xf32>
    %c31 = arith.constant 31 : index
    %c0_765 = arith.constant 0 : index
    %972 = vector.load %arg2[%c31, %c0_765] : memref<125x16xf32, #tpu.memory_space<vmem>>, vector<1x16xf32>
    %973 = vector.shape_cast %972 : vector<1x16xf32> to vector<1x1x16xf32>
    %974 = vector.broadcast %973 : vector<1x1x16xf32> to vector<4x4x16xf32>
    %975 = arith.mulf %971, %974 : vector<4x4x16xf32>
    %c0_766 = arith.constant 0 : index
    %c1_767 = arith.constant 1 : index
    %c2_768 = arith.constant 2 : index
    %c2_769 = arith.constant 2 : index
    %c0_770 = arith.constant 0 : index
    %976 = vector.load %arg1[%c0_766, %c1_767, %c2_768, %c2_769, %c0_770] : memref<1x3x6x6x16xf32, #tpu.memory_space<vmem>>, vector<1x1x4x4x16xf32>
    %977 = vector.shape_cast %976 : vector<1x1x4x4x16xf32> to vector<4x4x16xf32>
    %c33 = arith.constant 33 : index
    %c0_771 = arith.constant 0 : index
    %978 = vector.load %arg2[%c33, %c0_771] : memref<125x16xf32, #tpu.memory_space<vmem>>, vector<1x16xf32>
    %979 = vector.shape_cast %978 : vector<1x16xf32> to vector<1x1x16xf32>
    %980 = vector.broadcast %979 : vector<1x1x16xf32> to vector<4x4x16xf32>
    %981 = arith.mulf %977, %980 : vector<4x4x16xf32>
    %982 = arith.addf %975, %981 : vector<4x4x16xf32>
    %c0_772 = arith.constant 0 : index
    %c2_773 = arith.constant 2 : index
    %c2_774 = arith.constant 2 : index
    %c1_775 = arith.constant 1 : index
    %c0_776 = arith.constant 0 : index
    %983 = vector.load %arg1[%c0_772, %c2_773, %c2_774, %c1_775, %c0_776] : memref<1x3x6x6x16xf32, #tpu.memory_space<vmem>>, vector<1x1x4x4x16xf32>
    %984 = vector.shape_cast %983 : vector<1x1x4x4x16xf32> to vector<4x4x16xf32>
    %c41 = arith.constant 41 : index
    %c0_777 = arith.constant 0 : index
    %985 = vector.load %arg2[%c41, %c0_777] : memref<125x16xf32, #tpu.memory_space<vmem>>, vector<1x16xf32>
    %986 = vector.shape_cast %985 : vector<1x16xf32> to vector<1x1x16xf32>
    %987 = vector.broadcast %986 : vector<1x1x16xf32> to vector<4x4x16xf32>
    %988 = arith.mulf %984, %987 : vector<4x4x16xf32>
    %989 = arith.addf %982, %988 : vector<4x4x16xf32>
    %c0_778 = arith.constant 0 : index
    %c1_779 = arith.constant 1 : index
    %c2_780 = arith.constant 2 : index
    %c1_781 = arith.constant 1 : index
    %c0_782 = arith.constant 0 : index
    %990 = vector.load %arg1[%c0_778, %c1_779, %c2_780, %c1_781, %c0_782] : memref<1x3x6x6x16xf32, #tpu.memory_space<vmem>>, vector<1x1x4x4x16xf32>
    %991 = vector.shape_cast %990 : vector<1x1x4x4x16xf32> to vector<4x4x16xf32>
    %c43 = arith.constant 43 : index
    %c0_783 = arith.constant 0 : index
    %992 = vector.load %arg2[%c43, %c0_783] : memref<125x16xf32, #tpu.memory_space<vmem>>, vector<1x16xf32>
    %993 = vector.shape_cast %992 : vector<1x16xf32> to vector<1x1x16xf32>
    %994 = vector.broadcast %993 : vector<1x1x16xf32> to vector<4x4x16xf32>
    %995 = arith.mulf %991, %994 : vector<4x4x16xf32>
    %996 = arith.addf %989, %995 : vector<4x4x16xf32>
    %c0_784 = arith.constant 0 : index
    %c2_785 = arith.constant 2 : index
    %c1_786 = arith.constant 1 : index
    %c2_787 = arith.constant 2 : index
    %c0_788 = arith.constant 0 : index
    %997 = vector.load %arg1[%c0_784, %c2_785, %c1_786, %c2_787, %c0_788] : memref<1x3x6x6x16xf32, #tpu.memory_space<vmem>>, vector<1x1x4x4x16xf32>
    %998 = vector.shape_cast %997 : vector<1x1x4x4x16xf32> to vector<4x4x16xf32>
    %c81 = arith.constant 81 : index
    %c0_789 = arith.constant 0 : index
    %999 = vector.load %arg2[%c81, %c0_789] : memref<125x16xf32, #tpu.memory_space<vmem>>, vector<1x16xf32>
    %1000 = vector.shape_cast %999 : vector<1x16xf32> to vector<1x1x16xf32>
    %1001 = vector.broadcast %1000 : vector<1x1x16xf32> to vector<4x4x16xf32>
    %1002 = arith.mulf %998, %1001 : vector<4x4x16xf32>
    %1003 = arith.addf %996, %1002 : vector<4x4x16xf32>
    %c0_790 = arith.constant 0 : index
    %c1_791 = arith.constant 1 : index
    %c1_792 = arith.constant 1 : index
    %c2_793 = arith.constant 2 : index
    %c0_794 = arith.constant 0 : index
    %1004 = vector.load %arg1[%c0_790, %c1_791, %c1_792, %c2_793, %c0_794] : memref<1x3x6x6x16xf32, #tpu.memory_space<vmem>>, vector<1x1x4x4x16xf32>
    %1005 = vector.shape_cast %1004 : vector<1x1x4x4x16xf32> to vector<4x4x16xf32>
    %c83 = arith.constant 83 : index
    %c0_795 = arith.constant 0 : index
    %1006 = vector.load %arg2[%c83, %c0_795] : memref<125x16xf32, #tpu.memory_space<vmem>>, vector<1x16xf32>
    %1007 = vector.shape_cast %1006 : vector<1x16xf32> to vector<1x1x16xf32>
    %1008 = vector.broadcast %1007 : vector<1x1x16xf32> to vector<4x4x16xf32>
    %1009 = arith.mulf %1005, %1008 : vector<4x4x16xf32>
    %1010 = arith.addf %1003, %1009 : vector<4x4x16xf32>
    %c0_796 = arith.constant 0 : index
    %c2_797 = arith.constant 2 : index
    %c1_798 = arith.constant 1 : index
    %c1_799 = arith.constant 1 : index
    %c0_800 = arith.constant 0 : index
    %1011 = vector.load %arg1[%c0_796, %c2_797, %c1_798, %c1_799, %c0_800] : memref<1x3x6x6x16xf32, #tpu.memory_space<vmem>>, vector<1x1x4x4x16xf32>
    %1012 = vector.shape_cast %1011 : vector<1x1x4x4x16xf32> to vector<4x4x16xf32>
    %c91 = arith.constant 91 : index
    %c0_801 = arith.constant 0 : index
    %1013 = vector.load %arg2[%c91, %c0_801] : memref<125x16xf32, #tpu.memory_space<vmem>>, vector<1x16xf32>
    %1014 = vector.shape_cast %1013 : vector<1x16xf32> to vector<1x1x16xf32>
    %1015 = vector.broadcast %1014 : vector<1x1x16xf32> to vector<4x4x16xf32>
    %1016 = arith.mulf %1012, %1015 : vector<4x4x16xf32>
    %1017 = arith.addf %1010, %1016 : vector<4x4x16xf32>
    %c0_802 = arith.constant 0 : index
    %c1_803 = arith.constant 1 : index
    %c1_804 = arith.constant 1 : index
    %c1_805 = arith.constant 1 : index
    %c0_806 = arith.constant 0 : index
    %1018 = vector.load %arg1[%c0_802, %c1_803, %c1_804, %c1_805, %c0_806] : memref<1x3x6x6x16xf32, #tpu.memory_space<vmem>>, vector<1x1x4x4x16xf32>
    %1019 = vector.shape_cast %1018 : vector<1x1x4x4x16xf32> to vector<4x4x16xf32>
    %c93 = arith.constant 93 : index
    %c0_807 = arith.constant 0 : index
    %1020 = vector.load %arg2[%c93, %c0_807] : memref<125x16xf32, #tpu.memory_space<vmem>>, vector<1x16xf32>
    %1021 = vector.shape_cast %1020 : vector<1x16xf32> to vector<1x1x16xf32>
    %1022 = vector.broadcast %1021 : vector<1x1x16xf32> to vector<4x4x16xf32>
    %1023 = arith.mulf %1019, %1022 : vector<4x4x16xf32>
    %1024 = arith.addf %1017, %1023 : vector<4x4x16xf32>
    %1025 = vector.shape_cast %0 : vector<1x16xf32> to vector<1x1x16xf32>
    %1026 = vector.broadcast %1025 : vector<1x1x16xf32> to vector<4x4x16xf32>
    %1027 = arith.addf %1024, %1026 : vector<4x4x16xf32>
    %1028 = tpu.iota {dimensions = array<i32: 0>} : vector<4x4x16xi32>
    %c3_i32_808 = arith.constant 3 : i32
    %1029 = vector.broadcast %c3_i32_808 : i32 to vector<4x4x16xi32>
    %1030 = arith.cmpi slt, %1028, %1029 : vector<4x4x16xi32>
    %1031 = tpu.iota {dimensions = array<i32: 1>} : vector<4x4x16xi32>
    %c3_i32_809 = arith.constant 3 : i32
    %1032 = vector.broadcast %c3_i32_809 : i32 to vector<4x4x16xi32>
    %1033 = arith.cmpi slt, %1031, %1032 : vector<4x4x16xi32>
    %1034 = tpu.iota {dimensions = array<i32: 2>} : vector<4x4x16xi32>
    %c12_i32_810 = arith.constant 12 : i32
    %1035 = vector.broadcast %c12_i32_810 : i32 to vector<4x4x16xi32>
    %1036 = arith.cmpi slt, %1034, %1035 : vector<4x4x16xi32>
    %1037 = arith.andi %1030, %1033 : vector<4x4x16xi1>
    %1038 = arith.andi %1037, %1036 : vector<4x4x16xi1>
    %cst_811 = arith.constant 0.000000e+00 : f32
    %1039 = vector.broadcast %cst_811 : f32 to vector<4x4x16xf32>
    %1040 = arith.select %1038, %1027, %1039 : vector<4x4x16xi1>, vector<4x4x16xf32>
    %cst_812 = arith.constant dense<0.000000e+00> : vector<16xf32>
    %1041 = vector.multi_reduction <add>, %1040, %cst_812 [0, 1] : vector<4x4x16xf32> to vector<16xf32>
    %1042 = vector.shape_cast %1041 : vector<16xf32> to vector<1x16xf32>
    %1043 = arith.addf %964, %1042 : vector<1x16xf32>
    %1044 = arith.mulf %1040, %1040 : vector<4x4x16xf32>
    %cst_813 = arith.constant dense<0.000000e+00> : vector<16xf32>
    %1045 = vector.multi_reduction <add>, %1044, %cst_813 [0, 1] : vector<4x4x16xf32> to vector<16xf32>
    %1046 = vector.shape_cast %1045 : vector<16xf32> to vector<1x16xf32>
    %1047 = arith.addf %968, %1046 : vector<1x16xf32>
    %c28_814 = arith.constant 28 : index
    %c0_815 = arith.constant 0 : index
    %c0_816 = arith.constant 0 : index
    %1048 = vector.load %arg9[%c28_814, %c0_815, %c0_816] : memref<32x4x16xf32, #tpu.memory_space<vmem>>, vector<4x4x16xf32>
    tpu.vector_store %arg9[%c28_814, %c0_815, %c0_816], %1027 {strides = array<i32>} : memref<32x4x16xf32, #tpu.memory_space<vmem>>, vector<4x4x16xf32>,
    %c0_817 = arith.constant 0 : index
    %c0_818 = arith.constant 0 : index
    %1049 = vector.load %arg6[%c0_817, %c0_818] : memref<16x4xf32, #tpu.memory_space<vmem>>, vector<16x4xf32>
    %cst_819 = arith.constant dense<0.000000e+00> : vector<1x4xf32>
    %1050 = tpu.matmul %1043, %1049, %cst_819 {dimension_numbers = #tpu.dot_dimension_numbers<[1], [0], [0], [1], [0, 0, 1, 1], [], []>} : vector<1x16xf32>, vector<16x4xf32>, vector<1x4xf32> -> vector<1x4xf32>
    %cst_820 = arith.constant 0.002915452 : f32
    %1051 = vector.broadcast %cst_820 : f32 to vector<1x4xf32>
    %1052 = arith.mulf %1050, %1051 : vector<1x4xf32>
    %c0_821 = arith.constant 0 : index
    %c0_822 = arith.constant 0 : index
    %1053 = vector.load %arg6[%c0_821, %c0_822] : memref<16x4xf32, #tpu.memory_space<vmem>>, vector<16x4xf32>
    %cst_823 = arith.constant dense<0.000000e+00> : vector<1x4xf32>
    %1054 = tpu.matmul %1047, %1053, %cst_823 {dimension_numbers = #tpu.dot_dimension_numbers<[1], [0], [0], [1], [0, 0, 1, 1], [], []>} : vector<1x16xf32>, vector<16x4xf32>, vector<1x4xf32> -> vector<1x4xf32>
    %cst_824 = arith.constant 0.002915452 : f32
    %1055 = vector.broadcast %cst_824 : f32 to vector<1x4xf32>
    %1056 = arith.mulf %1054, %1055 : vector<1x4xf32>
    %1057 = arith.mulf %1052, %1052 : vector<1x4xf32>
    %1058 = arith.subf %1056, %1057 : vector<1x4xf32>
    %cst_825 = arith.constant 0.000000e+00 : f32
    %1059 = vector.broadcast %cst_825 : f32 to vector<1x4xf32>
    %1060 = arith.maximumf %1058, %1059 : vector<1x4xf32>
    %cst_826 = arith.constant 9.99999974E-6 : f32
    %1061 = vector.broadcast %cst_826 : f32 to vector<1x4xf32>
    %1062 = arith.addf %1060, %1061 : vector<1x4xf32>
    %1063 = math.rsqrt %1062 : vector<1x4xf32>
    %c0_827 = arith.constant 0 : index
    %c0_828 = arith.constant 0 : index
    %1064 = vector.load %arg4[%c0_827, %c0_828] : memref<1x4xf32, #tpu.memory_space<vmem>>, vector<1x4xf32>
    %1065 = arith.mulf %1064, %1063 : vector<1x4xf32>
    %c0_829 = arith.constant 0 : index
    %c0_830 = arith.constant 0 : index
    %1066 = vector.load %arg5[%c0_829, %c0_830] : memref<1x4xf32, #tpu.memory_space<vmem>>, vector<1x4xf32>
    %1067 = arith.mulf %1052, %1065 : vector<1x4xf32>
    %1068 = arith.subf %1066, %1067 : vector<1x4xf32>
    %c0_831 = arith.constant 0 : index
    %c0_832 = arith.constant 0 : index
    %1069 = vector.load %arg7[%c0_831, %c0_832] : memref<4x16xf32, #tpu.memory_space<vmem>>, vector<4x16xf32>
    %cst_833 = arith.constant dense<0.000000e+00> : vector<1x16xf32>
    %1070 = tpu.matmul %1065, %1069, %cst_833 {dimension_numbers = #tpu.dot_dimension_numbers<[1], [0], [0], [1], [0, 0, 1, 1], [], []>} : vector<1x4xf32>, vector<4x16xf32>, vector<1x16xf32> -> vector<1x16xf32>
    %c0_834 = arith.constant 0 : index
    %c0_835 = arith.constant 0 : index
    %1071 = vector.load %arg7[%c0_834, %c0_835] : memref<4x16xf32, #tpu.memory_space<vmem>>, vector<4x16xf32>
    %cst_836 = arith.constant dense<0.000000e+00> : vector<1x16xf32>
    %1072 = tpu.matmul %1068, %1071, %cst_836 {dimension_numbers = #tpu.dot_dimension_numbers<[1], [0], [0], [1], [0, 0, 1, 1], [], []>} : vector<1x4xf32>, vector<4x16xf32>, vector<1x16xf32> -> vector<1x16xf32>
    %c0_837 = arith.constant 0 : index
    %c0_838 = arith.constant 0 : index
    %c0_839 = arith.constant 0 : index
    %1073 = vector.load %arg9[%c0_837, %c0_838, %c0_839] : memref<32x4x16xf32, #tpu.memory_space<vmem>>, vector<4x4x16xf32>
    %1074 = vector.shape_cast %1070 : vector<1x16xf32> to vector<1x1x16xf32>
    %1075 = vector.broadcast %1074 : vector<1x1x16xf32> to vector<4x4x16xf32>
    %1076 = arith.mulf %1073, %1075 : vector<4x4x16xf32>
    %1077 = vector.shape_cast %1072 : vector<1x16xf32> to vector<1x1x16xf32>
    %1078 = vector.broadcast %1077 : vector<1x1x16xf32> to vector<4x4x16xf32>
    %1079 = arith.addf %1076, %1078 : vector<4x4x16xf32>
    %c0_840 = arith.constant 0 : index
    %c0_841 = arith.constant 0 : index
    %c0_842 = arith.constant 0 : index
    %c0_843 = arith.constant 0 : index
    %1080 = vector.load %arg8[%c0_840, %c0_841, %c0_842, %c0_843] : memref<1x32x4x16xf32, #tpu.memory_space<vmem>>, vector<1x4x4x16xf32>
    %1081 = vector.shape_cast %1080 : vector<1x4x4x16xf32> to vector<4x4x16xf32>
    %1082 = vector.shape_cast %1079 : vector<4x4x16xf32> to vector<1x4x4x16xf32>
    tpu.vector_store %arg8[%c0_840, %c0_841, %c0_842, %c0_843], %1082 {strides = array<i32>} : memref<1x32x4x16xf32, #tpu.memory_space<vmem>>, vector<1x4x4x16xf32>,
    %c4_844 = arith.constant 4 : index
    %c0_845 = arith.constant 0 : index
    %c0_846 = arith.constant 0 : index
    %1083 = vector.load %arg9[%c4_844, %c0_845, %c0_846] : memref<32x4x16xf32, #tpu.memory_space<vmem>>, vector<4x4x16xf32>
    %1084 = vector.shape_cast %1070 : vector<1x16xf32> to vector<1x1x16xf32>
    %1085 = vector.broadcast %1084 : vector<1x1x16xf32> to vector<4x4x16xf32>
    %1086 = arith.mulf %1083, %1085 : vector<4x4x16xf32>
    %1087 = vector.shape_cast %1072 : vector<1x16xf32> to vector<1x1x16xf32>
    %1088 = vector.broadcast %1087 : vector<1x1x16xf32> to vector<4x4x16xf32>
    %1089 = arith.addf %1086, %1088 : vector<4x4x16xf32>
    %c0_847 = arith.constant 0 : index
    %c4_848 = arith.constant 4 : index
    %c0_849 = arith.constant 0 : index
    %c0_850 = arith.constant 0 : index
    %1090 = vector.load %arg8[%c0_847, %c4_848, %c0_849, %c0_850] : memref<1x32x4x16xf32, #tpu.memory_space<vmem>>, vector<1x4x4x16xf32>
    %1091 = vector.shape_cast %1090 : vector<1x4x4x16xf32> to vector<4x4x16xf32>
    %1092 = vector.shape_cast %1089 : vector<4x4x16xf32> to vector<1x4x4x16xf32>
    tpu.vector_store %arg8[%c0_847, %c4_848, %c0_849, %c0_850], %1092 {strides = array<i32>} : memref<1x32x4x16xf32, #tpu.memory_space<vmem>>, vector<1x4x4x16xf32>,
    %c8_851 = arith.constant 8 : index
    %c0_852 = arith.constant 0 : index
    %c0_853 = arith.constant 0 : index
    %1093 = vector.load %arg9[%c8_851, %c0_852, %c0_853] : memref<32x4x16xf32, #tpu.memory_space<vmem>>, vector<4x4x16xf32>
    %1094 = vector.shape_cast %1070 : vector<1x16xf32> to vector<1x1x16xf32>
    %1095 = vector.broadcast %1094 : vector<1x1x16xf32> to vector<4x4x16xf32>
    %1096 = arith.mulf %1093, %1095 : vector<4x4x16xf32>
    %1097 = vector.shape_cast %1072 : vector<1x16xf32> to vector<1x1x16xf32>
    %1098 = vector.broadcast %1097 : vector<1x1x16xf32> to vector<4x4x16xf32>
    %1099 = arith.addf %1096, %1098 : vector<4x4x16xf32>
    %c0_854 = arith.constant 0 : index
    %c8_855 = arith.constant 8 : index
    %c0_856 = arith.constant 0 : index
    %c0_857 = arith.constant 0 : index
    %1100 = vector.load %arg8[%c0_854, %c8_855, %c0_856, %c0_857] : memref<1x32x4x16xf32, #tpu.memory_space<vmem>>, vector<1x4x4x16xf32>
    %1101 = vector.shape_cast %1100 : vector<1x4x4x16xf32> to vector<4x4x16xf32>
    %1102 = vector.shape_cast %1099 : vector<4x4x16xf32> to vector<1x4x4x16xf32>
    tpu.vector_store %arg8[%c0_854, %c8_855, %c0_856, %c0_857], %1102 {strides = array<i32>} : memref<1x32x4x16xf32, #tpu.memory_space<vmem>>, vector<1x4x4x16xf32>,
    %c12_858 = arith.constant 12 : index
    %c0_859 = arith.constant 0 : index
    %c0_860 = arith.constant 0 : index
    %1103 = vector.load %arg9[%c12_858, %c0_859, %c0_860] : memref<32x4x16xf32, #tpu.memory_space<vmem>>, vector<4x4x16xf32>
    %1104 = vector.shape_cast %1070 : vector<1x16xf32> to vector<1x1x16xf32>
    %1105 = vector.broadcast %1104 : vector<1x1x16xf32> to vector<4x4x16xf32>
    %1106 = arith.mulf %1103, %1105 : vector<4x4x16xf32>
    %1107 = vector.shape_cast %1072 : vector<1x16xf32> to vector<1x1x16xf32>
    %1108 = vector.broadcast %1107 : vector<1x1x16xf32> to vector<4x4x16xf32>
    %1109 = arith.addf %1106, %1108 : vector<4x4x16xf32>
    %c0_861 = arith.constant 0 : index
    %c12_862 = arith.constant 12 : index
    %c0_863 = arith.constant 0 : index
    %c0_864 = arith.constant 0 : index
    %1110 = vector.load %arg8[%c0_861, %c12_862, %c0_863, %c0_864] : memref<1x32x4x16xf32, #tpu.memory_space<vmem>>, vector<1x4x4x16xf32>
    %1111 = vector.shape_cast %1110 : vector<1x4x4x16xf32> to vector<4x4x16xf32>
    %1112 = vector.shape_cast %1109 : vector<4x4x16xf32> to vector<1x4x4x16xf32>
    tpu.vector_store %arg8[%c0_861, %c12_862, %c0_863, %c0_864], %1112 {strides = array<i32>} : memref<1x32x4x16xf32, #tpu.memory_space<vmem>>, vector<1x4x4x16xf32>,
    %c16_865 = arith.constant 16 : index
    %c0_866 = arith.constant 0 : index
    %c0_867 = arith.constant 0 : index
    %1113 = vector.load %arg9[%c16_865, %c0_866, %c0_867] : memref<32x4x16xf32, #tpu.memory_space<vmem>>, vector<4x4x16xf32>
    %1114 = vector.shape_cast %1070 : vector<1x16xf32> to vector<1x1x16xf32>
    %1115 = vector.broadcast %1114 : vector<1x1x16xf32> to vector<4x4x16xf32>
    %1116 = arith.mulf %1113, %1115 : vector<4x4x16xf32>
    %1117 = vector.shape_cast %1072 : vector<1x16xf32> to vector<1x1x16xf32>
    %1118 = vector.broadcast %1117 : vector<1x1x16xf32> to vector<4x4x16xf32>
    %1119 = arith.addf %1116, %1118 : vector<4x4x16xf32>
    %c0_868 = arith.constant 0 : index
    %c16_869 = arith.constant 16 : index
    %c0_870 = arith.constant 0 : index
    %c0_871 = arith.constant 0 : index
    %1120 = vector.load %arg8[%c0_868, %c16_869, %c0_870, %c0_871] : memref<1x32x4x16xf32, #tpu.memory_space<vmem>>, vector<1x4x4x16xf32>
    %1121 = vector.shape_cast %1120 : vector<1x4x4x16xf32> to vector<4x4x16xf32>
    %1122 = vector.shape_cast %1119 : vector<4x4x16xf32> to vector<1x4x4x16xf32>
    tpu.vector_store %arg8[%c0_868, %c16_869, %c0_870, %c0_871], %1122 {strides = array<i32>} : memref<1x32x4x16xf32, #tpu.memory_space<vmem>>, vector<1x4x4x16xf32>,
    %c20_872 = arith.constant 20 : index
    %c0_873 = arith.constant 0 : index
    %c0_874 = arith.constant 0 : index
    %1123 = vector.load %arg9[%c20_872, %c0_873, %c0_874] : memref<32x4x16xf32, #tpu.memory_space<vmem>>, vector<4x4x16xf32>
    %1124 = vector.shape_cast %1070 : vector<1x16xf32> to vector<1x1x16xf32>
    %1125 = vector.broadcast %1124 : vector<1x1x16xf32> to vector<4x4x16xf32>
    %1126 = arith.mulf %1123, %1125 : vector<4x4x16xf32>
    %1127 = vector.shape_cast %1072 : vector<1x16xf32> to vector<1x1x16xf32>
    %1128 = vector.broadcast %1127 : vector<1x1x16xf32> to vector<4x4x16xf32>
    %1129 = arith.addf %1126, %1128 : vector<4x4x16xf32>
    %c0_875 = arith.constant 0 : index
    %c20_876 = arith.constant 20 : index
    %c0_877 = arith.constant 0 : index
    %c0_878 = arith.constant 0 : index
    %1130 = vector.load %arg8[%c0_875, %c20_876, %c0_877, %c0_878] : memref<1x32x4x16xf32, #tpu.memory_space<vmem>>, vector<1x4x4x16xf32>
    %1131 = vector.shape_cast %1130 : vector<1x4x4x16xf32> to vector<4x4x16xf32>
    %1132 = vector.shape_cast %1129 : vector<4x4x16xf32> to vector<1x4x4x16xf32>
    tpu.vector_store %arg8[%c0_875, %c20_876, %c0_877, %c0_878], %1132 {strides = array<i32>} : memref<1x32x4x16xf32, #tpu.memory_space<vmem>>, vector<1x4x4x16xf32>,
    %c24_879 = arith.constant 24 : index
    %c0_880 = arith.constant 0 : index
    %c0_881 = arith.constant 0 : index
    %1133 = vector.load %arg9[%c24_879, %c0_880, %c0_881] : memref<32x4x16xf32, #tpu.memory_space<vmem>>, vector<4x4x16xf32>
    %1134 = vector.shape_cast %1070 : vector<1x16xf32> to vector<1x1x16xf32>
    %1135 = vector.broadcast %1134 : vector<1x1x16xf32> to vector<4x4x16xf32>
    %1136 = arith.mulf %1133, %1135 : vector<4x4x16xf32>
    %1137 = vector.shape_cast %1072 : vector<1x16xf32> to vector<1x1x16xf32>
    %1138 = vector.broadcast %1137 : vector<1x1x16xf32> to vector<4x4x16xf32>
    %1139 = arith.addf %1136, %1138 : vector<4x4x16xf32>
    %c0_882 = arith.constant 0 : index
    %c24_883 = arith.constant 24 : index
    %c0_884 = arith.constant 0 : index
    %c0_885 = arith.constant 0 : index
    %1140 = vector.load %arg8[%c0_882, %c24_883, %c0_884, %c0_885] : memref<1x32x4x16xf32, #tpu.memory_space<vmem>>, vector<1x4x4x16xf32>
    %1141 = vector.shape_cast %1140 : vector<1x4x4x16xf32> to vector<4x4x16xf32>
    %1142 = vector.shape_cast %1139 : vector<4x4x16xf32> to vector<1x4x4x16xf32>
    tpu.vector_store %arg8[%c0_882, %c24_883, %c0_884, %c0_885], %1142 {strides = array<i32>} : memref<1x32x4x16xf32, #tpu.memory_space<vmem>>, vector<1x4x4x16xf32>,
    %c28_886 = arith.constant 28 : index
    %c0_887 = arith.constant 0 : index
    %c0_888 = arith.constant 0 : index
    %1143 = vector.load %arg9[%c28_886, %c0_887, %c0_888] : memref<32x4x16xf32, #tpu.memory_space<vmem>>, vector<4x4x16xf32>
    %1144 = vector.shape_cast %1070 : vector<1x16xf32> to vector<1x1x16xf32>
    %1145 = vector.broadcast %1144 : vector<1x1x16xf32> to vector<4x4x16xf32>
    %1146 = arith.mulf %1143, %1145 : vector<4x4x16xf32>
    %1147 = vector.shape_cast %1072 : vector<1x16xf32> to vector<1x1x16xf32>
    %1148 = vector.broadcast %1147 : vector<1x1x16xf32> to vector<4x4x16xf32>
    %1149 = arith.addf %1146, %1148 : vector<4x4x16xf32>
    %c0_889 = arith.constant 0 : index
    %c28_890 = arith.constant 28 : index
    %c0_891 = arith.constant 0 : index
    %c0_892 = arith.constant 0 : index
    %1150 = vector.load %arg8[%c0_889, %c28_890, %c0_891, %c0_892] : memref<1x32x4x16xf32, #tpu.memory_space<vmem>>, vector<1x4x4x16xf32>
    %1151 = vector.shape_cast %1150 : vector<1x4x4x16xf32> to vector<4x4x16xf32>
    %1152 = vector.shape_cast %1149 : vector<4x4x16xf32> to vector<1x4x4x16xf32>
    tpu.vector_store %arg8[%c0_889, %c28_890, %c0_891, %c0_892], %1152 {strides = array<i32>} : memref<1x32x4x16xf32, #tpu.memory_space<vmem>>, vector<1x4x4x16xf32>,
    return
  }
  func.func @transform_0(%arg0: i32) -> (i32, i32, i32, i32, i32) {
    %c0_i32 = arith.constant 0 : i32
    %c0_i32_0 = arith.constant 0 : i32
    %c0_i32_1 = arith.constant 0 : i32
    %c0_i32_2 = arith.constant 0 : i32
    %c0_i32_3 = arith.constant 0 : i32
    return %arg0, %c0_i32, %c0_i32_0, %c0_i32_1, %c0_i32_2 : i32, i32, i32, i32, i32
  }
  func.func @transform_1(%arg0: i32) -> (i32, i32) {
    %c0_i32 = arith.constant 0 : i32
    %c0_i32_0 = arith.constant 0 : i32
    %c0_i32_1 = arith.constant 0 : i32
    return %c0_i32, %c0_i32_0 : i32, i32
  }
  func.func @transform_2(%arg0: i32) -> (i32, i32) {
    %c0_i32 = arith.constant 0 : i32
    %c0_i32_0 = arith.constant 0 : i32
    %c0_i32_1 = arith.constant 0 : i32
    return %c0_i32, %c0_i32_0 : i32, i32
  }
  func.func @transform_3(%arg0: i32) -> (i32, i32) {
    %c0_i32 = arith.constant 0 : i32
    %c0_i32_0 = arith.constant 0 : i32
    %c0_i32_1 = arith.constant 0 : i32
    return %c0_i32, %c0_i32_0 : i32, i32
  }
  func.func @transform_4(%arg0: i32) -> (i32, i32) {
    %c0_i32 = arith.constant 0 : i32
    %c0_i32_0 = arith.constant 0 : i32
    %c0_i32_1 = arith.constant 0 : i32
    return %c0_i32, %c0_i32_0 : i32, i32
  }
  func.func @transform_5(%arg0: i32) -> (i32, i32) {
    %c0_i32 = arith.constant 0 : i32
    %c0_i32_0 = arith.constant 0 : i32
    %c0_i32_1 = arith.constant 0 : i32
    return %c0_i32, %c0_i32_0 : i32, i32
  }
  func.func @transform_6(%arg0: i32) -> (i32, i32) {
    %c0_i32 = arith.constant 0 : i32
    %c0_i32_0 = arith.constant 0 : i32
    %c0_i32_1 = arith.constant 0 : i32
    return %c0_i32, %c0_i32_0 : i32, i32
  }
  func.func @transform_7(%arg0: i32) -> (i32, i32, i32, i32) {
    %c0_i32 = arith.constant 0 : i32
    %c0_i32_0 = arith.constant 0 : i32
    %c0_i32_1 = arith.constant 0 : i32
    %c0_i32_2 = arith.constant 0 : i32
    return %arg0, %c0_i32, %c0_i32_0, %c0_i32_1 : i32, i32, i32, i32
  }
}

module attributes {stable_mosaic.version = 11 : i64} {
  func.func @_pointwise_mlp_kernel(%arg0: i32, %arg1: memref<16x256xf32, #tpu.memory_space<vmem>>, %arg2: memref<256x1024xf32, #tpu.memory_space<vmem>>, %arg3: memref<1x1024xf32, #tpu.memory_space<vmem>>, %arg4: memref<1024x128xf32, #tpu.memory_space<vmem>>, %arg5: memref<1x128xf32, #tpu.memory_space<vmem>>, %arg6: memref<16x128xf32, #tpu.memory_space<vmem>>) attributes {dimension_semantics = [#tpu.dimension_semantics<parallel>], iteration_bounds = array<i64: 1>, scalar_prefetch = 0 : i64, scratch_operands = 0 : i64, tpu.core_type = #tpu.core_type<tc>, window_params = [{transform_indices = @transform_0, window_bounds = array<i64: 16, 256>}, {pipeline_mode = #tpu.pipeline_mode<synchronous>, transform_indices = @transform_1, window_bounds = array<i64: 256, 1024>}, {pipeline_mode = #tpu.pipeline_mode<synchronous>, transform_indices = @transform_2, window_bounds = array<i64: 1, 1024>}, {pipeline_mode = #tpu.pipeline_mode<synchronous>, transform_indices = @transform_3, window_bounds = array<i64: 1024, 128>}, {pipeline_mode = #tpu.pipeline_mode<synchronous>, transform_indices = @transform_4, window_bounds = array<i64: 1, 128>}, {transform_indices = @transform_5, window_bounds = array<i64: 16, 128>}]} {
    %c0 = arith.constant 0 : index
    %c0_0 = arith.constant 0 : index
    %0 = vector.load %arg1[%c0, %c0_0] : memref<16x256xf32, #tpu.memory_space<vmem>>, vector<16x256xf32>
    %c0_1 = arith.constant 0 : index
    %c0_2 = arith.constant 0 : index
    %1 = vector.load %arg2[%c0_1, %c0_2] : memref<256x1024xf32, #tpu.memory_space<vmem>>, vector<256x1024xf32>
    %cst = arith.constant dense<0.000000e+00> : vector<16x1024xf32>
    %2 = tpu.matmul %0, %1, %cst {dimension_numbers = #tpu.dot_dimension_numbers<[1], [0], [0], [1], [0, 0, 1, 1], [], []>} : vector<16x256xf32>, vector<256x1024xf32>, vector<16x1024xf32> -> vector<16x1024xf32>
    %c0_3 = arith.constant 0 : index
    %c0_4 = arith.constant 0 : index
    %3 = vector.load %arg3[%c0_3, %c0_4] : memref<1x1024xf32, #tpu.memory_space<vmem>>, vector<1x1024xf32>
    %4 = vector.broadcast %3 : vector<1x1024xf32> to vector<16x1024xf32>
    %5 = arith.addf %2, %4 : vector<16x1024xf32>
    %cst_5 = arith.constant 5.000000e-01 : f32
    %6 = vector.broadcast %cst_5 : f32 to vector<16x1024xf32>
    %7 = arith.mulf %6, %5 : vector<16x1024xf32>
    %cst_6 = arith.constant 4.471500e-02 : f32
    %8 = vector.broadcast %cst_6 : f32 to vector<16x1024xf32>
    %9 = arith.mulf %8, %5 : vector<16x1024xf32>
    %10 = arith.mulf %9, %5 : vector<16x1024xf32>
    %11 = arith.mulf %10, %5 : vector<16x1024xf32>
    %12 = arith.addf %5, %11 : vector<16x1024xf32>
    %cst_7 = arith.constant 0.797884583 : f32
    %13 = vector.broadcast %cst_7 : f32 to vector<16x1024xf32>
    %14 = arith.mulf %13, %12 : vector<16x1024xf32>
    %15 = math.tanh %14 : vector<16x1024xf32>
    %cst_8 = arith.constant 1.000000e+00 : f32
    %16 = vector.broadcast %cst_8 : f32 to vector<16x1024xf32>
    %17 = arith.addf %16, %15 : vector<16x1024xf32>
    %18 = arith.mulf %7, %17 : vector<16x1024xf32>
    %c0_9 = arith.constant 0 : index
    %c0_10 = arith.constant 0 : index
    %19 = vector.load %arg4[%c0_9, %c0_10] : memref<1024x128xf32, #tpu.memory_space<vmem>>, vector<1024x128xf32>
    %cst_11 = arith.constant dense<0.000000e+00> : vector<16x128xf32>
    %20 = tpu.matmul %18, %19, %cst_11 {dimension_numbers = #tpu.dot_dimension_numbers<[1], [0], [0], [1], [0, 0, 1, 1], [], []>} : vector<16x1024xf32>, vector<1024x128xf32>, vector<16x128xf32> -> vector<16x128xf32>
    %c0_12 = arith.constant 0 : index
    %c0_13 = arith.constant 0 : index
    %21 = vector.load %arg5[%c0_12, %c0_13] : memref<1x128xf32, #tpu.memory_space<vmem>>, vector<1x128xf32>
    %22 = vector.broadcast %21 : vector<1x128xf32> to vector<16x128xf32>
    %23 = arith.addf %20, %22 : vector<16x128xf32>
    %c0_14 = arith.constant 0 : index
    %c0_15 = arith.constant 0 : index
    %24 = vector.load %arg6[%c0_14, %c0_15] : memref<16x128xf32, #tpu.memory_space<vmem>>, vector<16x128xf32>
    tpu.vector_store %arg6[%c0_14, %c0_15], %23 {strides = array<i32>} : memref<16x128xf32, #tpu.memory_space<vmem>>, vector<16x128xf32>,
    return
  }
  func.func @transform_0(%arg0: i32) -> (i32, i32) {
    %c0_i32 = arith.constant 0 : i32
    %c0_i32_0 = arith.constant 0 : i32
    return %arg0, %c0_i32 : i32, i32
  }
  func.func @transform_1(%arg0: i32) -> (i32, i32) {
    %c0_i32 = arith.constant 0 : i32
    %c0_i32_0 = arith.constant 0 : i32
    %c0_i32_1 = arith.constant 0 : i32
    return %c0_i32, %c0_i32_0 : i32, i32
  }
  func.func @transform_2(%arg0: i32) -> (i32, i32) {
    %c0_i32 = arith.constant 0 : i32
    %c0_i32_0 = arith.constant 0 : i32
    %c0_i32_1 = arith.constant 0 : i32
    return %c0_i32, %c0_i32_0 : i32, i32
  }
  func.func @transform_3(%arg0: i32) -> (i32, i32) {
    %c0_i32 = arith.constant 0 : i32
    %c0_i32_0 = arith.constant 0 : i32
    %c0_i32_1 = arith.constant 0 : i32
    return %c0_i32, %c0_i32_0 : i32, i32
  }
  func.func @transform_4(%arg0: i32) -> (i32, i32) {
    %c0_i32 = arith.constant 0 : i32
    %c0_i32_0 = arith.constant 0 : i32
    %c0_i32_1 = arith.constant 0 : i32
    return %c0_i32, %c0_i32_0 : i32, i32
  }
  func.func @transform_5(%arg0: i32) -> (i32, i32) {
    %c0_i32 = arith.constant 0 : i32
    %c0_i32_0 = arith.constant 0 : i32
    return %arg0, %c0_i32 : i32, i32
  }
}

</mosaic_0001>

<bundles_post_ra>
// kernel: tile.35
= control target key start
LH: loop header
LB: loop body
LE: loop exit
PB: predicated region body
PF: predicated region fallthrough
CT: control target
= control target key end

     0   :  { %vm21_vm0 = vcmask 31744   ;;  %s56_s14 = smov 4   ;;  %s57_s15 = smov 8   ;;  %vm27_vm1 = vcmask 130144   ;;  %vm33_vm2 = vcmask 97344   ;;  %vm39_vm3 = vcmask 64544   ;;  %s83_s0 = inlined_call_operand.vmem [shape: f32[4,4,4], index: 0, kind: input, shape index: {}]   ;;  %s84_s1 = inlined_call_operand.vmem [shape: f32[16,4], index: 1, kind: output, shape index: {}]  }
   0x1   :  { %v49_v0 = vld [vmem:[%s83_s0 + $0xc] sm:$0xf]  ;;  %v50_v1 = vld [vmem:[%s83_s0 + $0x8] sm:$0xf]  ;;  %v51_v2 = vld [vmem:[%s83_s0 + $0x4] sm:$0xf] }
   0x2   :  { %8 = vst [vmem:[#allocation1 + $0x18] sm:$0xf] %v49_v0  ;;  %13 = vst [vmem:[#allocation1 + $0x10] sm:$0xf] %v50_v1  ;;  %v18_v3 = vld [vmem:[%s83_s0] sm:$0xf] }
   0x3   :  { %17 = vst [vmem:[#allocation1 + $0x8] sm:$0xf] %v51_v2  ;;  %19 = vst [vmem:[#allocation1] sm:$0xf] %v18_v3  ;;  %s55_s0 = smov 12  }
   0xa   :  { %v24_v4 = vld [vmem:[#allocation1 + $0x3] ss:$8 sm:$0xf]   ;;  %v36_v5 = vld [vmem:[#allocation1 + $0x1] ss:$8 sm:$0xf]  }
   0xb   :  { %25 = vrot.lane.b32.xlu0 %v24_v4, %s55_s0  ;;  %v20_v6 = vld [vmem:[#allocation1] ss:$8 sm:$0xf]   ;;  %v30_v7 = vld [vmem:[#allocation1 + $0x2] ss:$8 sm:$0xf]   ;;  %37 = vrot.lane.b32.xlu1 %v36_v5, %s56_s14 }
   0xc   :  { %22 = vst.msk [vmem:[#allocation0] sm:$0xf] %vm21_vm0, %v20_v6  }
   0xf   :  { %31 = vrot.lane.b32.xlu0 %v30_v7, %s57_s15 }
  0x7d   :  { %v26_v8 = vpop.permute.xlu0 %25   ;;  %v38_v9 = vpop.permute.xlu1 %37  }
  0x7e   :  { %28 = vst.msk [vmem:[#allocation0] sm:$0xf] %vm27_vm1, %v26_v8  }
  0x81   :  { %v32_v10 = vpop.permute.xlu0 %31  }
  0x82   :  { %34 = vst.msk [vmem:[#allocation0] sm:$0xf] %vm33_vm2, %v32_v10  }
  0x83   :  { %40 = vst.msk [vmem:[#allocation0] sm:$0xf] %vm39_vm3, %v38_v9  }
  0x8a   :  { %v44_v11 = vld [vmem:[#allocation0] sm:$0xf] }
  0x8b   :  { %46 = vst [vmem:[%s84_s1] sm:$0xf] %v44_v11 }

// kernel: squeeze.1
= control target key start
LH: loop header
LB: loop body
LE: loop exit
PB: predicated region body
PF: predicated region fallthrough
CT: control target
= control target key end

     0   :  { %s203_s8 = smov 120   ;;  %s204_s11 = smov 110   ;;  %vm3_vm0 = vcmask 39936   ;;  %vm9_vm1 = vcmask 1023936   ;;  %vm15_vm2 = vcmask 982936   ;;  %vm21_vm3 = vcmask 941936   ;;  %s315_s0 = inlined_call_operand.vmem [shape: f32[4,5,5,5], index: 0, kind: input, shape index: {}]   ;;  %s316_s1 = inlined_call_operand.vmem [shape: f32[4,125], index: 1, kind: output, shape index: {}]  }
   0x1   :  { %v155_v0 = vld [vmem:[%s315_s0 + $0x24] ss:$40 sm:$0xf]   ;;  %v157_v1 = vld [vmem:[%s315_s0 + $0x22] ss:$40 sm:$0xf]  }
   0x2   :  { %7 = vrot.lane.b32.xlu0 %v155_v0, %s203_s8  ;;  %19 = vrot.lane.b32.xlu1 %v157_v1, %s204_s11  ;;  %v156_v2 = vld [vmem:[%s315_s0 + $0x23] ss:$40 sm:$0xf]   ;;  %v158_v3 = vld [vmem:[%s315_s0 + $0x21] ss:$40 sm:$0xf]  }
   0x3   :  { %s205_s16 = smov 115   ;;  %s206_s17 = smov 105   ;;  %v159_v4 = vld [vmem:[%s315_s0 + $0x20] ss:$40 sm:$0xf]   ;;  %vm27_vm4 = vcmask 900936  }
   0x4   :  { %v160_v5 = vld [vmem:[%s315_s0 + $0x1c] ss:$40 sm:$0xf]   ;;  %s207_s22 = smov 100   ;;  %s208_s23 = smov 95   ;;  %vm33_vm5 = vcmask 859936  }
   0x5   :  { %v161_v6 = vld [vmem:[%s315_s0 + $0x1b] ss:$40 sm:$0xf]   ;;  %v162_v7 = vld [vmem:[%s315_s0 + $0x1a] ss:$40 sm:$0xf]  }
   0x6   :  { %13 = vrot.lane.b32.xlu0 %v156_v2, %s205_s16  ;;  %25 = vrot.lane.b32.xlu1 %v158_v3, %s206_s17  ;;  %s209_s28 = smov 90   ;;  %s210_s29 = smov 85   ;;  %v163_v8 = vld [vmem:[%s315_s0 + $0x19] ss:$40 sm:$0xf]   ;;  %vm39_vm6 = vcmask 818936  }
   0x7   :  { %v164_v9 = vld [vmem:[%s315_s0 + $0x18] ss:$40 sm:$0xf]   ;;  %s211_s5 = smov 80   ;;  %s212_s8 = smov 75   ;;  %vm45_vm7 = vcmask 777936  }
   0x8   :  { %v165_v10 = vld [vmem:[%s315_s0 + $0x14] ss:$40 sm:$0xf]   ;;  %v2_v11 = vld [vmem:[%s315_s0] ss:$40 sm:$0xf]  }
   0x9   :  { %v166_v12 = vld [vmem:[%s315_s0 + $0x13] ss:$40 sm:$0xf]   ;;  %4 = vst.msk [vmem:[#allocation0] sm:$0xf] %vm3_vm0, %v2_v11   ;;  %s213_s13 = smov 70  }
   0xa   :  { %31 = vrot.lane.b32.xlu0 %v159_v4, %s207_s22  ;;  %37 = vrot.lane.b32.xlu1 %v160_v5, %s208_s23  ;;  %s214_s14 = smov 65   ;;  %v167_v13 = vld [vmem:[%s315_s0 + $0x12] ss:$40 sm:$0xf]   ;;  %s215_s19 = smov 60   ;;  %vm51_vm8 = vcmask 736936  }
   0xb   :  { %v168_v14 = vld [vmem:[%s315_s0 + $0x11] ss:$40 sm:$0xf]   ;;  %s216_s20 = smov 55   ;;  %s217_s25 = smov 50   ;;  %vm57_vm9 = vcmask 695936  }
   0xc   :  { %v169_v15 = vld [vmem:[%s315_s0 + $0x10] ss:$40 sm:$0xf]   ;;  %v170_v16 = vld [vmem:[%s315_s0 + $0xc] ss:$40 sm:$0xf]  }
   0xd   :  { %s218_s26 = smov 45   ;;  %v171_v17 = vld [vmem:[%s315_s0 + $0xb] ss:$40 sm:$0xf]   ;;  %s219_s2 = smov 40   ;;  %vm63_vm10 = vcmask 654936  }
   0xe   :  { %43 = vrot.lane.b32.xlu0 %v161_v6, %s209_s28  ;;  %49 = vrot.lane.b32.xlu1 %v162_v7, %s210_s29  ;;  %v172_v18 = vld [vmem:[%s315_s0 + $0xa] ss:$40 sm:$0xf]   ;;  %s220_s3 = smov 35   ;;  %s222_s9 = smov 25   ;;  %vm69_vm11 = vcmask 613936  }
   0xf   :  { %v173_v19 = vld [vmem:[%s315_s0 + $0x9] ss:$40 sm:$0xf]   ;;  %v174_v20 = vld [vmem:[%s315_s0 + $0x8] ss:$40 sm:$0xf]  }
  0x10   :  { %v175_v21 = vld [vmem:[%s315_s0 + $0x4] ss:$40 sm:$0xf]   ;;  %v176_v22 = vld [vmem:[%s315_s0 + $0x3] ss:$40 sm:$0xf]  }
  0x11   :  { %s224_s15 = smov 15   ;;  %v177_v23 = vld [vmem:[%s315_s0 + $0x2] ss:$40 sm:$0xf]   ;;  %vm75_vm12 = vcmask 572936   ;;  %vm81_vm13 = vcmask 531936  }
  0x12   :  { %55 = vrot.lane.b32.xlu0 %v163_v8, %s211_s5  ;;  %61 = vrot.lane.b32.xlu1 %v164_v9, %s212_s8  ;;  %s221_s8 = smov 30   ;;  %v178_v24 = vld [vmem:[%s315_s0 + $0x1] ss:$40 sm:$0xf]   ;;  %s225_s0 = smov 10   ;;  %vm87_vm14 = vcmask 490936  }
  0x13   :  { %vm93_vm15 = vcmask 449936   ;;  %vm99_vm0 = vcmask 408936  }
  0x16   :  { %67 = vrot.lane.b32.xlu0 %v165_v10, %s213_s13  ;;  %73 = vrot.lane.b32.xlu1 %v166_v12, %s214_s14  ;;  %s223_s14 = smov 20  }
  0x1a   :  { %79 = vrot.lane.b32.xlu0 %v167_v13, %s215_s19  ;;  %85 = vrot.lane.b32.xlu1 %v168_v14, %s216_s20  ;;  %s226_s20 = smov 5  }
  0x1e   :  { %91 = vrot.lane.b32.xlu0 %v169_v15, %s217_s25  ;;  %97 = vrot.lane.b32.xlu1 %v170_v16, %s218_s26 }
  0x22   :  { %103 = vrot.lane.b32.xlu0 %v171_v17, %s219_s2  ;;  %109 = vrot.lane.b32.xlu1 %v172_v18, %s220_s3 }
  0x26   :  { %115 = vrot.lane.b32.xlu0 %v173_v19, %s221_s8  ;;  %121 = vrot.lane.b32.xlu1 %v174_v20, %s222_s9 }
  0x2a   :  { %127 = vrot.lane.b32.xlu0 %v175_v21, %s223_s14  ;;  %133 = vrot.lane.b32.xlu1 %v176_v22, %s224_s15 }
  0x2e   :  { %139 = vrot.lane.b32.xlu0 %v177_v23, %s225_s0  ;;  %145 = vrot.lane.b32.xlu1 %v178_v24, %s226_s20 }
  0x74   :  { %v8_v25 = vpop.permute.xlu0 %7   ;;  %v20_v26 = vpop.permute.xlu1 %19  }
  0x75   :  { %10 = vst.msk [vmem:[#allocation0] sm:$0xf] %vm9_vm1, %v8_v25   ;;  %vm105_vm1 = vcmask 367936  }
  0x78   :  { %v14_v27 = vpop.permute.xlu0 %13   ;;  %v26_v28 = vpop.permute.xlu1 %25  }
  0x79   :  { %16 = vst.msk [vmem:[#allocation0] sm:$0xf] %vm15_vm2, %v14_v27   ;;  %vm111_vm2 = vcmask 326936  }
  0x7a   :  { %22 = vst.msk [vmem:[#allocation0] sm:$0xf] %vm21_vm3, %v20_v26   ;;  %vm117_vm3 = vcmask 285936  }
  0x7b   :  { %28 = vst.msk [vmem:[#allocation0] sm:$0xf] %vm27_vm4, %v26_v28   ;;  %vm123_vm4 = vcmask 244936  }
  0x7c   :  { %v32_v29 = vpop.permute.xlu0 %31   ;;  %v38_v30 = vpop.permute.xlu1 %37  }
  0x7d   :  { %34 = vst.msk [vmem:[#allocation0] sm:$0xf] %vm33_vm5, %v32_v29   ;;  %vm129_vm5 = vcmask 203936  }
  0x7e   :  { %40 = vst.msk [vmem:[#allocation0] sm:$0xf] %vm39_vm6, %v38_v30   ;;  %vm135_vm6 = vcmask 162936  }
  0x80   :  { %v44_v31 = vpop.permute.xlu0 %43   ;;  %v50_v32 = vpop.permute.xlu1 %49  }
  0x81   :  { %46 = vst.msk [vmem:[#allocation0] sm:$0xf] %vm45_vm7, %v44_v31   ;;  %vm141_vm7 = vcmask 121936  }
  0x82   :  { %52 = vst.msk [vmem:[#allocation0] sm:$0xf] %vm51_vm8, %v50_v32   ;;  %vm147_vm8 = vcmask 80936  }
  0x84   :  { %v56_v33 = vpop.permute.xlu0 %55   ;;  %v62_v34 = vpop.permute.xlu1 %61  }
  0x85   :  { %58 = vst.msk [vmem:[#allocation0] sm:$0xf] %vm57_vm9, %v56_v33  }
  0x86   :  { %64 = vst.msk [vmem:[#allocation0] sm:$0xf] %vm63_vm10, %v62_v34  }
  0x88   :  { %v68_v35 = vpop.permute.xlu0 %67   ;;  %v74_v36 = vpop.permute.xlu1 %73  }
  0x89   :  { %70 = vst.msk [vmem:[#allocation0] sm:$0xf] %vm69_vm11, %v68_v35  }
  0x8a   :  { %76 = vst.msk [vmem:[#allocation0] sm:$0xf] %vm75_vm12, %v74_v36  }
  0x8c   :  { %v80_v37 = vpop.permute.xlu0 %79   ;;  %v86_v38 = vpop.permute.xlu1 %85  }
  0x8d   :  { %82 = vst.msk [vmem:[#allocation0] sm:$0xf] %vm81_vm13, %v80_v37  }
  0x8e   :  { %88 = vst.msk [vmem:[#allocation0] sm:$0xf] %vm87_vm14, %v86_v38  }
  0x90   :  { %v92_v39 = vpop.permute.xlu0 %91   ;;  %v98_v40 = vpop.permute.xlu1 %97  }
  0x91   :  { %94 = vst.msk [vmem:[#allocation0] sm:$0xf] %vm93_vm15, %v92_v39  }
  0x92   :  { %100 = vst.msk [vmem:[#allocation0] sm:$0xf] %vm99_vm0, %v98_v40  }
  0x94   :  { %v104_v41 = vpop.permute.xlu0 %103   ;;  %v110_v42 = vpop.permute.xlu1 %109  }
  0x95   :  { %106 = vst.msk [vmem:[#allocation0] sm:$0xf] %vm105_vm1, %v104_v41  }
  0x96   :  { %112 = vst.msk [vmem:[#allocation0] sm:$0xf] %vm111_vm2, %v110_v42  }
  0x98   :  { %v116_v43 = vpop.permute.xlu0 %115   ;;  %v122_v44 = vpop.permute.xlu1 %121  }
  0x99   :  { %118 = vst.msk [vmem:[#allocation0] sm:$0xf] %vm117_vm3, %v116_v43  }
  0x9a   :  { %124 = vst.msk [vmem:[#allocation0] sm:$0xf] %vm123_vm4, %v122_v44  }
  0x9c   :  { %v128_v45 = vpop.permute.xlu0 %127   ;;  %v134_v46 = vpop.permute.xlu1 %133  }
  0x9d   :  { %130 = vst.msk [vmem:[#allocation0] sm:$0xf] %vm129_vm5, %v128_v45  }
  0x9e   :  { %136 = vst.msk [vmem:[#allocation0] sm:$0xf] %vm135_vm6, %v134_v46  }
  0xa0   :  { %v140_v47 = vpop.permute.xlu0 %139   ;;  %v146_v48 = vpop.permute.xlu1 %145  }
  0xa1   :  { %142 = vst.msk [vmem:[#allocation0] sm:$0xf] %vm141_vm7, %v140_v47  }
  0xa2   :  { %148 = vst.msk [vmem:[#allocation0] sm:$0xf] %vm147_vm8, %v146_v48  }
  0xa9   :  { %v152_v49 = vld [vmem:[#allocation0] sm:$0xf] }
  0xaa   :  { %154 = vst [vmem:[%s316_s1] sm:$0xf] %v152_v49 }

// kernel: mednext_up_block_forward.2
= control target key start
LH: loop header
LB: loop body
LE: loop exit
PB: predicated region body
PF: predicated region fallthrough
CT: control target
= control target key end

     0   :  { %12 = vsyncpa [#allocation4], 0  ;;  %s5565_s0 = inlined_call_operand.vmem [shape: f32[2,3,6,6,16], index: 0, kind: input, shape index: {}]   ;;  %s5566_s1 = inlined_call_operand.vmem [shape: f32[125,16], index: 1, kind: input, shape index: {}]   ;;  %s5567_s2 = inlined_call_operand.vmem [shape: f32[1,16], index: 2, kind: input, shape index: {}]   ;;  %s5568_s3 = inlined_call_operand.hbm [shape: f32[1,4], index: 3, kind: input, shape index: {}]   ;;  %s5569_s4 = inlined_call_operand.hbm [shape: f32[1,4], index: 4, kind: input, shape index: {}]   ;;  %s5570_s5 = inlined_call_operand.vmem [shape: f32[16,4], index: 5, kind: input, shape index: {}]   ;;  %s5571_s6 = inlined_call_operand.vmem [shape: f32[4,16], index: 6, kind: input, shape index: {}]   ;;  %s5572_s7 = inlined_call_operand.vmem [shape: f32[2,32,4,16], index: 7, kind: output, shape index: {}]  }
   0x1   :  { %13 = vsyncpa [#allocation6], 0  ;;  %s4171_s24 = smov 0  }
   0x2 LB: > { %s4177_s25 = sadd.s32 4294967295, %s4124_s24   ;;  %p3324_p0 = scmp.ge.s32.totalorder %s4124_s24, 1  ;;  %s4124_s24 = sphi %s4171_s24, %s19_s24  }
   0x3   : > { %p202_p1 = scmp.lt.s32.totalorder %s4124_s24, 3  ;;  %p5573_p2 = scmp.eq.s32.totalorder %s4177_s25, 0 }
   0x4   : > { %s4126_s27 = smov [#allocation3]   ;;  %s4127_s29 = smov [#allocation5]  }
   0x5   : > { %p4182_p3 = pnand %p3324_p0, %p202_p1  ;;  %s221_s28 = sshll.u32 %s4126_s27, 4  ;;  %s222_s28 = int_to_ptr.vmem [resolvable:$true] %s221_s28 }
   0x6   : > { %s232_s30 = sshll.u32 %s4127_s29, 4  ;;  %s4054_s11 = scalar_lea.hbm %s5568_s3, 16  ;;  %s4194_s30 = int_to_ptr.vmem [resolvable:$true] %s232_s30 }
   0x7   : > { %s5575_s26 = scalar_select %p4182_p3, 1, 0 }
   0x8   : > { %p4026_p4 = pneg %p4182_p3  ;;  %p4055_p6 = scmp.ne.s32.totalorder %s5568_s3, %s4054_s11 }
   0x9   : > { %p4061_p10 = scmp.lt.u32.totalorder %s4054_s11, %s5568_s3 }
   0xa   : > { %p4190_p5 = pnand %p5573_p2, %p4026_p4 }
   0xc   : > { %p4056_p7 = pneg %p4190_p5 }
   0xe   : > { %p4057_p8 = pnand %p4056_p7, %p4055_p6 }
  0x10   : > { %p4058_p9 = pneg %p4057_p8 }
  0x12   : > { %p4063_p11 = pnand %p4061_p10, %p4058_p9 }
  0x14   : > { %4066 = shalt.err (!%p4063_p11)
}
  0x15   : > { %s4067_s16 = scalar_lea.vmem %s222_s28, 16  ;;  %s4074_s17 = scalar_lea.vmem %s222_s28, 32 }
  0x16   : > { %p4068_p12 = scmp.ne.s32.totalorder %s222_s28, %s4067_s16  ;;  %p4075_p1 = scmp.lt.s32.totalorder %s222_s28, %s222_s28 }
  0x17   : > { %p4076_p4 = scmp.lt.s32.totalorder %s4074_s17, %s4067_s16 }
  0x18   : > { %p4070_p13 = pnand %p4068_p12, %p4056_p7 }
  0x19   : > { %p4077_p2 = por %p4076_p4, %p4075_p1 }
  0x1a   : > { %p4071_p0 = pneg %p4070_p13 }
  0x1c   : > { %p4078_p3 = pnand %p4077_p2, %p4071_p0 }
  0x1e   : > { %4081 = shalt.err (!%p4078_p3)
}
  0x1f   : > { %4029 = dma.hbm_to_vmem [thread:$0]  (!%p4190_p5), %s5568_s3, 16, %s222_s28, [#allocation4]  }
  0x20   : > { %s4082_s22 = scalar_lea.hbm %s5569_s4, 16 }
  0x21   : > { %p4083_p6 = scmp.ne.s32.totalorder %s5569_s4, %s4082_s22  ;;  %p4089_p3 = scmp.lt.u32.totalorder %s4082_s22, %s5569_s4 }
  0x23   : > { %p4085_p8 = pnand %p4083_p6, %p4056_p7 }
  0x25   : > { %p4086_p2 = pneg %p4085_p8 }
  0x27   : > { %p4091_p9 = pnand %p4089_p3, %p4086_p2 }
  0x29   : > { %4094 = shalt.err (!%p4091_p9)
}
  0x2a   : > { %s4095_s28 = scalar_lea.vmem %s4194_s30, 16  ;;  %s4102_s10 = scalar_lea.vmem %s4194_s30, 32 }
  0x2b   : > { %p4096_p10 = scmp.ne.s32.totalorder %s4194_s30, %s4095_s28  ;;  %p4103_p13 = scmp.lt.s32.totalorder %s4194_s30, %s4194_s30 }
  0x2c   : > { %p4104_p0 = scmp.lt.s32.totalorder %s4102_s10, %s4095_s28 }
  0x2d   : > { %p4098_p11 = pnand %p4096_p10, %p4056_p7 }
  0x2e   : > { %p4105_p1 = por %p4104_p0, %p4103_p13 }
  0x2f   : > { %p4099_p12 = pneg %p4098_p11 }
  0x31   : > { %p4106_p4 = pnand %p4105_p1, %p4099_p12 }
  0x33   : > { %4109 = shalt.err (!%p4106_p4)
}
  0x34   : > { %4032 = dma.hbm_to_vmem [thread:$0]  (!%p4190_p5), %s5569_s4, 16, %s4194_s30, [#allocation6]  }
  0x35   : > { %p5577_p6 = scmp.ne.s32.totalorder %s5575_s26, 0 }
  0x36   : > { %p5578_p7 = scmp.eq.s32.totalorder (!%p5577_p6), %s4177_s25, 0 }
  0x37   : > { %259 = sbr.rel (%p5577_p6) target bundleno = 872 (0x368), region = 48 }
  0x3e   : > { %4115 = dma.done.wait (%p5578_p7), [#allocation4], 16   ;;  %p5579_p8 = pmov %p5578_p7 }
  0x3f   : > { %p5580_p2 = pmov %p5578_p7 }
  0x40   : > { %4117 = vsyncadd (%p5579_p8), [#allocation4], 4294967280 }
  0x41   : > { %4119 = dma.done.wait (%p5580_p2), [#allocation6], 16   ;;  %p5581_p3 = pmov %p5580_p2 }
  0x42   : > { %p295_p9 = scmp.lt.s32.totalorder %s4177_s25, 1  ;;  %v1122_v0 = vlaneseq  ;;  %v3338_v7 = vld [vmem:[%s5566_s1] ss:$0 sm:$0xff]  ;;  %v3343_v16 = vld [vmem:[%s5566_s1 + $0x2] ss:$0 sm:$0xff]  ;;  %vm779_vm0 = vcmask 125952  }
  0x43   : > { %4121 = vsyncadd (%p5581_p3), [#allocation6], 4294967280  ;;  %v3348_v25 = vld [vmem:[%s5566_s1 + $0x4] ss:$0 sm:$0xff]  ;;  %v3353_v34 = vld [vmem:[%s5566_s1 + $0xa] ss:$0 sm:$0xff] }
  0x44   : > { %s5591_s25 = smov (!%p295_p9, %s4177_s25), 1  ;;  %v4266_v3 = vshrl.u32 %v1122_v0, 7  ;;  %v4268_v4 = vand.u32 127, %v1122_v0  ;;  %v3358_v47 = vld [vmem:[%s5566_s1 + $0xc] ss:$0 sm:$0xff]  ;;  %vm4129_vm9 = vmmov 0  }
  0x45   : > { %s4017_s26 = smul.u32 144, %s5591_s25  ;;  %v3363_v60 = vld [vmem:[%s5566_s1 + $0xe] ss:$0 sm:$0xff]  ;;  %vm2791_vm10 = vcmask 130048   ;;  %vm2955_vm11 = vcmask 1043456   ;;  %vm2951_vm12 = vcmask 31744  }
  0x46   : > { %vm1124_vm1 = vcmp.lt.s32.totalorder %v4266_v3, 4  ;;  %vm1127_vm2 = vcmp.lt.s32.totalorder %v4268_v4, 12  ;;  %vm1477_vm4 = vcmp.lt.s32.totalorder %v4266_v3, 3  ;;  %vm1478_vm5 = vcmp.lt.s32.totalorder %v4268_v4, 16  ;;  %s3976_s15 = sshll.u32 %s5591_s25, 7 }
  0x47   : > { %s4262_s13 = scalar_lea.vmem %s5565_s0, %s4017_s26  ;;  %vm4627_vm3 = vmand %vm1124_vm1, %vm1127_vm2  ;;  %s5443_s17 = scalar_lea.vmem %s5572_s7, %s3976_s15 }
  0x48   : > { %v3334_v1 = vld [vmem:[%s4262_s13 + $0x72] sm:$0xf]  ;;  %v3335_v2 = vld [vmem:[%s4262_s13 + $0x7a] sm:$0xf]  ;;  %v3336_v5 = vld [vmem:[%s4262_s13 + $0x82] sm:$0xf] }
  0x49   : > { %v3337_v6 = vld [vmem:[%s4262_s13 + $0x8a] sm:$0xf]  ;;  %v316_v8 = vmul.f32 %v3338_v7, %v3334_v1  ;;  %v317_v9 = vmul.f32 %v3338_v7, %v3335_v2  ;;  %v318_v10 = vmul.f32 %v3338_v7, %v3336_v5  ;;  %v3339_v12 = vld [vmem:[%s4262_s13 + $0x42] sm:$0xf]  ;;  %v3341_v14 = vld [vmem:[%s4262_s13 + $0x52] sm:$0xf] }
  0x4a   : > { %v319_v11 = vmul.f32 %v3338_v7, %v3337_v6  ;;  %v3340_v13 = vld [vmem:[%s4262_s13 + $0x4a] sm:$0xf]  ;;  %v3342_v15 = vld [vmem:[%s4262_s13 + $0x5a] sm:$0xf]  ;;  %v3344_v17 = vld [vmem:[%s4262_s13 + $0x12] sm:$0xf]  ;;  %v330_v18 = vmul.f32 %v3343_v16, %v3339_v12  ;;  %v332_v20 = vmul.f32 %v3343_v16, %v3341_v14 }
  0x4b   : > { %v331_v19 = vmul.f32 %v3343_v16, %v3340_v13  ;;  %v333_v21 = vmul.f32 %v3343_v16, %v3342_v15  ;;  %v3345_v22 = vld [vmem:[%s4262_s13 + $0x1a] sm:$0xf]  ;;  %v3346_v23 = vld [vmem:[%s4262_s13 + $0x22] sm:$0xf]  ;;  %v3347_v24 = vld [vmem:[%s4262_s13 + $0x2a] sm:$0xf]  ;;  %v348_v35 = vmul.f32 %v3348_v25, %v3344_v17 }
  0x4c   : > { %v3349_v26 = vld [vmem:[%s4262_s13 + $0x71] sm:$0xf]  ;;  %v3350_v27 = vld [vmem:[%s4262_s13 + $0x79] sm:$0xf]  ;;  %v334_v28 = vadd.f32 %v330_v18, %v316_v8  ;;  %v336_v30 = vadd.f32 %v332_v20, %v318_v10  ;;  %v3351_v32 = vld [vmem:[%s4262_s13 + $0x81] sm:$0xf]  ;;  %v349_v36 = vmul.f32 %v3348_v25, %v3345_v22  ;;  %v350_v37 = vmul.f32 %v3348_v25, %v3346_v23 }
  0x4d   : > { %v335_v29 = vadd.f32 %v331_v19, %v317_v9  ;;  %v337_v31 = vadd.f32 %v333_v21, %v319_v11  ;;  %v3352_v33 = vld [vmem:[%s4262_s13 + $0x89] sm:$0xf]  ;;  %v351_v38 = vmul.f32 %v3348_v25, %v3347_v24  ;;  %v3354_v39 = vld [vmem:[%s4262_s13 + $0x41] sm:$0xf]  ;;  %v3356_v41 = vld [vmem:[%s4262_s13 + $0x51] sm:$0xf]  ;;  %v365_v42 = vmul.f32 %v3353_v34, %v3349_v26 }
  0x4e   : > { %v3355_v40 = vld [vmem:[%s4262_s13 + $0x49] sm:$0xf]  ;;  %v366_v43 = vmul.f32 %v3353_v34, %v3350_v27  ;;  %v367_v44 = vmul.f32 %v3353_v34, %v3351_v32  ;;  %v368_v45 = vmul.f32 %v3353_v34, %v3352_v33  ;;  %v3357_v46 = vld [vmem:[%s4262_s13 + $0x59] sm:$0xf]  ;;  %v3359_v48 = vld [vmem:[%s4262_s13 + $0x11] sm:$0xf]  ;;  %v352_v49 = vadd.f32 %v348_v35, %v334_v28 }
  0x4f   : > { %v353_v50 = vadd.f32 %v349_v36, %v335_v29  ;;  %v354_v51 = vadd.f32 %v350_v37, %v336_v30  ;;  %v355_v52 = vadd.f32 %v351_v38, %v337_v31  ;;  %v3360_v53 = vld [vmem:[%s4262_s13 + $0x19] sm:$0xf]  ;;  %v3361_v54 = vld [vmem:[%s4262_s13 + $0x21] sm:$0xf]  ;;  %v3362_v55 = vld [vmem:[%s4262_s13 + $0x29] sm:$0xf]  ;;  %v382_v56 = vmul.f32 %v3358_v47, %v3354_v39 }
  0x50   : > { %v383_v57 = vmul.f32 %v3358_v47, %v3355_v40  ;;  %v384_v58 = vmul.f32 %v3358_v47, %v3356_v41  ;;  %v385_v59 = vmul.f32 %v3358_v47, %v3357_v46  ;;  %v3364_v61 = vld [vmem:[%s4262_s13 + $0x70] sm:$0xf]  ;;  %v3365_v62 = vld [vmem:[%s4262_s13 + $0x78] sm:$0xf]  ;;  %v369_v63 = vadd.f32 %v365_v42, %v352_v49  ;;  %v3366_v5 = vld [vmem:[%s4262_s13 + $0x80] sm:$0xf] }
  0x51   : > { %v370_v0 = vadd.f32 %v366_v43, %v353_v50  ;;  %v371_v1 = vadd.f32 %v367_v44, %v354_v51  ;;  %v372_v2 = vadd.f32 %v368_v45, %v355_v52  ;;  %v3367_v6 = vld [vmem:[%s4262_s13 + $0x88] sm:$0xf]  ;;  %v3368_v7 = vld [vmem:[%s5566_s1 + $0x14] ss:$0 sm:$0xff]  ;;  %v399_v8 = vmul.f32 %v3363_v60, %v3359_v48  ;;  %v3369_v12 = vld [vmem:[%s4262_s13 + $0x40] sm:$0xf] }
  0x52   : > { %v400_v9 = vmul.f32 %v3363_v60, %v3360_v53  ;;  %v401_v10 = vmul.f32 %v3363_v60, %v3361_v54  ;;  %v402_v11 = vmul.f32 %v3363_v60, %v3362_v55  ;;  %v3370_v13 = vld [vmem:[%s4262_s13 + $0x48] sm:$0xf]  ;;  %v386_v14 = vadd.f32 %v382_v56, %v369_v63  ;;  %v3371_v18 = vld [vmem:[%s4262_s13 + $0x50] sm:$0xf]  ;;  %v3372_v19 = vld [vmem:[%s4262_s13 + $0x58] sm:$0xf] }
  0x53   : > { %v387_v15 = vadd.f32 %v383_v57, %v370_v0  ;;  %v388_v16 = vadd.f32 %v384_v58, %v371_v1  ;;  %v389_v17 = vadd.f32 %v385_v59, %v372_v2  ;;  %v3373_v20 = vld [vmem:[%s5566_s1 + $0x16] ss:$0 sm:$0xff]  ;;  %v416_v21 = vmul.f32 %v3368_v7, %v3364_v61  ;;  %v3374_v25 = vld [vmem:[%s4262_s13 + $0x10] sm:$0xf]  ;;  %v3375_v26 = vld [vmem:[%s4262_s13 + $0x18] sm:$0xf] }
  0x54   : > { %v417_v22 = vmul.f32 %v3368_v7, %v3365_v62  ;;  %v418_v23 = vmul.f32 %v3368_v7, %v3366_v5  ;;  %v419_v24 = vmul.f32 %v3368_v7, %v3367_v6  ;;  %v403_v27 = vadd.f32 %v399_v8, %v386_v14  ;;  %v3376_v31 = vld [vmem:[%s4262_s13 + $0x20] sm:$0xf]  ;;  %v3377_v32 = vld [vmem:[%s4262_s13 + $0x28] sm:$0xf]  ;;  %v3378_v33 = vld [vmem:[%s5566_s1 + $0x18] ss:$0 sm:$0xff] }
  0x55   : > { %v404_v28 = vadd.f32 %v400_v9, %v387_v15  ;;  %v405_v29 = vadd.f32 %v401_v10, %v388_v16  ;;  %v406_v30 = vadd.f32 %v402_v11, %v389_v17  ;;  %v433_v34 = vmul.f32 %v3373_v20, %v3369_v12  ;;  %v3379_v38 = vld [vmem:[%s4262_s13 + $0x6a] sm:$0xf]  ;;  %v3380_v39 = vld [vmem:[%s4262_s13 + $0x72] sm:$0xf]  ;;  %v3381_v44 = vld [vmem:[%s4262_s13 + $0x7a] sm:$0xf] }
  0x56   : > { %v434_v35 = vmul.f32 %v3373_v20, %v3370_v13  ;;  %v435_v36 = vmul.f32 %v3373_v20, %v3371_v18  ;;  %v436_v37 = vmul.f32 %v3373_v20, %v3372_v19  ;;  %v420_v40 = vadd.f32 %v416_v21, %v403_v27  ;;  %v3382_v45 = vld [vmem:[%s4262_s13 + $0x82] sm:$0xf]  ;;  %v3383_v46 = vld [vmem:[%s5566_s1 + $0x32] ss:$0 sm:$0xff]  ;;  %v3384_v51 = vld [vmem:[%s4262_s13 + $0x3a] sm:$0xf] }
  0x57   : > { %v421_v41 = vadd.f32 %v417_v22, %v404_v28  ;;  %v422_v42 = vadd.f32 %v418_v23, %v405_v29  ;;  %v423_v43 = vadd.f32 %v419_v24, %v406_v30  ;;  %v450_v47 = vmul.f32 %v3378_v33, %v3374_v25  ;;  %v3385_v52 = vld [vmem:[%s4262_s13 + $0x42] sm:$0xf]  ;;  %v3386_v57 = vld [vmem:[%s4262_s13 + $0x4a] sm:$0xf]  ;;  %v3387_v58 = vld [vmem:[%s4262_s13 + $0x52] sm:$0xf] }
  0x58   : > { %v451_v48 = vmul.f32 %v3378_v33, %v3375_v26  ;;  %v452_v49 = vmul.f32 %v3378_v33, %v3376_v31  ;;  %v453_v50 = vmul.f32 %v3378_v33, %v3377_v32  ;;  %v437_v53 = vadd.f32 %v433_v34, %v420_v40  ;;  %v3388_v59 = vld [vmem:[%s5566_s1 + $0x34] ss:$0 sm:$0xff]  ;;  %v3389_v0 = vld [vmem:[%s4262_s13 + $0xa] sm:$0xf]  ;;  %v3391_v8 = vld [vmem:[%s4262_s13 + $0x1a] sm:$0xf] }
  0x59   : > { %v438_v54 = vadd.f32 %v434_v35, %v421_v41  ;;  %v439_v55 = vadd.f32 %v435_v36, %v422_v42  ;;  %v440_v56 = vadd.f32 %v436_v37, %v423_v43  ;;  %v468_v60 = vmul.f32 %v3383_v46, %v3379_v38  ;;  %v3390_v1 = vld [vmem:[%s4262_s13 + $0x12] sm:$0xf]  ;;  %v3392_v9 = vld [vmem:[%s4262_s13 + $0x22] sm:$0xf]  ;;  %v3393_v10 = vld [vmem:[%s5566_s1 + $0x36] ss:$0 sm:$0xff] }
  0x5a   : > { %v469_v61 = vmul.f32 %v3383_v46, %v3380_v39  ;;  %v470_v62 = vmul.f32 %v3383_v46, %v3381_v44  ;;  %v471_v63 = vmul.f32 %v3383_v46, %v3382_v45  ;;  %v454_v2 = vadd.f32 %v450_v47, %v437_v53  ;;  %v3394_v15 = vld [vmem:[%s4262_s13 + $0x69] sm:$0xf]  ;;  %v3395_v16 = vld [vmem:[%s4262_s13 + $0x71] sm:$0xf]  ;;  %v3396_v21 = vld [vmem:[%s4262_s13 + $0x79] sm:$0xf] }
  0x5b   : > { %v455_v5 = vadd.f32 %v451_v48, %v438_v54  ;;  %v456_v6 = vadd.f32 %v452_v49, %v439_v55  ;;  %v457_v7 = vadd.f32 %v453_v50, %v440_v56  ;;  %v486_v11 = vmul.f32 %v3388_v59, %v3384_v51  ;;  %v3397_v22 = vld [vmem:[%s4262_s13 + $0x81] sm:$0xf]  ;;  %v3398_v23 = vld [vmem:[%s5566_s1 + $0x3c] ss:$0 sm:$0xff]  ;;  %v3401_v34 = vld [vmem:[%s4262_s13 + $0x49] sm:$0xf] }
  0x5c   : > { %v487_v12 = vmul.f32 %v3388_v59, %v3385_v52  ;;  %v488_v13 = vmul.f32 %v3388_v59, %v3386_v57  ;;  %v489_v14 = vmul.f32 %v3388_v59, %v3387_v58  ;;  %v472_v17 = vadd.f32 %v468_v60, %v454_v2  ;;  %v3399_v28 = vld [vmem:[%s4262_s13 + $0x39] sm:$0xf]  ;;  %v3400_v29 = vld [vmem:[%s4262_s13 + $0x41] sm:$0xf]  ;;  %v3402_v35 = vld [vmem:[%s4262_s13 + $0x51] sm:$0xf] }
  0x5d   : > { %v473_v18 = vadd.f32 %v469_v61, %v455_v5  ;;  %v474_v19 = vadd.f32 %v470_v62, %v456_v6  ;;  %v475_v20 = vadd.f32 %v471_v63, %v457_v7  ;;  %v504_v24 = vmul.f32 %v3393_v10, %v3389_v0  ;;  %v3403_v36 = vld [vmem:[%s5566_s1 + $0x3e] ss:$0 sm:$0xff]  ;;  %v3404_v41 = vld [vmem:[%s4262_s13 + $0x9] sm:$0xf]  ;;  %v3405_v42 = vld [vmem:[%s4262_s13 + $0x11] sm:$0xf] }
  0x5e   : > { %v505_v25 = vmul.f32 %v3393_v10, %v3390_v1  ;;  %v506_v26 = vmul.f32 %v3393_v10, %v3391_v8  ;;  %v507_v27 = vmul.f32 %v3393_v10, %v3392_v9  ;;  %v490_v30 = vadd.f32 %v486_v11, %v472_v17  ;;  %v3406_v47 = vld [vmem:[%s4262_s13 + $0x19] sm:$0xf]  ;;  %v3407_v48 = vld [vmem:[%s4262_s13 + $0x21] sm:$0xf]  ;;  %v3408_v49 = vld [vmem:[%s5566_s1 + $0x40] ss:$0 sm:$0xff] }
  0x5f   : > { %v491_v31 = vadd.f32 %v487_v12, %v473_v18  ;;  %v492_v32 = vadd.f32 %v488_v13, %v474_v19  ;;  %v493_v33 = vadd.f32 %v489_v14, %v475_v20  ;;  %v521_v37 = vmul.f32 %v3398_v23, %v3394_v15  ;;  %v3409_v54 = vld [vmem:[%s4262_s13 + $0x68] sm:$0xf]  ;;  %v3410_v55 = vld [vmem:[%s4262_s13 + $0x70] sm:$0xf]  ;;  %v3411_v60 = vld [vmem:[%s4262_s13 + $0x78] sm:$0xf] }
  0x60   : > { %v522_v38 = vmul.f32 %v3398_v23, %v3395_v16  ;;  %v523_v39 = vmul.f32 %v3398_v23, %v3396_v21  ;;  %v524_v40 = vmul.f32 %v3398_v23, %v3397_v22  ;;  %v508_v43 = vadd.f32 %v504_v24, %v490_v30  ;;  %v3412_v61 = vld [vmem:[%s4262_s13 + $0x80] sm:$0xf]  ;;  %v3413_v62 = vld [vmem:[%s5566_s1 + $0x46] ss:$0 sm:$0xff]  ;;  %v3414_v5 = vld [vmem:[%s4262_s13 + $0x38] sm:$0xf] }
  0x61   : > { %v509_v44 = vadd.f32 %v505_v25, %v491_v31  ;;  %v510_v45 = vadd.f32 %v506_v26, %v492_v32  ;;  %v511_v46 = vadd.f32 %v507_v27, %v493_v33  ;;  %v538_v50 = vmul.f32 %v3403_v36, %v3399_v28  ;;  %v3415_v6 = vld [vmem:[%s4262_s13 + $0x40] sm:$0xf]  ;;  %v3416_v11 = vld [vmem:[%s4262_s13 + $0x48] sm:$0xf]  ;;  %v3417_v12 = vld [vmem:[%s4262_s13 + $0x50] sm:$0xf] }
  0x62   : > { %v539_v51 = vmul.f32 %v3403_v36, %v3400_v29  ;;  %v540_v52 = vmul.f32 %v3403_v36, %v3401_v34  ;;  %v541_v53 = vmul.f32 %v3403_v36, %v3402_v35  ;;  %v525_v56 = vadd.f32 %v521_v37, %v508_v43  ;;  %v3418_v13 = vld [vmem:[%s5566_s1 + $0x48] ss:$0 sm:$0xff]  ;;  %v3420_v19 = vld [vmem:[%s4262_s13 + $0x10] sm:$0xf]  ;;  %v3421_v24 = vld [vmem:[%s4262_s13 + $0x18] sm:$0xf] }
  0x63   : > { %v526_v57 = vadd.f32 %v522_v38, %v509_v44  ;;  %v527_v58 = vadd.f32 %v523_v39, %v510_v45  ;;  %v528_v59 = vadd.f32 %v524_v40, %v511_v46  ;;  %v555_v63 = vmul.f32 %v3408_v49, %v3404_v41  ;;  %v3419_v18 = vld [vmem:[%s4262_s13 + $0x8] sm:$0xf]  ;;  %v3422_v25 = vld [vmem:[%s4262_s13 + $0x20] sm:$0xf]  ;;  %v3426_v37 = vld [vmem:[%s4262_s13 + $0x72] sm:$0xf] }
  0x64   : > { %v556_v0 = vmul.f32 %v3408_v49, %v3405_v42  ;;  %v557_v1 = vmul.f32 %v3408_v49, %v3406_v47  ;;  %v558_v2 = vmul.f32 %v3408_v49, %v3407_v48  ;;  %v542_v7 = vadd.f32 %v538_v50, %v525_v56  ;;  %v3423_v26 = vld [vmem:[%s5566_s1 + $0x4a] ss:$0 sm:$0xff]  ;;  %v3424_v31 = vld [vmem:[%s4262_s13 + $0x62] sm:$0xf]  ;;  %v3427_v38 = vld [vmem:[%s4262_s13 + $0x7a] sm:$0xf] }
  0x65   : > { %v543_v8 = vadd.f32 %v539_v51, %v526_v57  ;;  %v544_v9 = vadd.f32 %v540_v52, %v527_v58  ;;  %v545_v10 = vadd.f32 %v541_v53, %v528_v59  ;;  %v572_v14 = vmul.f32 %v3413_v62, %v3409_v54  ;;  %v3425_v32 = vld [vmem:[%s4262_s13 + $0x6a] sm:$0xf]  ;;  %v3428_v39 = vld [vmem:[%s5566_s1 + $0x64] ss:$0 sm:$0xff]  ;;  %v3429_v44 = vld [vmem:[%s4262_s13 + $0x32] sm:$0xf] }
  0x66   : > { %v573_v15 = vmul.f32 %v3413_v62, %v3410_v55  ;;  %v574_v16 = vmul.f32 %v3413_v62, %v3411_v60  ;;  %v575_v17 = vmul.f32 %v3413_v62, %v3412_v61  ;;  %v559_v20 = vadd.f32 %v555_v63, %v542_v7  ;;  %v3430_v45 = vld [vmem:[%s4262_s13 + $0x3a] sm:$0xf]  ;;  %v3431_v50 = vld [vmem:[%s4262_s13 + $0x42] sm:$0xf]  ;;  %v3432_v51 = vld [vmem:[%s4262_s13 + $0x4a] sm:$0xf] }
  0x67   : > { %v560_v21 = vadd.f32 %v556_v0, %v543_v8  ;;  %v561_v22 = vadd.f32 %v557_v1, %v544_v9  ;;  %v562_v23 = vadd.f32 %v558_v2, %v545_v10  ;;  %v589_v27 = vmul.f32 %v3418_v13, %v3414_v5  ;;  %v3433_v52 = vld [vmem:[%s5566_s1 + $0x66] ss:$0 sm:$0xff]  ;;  %v650_v57 = vld [vmem:[%s4262_s13 + $0x2] sm:$0xf]  ;;  %v651_v58 = vld [vmem:[%s4262_s13 + $0xa] sm:$0xf] }
  0x68   : > { %v590_v28 = vmul.f32 %v3418_v13, %v3415_v6  ;;  %v591_v29 = vmul.f32 %v3418_v13, %v3416_v11  ;;  %v592_v30 = vmul.f32 %v3418_v13, %v3417_v12  ;;  %v576_v33 = vadd.f32 %v572_v14, %v559_v20  ;;  %v652_v63 = vld [vmem:[%s4262_s13 + $0x12] sm:$0xf]  ;;  %v653_v0 = vld [vmem:[%s4262_s13 + $0x1a] sm:$0xf]  ;;  %v3434_v1 = vld [vmem:[%s5566_s1 + $0x68] ss:$0 sm:$0xff] }
  0x69   : > { %v577_v34 = vadd.f32 %v573_v15, %v560_v21  ;;  %v578_v35 = vadd.f32 %v574_v16, %v561_v22  ;;  %v579_v36 = vadd.f32 %v575_v17, %v562_v23  ;;  %v606_v40 = vmul.f32 %v3423_v26, %v3419_v18  ;;  %v3435_v8 = vld [vmem:[%s4262_s13 + $0x61] sm:$0xf]  ;;  %v3436_v9 = vld [vmem:[%s4262_s13 + $0x69] sm:$0xf]  ;;  %v3437_v14 = vld [vmem:[%s4262_s13 + $0x71] sm:$0xf] }
  0x6a   : > { %v607_v41 = vmul.f32 %v3423_v26, %v3420_v19  ;;  %v608_v42 = vmul.f32 %v3423_v26, %v3421_v24  ;;  %v609_v43 = vmul.f32 %v3423_v26, %v3422_v25  ;;  %v593_v46 = vadd.f32 %v589_v27, %v576_v33  ;;  %v3438_v15 = vld [vmem:[%s4262_s13 + $0x79] sm:$0xf]  ;;  %v3439_v16 = vld [vmem:[%s5566_s1 + $0x6e] ss:$0 sm:$0xff]  ;;  %v3440_v21 = vld [vmem:[%s4262_s13 + $0x31] sm:$0xf] }
  0x6b   : > { %v594_v47 = vadd.f32 %v590_v28, %v577_v34  ;;  %v595_v48 = vadd.f32 %v591_v29, %v578_v35  ;;  %v596_v49 = vadd.f32 %v592_v30, %v579_v36  ;;  %v624_v53 = vmul.f32 %v3428_v39, %v3424_v31  ;;  %v3441_v22 = vld [vmem:[%s4262_s13 + $0x39] sm:$0xf]  ;;  %v3442_v27 = vld [vmem:[%s4262_s13 + $0x41] sm:$0xf]  ;;  %v3443_v28 = vld [vmem:[%s4262_s13 + $0x49] sm:$0xf] }
  0x6c   : > { %v625_v54 = vmul.f32 %v3428_v39, %v3425_v32  ;;  %v626_v55 = vmul.f32 %v3428_v39, %v3426_v37  ;;  %v627_v56 = vmul.f32 %v3428_v39, %v3427_v38  ;;  %v610_v59 = vadd.f32 %v606_v40, %v593_v46  ;;  %v3444_v29 = vld [vmem:[%s5566_s1 + $0x70] ss:$0 sm:$0xff]  ;;  %v701_v34 = vld [vmem:[%s4262_s13 + $0x1] sm:$0xf]  ;;  %v702_v35 = vld [vmem:[%s4262_s13 + $0x9] sm:$0xf] }
  0x6d   : > { %v611_v60 = vadd.f32 %v607_v41, %v594_v47  ;;  %v612_v61 = vadd.f32 %v608_v42, %v595_v48  ;;  %v613_v62 = vadd.f32 %v609_v43, %v596_v49  ;;  %v642_v2 = vmul.f32 %v3433_v52, %v3429_v44  ;;  %v703_v40 = vld [vmem:[%s4262_s13 + $0x11] sm:$0xf]  ;;  %v704_v41 = vld [vmem:[%s4262_s13 + $0x19] sm:$0xf]  ;;  %v3446_v47 = vld [vmem:[%s4262_s13 + $0x60] sm:$0xf] }
  0x6e   : > { %v643_v5 = vmul.f32 %v3433_v52, %v3430_v45  ;;  %v644_v6 = vmul.f32 %v3433_v52, %v3431_v50  ;;  %v645_v7 = vmul.f32 %v3433_v52, %v3432_v51  ;;  %v628_v10 = vadd.f32 %v624_v53, %v610_v59  ;;  %v3445_v42 = vld [vmem:[%s5566_s1 + $0x72] ss:$0 sm:$0xff]  ;;  %v3447_v48 = vld [vmem:[%s4262_s13 + $0x68] sm:$0xf]  ;;  %vm4799_vm6 = vmand %vm1477_vm4, %vm1478_vm5 }
  0x6f   : > { %v629_v11 = vadd.f32 %v625_v54, %v611_v60  ;;  %v630_v12 = vadd.f32 %v626_v55, %v612_v61  ;;  %v631_v13 = vadd.f32 %v627_v56, %v613_v62  ;;  %v659_v17 = vmul.f32 %v3434_v1, %v650_v57  ;;  %v3448_v53 = vld [vmem:[%s4262_s13 + $0x70] sm:$0xf]  ;;  %v3449_v54 = vld [vmem:[%s4262_s13 + $0x78] sm:$0xf]  ;;  %vm4921_vm7 = vmand %vm1477_vm4, %vm1127_vm2 }
  0x70   : > { %v660_v18 = vmul.f32 %v3434_v1, %v651_v58  ;;  %v661_v19 = vmul.f32 %v3434_v1, %v652_v63  ;;  %v662_v20 = vmul.f32 %v3434_v1, %v653_v0  ;;  %v646_v23 = vadd.f32 %v642_v2, %v628_v10  ;;  %v3450_v55 = vld [vmem:[%s5566_s1 + $0x78] ss:$0 sm:$0xff]  ;;  %v3451_v60 = vld [vmem:[%s4262_s13 + $0x30] sm:$0xf]  ;;  %v3453_v2 = vld [vmem:[%s4262_s13 + $0x40] sm:$0xf] }
  0x71   : > { %v647_v24 = vadd.f32 %v643_v5, %v629_v11  ;;  %v648_v25 = vadd.f32 %v644_v6, %v630_v12  ;;  %v649_v26 = vadd.f32 %v645_v7, %v631_v13  ;;  %v676_v30 = vmul.f32 %v3439_v16, %v3435_v8  ;;  %v3452_v61 = vld [vmem:[%s4262_s13 + $0x38] sm:$0xf]  ;;  %v3454_v5 = vld [vmem:[%s4262_s13 + $0x48] sm:$0xf]  ;;  %v752_v11 = vld [vmem:[%s4262_s13] sm:$0xf] }
  0x72   : > { %v677_v31 = vmul.f32 %v3439_v16, %v3436_v9  ;;  %v678_v32 = vmul.f32 %v3439_v16, %v3437_v14  ;;  %v679_v33 = vmul.f32 %v3439_v16, %v3438_v15  ;;  %v663_v36 = vadd.f32 %v659_v17, %v646_v23  ;;  %v3455_v6 = vld [vmem:[%s5566_s1 + $0x7a] ss:$0 sm:$0xff]  ;;  %v753_v12 = vld [vmem:[%s4262_s13 + $0x8] sm:$0xf]  ;;  %v754_v17 = vld [vmem:[%s4262_s13 + $0x10] sm:$0xf] }
  0x73   : > { %v664_v37 = vadd.f32 %v660_v18, %v647_v24  ;;  %v665_v38 = vadd.f32 %v661_v19, %v648_v25  ;;  %v666_v39 = vadd.f32 %v662_v20, %v649_v26  ;;  %v693_v43 = vmul.f32 %v3444_v29, %v3440_v21  ;;  %v755_v18 = vld [vmem:[%s4262_s13 + $0x18] sm:$0xf]  ;;  %v3456_v19 = vld [vmem:[%s5566_s1 + $0x7c] ss:$0 sm:$0xff]  ;;  %v3458_v24 = vld [vmem:[%s4262_s13 + $0x72] sm:$0xf] }
  0x74   : > { %v694_v44 = vmul.f32 %v3444_v29, %v3441_v22  ;;  %v695_v45 = vmul.f32 %v3444_v29, %v3442_v27  ;;  %v696_v46 = vmul.f32 %v3444_v29, %v3443_v28  ;;  %v680_v49 = vadd.f32 %v676_v30, %v663_v36  ;;  %v3459_v25 = vld [vmem:[%s4262_s13 + $0x7a] sm:$0xf]  ;;  %v3460_v30 = vld [vmem:[%s4262_s13 + $0x82] sm:$0xf]  ;;  %vm5085_vm8 = vmand %vm1124_vm1, %vm1478_vm5 }
  0x75   : > { %v681_v50 = vadd.f32 %v677_v31, %v664_v37  ;;  %v682_v51 = vadd.f32 %v678_v32, %v665_v38  ;;  %v683_v52 = vadd.f32 %v679_v33, %v666_v39  ;;  %v710_v56 = vmul.f32 %v3445_v42, %v701_v34  ;;  %v3461_v31 = vld [vmem:[%s4262_s13 + $0x8a] sm:$0xf]  ;;  %v3462_v32 = vld [vmem:[%s5566_s1 + $0x1] ss:$0 sm:$0xff]  ;;  %v3463_v37 = vld [vmem:[%s4262_s13 + $0x42] sm:$0xf] }
  0x76   : > { %v711_v57 = vmul.f32 %v3445_v42, %v702_v35  ;;  %v712_v58 = vmul.f32 %v3445_v42, %v703_v40  ;;  %v713_v59 = vmul.f32 %v3445_v42, %v704_v41  ;;  %v697_v62 = vadd.f32 %v693_v43, %v680_v49  ;;  %v3464_v38 = vld [vmem:[%s4262_s13 + $0x4a] sm:$0xf]  ;;  %v3465_v43 = vld [vmem:[%s4262_s13 + $0x52] sm:$0xf] }
  0x77   : > { %v698_v63 = vadd.f32 %v694_v44, %v681_v50  ;;  %v699_v0 = vadd.f32 %v695_v45, %v682_v51  ;;  %v700_v1 = vadd.f32 %v696_v46, %v683_v52  ;;  %v727_v7 = vmul.f32 %v3450_v55, %v3446_v47  ;;  %v3466_v44 = vld [vmem:[%s4262_s13 + $0x5a] sm:$0xf]  ;;  %v3467_v45 = vld [vmem:[%s5566_s1 + $0x3] ss:$0 sm:$0xff]  ;;  %v4474_v46 = vld [vmem:[%s5567_s2] ss:$0 sm:$0xff] }
  0x78   : > { %v728_v8 = vmul.f32 %v3450_v55, %v3447_v48  ;;  %v729_v9 = vmul.f32 %v3450_v55, %v3448_v53  ;;  %v730_v10 = vmul.f32 %v3450_v55, %v3449_v54  ;;  %v714_v13 = vadd.f32 %v710_v56, %v697_v62 }
  0x79   : > { %v715_v14 = vadd.f32 %v711_v57, %v698_v63  ;;  %v716_v15 = vadd.f32 %v712_v58, %v699_v0  ;;  %v717_v16 = vadd.f32 %v713_v59, %v700_v1  ;;  %v744_v20 = vmul.f32 %v3455_v6, %v3451_v60  ;;  %v3468_v63 = vld [vmem:[%s4262_s13 + $0x71] sm:$0xf] }
  0x7a   : > { %v745_v21 = vmul.f32 %v3455_v6, %v3452_v61  ;;  %v746_v22 = vmul.f32 %v3455_v6, %v3453_v2  ;;  %v747_v23 = vmul.f32 %v3455_v6, %v3454_v5  ;;  %v731_v26 = vadd.f32 %v727_v7, %v714_v13  ;;  %v3469_v6 = vld [vmem:[%s4262_s13 + $0x79] sm:$0xf]  ;;  %v3470_v7 = vld [vmem:[%s4262_s13 + $0x81] sm:$0xf] }
  0x7b   : > { %v732_v27 = vadd.f32 %v728_v8, %v715_v14  ;;  %v733_v28 = vadd.f32 %v729_v9, %v716_v15  ;;  %v734_v29 = vadd.f32 %v730_v10, %v717_v16  ;;  %v761_v33 = vmul.f32 %v3456_v19, %v752_v11  ;;  %v3472_v8 = vld [vmem:[%s5566_s1 + $0xb] ss:$0 sm:$0xff] }
  0x7c   : > { %v762_v34 = vmul.f32 %v3456_v19, %v753_v12  ;;  %v763_v35 = vmul.f32 %v3456_v19, %v754_v17  ;;  %v764_v36 = vmul.f32 %v3456_v19, %v755_v18  ;;  %v748_v39 = vadd.f32 %v744_v20, %v731_v26  ;;  %v3471_v17 = vld [vmem:[%s4262_s13 + $0x89] sm:$0xf]  ;;  %v3473_v18 = vld [vmem:[%s4262_s13 + $0x41] sm:$0xf] }
  0x7d   : > { %v749_v40 = vadd.f32 %v745_v21, %v732_v27  ;;  %v750_v41 = vadd.f32 %v746_v22, %v733_v28  ;;  %v751_v42 = vadd.f32 %v747_v23, %v734_v29  ;;  %v825_v47 = vmul.f32 %v3462_v32, %v3458_v24  ;;  %v3474_v23 = vld [vmem:[%s4262_s13 + $0x49] sm:$0xf]  ;;  %v3475_v24 = vld [vmem:[%s4262_s13 + $0x51] sm:$0xf] }
  0x7e   : > { %v826_v48 = vmul.f32 %v3462_v32, %v3459_v25  ;;  %v827_v49 = vmul.f32 %v3462_v32, %v3460_v30  ;;  %v828_v50 = vmul.f32 %v3462_v32, %v3461_v31  ;;  %v765_v51 = vadd.f32 %v761_v33, %v748_v39  ;;  %v3477_v25 = vld [vmem:[%s5566_s1 + $0xd] ss:$0 sm:$0xff]  ;;  %v3476_v30 = vld [vmem:[%s4262_s13 + $0x59] sm:$0xf] }
  0x7f   : > { %v766_v52 = vadd.f32 %v762_v34, %v749_v40  ;;  %v767_v53 = vadd.f32 %v763_v35, %v750_v41  ;;  %v768_v54 = vadd.f32 %v764_v36, %v751_v42  ;;  %v838_v55 = vmul.f32 %v3467_v45, %v3463_v37  ;;  %v3478_v35 = vld [vmem:[%s4262_s13 + $0x70] sm:$0xf]  ;;  %v3482_v36 = vld [vmem:[%s5566_s1 + $0x15] ss:$0 sm:$0xff]  ;;  %v3479_v41 = vld [vmem:[%s4262_s13 + $0x78] sm:$0xf] }
  0x80   : > { %v839_v56 = vmul.f32 %v3467_v45, %v3464_v38  ;;  %v840_v57 = vmul.f32 %v3467_v45, %v3465_v43  ;;  %v841_v58 = vmul.f32 %v3467_v45, %v3466_v44  ;;  %v775_v59 = vadd.f32 %v4474_v46, %v765_v51 }
  0x81   : > { %v776_v60 = vadd.f32 %v4474_v46, %v766_v52  ;;  %v777_v61 = vadd.f32 %v4474_v46, %v767_v53  ;;  %v778_v62 = vadd.f32 %v4474_v46, %v768_v54  ;;  %v842_v0 = vadd.f32 %v838_v55, %v825_v47  ;;  %v3480_v47 = vld [vmem:[%s4262_s13 + $0x80] sm:$0xf]  ;;  %v3487_v54 = vld [vmem:[%s5566_s1 + $0x17] ss:$0 sm:$0xff] }
  0x82   : > { %v843_v1 = vadd.f32 %v839_v56, %v826_v48  ;;  %v844_v2 = vadd.f32 %v840_v57, %v827_v49  ;;  %v845_v5 = vadd.f32 %v841_v58, %v828_v50  ;;  %v780_v9 = vsel %vm779_vm0, %v775_v59, 0.0  ;;  %812 = vst.msk [vmem:[#allocation2] sm:$0xf] %vm779_vm0, %v775_v59  ;;  %v3481_v48 = vld [vmem:[%s4262_s13 + $0x88] sm:$0xf] }
  0x83   : > { %v781_v10 = vsel %vm779_vm0, %v776_v60, 0.0  ;;  %v783_v11 = vsel %vm779_vm0, %v777_v61, 0.0  ;;  %v785_v12 = vsel %vm779_vm0, %v778_v62, 0.0  ;;  %813 = vst.msk [vmem:[#allocation2 + $0x4] sm:$0xf] %vm779_vm0, %v776_v60  ;;  %v794_v14 = vmul.f32 %v775_v59, %v775_v59 }
  0x84   : > { %814 = vst.msk [vmem:[#allocation2 + $0x8] sm:$0xf] %vm779_vm0, %v777_v61  ;;  %815 = vst.msk [vmem:[#allocation2 + $0xc] sm:$0xf] %vm779_vm0, %v778_v62  ;;  %v782_v13 = vadd.f32 %v781_v10, %v780_v9  ;;  %v795_v15 = vmul.f32 %v776_v60, %v776_v60  ;;  %v796_v16 = vmul.f32 %v777_v61, %v777_v61  ;;  %v3483_v53 = vld [vmem:[%s4262_s13 + $0x40] sm:$0xf] }
  0x85   : > { %v797_v19 = vmul.f32 %v778_v62, %v778_v62  ;;  %v855_v20 = vmul.f32 %v3472_v8, %v3468_v63  ;;  %v856_v21 = vmul.f32 %v3472_v8, %v3469_v6  ;;  %v857_v22 = vmul.f32 %v3472_v8, %v3470_v7  ;;  %v3484_v59 = vld [vmem:[%s4262_s13 + $0x48] sm:$0xf]  ;;  %v3489_v9 = vld [vmem:[%s4262_s13 + $0x72] sm:$0xf] }
  0x86   : > { %v784_v26 = vadd.f32 %v783_v11, %v782_v13  ;;  %v798_v27 = vsel %vm779_vm0, %v794_v14, 0.0  ;;  %v799_v28 = vsel %vm779_vm0, %v795_v15, 0.0  ;;  %v801_v29 = vsel %vm779_vm0, %v796_v16, 0.0  ;;  %v3492_v10 = vld [vmem:[%s5566_s1 + $0x33] ss:$0 sm:$0xff] }
  0x87   : > { %v800_v31 = vadd.f32 %v799_v28, %v798_v27  ;;  %v803_v32 = vsel %vm779_vm0, %v797_v19, 0.0  ;;  %v858_v33 = vmul.f32 %v3472_v8, %v3471_v17  ;;  %v859_v34 = vadd.f32 %v855_v20, %v842_v0  ;;  %v3485_v0 = vld [vmem:[%s4262_s13 + $0x50] sm:$0xf]  ;;  %v3490_v15 = vld [vmem:[%s4262_s13 + $0x7a] sm:$0xf] }
  0x88   : > { %v786_v37 = vadd.f32 %v785_v12, %v784_v26  ;;  %v860_v38 = vadd.f32 %v856_v21, %v843_v1  ;;  %v861_v39 = vadd.f32 %v857_v22, %v844_v2  ;;  %v872_v40 = vmul.f32 %v3477_v25, %v3473_v18  ;;  %v3486_v1 = vld [vmem:[%s4262_s13 + $0x58] sm:$0xf]  ;;  %v3488_v2 = vld [vmem:[%s4262_s13 + $0x6a] sm:$0xf]  ;;  %v3491_v20 = vld [vmem:[%s4262_s13 + $0x82] sm:$0xf] }
  0x89   : > { %v802_v42 = vadd.f32 %v801_v29, %v800_v31  ;;  %v862_v43 = vadd.f32 %v858_v33, %v845_v5  ;;  %v873_v44 = vmul.f32 %v3477_v25, %v3474_v23  ;;  %v874_v45 = vmul.f32 %v3477_v25, %v3475_v24  ;;  %v3494_v26 = vld [vmem:[%s4262_s13 + $0x42] sm:$0xf]  ;;  %v3497_v27 = vld [vmem:[%s5566_s1 + $0x35] ss:$0 sm:$0xff] }
  0x8a   : > { %v787_v49 = vrot.slane %v786_v37, 4  ;;  %v875_v50 = vmul.f32 %v3477_v25, %v3476_v30  ;;  %v876_v51 = vadd.f32 %v872_v40, %v859_v34  ;;  %v889_v52 = vmul.f32 %v3482_v36, %v3478_v35  ;;  %v3493_v25 = vld [vmem:[%s4262_s13 + $0x3a] sm:$0xf]  ;;  %v3496_v33 = vld [vmem:[%s4262_s13 + $0x52] sm:$0xf] }
  0x8b   : > { %v804_v55 = vadd.f32 %v803_v32, %v802_v42  ;;  %v877_v56 = vadd.f32 %v873_v44, %v860_v38  ;;  %v878_v57 = vadd.f32 %v874_v45, %v861_v39  ;;  %v890_v58 = vmul.f32 %v3482_v36, %v3479_v41  ;;  %v3495_v32 = vld [vmem:[%s4262_s13 + $0x4a] sm:$0xf]  ;;  %v3502_v39 = vld [vmem:[%s5566_s1 + $0x3d] ss:$0 sm:$0xff]  ;;  %v3499_v44 = vld [vmem:[%s4262_s13 + $0x71] sm:$0xf] }
  0x8c   : > { %v788_v60 = vadd.f32 %v787_v49, %v786_v37  ;;  %v879_v61 = vadd.f32 %v875_v50, %v862_v43  ;;  %v891_v62 = vmul.f32 %v3482_v36, %v3480_v47  ;;  %v892_v63 = vmul.f32 %v3482_v36, %v3481_v48  ;;  %v3498_v38 = vld [vmem:[%s4262_s13 + $0x69] sm:$0xf]  ;;  %v3500_v45 = vld [vmem:[%s4262_s13 + $0x79] sm:$0xf] }
  0x8d   : > { %v805_v5 = vrot.slane %v804_v55, 4  ;;  %v893_v6 = vadd.f32 %v889_v52, %v876_v51  ;;  %v894_v7 = vadd.f32 %v890_v58, %v877_v56  ;;  %v906_v8 = vmul.f32 %v3487_v54, %v3483_v53  ;;  %v3501_v51 = vld [vmem:[%s4262_s13 + $0x81] sm:$0xf]  ;;  %v3503_v52 = vld [vmem:[%s4262_s13 + $0x39] sm:$0xf] }
  0x8e   : > { %v789_v11 = vrot.slane %v788_v60, 2  ;;  %v895_v12 = vadd.f32 %v891_v62, %v878_v57  ;;  %v896_v13 = vadd.f32 %v892_v63, %v879_v61  ;;  %v907_v14 = vmul.f32 %v3487_v54, %v3484_v59  ;;  %v3507_v53 = vld [vmem:[%s5566_s1 + $0x3f] ss:$0 sm:$0xff]  ;;  %v3504_v58 = vld [vmem:[%s4262_s13 + $0x41] sm:$0xf] }
  0x8f   : > { %v806_v16 = vadd.f32 %v805_v5, %v804_v55  ;;  %v908_v17 = vmul.f32 %v3487_v54, %v3485_v0  ;;  %v909_v18 = vmul.f32 %v3487_v54, %v3486_v1  ;;  %v910_v19 = vadd.f32 %v906_v8, %v893_v6  ;;  %v3505_v59 = vld [vmem:[%s4262_s13 + $0x49] sm:$0xf]  ;;  %v3506_v0 = vld [vmem:[%s4262_s13 + $0x51] sm:$0xf] }
  0x90   : > { %v790_v21 = vadd.f32 %v789_v11, %v788_v60  ;;  %v911_v22 = vadd.f32 %v907_v14, %v894_v7  ;;  %v923_v23 = vmul.f32 %v3492_v10, %v3488_v2  ;;  %v924_v24 = vmul.f32 %v3492_v10, %v3489_v9  ;;  %v3508_v1 = vld [vmem:[%s4262_s13 + $0x68] sm:$0xf]  ;;  %v3512_v2 = vld [vmem:[%s5566_s1 + $0x47] ss:$0 sm:$0xff]  ;;  %v3509_v9 = vld [vmem:[%s4262_s13 + $0x70] sm:$0xf] }
  0x91   : > { %v807_v28 = vrot.slane %v806_v16, 2  ;;  %v912_v29 = vadd.f32 %v908_v17, %v895_v12  ;;  %v913_v30 = vadd.f32 %v909_v18, %v896_v13  ;;  %v925_v31 = vmul.f32 %v3492_v10, %v3490_v15  ;;  %v3511_v15 = vld [vmem:[%s4262_s13 + $0x80] sm:$0xf]  ;;  %v3517_v17 = vld [vmem:[%s5566_s1 + $0x49] ss:$0 sm:$0xff] }
  0x92   : > { %v791_v34 = vrot.slane %v790_v21, 1  ;;  %v926_v35 = vmul.f32 %v3492_v10, %v3491_v20  ;;  %v927_v36 = vadd.f32 %v923_v23, %v910_v19  ;;  %v928_v37 = vadd.f32 %v924_v24, %v911_v22  ;;  %v3510_v10 = vld [vmem:[%s4262_s13 + $0x78] sm:$0xf]  ;;  %v3514_v22 = vld [vmem:[%s4262_s13 + $0x40] sm:$0xf] }
  0x93   : > { %v808_v40 = vadd.f32 %v807_v28, %v806_v16  ;;  %v929_v41 = vadd.f32 %v925_v31, %v912_v29  ;;  %v940_v42 = vmul.f32 %v3497_v27, %v3493_v25  ;;  %v941_v43 = vmul.f32 %v3497_v27, %v3494_v26  ;;  %v3513_v16 = vld [vmem:[%s4262_s13 + $0x38] sm:$0xf]  ;;  %v3515_v23 = vld [vmem:[%s4262_s13 + $0x48] sm:$0xf]  ;;  %v3516_v28 = vld [vmem:[%s4262_s13 + $0x50] sm:$0xf] }
  0x94   : > { %v4540_v47 = vadd.f32 %v791_v34, %v790_v21  ;;  %v930_v48 = vadd.f32 %v926_v35, %v913_v30  ;;  %v942_v49 = vmul.f32 %v3497_v27, %v3495_v32  ;;  %v943_v50 = vmul.f32 %v3497_v27, %v3496_v33  ;;  %v3518_v29 = vld [vmem:[%s4262_s13 + $0x62] sm:$0xf]  ;;  %v3519_v35 = vld [vmem:[%s4262_s13 + $0x6a] sm:$0xf] }
  0x95   : > { %v809_v54 = vrot.slane %v808_v40, 1  ;;  %v944_v55 = vadd.f32 %v940_v42, %v927_v36  ;;  %v945_v56 = vadd.f32 %v941_v43, %v928_v37  ;;  %v957_v57 = vmul.f32 %v3502_v39, %v3498_v38  ;;  %v3522_v30 = vld [vmem:[%s5566_s1 + $0x65] ss:$0 sm:$0xff]  ;;  %v3520_v36 = vld [vmem:[%s4262_s13 + $0x72] sm:$0xf] }
  0x96   : > { %v946_v60 = vadd.f32 %v942_v49, %v929_v41  ;;  %v947_v61 = vadd.f32 %v943_v50, %v930_v48  ;;  %v958_v62 = vmul.f32 %v3502_v39, %v3499_v44  ;;  %v959_v63 = vmul.f32 %v3502_v39, %v3500_v45  ;;  %v3521_v41 = vld [vmem:[%s4262_s13 + $0x7a] sm:$0xf]  ;;  %v3523_v42 = vld [vmem:[%s4262_s13 + $0x32] sm:$0xf]  ;;  %v3527_v43 = vld [vmem:[%s5566_s1 + $0x67] ss:$0 sm:$0xff] }
  0x97   : > { %v4554_v5 = vadd.f32 %v809_v54, %v808_v40  ;;  %v960_v6 = vmul.f32 %v3502_v39, %v3501_v51  ;;  %v961_v7 = vadd.f32 %v957_v57, %v944_v55  ;;  %v974_v8 = vmul.f32 %v3507_v53, %v3503_v52  ;;  %v3524_v50 = vld [vmem:[%s4262_s13 + $0x3a] sm:$0xf]  ;;  %v3525_v51 = vld [vmem:[%s4262_s13 + $0x42] sm:$0xf] }
  0x98   : > { %v962_v11 = vadd.f32 %v958_v62, %v945_v56  ;;  %v963_v12 = vadd.f32 %v959_v63, %v946_v60  ;;  %v975_v13 = vmul.f32 %v3507_v53, %v3504_v58  ;;  %v976_v14 = vmul.f32 %v3507_v53, %v3505_v59  ;;  %v3526_v56 = vld [vmem:[%s4262_s13 + $0x4a] sm:$0xf]  ;;  %v3528_v57 = vld [vmem:[%s4262_s13 + $0x61] sm:$0xf]  ;;  %v3532_v58 = vld [vmem:[%s5566_s1 + $0x6f] ss:$0 sm:$0xff] }
  0x99   : > { %v964_v18 = vadd.f32 %v960_v6, %v947_v61  ;;  %v977_v19 = vmul.f32 %v3507_v53, %v3506_v0  ;;  %v978_v20 = vadd.f32 %v974_v8, %v961_v7  ;;  %v991_v21 = vmul.f32 %v3512_v2, %v3508_v1  ;;  %v3529_v63 = vld [vmem:[%s4262_s13 + $0x69] sm:$0xf]  ;;  %v3530_v0 = vld [vmem:[%s4262_s13 + $0x71] sm:$0xf]  ;;  %v3531_v8 = vld [vmem:[%s4262_s13 + $0x79] sm:$0xf] }
  0x9a   : > { %v979_v24 = vadd.f32 %v975_v13, %v962_v11  ;;  %v980_v25 = vadd.f32 %v976_v14, %v963_v12  ;;  %v992_v26 = vmul.f32 %v3512_v2, %v3509_v9  ;;  %v993_v27 = vmul.f32 %v3512_v2, %v3510_v10  ;;  %v3533_v9 = vld [vmem:[%s4262_s13 + $0x31] sm:$0xf] }
  0x9b   : > { %v981_v31 = vadd.f32 %v977_v19, %v964_v18  ;;  %v994_v32 = vmul.f32 %v3512_v2, %v3511_v15  ;;  %v995_v33 = vadd.f32 %v991_v21, %v978_v20  ;;  %v1008_v34 = vmul.f32 %v3517_v17, %v3513_v16  ;;  %v3537_v10 = vld [vmem:[%s5566_s1 + $0x71] ss:$0 sm:$0xff]  ;;  %v3534_v15 = vld [vmem:[%s4262_s13 + $0x39] sm:$0xf]  ;;  %v3535_v16 = vld [vmem:[%s4262_s13 + $0x41] sm:$0xf] }
  0x9c   : > { %v996_v37 = vadd.f32 %v992_v26, %v979_v24  ;;  %v997_v38 = vadd.f32 %v993_v27, %v980_v25  ;;  %v1009_v39 = vmul.f32 %v3517_v17, %v3514_v22  ;;  %v1010_v40 = vmul.f32 %v3517_v17, %v3515_v23  ;;  %v3536_v21 = vld [vmem:[%s4262_s13 + $0x49] sm:$0xf]  ;;  %v3538_v22 = vld [vmem:[%s4262_s13 + $0x60] sm:$0xf]  ;;  %v3542_v23 = vld [vmem:[%s5566_s1 + $0x79] ss:$0 sm:$0xff] }
  0x9d   : > { %v998_v44 = vadd.f32 %v994_v32, %v981_v31  ;;  %v1011_v45 = vmul.f32 %v3517_v17, %v3516_v28  ;;  %v1012_v48 = vadd.f32 %v1008_v34, %v995_v33  ;;  %v1025_v49 = vmul.f32 %v3522_v30, %v3518_v29  ;;  %v3539_v28 = vld [vmem:[%s4262_s13 + $0x68] sm:$0xf]  ;;  %v3540_v29 = vld [vmem:[%s4262_s13 + $0x70] sm:$0xf]  ;;  %v3541_v34 = vld [vmem:[%s4262_s13 + $0x78] sm:$0xf] }
  0x9e   : > { %v1013_v52 = vadd.f32 %v1009_v39, %v996_v37  ;;  %v1014_v53 = vadd.f32 %v1010_v40, %v997_v38  ;;  %v1026_v54 = vmul.f32 %v3522_v30, %v3519_v35  ;;  %v1027_v55 = vmul.f32 %v3522_v30, %v3520_v36  ;;  %v3543_v35 = vld [vmem:[%s4262_s13 + $0x30] sm:$0xf]  ;;  %v3547_v36 = vld [vmem:[%s5566_s1 + $0x7b] ss:$0 sm:$0xff] }
  0x9f   : > { %v1015_v59 = vadd.f32 %v1011_v45, %v998_v44  ;;  %v1028_v60 = vmul.f32 %v3522_v30, %v3521_v41  ;;  %v1029_v61 = vadd.f32 %v1025_v49, %v1012_v48  ;;  %v1042_v62 = vmul.f32 %v3527_v43, %v3523_v42  ;;  %v3544_v41 = vld [vmem:[%s4262_s13 + $0x38] sm:$0xf]  ;;  %v3545_v42 = vld [vmem:[%s4262_s13 + $0x40] sm:$0xf]  ;;  %v3546_v49 = vld [vmem:[%s4262_s13 + $0x48] sm:$0xf] }
  0xa0   : > { %v1030_v1 = vadd.f32 %v1026_v54, %v1013_v52  ;;  %v1031_v2 = vadd.f32 %v1027_v55, %v1014_v53  ;;  %v1043_v6 = vmul.f32 %v3527_v43, %v3524_v50  ;;  %v1044_v7 = vmul.f32 %v3527_v43, %v3525_v51  ;;  %v3548_v50 = vld [vmem:[%s4262_s13 + $0x72] sm:$0xf]  ;;  %v3552_v51 = vld [vmem:[%s5566_s1 + $0x5] ss:$0 sm:$0xff] }
  0xa1   : > { %v1032_v11 = vadd.f32 %v1028_v60, %v1015_v59  ;;  %v1045_v12 = vmul.f32 %v3527_v43, %v3526_v56  ;;  %v1046_v13 = vadd.f32 %v1042_v62, %v1029_v61  ;;  %v1059_v14 = vmul.f32 %v3532_v58, %v3528_v57  ;;  %v3549_v56 = vld [vmem:[%s4262_s13 + $0x7a] sm:$0xf]  ;;  %v3550_v57 = vld [vmem:[%s4262_s13 + $0x82] sm:$0xf]  ;;  %v3551_v62 = vld [vmem:[%s4262_s13 + $0x8a] sm:$0xf] }
  0xa2   : > { %v1047_v17 = vadd.f32 %v1043_v6, %v1030_v1  ;;  %v1048_v18 = vadd.f32 %v1044_v7, %v1031_v2  ;;  %v1060_v19 = vmul.f32 %v3532_v58, %v3529_v63  ;;  %v1061_v20 = vmul.f32 %v3532_v58, %v3530_v0  ;;  %v3553_v63 = vld [vmem:[%s4262_s13 + $0x42] sm:$0xf]  ;;  %v3557_v0 = vld [vmem:[%s5566_s1 + $0x7] ss:$0 sm:$0xff] }
  0xa3   : > { %v1049_v24 = vadd.f32 %v1045_v12, %v1032_v11  ;;  %v1062_v25 = vmul.f32 %v3532_v58, %v3531_v8  ;;  %v1063_v26 = vadd.f32 %v1059_v14, %v1046_v13  ;;  %v1076_v27 = vmul.f32 %v3537_v10, %v3533_v9  ;;  %v3554_v8 = vld [vmem:[%s4262_s13 + $0x4a] sm:$0xf]  ;;  %v3555_v9 = vld [vmem:[%s4262_s13 + $0x52] sm:$0xf] }
  0xa4   : > { %v1064_v30 = vadd.f32 %v1060_v19, %v1047_v17  ;;  %v1065_v31 = vadd.f32 %v1061_v20, %v1048_v18  ;;  %v1077_v32 = vmul.f32 %v3537_v10, %v3534_v15  ;;  %v1078_v33 = vmul.f32 %v3537_v10, %v3535_v16  ;;  %v3556_v15 = vld [vmem:[%s4262_s13 + $0x5a] sm:$0xf] }
  0xa5   : > { %v1066_v37 = vadd.f32 %v1062_v25, %v1049_v24  ;;  %v1079_v38 = vmul.f32 %v3537_v10, %v3536_v21  ;;  %v1080_v39 = vadd.f32 %v1076_v27, %v1063_v26  ;;  %v1093_v40 = vmul.f32 %v3542_v23, %v3538_v22 }
  0xa6   : > { %v1081_v43 = vadd.f32 %v1077_v32, %v1064_v30  ;;  %v1082_v44 = vadd.f32 %v1078_v33, %v1065_v31  ;;  %v1094_v45 = vmul.f32 %v3542_v23, %v3539_v28  ;;  %v1095_v48 = vmul.f32 %v3542_v23, %v3540_v29  ;;  %v3559_v32 = vld [vmem:[%s4262_s13 + $0x1a] sm:$0xf] }
  0xa7   : > { %v1083_v52 = vadd.f32 %v1079_v38, %v1066_v37  ;;  %v1096_v53 = vmul.f32 %v3542_v23, %v3541_v34  ;;  %v1097_v54 = vadd.f32 %v1093_v40, %v1080_v39  ;;  %v1110_v55 = vmul.f32 %v3547_v36, %v3543_v35  ;;  %v3560_v37 = vld [vmem:[%s4262_s13 + $0x22] sm:$0xf] }
  0xa8   : > { %v1098_v58 = vadd.f32 %v1094_v45, %v1081_v43  ;;  %v1099_v59 = vadd.f32 %v1095_v48, %v1082_v44  ;;  %v1111_v60 = vmul.f32 %v3547_v36, %v3544_v41  ;;  %v1112_v61 = vmul.f32 %v3547_v36, %v3545_v42  ;;  %v3561_v42 = vld [vmem:[%s4262_s13 + $0x2a] sm:$0xf]  ;;  %v3562_v43 = vld [vmem:[%s5566_s1 + $0x9] ss:$0 sm:$0xff] }
  0xa9   : > { %v1100_v1 = vadd.f32 %v1096_v53, %v1083_v52  ;;  %v1113_v2 = vmul.f32 %v3547_v36, %v3546_v49  ;;  %v1114_v6 = vadd.f32 %v1110_v55, %v1097_v54  ;;  %v1180_v7 = vmul.f32 %v3552_v51, %v3548_v50  ;;  %v3563_v50 = vld [vmem:[%s4262_s13 + $0x71] sm:$0xf] }
  0xaa   : > { %v1115_v10 = vadd.f32 %v1111_v60, %v1098_v58  ;;  %v1116_v11 = vadd.f32 %v1112_v61, %v1099_v59  ;;  %v1181_v13 = vmul.f32 %v3552_v51, %v3549_v56  ;;  %v1182_v14 = vmul.f32 %v3552_v51, %v3550_v57  ;;  %v3564_v56 = vld [vmem:[%s4262_s13 + $0x79] sm:$0xf]  ;;  %v3565_v61 = vld [vmem:[%s4262_s13 + $0x81] sm:$0xf] }
  0xab   : > { %v1117_v16 = vadd.f32 %v1113_v2, %v1100_v1  ;;  %v1118_v17 = vadd.f32 %v4474_v46, %v1114_v6  ;;  %v1183_v18 = vmul.f32 %v3552_v51, %v3551_v62  ;;  %v1193_v19 = vmul.f32 %v3557_v0, %v3553_v63  ;;  %v3567_v51 = vld [vmem:[%s5566_s1 + $0xf] ss:$0 sm:$0xff]  ;;  %v3566_v1 = vld [vmem:[%s4262_s13 + $0x89] sm:$0xf]  ;;  %v3568_v6 = vld [vmem:[%s4262_s13 + $0x41] sm:$0xf] }
  0xac   : > { %v1119_v20 = vadd.f32 %v4474_v46, %v1115_v10  ;;  %v1120_v21 = vadd.f32 %v4474_v46, %v1116_v11  ;;  %v1194_v22 = vmul.f32 %v3557_v0, %v3554_v8  ;;  %v1195_v23 = vmul.f32 %v3557_v0, %v3555_v9 }
  0xad   : > { %v1121_v24 = vadd.f32 %v4474_v46, %v1117_v16  ;;  %v1130_v25 = vsel %vm4627_vm3, %v1118_v17, 0.0  ;;  %1167 = vst.msk [vmem:[#allocation2 + $0x10] sm:$0xf] %vm779_vm0, %v1118_v17  ;;  %v1196_v26 = vmul.f32 %v3557_v0, %v3556_v15  ;;  %v1197_v27 = vadd.f32 %v1193_v19, %v1180_v7  ;;  %v3558_v46 = vld [vmem:[%s4262_s13 + $0x12] sm:$0xf] }
  0xae   : > { %v1131_v28 = vsel %vm4627_vm3, %v1119_v20, 0.0  ;;  %v1132_v29 = vsel %vm4627_vm3, %v1120_v21, 0.0  ;;  %v1134_v30 = vsel %vm779_vm0, %v1130_v25, 0.0  ;;  %v1148_v31 = vmul.f32 %v1130_v25, %v1130_v25  ;;  %1168 = vst.msk [vmem:[#allocation2 + $0x14] sm:$0xf] %vm779_vm0, %v1119_v20 }
  0xaf   : > { %1169 = vst.msk [vmem:[#allocation2 + $0x18] sm:$0xf] %vm779_vm0, %v1120_v21  ;;  %v1133_v33 = vsel %vm4627_vm3, %v1121_v24, 0.0  ;;  %v1135_v34 = vsel %vm779_vm0, %v1131_v28, 0.0  ;;  %v1137_v35 = vsel %vm779_vm0, %v1132_v29, 0.0  ;;  %v1149_v36 = vmul.f32 %v1131_v28, %v1131_v28 }
  0xb0   : > { %1170 = vst.msk [vmem:[#allocation2 + $0x1c] sm:$0xf] %vm779_vm0, %v1121_v24  ;;  %v1136_v38 = vadd.f32 %v1135_v34, %v1134_v30  ;;  %v1139_v39 = vsel %vm779_vm0, %v1133_v33, 0.0  ;;  %v1150_v40 = vmul.f32 %v1132_v29, %v1132_v29  ;;  %v1151_v41 = vmul.f32 %v1133_v33, %v1133_v33  ;;  %v3572_v7 = vld [vmem:[%s5566_s1 + $0x11] ss:$0 sm:$0xff] }
  0xb1   : > { %v1152_v44 = vsel %vm779_vm0, %v1148_v31, 0.0  ;;  %v1153_v45 = vsel %vm779_vm0, %v1149_v36, 0.0  ;;  %v1198_v48 = vadd.f32 %v1194_v22, %v1181_v13  ;;  %v1199_v49 = vadd.f32 %v1195_v23, %v1182_v14  ;;  %v3569_v13 = vld [vmem:[%s4262_s13 + $0x49] sm:$0xf]  ;;  %v3571_v19 = vld [vmem:[%s4262_s13 + $0x59] sm:$0xf] }
  0xb2   : > { %v1138_v52 = vadd.f32 %v1137_v35, %v1136_v38  ;;  %v1154_v53 = vadd.f32 %v1153_v45, %v1152_v44  ;;  %v1155_v54 = vsel %vm779_vm0, %v1150_v40, 0.0  ;;  %v1157_v55 = vsel %vm779_vm0, %v1151_v41, 0.0  ;;  %v3573_v24 = vld [vmem:[%s4262_s13 + $0x11] sm:$0xf]  ;;  %v3574_v30 = vld [vmem:[%s4262_s13 + $0x19] sm:$0xf] }
  0xb3   : > { %v1200_v57 = vadd.f32 %v1196_v26, %v1183_v18  ;;  %v1210_v58 = vmul.f32 %v3562_v43, %v3558_v46  ;;  %v1211_v59 = vmul.f32 %v3562_v43, %v3559_v32  ;;  %v1212_v60 = vmul.f32 %v3562_v43, %v3560_v37  ;;  %v3570_v18 = vld [vmem:[%s4262_s13 + $0x51] sm:$0xf]  ;;  %v3575_v31 = vld [vmem:[%s4262_s13 + $0x21] sm:$0xf]  ;;  %v3576_v35 = vld [vmem:[%s4262_s13 + $0x29] sm:$0xf] }
  0xb4   : > { %v1140_v62 = vadd.f32 %v1139_v39, %v1138_v52  ;;  %v1156_v63 = vadd.f32 %v1155_v54, %v1154_v53  ;;  %v1213_v0 = vmul.f32 %v3562_v43, %v3561_v42  ;;  %v1227_v2 = vmul.f32 %v3567_v51, %v3563_v50  ;;  %v3577_v25 = vld [vmem:[%s5566_s1 + $0x13] ss:$0 sm:$0xff]  ;;  %v3578_v36 = vld [vmem:[%s4262_s13 + $0x6a] sm:$0xf]  ;;  %v3582_v42 = vld [vmem:[%s5566_s1 + $0x37] ss:$0 sm:$0xff] }
  0xb5   : > { %v1214_v8 = vadd.f32 %v1210_v58, %v1197_v27  ;;  %v1215_v9 = vadd.f32 %v1211_v59, %v1198_v48  ;;  %v1216_v10 = vadd.f32 %v1212_v60, %v1199_v49  ;;  %v1228_v11 = vmul.f32 %v3567_v51, %v3564_v56  ;;  %v3579_v41 = vld [vmem:[%s4262_s13 + $0x72] sm:$0xf]  ;;  %v3580_v49 = vld [vmem:[%s4262_s13 + $0x7a] sm:$0xf]  ;;  %v3581_v50 = vld [vmem:[%s4262_s13 + $0x82] sm:$0xf] }
  0xb6   : > { %v1141_v14 = vrot.slane %v1140_v62, 4  ;;  %v1158_v15 = vadd.f32 %v1157_v55, %v1156_v63  ;;  %v1217_v16 = vadd.f32 %v1213_v0, %v1200_v57  ;;  %v1229_v17 = vmul.f32 %v3567_v51, %v3565_v61  ;;  %v3583_v55 = vld [vmem:[%s4262_s13 + $0x3a] sm:$0xf]  ;;  %v3587_v56 = vld [vmem:[%s5566_s1 + $0x39] ss:$0 sm:$0xff] }
  0xb7   : > { %v1230_v20 = vmul.f32 %v3567_v51, %v3566_v1  ;;  %v1231_v21 = vadd.f32 %v1227_v2, %v1214_v8  ;;  %v1232_v22 = vadd.f32 %v1228_v11, %v1215_v9  ;;  %v1244_v23 = vmul.f32 %v3572_v7, %v3568_v6  ;;  %v3584_v61 = vld [vmem:[%s4262_s13 + $0x42] sm:$0xf]  ;;  %v3585_v2 = vld [vmem:[%s4262_s13 + $0x4a] sm:$0xf]  ;;  %v3586_v6 = vld [vmem:[%s4262_s13 + $0x52] sm:$0xf] }
  0xb8   : > { %v1142_v26 = vadd.f32 %v1141_v14, %v1140_v62  ;;  %v1159_v27 = vrot.slane %v1158_v15, 4  ;;  %v1233_v28 = vadd.f32 %v1229_v17, %v1216_v10  ;;  %v1245_v29 = vmul.f32 %v3572_v7, %v3569_v13  ;;  %v3588_v11 = vld [vmem:[%s4262_s13 + $0xa] sm:$0xf]  ;;  %v3592_v13 = vld [vmem:[%s5566_s1 + $0x3b] ss:$0 sm:$0xff] }
  0xb9   : > { %v1234_v46 = vadd.f32 %v1230_v20, %v1217_v16  ;;  %v1246_v32 = vmul.f32 %v3572_v7, %v3570_v18  ;;  %v1247_v33 = vmul.f32 %v3572_v7, %v3571_v19  ;;  %v1248_v34 = vadd.f32 %v1244_v23, %v1231_v21  ;;  %v3589_v18 = vld [vmem:[%s4262_s13 + $0x12] sm:$0xf]  ;;  %v3590_v19 = vld [vmem:[%s4262_s13 + $0x1a] sm:$0xf] }
  0xba   : > { %v1143_v37 = vrot.slane %v1142_v26, 2  ;;  %v1160_v38 = vadd.f32 %v1159_v27, %v1158_v15  ;;  %v1249_v39 = vadd.f32 %v1245_v29, %v1232_v22  ;;  %v1261_v40 = vmul.f32 %v3577_v25, %v3573_v24  ;;  %v3591_v24 = vld [vmem:[%s4262_s13 + $0x22] sm:$0xf] }
  0xbb   : > { %v1250_v43 = vadd.f32 %v1246_v32, %v1233_v28  ;;  %v1251_v44 = vadd.f32 %v1247_v33, %v1234_v46  ;;  %v1262_v45 = vmul.f32 %v3577_v25, %v3574_v30  ;;  %v1263_v48 = vmul.f32 %v3577_v25, %v3575_v31  ;;  %v3594_v31 = vld [vmem:[%s4262_s13 + $0x71] sm:$0xf]  ;;  %v3595_v46 = vld [vmem:[%s4262_s13 + $0x79] sm:$0xf] }
  0xbc   : > { %v1144_v51 = vadd.f32 %v1143_v37, %v1142_v26  ;;  %v1161_v52 = vrot.slane %v1160_v38, 2  ;;  %v1264_v53 = vmul.f32 %v3577_v25, %v3576_v35  ;;  %v1265_v54 = vadd.f32 %v1261_v40, %v1248_v34  ;;  %v3593_v25 = vld [vmem:[%s4262_s13 + $0x69] sm:$0xf]  ;;  %v3597_v26 = vld [vmem:[%s5566_s1 + $0x41] ss:$0 sm:$0xff] }
  0xbd   : > { %v1266_v57 = vadd.f32 %v1262_v45, %v1249_v39  ;;  %v1267_v58 = vadd.f32 %v1263_v48, %v1250_v43  ;;  %v1278_v59 = vmul.f32 %v3582_v42, %v3578_v36  ;;  %v1279_v60 = vmul.f32 %v3582_v42, %v3579_v41  ;;  %v3596_v36 = vld [vmem:[%s4262_s13 + $0x81] sm:$0xf]  ;;  %v3598_v37 = vld [vmem:[%s4262_s13 + $0x39] sm:$0xf]  ;;  %v3600_v43 = vld [vmem:[%s4262_s13 + $0x49] sm:$0xf] }
  0xbe   : > { %v1145_v62 = vrot.slane %v1144_v51, 1  ;;  %v1162_v63 = vadd.f32 %v1161_v52, %v1160_v38  ;;  %v1268_v0 = vadd.f32 %v1264_v53, %v1251_v44  ;;  %v1280_v1 = vmul.f32 %v3582_v42, %v3580_v49 }
  0xbf   : > { %v1281_v7 = vmul.f32 %v3582_v42, %v3581_v50  ;;  %v1282_v8 = vadd.f32 %v1278_v59, %v1265_v54  ;;  %v1283_v9 = vadd.f32 %v1279_v60, %v1266_v57  ;;  %v1295_v10 = vmul.f32 %v3587_v56, %v3583_v55  ;;  %v3599_v42 = vld [vmem:[%s4262_s13 + $0x41] sm:$0xf]  ;;  %v3601_v50 = vld [vmem:[%s4262_s13 + $0x51] sm:$0xf]  ;;  %v3605_v57 = vld [vmem:[%s4262_s13 + $0x19] sm:$0xf] }
  0xc0   : > { %v1146_v14 = vadd.f32 %v1145_v62, %v1144_v51  ;;  %v1163_v15 = vrot.slane %v1162_v63, 1  ;;  %v1284_v16 = vadd.f32 %v1280_v1, %v1267_v58  ;;  %v1296_v17 = vmul.f32 %v3587_v56, %v3584_v61  ;;  %v3603_v51 = vld [vmem:[%s4262_s13 + $0x9] sm:$0xf]  ;;  %v3606_v62 = vld [vmem:[%s4262_s13 + $0x21] sm:$0xf] }
  0xc1   : > { %v1285_v20 = vadd.f32 %v1281_v7, %v1268_v0  ;;  %v1297_v21 = vmul.f32 %v3587_v56, %v3585_v2  ;;  %v1298_v22 = vmul.f32 %v3587_v56, %v3586_v6  ;;  %v1299_v23 = vadd.f32 %v1295_v10, %v1282_v8  ;;  %v3604_v56 = vld [vmem:[%s4262_s13 + $0x11] sm:$0xf]  ;;  %v3612_v0 = vld [vmem:[%s5566_s1 + $0x69] ss:$0 sm:$0xff]  ;;  %v3609_v8 = vld [vmem:[%s4262_s13 + $0x6a] sm:$0xf] }
  0xc2   : > { %v4710_v27 = vadd.f32 %v1146_v14, %v4540_v47  ;;  %v1164_v28 = vadd.f32 %v1163_v15, %v1162_v63  ;;  %v1300_v29 = vadd.f32 %v1296_v17, %v1283_v9  ;;  %v1312_v30 = vmul.f32 %v3592_v13, %v3588_v11  ;;  %v3602_v47 = vld [vmem:[%s5566_s1 + $0x43] ss:$0 sm:$0xff]  ;;  %v3610_v9 = vld [vmem:[%s4262_s13 + $0x72] sm:$0xf]  ;;  %v3611_v15 = vld [vmem:[%s4262_s13 + $0x7a] sm:$0xf] }
  0xc3   : > { %v1301_v32 = vadd.f32 %v1297_v21, %v1284_v16  ;;  %v1302_v33 = vadd.f32 %v1298_v22, %v1285_v20  ;;  %v1313_v34 = vmul.f32 %v3592_v13, %v3589_v18  ;;  %v1314_v35 = vmul.f32 %v3592_v13, %v3590_v19  ;;  %v3608_v63 = vld [vmem:[%s4262_s13 + $0x62] sm:$0xf]  ;;  %v3613_v16 = vld [vmem:[%s4262_s13 + $0x32] sm:$0xf]  ;;  %v3617_v17 = vld [vmem:[%s5566_s1 + $0x6b] ss:$0 sm:$0xff] }
  0xc4   : > { %v4720_v38 = vadd.f32 %v1164_v28, %v4554_v5  ;;  %v1315_v39 = vmul.f32 %v3592_v13, %v3591_v24  ;;  %v1316_v40 = vadd.f32 %v1312_v30, %v1299_v23  ;;  %v1329_v41 = vmul.f32 %v3597_v26, %v3593_v25  ;;  %v3607_v5 = vld [vmem:[%s5566_s1 + $0x45] ss:$0 sm:$0xff]  ;;  %v3614_v22 = vld [vmem:[%s4262_s13 + $0x3a] sm:$0xf] }
  0xc5   : > { %v1317_v44 = vadd.f32 %v1313_v34, %v1300_v29  ;;  %v1318_v45 = vadd.f32 %v1314_v35, %v1301_v32  ;;  %v1330_v48 = vmul.f32 %v3597_v26, %v3594_v31  ;;  %v1331_v49 = vmul.f32 %v3597_v26, %v3595_v46  ;;  %v3615_v23 = vld [vmem:[%s4262_s13 + $0x42] sm:$0xf]  ;;  %v3616_v29 = vld [vmem:[%s4262_s13 + $0x4a] sm:$0xf] }
  0xc6   : > { %v1319_v52 = vadd.f32 %v1315_v39, %v1302_v33  ;;  %v1332_v53 = vmul.f32 %v3597_v26, %v3596_v36  ;;  %v1333_v54 = vadd.f32 %v1329_v41, %v1316_v40  ;;  %v1346_v55 = vmul.f32 %v3602_v47, %v3598_v37  ;;  %v1405_v30 = vld [vmem:[%s4262_s13 + $0x2] sm:$0xf]  ;;  %v3618_v31 = vld [vmem:[%s5566_s1 + $0x6d] ss:$0 sm:$0xff]  ;;  %v1407_v36 = vld [vmem:[%s4262_s13 + $0x12] sm:$0xf] }
  0xc7   : > { %v1334_v58 = vadd.f32 %v1330_v48, %v1317_v44  ;;  %v1335_v59 = vadd.f32 %v1331_v49, %v1318_v45  ;;  %v1347_v60 = vmul.f32 %v3602_v47, %v3599_v42  ;;  %v1348_v61 = vmul.f32 %v3602_v47, %v3600_v43  ;;  %v1406_v35 = vld [vmem:[%s4262_s13 + $0xa] sm:$0xf]  ;;  %v1408_v41 = vld [vmem:[%s4262_s13 + $0x1a] sm:$0xf]  ;;  %v3619_v42 = vld [vmem:[%s4262_s13 + $0x61] sm:$0xf] }
  0xc8   : > { %v1336_v1 = vadd.f32 %v1332_v53, %v1319_v52  ;;  %v1349_v2 = vmul.f32 %v3602_v47, %v3601_v50  ;;  %v1350_v6 = vadd.f32 %v1346_v55, %v1333_v54  ;;  %v1363_v7 = vmul.f32 %v3607_v5, %v3603_v51  ;;  %v3623_v43 = vld [vmem:[%s5566_s1 + $0x73] ss:$0 sm:$0xff]  ;;  %v3620_v50 = vld [vmem:[%s4262_s13 + $0x69] sm:$0xf]  ;;  %v3622_v55 = vld [vmem:[%s4262_s13 + $0x79] sm:$0xf] }
  0xc9   : > { %v1351_v10 = vadd.f32 %v1347_v60, %v1334_v58  ;;  %v1352_v11 = vadd.f32 %v1348_v61, %v1335_v59  ;;  %v1364_v13 = vmul.f32 %v3607_v5, %v3604_v56  ;;  %v1365_v14 = vmul.f32 %v3607_v5, %v3605_v57  ;;  %v3621_v51 = vld [vmem:[%s4262_s13 + $0x71] sm:$0xf]  ;;  %v3628_v57 = vld [vmem:[%s5566_s1 + $0x75] ss:$0 sm:$0xff] }
  0xca   : > { %v1353_v18 = vadd.f32 %v1349_v2, %v1336_v1  ;;  %v1366_v19 = vmul.f32 %v3607_v5, %v3606_v62  ;;  %v1367_v20 = vadd.f32 %v1363_v7, %v1350_v6  ;;  %v1380_v21 = vmul.f32 %v3612_v0, %v3608_v63  ;;  %v3624_v56 = vld [vmem:[%s4262_s13 + $0x31] sm:$0xf]  ;;  %v3625_v62 = vld [vmem:[%s4262_s13 + $0x39] sm:$0xf]  ;;  %v3626_v63 = vld [vmem:[%s4262_s13 + $0x41] sm:$0xf] }
  0xcb   : > { %v1368_v24 = vadd.f32 %v1364_v13, %v1351_v10  ;;  %v1369_v25 = vadd.f32 %v1365_v14, %v1352_v11  ;;  %v1381_v26 = vmul.f32 %v3612_v0, %v3609_v8  ;;  %v1382_v28 = vmul.f32 %v3612_v0, %v3610_v9  ;;  %v3627_v7 = vld [vmem:[%s4262_s13 + $0x49] sm:$0xf]  ;;  %v1456_v8 = vld [vmem:[%s4262_s13 + $0x1] sm:$0xf]  ;;  %v3629_v9 = vld [vmem:[%s5566_s1 + $0x77] ss:$0 sm:$0xff] }
  0xcc   : > { %v1370_v46 = vadd.f32 %v1366_v19, %v1353_v18  ;;  %v1383_v32 = vmul.f32 %v3612_v0, %v3611_v15  ;;  %v1384_v33 = vadd.f32 %v1380_v21, %v1367_v20  ;;  %v1397_v34 = vmul.f32 %v3617_v17, %v3613_v16  ;;  %v1457_v15 = vld [vmem:[%s4262_s13 + $0x9] sm:$0xf]  ;;  %v1458_v16 = vld [vmem:[%s4262_s13 + $0x11] sm:$0xf]  ;;  %v1459_v21 = vld [vmem:[%s4262_s13 + $0x19] sm:$0xf] }
  0xcd   : > { %v1385_v37 = vadd.f32 %v1381_v26, %v1368_v24  ;;  %v1386_v47 = vadd.f32 %v1382_v28, %v1369_v25  ;;  %v1398_v39 = vmul.f32 %v3617_v17, %v3614_v22  ;;  %v1399_v40 = vmul.f32 %v3617_v17, %v3615_v23  ;;  %v3630_v26 = vld [vmem:[%s4262_s13 + $0x72] sm:$0xf]  ;;  %v3634_v28 = vld [vmem:[%s5566_s1 + $0x6] ss:$0 sm:$0xff] }
  0xce   : > { %v1387_v44 = vadd.f32 %v1383_v32, %v1370_v46  ;;  %v1400_v45 = vmul.f32 %v3617_v17, %v3616_v29  ;;  %v1401_v48 = vadd.f32 %v1397_v34, %v1384_v33  ;;  %v1414_v49 = vmul.f32 %v3618_v31, %v1405_v30  ;;  %v3631_v32 = vld [vmem:[%s4262_s13 + $0x7a] sm:$0xf]  ;;  %v3632_v33 = vld [vmem:[%s4262_s13 + $0x82] sm:$0xf]  ;;  %v3633_v34 = vld [vmem:[%s4262_s13 + $0x8a] sm:$0xf] }
  0xcf   : > { %v1402_v5 = vadd.f32 %v1398_v39, %v1385_v37  ;;  %v1403_v52 = vadd.f32 %v1399_v40, %v1386_v47  ;;  %v1415_v53 = vmul.f32 %v3618_v31, %v1406_v35  ;;  %v1416_v54 = vmul.f32 %v3618_v31, %v1407_v36  ;;  %v3635_v47 = vld [vmem:[%s4262_s13 + $0x42] sm:$0xf]  ;;  %v3639_v39 = vld [vmem:[%s5566_s1 + $0x8] ss:$0 sm:$0xff] }
  0xd0   : > { %v1404_v58 = vadd.f32 %v1400_v45, %v1387_v44  ;;  %v1417_v59 = vmul.f32 %v3618_v31, %v1408_v41  ;;  %v1418_v60 = vadd.f32 %v1414_v49, %v1401_v48  ;;  %v1431_v61 = vmul.f32 %v3623_v43, %v3619_v42  ;;  %v3637_v44 = vld [vmem:[%s4262_s13 + $0x52] sm:$0xf]  ;;  %v4792_v48 = vld [vmem:[%s5567_s2] ss:$0 sm:$0xff] }
  0xd1   : > { %v1419_v0 = vadd.f32 %v1415_v53, %v1402_v5  ;;  %v1420_v1 = vadd.f32 %v1416_v54, %v1403_v52  ;;  %v1432_v2 = vmul.f32 %v3623_v43, %v3620_v50  ;;  %v1433_v6 = vmul.f32 %v3623_v43, %v3621_v51 }
  0xd2   : > { %v1421_v10 = vadd.f32 %v1417_v59, %v1404_v58  ;;  %v1434_v11 = vmul.f32 %v3623_v43, %v3622_v55  ;;  %v1435_v13 = vadd.f32 %v1431_v61, %v1418_v60  ;;  %v1448_v14 = vmul.f32 %v3628_v57, %v3624_v56  ;;  %v3636_v43 = vld [vmem:[%s4262_s13 + $0x4a] sm:$0xf]  ;;  %v3638_v58 = vld [vmem:[%s4262_s13 + $0x5a] sm:$0xf] }
  0xd3   : > { %v1436_v17 = vadd.f32 %v1432_v2, %v1419_v0  ;;  %v1437_v18 = vadd.f32 %v1433_v6, %v1420_v1  ;;  %v1449_v19 = vmul.f32 %v3628_v57, %v3625_v62  ;;  %v1450_v20 = vmul.f32 %v3628_v57, %v3626_v63  ;;  %v3640_v1 = vld [vmem:[%s4262_s13 + $0x71] sm:$0xf] }
  0xd4   : > { %v1438_v22 = vadd.f32 %v1434_v11, %v1421_v10  ;;  %v1451_v23 = vmul.f32 %v3628_v57, %v3627_v7  ;;  %v1452_v24 = vadd.f32 %v1448_v14, %v1435_v13  ;;  %v1465_v25 = vmul.f32 %v3629_v9, %v1456_v8 }
  0xd5   : > { %v1453_v29 = vadd.f32 %v1449_v19, %v1436_v17  ;;  %v1454_v30 = vadd.f32 %v1450_v20, %v1437_v18  ;;  %v1466_v31 = vmul.f32 %v3629_v9, %v1457_v15  ;;  %v1467_v46 = vmul.f32 %v3629_v9, %v1458_v16  ;;  %v3642_v15 = vld [vmem:[%s4262_s13 + $0x81] sm:$0xf]  ;;  %v3644_v16 = vld [vmem:[%s5566_s1 + $0x10] ss:$0 sm:$0xff] }
  0xd6   : > { %v1455_v35 = vadd.f32 %v1451_v23, %v1438_v22  ;;  %v1468_v36 = vmul.f32 %v3629_v9, %v1459_v21  ;;  %v1469_v37 = vadd.f32 %v1465_v25, %v1452_v24  ;;  %v1531_v42 = vmul.f32 %v3634_v28, %v3630_v26  ;;  %v3641_v9 = vld [vmem:[%s4262_s13 + $0x79] sm:$0xf]  ;;  %v3643_v21 = vld [vmem:[%s4262_s13 + $0x89] sm:$0xf]  ;;  %v3645_v22 = vld [vmem:[%s4262_s13 + $0x41] sm:$0xf] }
  0xd7   : > { %v1470_v40 = vadd.f32 %v1466_v31, %v1453_v29  ;;  %v1471_v41 = vadd.f32 %v1467_v46, %v1454_v30  ;;  %v1532_v51 = vmul.f32 %v3634_v28, %v3631_v32  ;;  %v1533_v5 = vmul.f32 %v3634_v28, %v3632_v33  ;;  %v3649_v29 = vld [vmem:[%s5566_s1 + $0x12] ss:$0 sm:$0xff] }
  0xd8   : > { %v1472_v45 = vadd.f32 %v1468_v36, %v1455_v35  ;;  %v1473_v49 = vadd.f32 %v4792_v48, %v1469_v37  ;;  %v1534_v54 = vmul.f32 %v3634_v28, %v3633_v34  ;;  %v1544_v55 = vmul.f32 %v3639_v39, %v3635_v47  ;;  %v3646_v28 = vld [vmem:[%s4262_s13 + $0x49] sm:$0xf]  ;;  %v3647_v37 = vld [vmem:[%s4262_s13 + $0x51] sm:$0xf]  ;;  %v3648_v47 = vld [vmem:[%s4262_s13 + $0x59] sm:$0xf] }
  0xd9   : > { %v1474_v52 = vadd.f32 %v4792_v48, %v1470_v40  ;;  %v1475_v53 = vadd.f32 %v4792_v48, %v1471_v41  ;;  %v1545_v59 = vmul.f32 %v3639_v39, %v3636_v43  ;;  %v1546_v60 = vmul.f32 %v3639_v39, %v3637_v44  ;;  %v3650_v43 = vld [vmem:[%s4262_s13 + $0x6a] sm:$0xf]  ;;  %v3654_v44 = vld [vmem:[%s5566_s1 + $0x38] ss:$0 sm:$0xff] }
  0xda   : > { %v1476_v56 = vadd.f32 %v4792_v48, %v1472_v45  ;;  %v1481_v57 = vsel %vm4799_vm6, %v1473_v49, 0.0  ;;  %1518 = vst.msk [vmem:[#allocation2 + $0x20] sm:$0xf] %vm779_vm0, %v1473_v49  ;;  %v1547_v19 = vmul.f32 %v3639_v39, %v3638_v58  ;;  %v1548_v20 = vadd.f32 %v1544_v55, %v1531_v42  ;;  %v3653_v58 = vld [vmem:[%s4262_s13 + $0x82] sm:$0xf] }
  0xdb   : > { %v1482_v61 = vsel %vm4799_vm6, %v1474_v52, 0.0  ;;  %v1483_v62 = vsel %vm4799_vm6, %v1475_v53, 0.0  ;;  %v1485_v63 = vsel %vm779_vm0, %v1481_v57, 0.0  ;;  %v1499_v0 = vmul.f32 %v1481_v57, %v1481_v57  ;;  %1519 = vst.msk [vmem:[#allocation2 + $0x24] sm:$0xf] %vm779_vm0, %v1474_v52 }
  0xdc   : > { %1520 = vst.msk [vmem:[#allocation2 + $0x28] sm:$0xf] %vm779_vm0, %v1475_v53  ;;  %v1484_v2 = vsel %vm4799_vm6, %v1476_v56, 0.0  ;;  %v1486_v6 = vsel %vm779_vm0, %v1482_v61, 0.0  ;;  %v1488_v7 = vsel %vm779_vm0, %v1483_v62, 0.0  ;;  %v1500_v8 = vmul.f32 %v1482_v61, %v1482_v61 }
  0xdd   : > { %1521 = vst.msk [vmem:[#allocation2 + $0x2c] sm:$0xf] %vm779_vm0, %v1476_v56  ;;  %v1487_v10 = vadd.f32 %v1486_v6, %v1485_v63  ;;  %v1490_v11 = vsel %vm779_vm0, %v1484_v2, 0.0  ;;  %v1501_v13 = vmul.f32 %v1483_v62, %v1483_v62  ;;  %v1502_v14 = vmul.f32 %v1484_v2, %v1484_v2  ;;  %v3651_v52 = vld [vmem:[%s4262_s13 + $0x72] sm:$0xf] }
  0xde   : > { %v1503_v17 = vsel %vm779_vm0, %v1499_v0, 0.0  ;;  %v1504_v18 = vsel %vm779_vm0, %v1500_v8, 0.0  ;;  %v1549_v30 = vadd.f32 %v1545_v59, %v1532_v51  ;;  %v1550_v31 = vadd.f32 %v1546_v60, %v1533_v5  ;;  %v3652_v53 = vld [vmem:[%s4262_s13 + $0x7a] sm:$0xf]  ;;  %v3656_v0 = vld [vmem:[%s4262_s13 + $0x42] sm:$0xf] }
  0xdf   : > { %v1489_v23 = vadd.f32 %v1488_v7, %v1487_v10  ;;  %v1505_v24 = vadd.f32 %v1504_v18, %v1503_v17  ;;  %v1506_v25 = vsel %vm779_vm0, %v1501_v13, 0.0  ;;  %v1508_v26 = vsel %vm779_vm0, %v1502_v14, 0.0  ;;  %v3655_v59 = vld [vmem:[%s4262_s13 + $0x3a] sm:$0xf]  ;;  %v3658_v10 = vld [vmem:[%s4262_s13 + $0x52] sm:$0xf] }
  0xe0   : > { %v1551_v46 = vadd.f32 %v1547_v19, %v1534_v54  ;;  %v1561_v32 = vmul.f32 %v3644_v16, %v3640_v1  ;;  %v1562_v35 = vmul.f32 %v3644_v16, %v3641_v9  ;;  %v1563_v36 = vmul.f32 %v3644_v16, %v3642_v15  ;;  %v3659_v1 = vld [vmem:[%s5566_s1 + $0x3a] ss:$0 sm:$0xff]  ;;  %v3657_v9 = vld [vmem:[%s4262_s13 + $0x4a] sm:$0xf]  ;;  %v3664_v17 = vld [vmem:[%s5566_s1 + $0x42] ss:$0 sm:$0xff] }
  0xe1   : > { %v1491_v33 = vadd.f32 %v1490_v11, %v1489_v23  ;;  %v1507_v34 = vadd.f32 %v1506_v25, %v1505_v24  ;;  %v1564_v39 = vmul.f32 %v3644_v16, %v3643_v21  ;;  %v1578_v41 = vmul.f32 %v3649_v29, %v3645_v22  ;;  %v3660_v16 = vld [vmem:[%s4262_s13 + $0x69] sm:$0xf]  ;;  %v3661_v22 = vld [vmem:[%s4262_s13 + $0x71] sm:$0xf] }
  0xe2   : > { %v1565_v40 = vadd.f32 %v1561_v32, %v1548_v20  ;;  %v1579_v42 = vmul.f32 %v3649_v29, %v3646_v28  ;;  %v1566_v51 = vadd.f32 %v1562_v35, %v1549_v30  ;;  %v1567_v5 = vadd.f32 %v1563_v36, %v1550_v31  ;;  %v3662_v28 = vld [vmem:[%s4262_s13 + $0x79] sm:$0xf] }
  0xe3   : > { %v1492_v45 = vrot.slane %v1491_v33, 4  ;;  %v1509_v49 = vadd.f32 %v1508_v26, %v1507_v34  ;;  %v1568_v54 = vadd.f32 %v1564_v39, %v1551_v46  ;;  %v1580_v55 = vmul.f32 %v3649_v29, %v3647_v37  ;;  %v3669_v34 = vld [vmem:[%s5566_s1 + $0x44] ss:$0 sm:$0xff] }
  0xe4   : > { %v1581_v56 = vmul.f32 %v3649_v29, %v3648_v47  ;;  %v1582_v57 = vadd.f32 %v1578_v41, %v1565_v40  ;;  %v1583_v62 = vadd.f32 %v1579_v42, %v1566_v51  ;;  %v1595_v63 = vmul.f32 %v3654_v44, %v3650_v43  ;;  %v3663_v29 = vld [vmem:[%s4262_s13 + $0x81] sm:$0xf]  ;;  %v3667_v40 = vld [vmem:[%s4262_s13 + $0x49] sm:$0xf] }
  0xe5   : > { %v1493_v60 = vadd.f32 %v1492_v45, %v1491_v33  ;;  %v1510_v61 = vrot.slane %v1509_v49, 4  ;;  %v1584_v2 = vadd.f32 %v1580_v55, %v1567_v5  ;;  %v1596_v7 = vmul.f32 %v3654_v44, %v3651_v52  ;;  %v3665_v33 = vld [vmem:[%s4262_s13 + $0x39] sm:$0xf]  ;;  %v3666_v39 = vld [vmem:[%s4262_s13 + $0x41] sm:$0xf] }
  0xe6   : > { %v1585_v6 = vadd.f32 %v1581_v56, %v1568_v54  ;;  %v1597_v8 = vmul.f32 %v3654_v44, %v3652_v53  ;;  %v1598_v14 = vmul.f32 %v3654_v44, %v3653_v58  ;;  %v1599_v15 = vadd.f32 %v1595_v63, %v1582_v57  ;;  %v3668_v45 = vld [vmem:[%s4262_s13 + $0x51] sm:$0xf]  ;;  %v3671_v54 = vld [vmem:[%s4262_s13 + $0x6a] sm:$0xf] }
  0xe7   : > { %v1494_v11 = vrot.slane %v1493_v60, 2  ;;  %v1511_v13 = vadd.f32 %v1510_v61, %v1509_v49  ;;  %v1600_v18 = vadd.f32 %v1596_v7, %v1583_v62  ;;  %v1612_v20 = vmul.f32 %v3659_v1, %v3655_v59  ;;  %v3670_v49 = vld [vmem:[%s4262_s13 + $0x62] sm:$0xf]  ;;  %v3674_v55 = vld [vmem:[%s5566_s1 + $0x6a] ss:$0 sm:$0xff] }
  0xe8   : > { %v1601_v19 = vadd.f32 %v1597_v8, %v1584_v2  ;;  %v1613_v21 = vmul.f32 %v3659_v1, %v3656_v0  ;;  %v1602_v25 = vadd.f32 %v1598_v14, %v1585_v6  ;;  %v1614_v26 = vmul.f32 %v3659_v1, %v3657_v9  ;;  %v3673_v61 = vld [vmem:[%s4262_s13 + $0x7a] sm:$0xf]  ;;  %v3675_v2 = vld [vmem:[%s4262_s13 + $0x32] sm:$0xf]  ;;  %v3679_v7 = vld [vmem:[%s5566_s1 + $0x6c] ss:$0 sm:$0xff] }
  0xe9   : > { %v1495_v23 = vadd.f32 %v1494_v11, %v1493_v60  ;;  %v1512_v24 = vrot.slane %v1511_v13, 2  ;;  %v1615_v30 = vmul.f32 %v3659_v1, %v3658_v10  ;;  %v1616_v31 = vadd.f32 %v1612_v20, %v1599_v15  ;;  %v3672_v60 = vld [vmem:[%s4262_s13 + $0x72] sm:$0xf]  ;;  %v3676_v6 = vld [vmem:[%s4262_s13 + $0x3a] sm:$0xf] }
  0xea   : > { %v1617_v46 = vadd.f32 %v1613_v21, %v1600_v18  ;;  %v1629_v32 = vmul.f32 %v3664_v17, %v3660_v16  ;;  %v1618_v37 = vadd.f32 %v1614_v26, %v1601_v19  ;;  %v1630_v47 = vmul.f32 %v3664_v17, %v3661_v22  ;;  %v3680_v18 = vld [vmem:[%s4262_s13 + $0x61] sm:$0xf]  ;;  %v3681_v19 = vld [vmem:[%s4262_s13 + $0x69] sm:$0xf]  ;;  %v3684_v20 = vld [vmem:[%s5566_s1 + $0x74] ss:$0 sm:$0xff] }
  0xeb   : > { %v1496_v35 = vrot.slane %v1495_v23, 1  ;;  %v1513_v36 = vadd.f32 %v1512_v24, %v1511_v13  ;;  %v1619_v41 = vadd.f32 %v1615_v30, %v1602_v25  ;;  %v1631_v42 = vmul.f32 %v3664_v17, %v3662_v28  ;;  %v3677_v13 = vld [vmem:[%s4262_s13 + $0x42] sm:$0xf]  ;;  %v3682_v25 = vld [vmem:[%s4262_s13 + $0x71] sm:$0xf] }
  0xec   : > { %v1632_v43 = vmul.f32 %v3664_v17, %v3663_v29  ;;  %v1633_v44 = vadd.f32 %v1629_v32, %v1616_v31  ;;  %v1634_v52 = vadd.f32 %v1630_v47, %v1617_v46  ;;  %v1646_v53 = vmul.f32 %v3669_v34, %v3665_v33  ;;  %v3685_v31 = vld [vmem:[%s4262_s13 + $0x31] sm:$0xf]  ;;  %v3686_v46 = vld [vmem:[%s4262_s13 + $0x39] sm:$0xf]  ;;  %v3689_v32 = vld [vmem:[%s5566_s1 + $0x76] ss:$0 sm:$0xff] }
  0xed   : > { %v1497_v51 = vadd.f32 %v1496_v35, %v1495_v23  ;;  %v1514_v5 = vrot.slane %v1513_v36, 1  ;;  %v1635_v56 = vadd.f32 %v1631_v42, %v1618_v37  ;;  %v1647_v58 = vmul.f32 %v3669_v34, %v3666_v39  ;;  %v3687_v37 = vld [vmem:[%s4262_s13 + $0x41] sm:$0xf]  ;;  %v3688_v47 = vld [vmem:[%s4262_s13 + $0x49] sm:$0xf] }
  0xee   : > { %v1636_v57 = vadd.f32 %v1632_v43, %v1619_v41  ;;  %v1648_v59 = vmul.f32 %v3669_v34, %v3667_v40  ;;  %v1649_v0 = vmul.f32 %v3669_v34, %v3668_v45  ;;  %v1650_v1 = vadd.f32 %v1646_v53, %v1633_v44  ;;  %v3690_v43 = vld [vmem:[%s4262_s13 + $0x72] sm:$0xf]  ;;  %v3691_v44 = vld [vmem:[%s4262_s13 + $0x7a] sm:$0xf]  ;;  %v3694_v45 = vld [vmem:[%s5566_s1 + $0x19] ss:$0 sm:$0xff] }
  0xef   : > { %v4877_v62 = vadd.f32 %v1497_v51, %v4710_v27  ;;  %v1515_v63 = vadd.f32 %v1514_v5, %v1513_v36  ;;  %v1651_v8 = vadd.f32 %v1647_v58, %v1634_v52  ;;  %v1663_v10 = vmul.f32 %v3674_v55, %v3670_v49  ;;  %v3678_v27 = vld [vmem:[%s4262_s13 + $0x4a] sm:$0xf]  ;;  %v3692_v53 = vld [vmem:[%s4262_s13 + $0x82] sm:$0xf] }
  0xf0   : > { %v1652_v9 = vadd.f32 %v1648_v59, %v1635_v56  ;;  %v1664_v11 = vmul.f32 %v3674_v55, %v3671_v54  ;;  %v1653_v15 = vadd.f32 %v1649_v0, %v1636_v57  ;;  %v1665_v16 = vmul.f32 %v3674_v55, %v3672_v60  ;;  %v3693_v54 = vld [vmem:[%s4262_s13 + $0x8a] sm:$0xf]  ;;  %v3695_v59 = vld [vmem:[%s4262_s13 + $0x42] sm:$0xf] }
  0xf1   : > { %v4887_v14 = vadd.f32 %v1515_v63, %v4720_v38  ;;  %v1666_v17 = vmul.f32 %v3674_v55, %v3673_v61  ;;  %v1667_v21 = vadd.f32 %v1663_v10, %v1650_v1  ;;  %v1680_v23 = vmul.f32 %v3679_v7, %v3675_v2  ;;  %v3683_v38 = vld [vmem:[%s4262_s13 + $0x79] sm:$0xf]  ;;  %v3696_v60 = vld [vmem:[%s4262_s13 + $0x4a] sm:$0xf] }
  0xf2   : > { %v1668_v22 = vadd.f32 %v1664_v11, %v1651_v8  ;;  %v1681_v24 = vmul.f32 %v3679_v7, %v3676_v6  ;;  %v1669_v26 = vadd.f32 %v1665_v16, %v1652_v9  ;;  %v1682_v29 = vmul.f32 %v3679_v7, %v3677_v13  ;;  %v3699_v61 = vld [vmem:[%s5566_s1 + $0x1b] ss:$0 sm:$0xff]  ;;  %v3697_v6 = vld [vmem:[%s4262_s13 + $0x52] sm:$0xf] }
  0xf3   : > { %v1670_v28 = vadd.f32 %v1666_v17, %v1653_v15  ;;  %v1683_v30 = vmul.f32 %v3679_v7, %v3678_v27  ;;  %v1684_v33 = vadd.f32 %v1680_v23, %v1667_v21  ;;  %v1697_v35 = vmul.f32 %v3684_v20, %v3680_v18  ;;  %v3698_v7 = vld [vmem:[%s4262_s13 + $0x5a] sm:$0xf] }
  0xf4   : > { %v1685_v34 = vadd.f32 %v1681_v24, %v1668_v22  ;;  %v1698_v36 = vmul.f32 %v3684_v20, %v3681_v19  ;;  %v1686_v39 = vadd.f32 %v1682_v29, %v1669_v26  ;;  %v1699_v41 = vmul.f32 %v3684_v20, %v3682_v25 }
  0xf5   : > { %v1687_v40 = vadd.f32 %v1683_v30, %v1670_v28  ;;  %v1700_v42 = vmul.f32 %v3684_v20, %v3683_v38  ;;  %v1701_v49 = vadd.f32 %v1697_v35, %v1684_v33  ;;  %v1714_v5 = vmul.f32 %v3689_v32, %v3685_v31  ;;  %v3700_v38 = vld [vmem:[%s4262_s13 + $0x12] sm:$0xf]  ;;  %v3704_v31 = vld [vmem:[%s5566_s1 + $0x1d] ss:$0 sm:$0xff] }
  0xf6   : > { %v1702_v51 = vadd.f32 %v1698_v36, %v1685_v34  ;;  %v1715_v52 = vmul.f32 %v3689_v32, %v3686_v46  ;;  %v1703_v55 = vadd.f32 %v1699_v41, %v1686_v39  ;;  %v1716_v57 = vmul.f32 %v3689_v32, %v3687_v37  ;;  %v3701_v35 = vld [vmem:[%s4262_s13 + $0x1a] sm:$0xf]  ;;  %v3703_v41 = vld [vmem:[%s4262_s13 + $0x2a] sm:$0xf] }
  0xf7   : > { %v1704_v56 = vadd.f32 %v1700_v42, %v1687_v40  ;;  %v1717_v58 = vmul.f32 %v3689_v32, %v3688_v47  ;;  %v1718_v63 = vadd.f32 %v1714_v5, %v1701_v49  ;;  %v1777_v1 = vmul.f32 %v3694_v45, %v3690_v43  ;;  %v3702_v40 = vld [vmem:[%s4262_s13 + $0x22] sm:$0xf]  ;;  %v3705_v42 = vld [vmem:[%s4262_s13 + $0x71] sm:$0xf] }
  0xf8   : > { %v1719_v0 = vadd.f32 %v1715_v52, %v1702_v51  ;;  %v1778_v2 = vmul.f32 %v3694_v45, %v3691_v44  ;;  %v1720_v8 = vadd.f32 %v1716_v57, %v1703_v55  ;;  %v1779_v11 = vmul.f32 %v3694_v45, %v3692_v53  ;;  %v3706_v51 = vld [vmem:[%s4262_s13 + $0x79] sm:$0xf]  ;;  %v3709_v5 = vld [vmem:[%s5566_s1 + $0x23] ss:$0 sm:$0xff] }
  0xf9   : > { %v1721_v9 = vadd.f32 %v1717_v58, %v1704_v56  ;;  %v1780_v13 = vmul.f32 %v3694_v45, %v3693_v54  ;;  %v1722_v27 = vadd.f32 %v4792_v48, %v1718_v63  ;;  %v1790_v16 = vmul.f32 %v3699_v61, %v3695_v59 }
  0xfa   : > { %v1723_v15 = vadd.f32 %v4792_v48, %v1719_v0  ;;  %v1791_v17 = vmul.f32 %v3699_v61, %v3696_v60  ;;  %v1724_v18 = vadd.f32 %v4792_v48, %v1720_v8  ;;  %v1792_v20 = vmul.f32 %v3699_v61, %v3697_v6  ;;  %v3707_v60 = vld [vmem:[%s4262_s13 + $0x81] sm:$0xf]  ;;  %v3714_v8 = vld [vmem:[%s5566_s1 + $0x25] ss:$0 sm:$0xff] }
  0xfb   : > { %v1725_v19 = vadd.f32 %v4792_v48, %v1721_v9  ;;  %v1793_v21 = vmul.f32 %v3699_v61, %v3698_v7  ;;  %v1727_v22 = vsel %vm4921_vm7, %v1722_v27, 0.0  ;;  %1764 = vst.msk [vmem:[#allocation2 + $0x30] sm:$0xf] %vm779_vm0, %v1722_v27  ;;  %v1794_v24 = vadd.f32 %v1790_v16, %v1777_v1  ;;  %v3708_v61 = vld [vmem:[%s4262_s13 + $0x89] sm:$0xf] }
  0xfc   : > { %v1728_v23 = vsel %vm4921_vm7, %v1723_v15, 0.0  ;;  %1765 = vst.msk [vmem:[#allocation2 + $0x34] sm:$0xf] %vm779_vm0, %v1723_v15  ;;  %v1795_v25 = vadd.f32 %v1791_v17, %v1778_v2  ;;  %v1729_v26 = vsel %vm4921_vm7, %v1724_v18, 0.0  ;;  %v1731_v29 = vsel %vm779_vm0, %v1727_v22, 0.0 }
  0xfd   : > { %v1730_v28 = vsel %vm4921_vm7, %v1725_v19, 0.0  ;;  %v1732_v30 = vsel %vm779_vm0, %v1728_v23, 0.0  ;;  %1766 = vst.msk [vmem:[#allocation2 + $0x38] sm:$0xf] %vm779_vm0, %v1724_v18  ;;  %1767 = vst.msk [vmem:[#allocation2 + $0x3c] sm:$0xf] %vm779_vm0, %v1725_v19  ;;  %v1745_v34 = vmul.f32 %v1727_v22, %v1727_v22  ;;  %v1746_v36 = vmul.f32 %v1728_v23, %v1728_v23 }
  0xfe   : > { %v1733_v46 = vadd.f32 %v1732_v30, %v1731_v29  ;;  %v1734_v32 = vsel %vm779_vm0, %v1729_v26, 0.0  ;;  %v1736_v33 = vsel %vm779_vm0, %v1730_v28, 0.0  ;;  %v1747_v37 = vmul.f32 %v1729_v26, %v1729_v26  ;;  %v3710_v6 = vld [vmem:[%s4262_s13 + $0x41] sm:$0xf]  ;;  %v3711_v7 = vld [vmem:[%s4262_s13 + $0x49] sm:$0xf] }
  0xff   : > { %v1748_v47 = vmul.f32 %v1730_v28, %v1730_v28  ;;  %v1796_v39 = vadd.f32 %v1792_v20, %v1779_v11  ;;  %v1749_v44 = vsel %vm779_vm0, %v1745_v34, 0.0  ;;  %v1797_v45 = vadd.f32 %v1793_v21, %v1780_v13  ;;  %v3712_v15 = vld [vmem:[%s4262_s13 + $0x51] sm:$0xf]  ;;  %v3713_v16 = vld [vmem:[%s4262_s13 + $0x59] sm:$0xf] }
 0x100   : > { %v1735_v43 = vadd.f32 %v1734_v32, %v1733_v46  ;;  %v1807_v49 = vmul.f32 %v3704_v31, %v3700_v38  ;;  %v1750_v52 = vsel %vm779_vm0, %v1746_v36, 0.0  ;;  %v1752_v53 = vsel %vm779_vm0, %v1747_v37, 0.0  ;;  %v3716_v38 = vld [vmem:[%s4262_s13 + $0x19] sm:$0xf]  ;;  %v3719_v26 = vld [vmem:[%s5566_s1 + $0x27] ss:$0 sm:$0xff] }
 0x101   : > { %v1754_v54 = vsel %vm779_vm0, %v1748_v47, 0.0  ;;  %v1808_v55 = vmul.f32 %v3704_v31, %v3701_v35  ;;  %v1751_v57 = vadd.f32 %v1750_v52, %v1749_v44  ;;  %v1809_v58 = vmul.f32 %v3704_v31, %v3702_v40  ;;  %v3717_v46 = vld [vmem:[%s4262_s13 + $0x21] sm:$0xf]  ;;  %v3718_v32 = vld [vmem:[%s4262_s13 + $0x29] sm:$0xf] }
 0x102   : > { %v1737_v56 = vadd.f32 %v1736_v33, %v1735_v43  ;;  %v1810_v59 = vmul.f32 %v3704_v31, %v3703_v41  ;;  %v1811_v63 = vadd.f32 %v1807_v49, %v1794_v24  ;;  %v1824_v1 = vmul.f32 %v3709_v5, %v3705_v42  ;;  %v3720_v33 = vld [vmem:[%s4262_s13 + $0x70] sm:$0xf]  ;;  %v3721_v47 = vld [vmem:[%s4262_s13 + $0x78] sm:$0xf]  ;;  %v3723_v52 = vld [vmem:[%s4262_s13 + $0x88] sm:$0xf] }
 0x103   : > { %v1812_v0 = vadd.f32 %v1808_v55, %v1795_v25  ;;  %v1825_v2 = vmul.f32 %v3709_v5, %v3706_v51  ;;  %v1753_v11 = vadd.f32 %v1752_v53, %v1751_v57  ;;  %v1813_v13 = vadd.f32 %v1809_v58, %v1796_v39  ;;  %v3715_v25 = vld [vmem:[%s4262_s13 + $0x11] sm:$0xf]  ;;  %v3724_v39 = vld [vmem:[%s5566_s1 + $0x2d] ss:$0 sm:$0xff]  ;;  %v3725_v57 = vld [vmem:[%s4262_s13 + $0x40] sm:$0xf] }
 0x104   : > { %v1738_v9 = vrot.slane %v1737_v56, 4  ;;  %v1814_v27 = vadd.f32 %v1810_v59, %v1797_v45  ;;  %v1826_v17 = vmul.f32 %v3709_v5, %v3707_v60  ;;  %v1827_v18 = vmul.f32 %v3709_v5, %v3708_v61  ;;  %v3722_v5 = vld [vmem:[%s4262_s13 + $0x80] sm:$0xf]  ;;  %v3726_v58 = vld [vmem:[%s4262_s13 + $0x48] sm:$0xf] }
 0x105   : > { %v1828_v19 = vadd.f32 %v1824_v1, %v1811_v63  ;;  %v1829_v20 = vadd.f32 %v1825_v2, %v1812_v0  ;;  %v1755_v22 = vadd.f32 %v1754_v54, %v1753_v11  ;;  %v1841_v23 = vmul.f32 %v3714_v8, %v3710_v6  ;;  %v3729_v59 = vld [vmem:[%s5566_s1 + $0x2f] ss:$0 sm:$0xff]  ;;  %v3727_v1 = vld [vmem:[%s4262_s13 + $0x50] sm:$0xf]  ;;  %v3728_v2 = vld [vmem:[%s4262_s13 + $0x58] sm:$0xf] }
 0x106   : > { %v1739_v21 = vadd.f32 %v1738_v9, %v1737_v56  ;;  %v1842_v24 = vmul.f32 %v3714_v8, %v3711_v7  ;;  %v1830_v28 = vadd.f32 %v1826_v17, %v1813_v13  ;;  %v1831_v29 = vadd.f32 %v1827_v18, %v1814_v27  ;;  %v3730_v11 = vld [vmem:[%s4262_s13 + $0x10] sm:$0xf]  ;;  %v3731_v17 = vld [vmem:[%s4262_s13 + $0x18] sm:$0xf]  ;;  %v3732_v18 = vld [vmem:[%s4262_s13 + $0x20] sm:$0xf] }
 0x107   : > { %v1843_v30 = vmul.f32 %v3714_v8, %v3712_v15  ;;  %v1844_v31 = vmul.f32 %v3714_v8, %v3713_v16  ;;  %v1756_v35 = vrot.slane %v1755_v22, 4  ;;  %v1845_v36 = vadd.f32 %v1841_v23, %v1828_v19  ;;  %v3734_v19 = vld [vmem:[%s5566_s1 + $0x31] ss:$0 sm:$0xff] }
 0x108   : > { %v1740_v34 = vrot.slane %v1739_v21, 2  ;;  %v1846_v37 = vadd.f32 %v1842_v24, %v1829_v20  ;;  %v1858_v42 = vmul.f32 %v3719_v26, %v3715_v25  ;;  %v1859_v43 = vmul.f32 %v3719_v26, %v3716_v38  ;;  %v3733_v24 = vld [vmem:[%s4262_s13 + $0x28] sm:$0xf] }
 0x109   : > { %v1847_v40 = vadd.f32 %v1843_v30, %v1830_v28  ;;  %v1848_v41 = vadd.f32 %v1844_v31, %v1831_v29  ;;  %v1757_v45 = vadd.f32 %v1756_v35, %v1755_v22  ;;  %v1860_v49 = vmul.f32 %v3719_v26, %v3717_v46  ;;  %v3735_v25 = vld [vmem:[%s4262_s13 + $0x6a] sm:$0xf]  ;;  %v3736_v31 = vld [vmem:[%s4262_s13 + $0x72] sm:$0xf]  ;;  %v3737_v46 = vld [vmem:[%s4262_s13 + $0x7a] sm:$0xf] }
 0x10a   : > { %v1741_v44 = vadd.f32 %v1740_v34, %v1739_v21  ;;  %v1861_v51 = vmul.f32 %v3719_v26, %v3718_v32  ;;  %v1862_v53 = vadd.f32 %v1858_v42, %v1845_v36  ;;  %v1863_v54 = vadd.f32 %v1859_v43, %v1846_v37  ;;  %v3739_v38 = vld [vmem:[%s5566_s1 + $0x4b] ss:$0 sm:$0xff]  ;;  %v3738_v36 = vld [vmem:[%s4262_s13 + $0x82] sm:$0xf]  ;;  %v3744_v42 = vld [vmem:[%s5566_s1 + $0x4d] ss:$0 sm:$0xff] }
 0x10b   : > { %v1875_v55 = vmul.f32 %v3724_v39, %v3720_v33  ;;  %v1876_v56 = vmul.f32 %v3724_v39, %v3721_v47  ;;  %v1758_v61 = vrot.slane %v1757_v45, 2  ;;  %v1864_v63 = vadd.f32 %v1860_v49, %v1847_v40  ;;  %v3740_v40 = vld [vmem:[%s4262_s13 + $0x3a] sm:$0xf] }
 0x10c   : > { %v1742_v60 = vrot.slane %v1741_v44, 1  ;;  %v1865_v0 = vadd.f32 %v1861_v51, %v1848_v41  ;;  %v1877_v6 = vmul.f32 %v3724_v39, %v3722_v5  ;;  %v1878_v7 = vmul.f32 %v3724_v39, %v3723_v52  ;;  %v3741_v41 = vld [vmem:[%s4262_s13 + $0x42] sm:$0xf]  ;;  %v3742_v51 = vld [vmem:[%s4262_s13 + $0x4a] sm:$0xf] }
 0x10d   : > { %v1879_v8 = vadd.f32 %v1875_v55, %v1862_v53  ;;  %v1880_v9 = vadd.f32 %v1876_v56, %v1863_v54  ;;  %v1759_v27 = vadd.f32 %v1758_v61, %v1757_v45  ;;  %v1892_v15 = vmul.f32 %v3729_v59, %v3725_v57  ;;  %v3743_v5 = vld [vmem:[%s4262_s13 + $0x52] sm:$0xf]  ;;  %v3745_v56 = vld [vmem:[%s4262_s13 + $0xa] sm:$0xf] }
 0x10e   : > { %v1743_v13 = vadd.f32 %v1742_v60, %v1741_v44  ;;  %v1893_v16 = vmul.f32 %v3729_v59, %v3726_v58  ;;  %v1881_v20 = vadd.f32 %v1877_v6, %v1864_v63  ;;  %v1882_v21 = vadd.f32 %v1878_v7, %v1865_v0  ;;  %v3746_v57 = vld [vmem:[%s4262_s13 + $0x12] sm:$0xf]  ;;  %v3749_v58 = vld [vmem:[%s5566_s1 + $0x4f] ss:$0 sm:$0xff]  ;;  %v3747_v0 = vld [vmem:[%s4262_s13 + $0x1a] sm:$0xf] }
 0x10f   : > { %v1894_v22 = vmul.f32 %v3729_v59, %v3727_v1  ;;  %v1895_v23 = vmul.f32 %v3729_v59, %v3728_v2  ;;  %v1760_v28 = vrot.slane %v1759_v27, 1  ;;  %v1896_v29 = vadd.f32 %v1892_v15, %v1879_v8  ;;  %v3750_v8 = vld [vmem:[%s4262_s13 + $0x69] sm:$0xf] }
 0x110   : > { %v5003_v26 = vadd.f32 %v1743_v13, %v4877_v62  ;;  %v1897_v30 = vadd.f32 %v1893_v16, %v1880_v9  ;;  %v1909_v34 = vmul.f32 %v3734_v19, %v3730_v11  ;;  %v1910_v35 = vmul.f32 %v3734_v19, %v3731_v17  ;;  %v3751_v9 = vld [vmem:[%s4262_s13 + $0x71] sm:$0xf]  ;;  %v3754_v11 = vld [vmem:[%s5566_s1 + $0x55] ss:$0 sm:$0xff]  ;;  %v3752_v17 = vld [vmem:[%s4262_s13 + $0x79] sm:$0xf] }
 0x111   : > { %v1898_v32 = vadd.f32 %v1894_v22, %v1881_v20  ;;  %v1899_v33 = vadd.f32 %v1895_v23, %v1882_v21  ;;  %v1761_v37 = vadd.f32 %v1760_v28, %v1759_v27  ;;  %v1911_v47 = vmul.f32 %v3734_v19, %v3732_v18  ;;  %v3753_v18 = vld [vmem:[%s4262_s13 + $0x81] sm:$0xf]  ;;  %v3755_v23 = vld [vmem:[%s4262_s13 + $0x39] sm:$0xf] }
 0x112   : > { %v1912_v39 = vmul.f32 %v3734_v19, %v3733_v24  ;;  %v1926_v62 = vmul.f32 %v3739_v38, %v3735_v25  ;;  %v1913_v43 = vadd.f32 %v1909_v34, %v1896_v29  ;;  %v1914_v44 = vadd.f32 %v1910_v35, %v1897_v30  ;;  %v3756_v24 = vld [vmem:[%s4262_s13 + $0x41] sm:$0xf]  ;;  %v3759_v25 = vld [vmem:[%s5566_s1 + $0x57] ss:$0 sm:$0xff] }
 0x113   : > { %v1927_v45 = vmul.f32 %v3739_v38, %v3736_v31  ;;  %v1928_v49 = vmul.f32 %v3739_v38, %v3737_v46  ;;  %v5016_v52 = vadd.f32 %v1761_v37, %v4887_v14  ;;  %v1915_v53 = vadd.f32 %v1911_v47, %v1898_v32  ;;  %v3748_v14 = vld [vmem:[%s4262_s13 + $0x22] sm:$0xf]  ;;  %v3757_v31 = vld [vmem:[%s4262_s13 + $0x49] sm:$0xf]  ;;  %v3758_v46 = vld [vmem:[%s4262_s13 + $0x51] sm:$0xf] }
 0x114   : > { %v1916_v54 = vadd.f32 %v1912_v39, %v1899_v33  ;;  %v1929_v55 = vmul.f32 %v3739_v38, %v3738_v36  ;;  %v1930_v59 = vadd.f32 %v1926_v62, %v1913_v43  ;;  %v1943_v61 = vmul.f32 %v3744_v42, %v3740_v40  ;;  %v3760_v36 = vld [vmem:[%s4262_s13 + $0x9] sm:$0xf]  ;;  %v3761_v37 = vld [vmem:[%s4262_s13 + $0x11] sm:$0xf]  ;;  %v3764_v47 = vld [vmem:[%s5566_s1 + $0x59] ss:$0 sm:$0xff] }
 0x115   : > { %v1931_v60 = vadd.f32 %v1927_v45, %v1914_v44  ;;  %v1944_v63 = vmul.f32 %v3744_v42, %v3741_v41  ;;  %v1932_v1 = vadd.f32 %v1928_v49, %v1915_v53  ;;  %v1945_v6 = vmul.f32 %v3744_v42, %v3742_v51  ;;  %v3763_v43 = vld [vmem:[%s4262_s13 + $0x21] sm:$0xf]  ;;  %v3766_v53 = vld [vmem:[%s4262_s13 + $0x70] sm:$0xf] }
 0x116   : > { %v1933_v2 = vadd.f32 %v1929_v55, %v1916_v54  ;;  %v1946_v7 = vmul.f32 %v3744_v42, %v3743_v5  ;;  %v1947_v13 = vadd.f32 %v1943_v61, %v1930_v59  ;;  %v1960_v15 = vmul.f32 %v3749_v58, %v3745_v56  ;;  %v3762_v42 = vld [vmem:[%s4262_s13 + $0x19] sm:$0xf]  ;;  %v3765_v5 = vld [vmem:[%s4262_s13 + $0x68] sm:$0xf]  ;;  %v3769_v54 = vld [vmem:[%s5566_s1 + $0x5f] ss:$0 sm:$0xff] }
 0x117   : > { %v1948_v27 = vadd.f32 %v1944_v63, %v1931_v60  ;;  %v1961_v16 = vmul.f32 %v3749_v58, %v3746_v57  ;;  %v1949_v19 = vadd.f32 %v1945_v6, %v1932_v1  ;;  %v1962_v21 = vmul.f32 %v3749_v58, %v3747_v0  ;;  %v3767_v59 = vld [vmem:[%s4262_s13 + $0x78] sm:$0xf]  ;;  %v3768_v60 = vld [vmem:[%s4262_s13 + $0x80] sm:$0xf] }
 0x118   : > { %v1950_v20 = vadd.f32 %v1946_v7, %v1933_v2  ;;  %v1963_v22 = vmul.f32 %v3749_v58, %v3748_v14  ;;  %v1964_v38 = vadd.f32 %v1960_v15, %v1947_v13  ;;  %v1977_v29 = vmul.f32 %v3754_v11, %v3750_v8  ;;  %v3770_v1 = vld [vmem:[%s4262_s13 + $0x38] sm:$0xf]  ;;  %v3771_v2 = vld [vmem:[%s4262_s13 + $0x40] sm:$0xf]  ;;  %v3772_v13 = vld [vmem:[%s4262_s13 + $0x48] sm:$0xf] }
 0x119   : > { %v1965_v28 = vadd.f32 %v1961_v16, %v1948_v27  ;;  %v1978_v30 = vmul.f32 %v3754_v11, %v3751_v9  ;;  %v1966_v32 = vadd.f32 %v1962_v21, %v1949_v19  ;;  %v1979_v34 = vmul.f32 %v3754_v11, %v3752_v17  ;;  %v3774_v6 = vld [vmem:[%s5566_s1 + $0x61] ss:$0 sm:$0xff]  ;;  %v3773_v27 = vld [vmem:[%s4262_s13 + $0x50] sm:$0xf]  ;;  %v3775_v19 = vld [vmem:[%s4262_s13 + $0x8] sm:$0xf] }
 0x11a   : > { %v1967_v33 = vadd.f32 %v1963_v22, %v1950_v20  ;;  %v1980_v35 = vmul.f32 %v3754_v11, %v3753_v18  ;;  %v1981_v39 = vadd.f32 %v1977_v29, %v1964_v38  ;;  %v1994_v40 = vmul.f32 %v3759_v25, %v3755_v23  ;;  %v3776_v20 = vld [vmem:[%s4262_s13 + $0x10] sm:$0xf]  ;;  %v3779_v21 = vld [vmem:[%s5566_s1 + $0x63] ss:$0 sm:$0xff]  ;;  %v3777_v38 = vld [vmem:[%s4262_s13 + $0x18] sm:$0xf] }
 0x11b   : > { %v1982_v62 = vadd.f32 %v1978_v30, %v1965_v28  ;;  %v1995_v41 = vmul.f32 %v3759_v25, %v3756_v24  ;;  %v1983_v44 = vadd.f32 %v1979_v34, %v1966_v32  ;;  %v1996_v49 = vmul.f32 %v3759_v25, %v3757_v31  ;;  %v3778_v28 = vld [vmem:[%s4262_s13 + $0x20] sm:$0xf]  ;;  %v3780_v32 = vld [vmem:[%s4262_s13 + $0x72] sm:$0xf]  ;;  %v3784_v34 = vld [vmem:[%s5566_s1 + $0x1a] ss:$0 sm:$0xff] }
 0x11c   : > { %v1984_v45 = vadd.f32 %v1980_v35, %v1967_v33  ;;  %v1997_v51 = vmul.f32 %v3759_v25, %v3758_v46  ;;  %v1998_v55 = vadd.f32 %v1994_v40, %v1981_v39  ;;  %v2011_v57 = vmul.f32 %v3764_v47, %v3760_v36  ;;  %v3781_v33 = vld [vmem:[%s4262_s13 + $0x7a] sm:$0xf]  ;;  %v3782_v39 = vld [vmem:[%s4262_s13 + $0x82] sm:$0xf] }
 0x11d   : > { %v1999_v56 = vadd.f32 %v1995_v41, %v1982_v62  ;;  %v2012_v58 = vmul.f32 %v3764_v47, %v3761_v37  ;;  %v2000_v61 = vadd.f32 %v1996_v49, %v1983_v44  ;;  %v2013_v0 = vmul.f32 %v3764_v47, %v3762_v42  ;;  %v3783_v62 = vld [vmem:[%s4262_s13 + $0x8a] sm:$0xf]  ;;  %v3785_v44 = vld [vmem:[%s4262_s13 + $0x42] sm:$0xf]  ;;  %v3789_v49 = vld [vmem:[%s5566_s1 + $0x1c] ss:$0 sm:$0xff] }
 0x11e   : > { %v2001_v63 = vadd.f32 %v1997_v51, %v1984_v45  ;;  %v2014_v14 = vmul.f32 %v3764_v47, %v3763_v43  ;;  %v2015_v7 = vadd.f32 %v2011_v57, %v1998_v55  ;;  %v2028_v9 = vmul.f32 %v3769_v54, %v3765_v5  ;;  %v3786_v45 = vld [vmem:[%s4262_s13 + $0x4a] sm:$0xf]  ;;  %v3787_v55 = vld [vmem:[%s4262_s13 + $0x52] sm:$0xf] }
 0x11f   : > { %v2016_v8 = vadd.f32 %v2012_v58, %v1999_v56  ;;  %v2029_v11 = vmul.f32 %v3769_v54, %v3766_v53  ;;  %v2017_v15 = vadd.f32 %v2013_v0, %v2000_v61  ;;  %v2030_v17 = vmul.f32 %v3769_v54, %v3767_v59  ;;  %v3788_v56 = vld [vmem:[%s4262_s13 + $0x5a] sm:$0xf] }
 0x120   : > { %v2018_v16 = vadd.f32 %v2014_v14, %v2001_v63  ;;  %v2031_v18 = vmul.f32 %v3769_v54, %v3768_v60  ;;  %v2032_v22 = vadd.f32 %v2028_v9, %v2015_v7  ;;  %v2045_v24 = vmul.f32 %v3774_v6, %v3770_v1 }
 0x121   : > { %v2033_v23 = vadd.f32 %v2029_v11, %v2016_v8  ;;  %v2046_v25 = vmul.f32 %v3774_v6, %v3771_v2  ;;  %v2034_v29 = vadd.f32 %v2030_v17, %v2017_v15  ;;  %v2047_v31 = vmul.f32 %v3774_v6, %v3772_v13  ;;  %v3790_v8 = vld [vmem:[%s4262_s13 + $0x71] sm:$0xf]  ;;  %v3791_v15 = vld [vmem:[%s4262_s13 + $0x79] sm:$0xf] }
 0x122   : > { %v2035_v30 = vadd.f32 %v2031_v18, %v2018_v16  ;;  %v2048_v46 = vmul.f32 %v3774_v6, %v3773_v27  ;;  %v2049_v35 = vadd.f32 %v2045_v24, %v2032_v22  ;;  %v2062_v37 = vmul.f32 %v3779_v21, %v3775_v19 }
 0x123   : > { %v2050_v36 = vadd.f32 %v2046_v25, %v2033_v23  ;;  %v2063_v47 = vmul.f32 %v3779_v21, %v3776_v20  ;;  %v2051_v40 = vadd.f32 %v2047_v31, %v2034_v29  ;;  %v2064_v42 = vmul.f32 %v3779_v21, %v3777_v38  ;;  %v3792_v20 = vld [vmem:[%s4262_s13 + $0x81] sm:$0xf]  ;;  %v3793_v25 = vld [vmem:[%s4262_s13 + $0x89] sm:$0xf] }
 0x124   : > { %v2052_v41 = vadd.f32 %v2048_v46, %v2035_v30  ;;  %v2065_v43 = vmul.f32 %v3779_v21, %v3778_v28  ;;  %v2066_v51 = vadd.f32 %v2062_v37, %v2049_v35  ;;  %v2127_v53 = vmul.f32 %v3784_v34, %v3780_v32  ;;  %v3795_v38 = vld [vmem:[%s4262_s13 + $0x41] sm:$0xf]  ;;  %v3796_v46 = vld [vmem:[%s4262_s13 + $0x49] sm:$0xf]  ;;  %v3799_v32 = vld [vmem:[%s5566_s1 + $0x26] ss:$0 sm:$0xff] }
 0x125   : > { %v2067_v5 = vadd.f32 %v2063_v47, %v2050_v36  ;;  %v2128_v54 = vmul.f32 %v3784_v34, %v3781_v33  ;;  %v2068_v57 = vadd.f32 %v2064_v42, %v2051_v40  ;;  %v2129_v60 = vmul.f32 %v3784_v34, %v3782_v39  ;;  %v3797_v37 = vld [vmem:[%s4262_s13 + $0x51] sm:$0xf] }
 0x126   : > { %v2069_v58 = vadd.f32 %v2065_v43, %v2052_v41  ;;  %v2130_v61 = vmul.f32 %v3784_v34, %v3783_v62  ;;  %v2070_v63 = vadd.f32 %v4792_v48, %v2066_v51  ;;  %v2140_v14 = vmul.f32 %v3789_v49, %v3785_v44  ;;  %v3798_v41 = vld [vmem:[%s4262_s13 + $0x59] sm:$0xf]  ;;  %v3800_v42 = vld [vmem:[%s4262_s13 + $0x70] sm:$0xf] }
 0x127   : > { %v2071_v0 = vadd.f32 %v4792_v48, %v2067_v5  ;;  %v2141_v1 = vmul.f32 %v3789_v49, %v3786_v45  ;;  %v2072_v2 = vadd.f32 %v4792_v48, %v2068_v57  ;;  %v2142_v4 = vmul.f32 %v3789_v49, %v3787_v55  ;;  %v3801_v51 = vld [vmem:[%s4262_s13 + $0x78] sm:$0xf]  ;;  %v3804_v5 = vld [vmem:[%s5566_s1 + $0x2e] ss:$0 sm:$0xff]  ;;  %v3802_v57 = vld [vmem:[%s4262_s13 + $0x80] sm:$0xf] }
 0x128   : > { %v2073_v6 = vadd.f32 %v4792_v48, %v2069_v58  ;;  %v2143_v7 = vmul.f32 %v3789_v49, %v3788_v56  ;;  %v2077_v9 = vsel %vm5085_vm8, %v2070_v63, 0.0  ;;  %2114 = vst.msk [vmem:[#allocation2 + $0x40] sm:$0xf] %vm779_vm0, %v2070_v63  ;;  %v2144_v13 = vadd.f32 %v2140_v14, %v2127_v53  ;;  %v3794_v48 = vld [vmem:[%s5566_s1 + $0x24] ss:$0 sm:$0xff] }
 0x129   : > { %v2078_v11 = vsel %vm5085_vm8, %v2071_v0, 0.0  ;;  %2115 = vst.msk [vmem:[#allocation2 + $0x44] sm:$0xf] %vm779_vm0, %v2071_v0  ;;  %v2145_v27 = vadd.f32 %v2141_v1, %v2128_v54  ;;  %v2079_v16 = vsel %vm5085_vm8, %v2072_v2, 0.0  ;;  %v2081_v17 = vsel %vm779_vm0, %v2077_v9, 0.0 }
 0x12a   : > { %v2082_v18 = vsel %vm779_vm0, %v2078_v11, 0.0  ;;  %v2095_v19 = vmul.f32 %v2077_v9, %v2077_v9  ;;  %2116 = vst.msk [vmem:[#allocation2 + $0x48] sm:$0xf] %vm779_vm0, %v2072_v2  ;;  %2117 = vst.msk [vmem:[#allocation2 + $0x4c] sm:$0xf] %vm779_vm0, %v2073_v6  ;;  %v2084_v22 = vsel %vm779_vm0, %v2079_v16, 0.0  ;;  %v2096_v23 = vmul.f32 %v2078_v11, %v2078_v11 }
 0x12b   : > { %v2083_v21 = vadd.f32 %v2082_v18, %v2081_v17  ;;  %v2097_v24 = vmul.f32 %v2079_v16, %v2079_v16  ;;  %v2146_v29 = vadd.f32 %v2142_v4, %v2129_v60  ;;  %v2147_v30 = vadd.f32 %v2143_v7, %v2130_v61  ;;  %v3803_v58 = vld [vmem:[%s4262_s13 + $0x88] sm:$0xf]  ;;  %v3805_v0 = vld [vmem:[%s4262_s13 + $0x40] sm:$0xf]  ;;  %v3809_v14 = vld [vmem:[%s5566_s1 + $0x30] ss:$0 sm:$0xff] }
 0x12c   : > { %v2099_v28 = vsel %vm779_vm0, %v2095_v19, 0.0  ;;  %v2157_v31 = vmul.f32 %v3794_v48, %v3790_v8  ;;  %v2100_v34 = vsel %vm779_vm0, %v2096_v23, 0.0  ;;  %v2158_v36 = vmul.f32 %v3794_v48, %v3791_v15  ;;  %v3806_v7 = vld [vmem:[%s4262_s13 + $0x48] sm:$0xf]  ;;  %v3808_v15 = vld [vmem:[%s4262_s13 + $0x58] sm:$0xf] }
 0x12d   : > { %v2085_v33 = vadd.f32 %v2084_v22, %v2083_v21  ;;  %v2102_v35 = vsel %vm779_vm0, %v2097_v24, 0.0  ;;  %v2101_v47 = vadd.f32 %v2100_v34, %v2099_v28  ;;  %v2159_v39 = vmul.f32 %v3794_v48, %v3792_v20  ;;  %v3810_v19 = vld [vmem:[%s4262_s13 + $0x6a] sm:$0xf]  ;;  %v3811_v20 = vld [vmem:[%s4262_s13 + $0x72] sm:$0xf] }
 0x12e   : > { %v2160_v62 = vmul.f32 %v3794_v48, %v3793_v25  ;;  %v2161_v40 = vadd.f32 %v2157_v31, %v2144_v13  ;;  %v2162_v44 = vadd.f32 %v2158_v36, %v2145_v27  ;;  %v2174_v45 = vmul.f32 %v3799_v32, %v3795_v38  ;;  %v3807_v27 = vld [vmem:[%s4262_s13 + $0x50] sm:$0xf]  ;;  %v3814_v21 = vld [vmem:[%s5566_s1 + $0x4c] ss:$0 sm:$0xff]  ;;  %v3812_v38 = vld [vmem:[%s4262_s13 + $0x7a] sm:$0xf] }
 0x12f   : > { %v2088_v43 = vrot.slane %v2085_v33, 4  ;;  %v2175_v49 = vmul.f32 %v3799_v32, %v3796_v46  ;;  %v2103_v53 = vadd.f32 %v2102_v35, %v2101_v47  ;;  %v2163_v54 = vadd.f32 %v2159_v39, %v2146_v29  ;;  %v3813_v46 = vld [vmem:[%s4262_s13 + $0x82] sm:$0xf]  ;;  %v3819_v47 = vld [vmem:[%s5566_s1 + $0x4e] ss:$0 sm:$0xff] }
 0x130   : > { %v2164_v55 = vadd.f32 %v2160_v62, %v2147_v30  ;;  %v2176_v56 = vmul.f32 %v3799_v32, %v3797_v37  ;;  %v2177_v60 = vmul.f32 %v3799_v32, %v3798_v41  ;;  %v2178_v61 = vadd.f32 %v2174_v45, %v2161_v40  ;;  %v3815_v32 = vld [vmem:[%s4262_s13 + $0x3a] sm:$0xf]  ;;  %v3816_v37 = vld [vmem:[%s4262_s13 + $0x42] sm:$0xf] }
 0x131   : > { %v2089_v59 = vadd.f32 %v2088_v43, %v2085_v33  ;;  %v2179_v63 = vadd.f32 %v2175_v49, %v2162_v44  ;;  %v2106_v1 = vrot.slane %v2103_v53, 4  ;;  %v2191_v6 = vmul.f32 %v3804_v5, %v3800_v42  ;;  %v3817_v42 = vld [vmem:[%s4262_s13 + $0x4a] sm:$0xf]  ;;  %v3818_v43 = vld [vmem:[%s4262_s13 + $0x52] sm:$0xf] }
 0x132   : > { %v2180_v2 = vadd.f32 %v2176_v56, %v2163_v54  ;;  %v2192_v4 = vmul.f32 %v3804_v5, %v3801_v51  ;;  %v2181_v9 = vadd.f32 %v2177_v60, %v2164_v55  ;;  %v2193_v11 = vmul.f32 %v3804_v5, %v3802_v57 }
 0x133   : > { %v2090_v8 = vrot.slane %v2089_v59, 2  ;;  %v2194_v13 = vmul.f32 %v3804_v5, %v3803_v58  ;;  %v2107_v48 = vadd.f32 %v2106_v1, %v2103_v53  ;;  %v2195_v16 = vadd.f32 %v2191_v6, %v2178_v61  ;;  %v3820_v5 = vld [vmem:[%s4262_s13 + $0x69] sm:$0xf]  ;;  %v3824_v53 = vld [vmem:[%s5566_s1 + $0x56] ss:$0 sm:$0xff] }
 0x134   : > { %v2196_v17 = vadd.f32 %v2192_v4, %v2179_v63  ;;  %v2208_v18 = vmul.f32 %v3809_v14, %v3805_v0  ;;  %v2197_v23 = vadd.f32 %v2193_v11, %v2180_v2  ;;  %v2209_v25 = vmul.f32 %v3809_v14, %v3806_v7  ;;  %v3821_v58 = vld [vmem:[%s4262_s13 + $0x71] sm:$0xf]  ;;  %v3825_v1 = vld [vmem:[%s4262_s13 + $0x39] sm:$0xf]  ;;  %v3829_v2 = vld [vmem:[%s5566_s1 + $0x58] ss:$0 sm:$0xff] }
 0x135   : > { %v2091_v22 = vadd.f32 %v2090_v8, %v2089_v59  ;;  %v2198_v24 = vadd.f32 %v2194_v13, %v2181_v9  ;;  %v2108_v28 = vrot.slane %v2107_v48, 2  ;;  %v2210_v29 = vmul.f32 %v3809_v14, %v3807_v27  ;;  %v3822_v59 = vld [vmem:[%s4262_s13 + $0x79] sm:$0xf]  ;;  %v3826_v9 = vld [vmem:[%s4262_s13 + $0x41] sm:$0xf] }
 0x136   : > { %v2211_v30 = vmul.f32 %v3809_v14, %v3808_v15  ;;  %v2212_v31 = vadd.f32 %v2208_v18, %v2195_v16  ;;  %v2213_v34 = vadd.f32 %v2209_v25, %v2196_v17  ;;  %v2225_v35 = vmul.f32 %v3814_v21, %v3810_v19  ;;  %v3823_v14 = vld [vmem:[%s4262_s13 + $0x81] sm:$0xf]  ;;  %v3830_v16 = vld [vmem:[%s4262_s13 + $0x68] sm:$0xf]  ;;  %v3834_v17 = vld [vmem:[%s5566_s1 + $0x60] ss:$0 sm:$0xff] }
 0x137   : > { %v2092_v33 = vrot.slane %v2091_v22, 1  ;;  %v2226_v36 = vmul.f32 %v3814_v21, %v3811_v20  ;;  %v2109_v39 = vadd.f32 %v2108_v28, %v2107_v48  ;;  %v2214_v62 = vadd.f32 %v2210_v29, %v2197_v23  ;;  %v3828_v48 = vld [vmem:[%s4262_s13 + $0x51] sm:$0xf]  ;;  %v3832_v23 = vld [vmem:[%s4262_s13 + $0x78] sm:$0xf] }
 0x138   : > { %v2215_v40 = vadd.f32 %v2211_v30, %v2198_v24  ;;  %v2227_v41 = vmul.f32 %v3814_v21, %v3812_v38  ;;  %v2228_v45 = vmul.f32 %v3814_v21, %v3813_v46  ;;  %v2229_v49 = vadd.f32 %v2225_v35, %v2212_v31  ;;  %v3833_v29 = vld [vmem:[%s4262_s13 + $0x80] sm:$0xf]  ;;  %v3835_v30 = vld [vmem:[%s4262_s13 + $0x38] sm:$0xf]  ;;  %v3837_v35 = vld [vmem:[%s4262_s13 + $0x48] sm:$0xf] }
 0x139   : > { %v2093_v44 = vadd.f32 %v2092_v33, %v2091_v22  ;;  %v2230_v51 = vadd.f32 %v2226_v36, %v2213_v34  ;;  %v2110_v54 = vrot.slane %v2109_v39, 1  ;;  %v2242_v56 = vmul.f32 %v3819_v47, %v3815_v32  ;;  %v3831_v22 = vld [vmem:[%s4262_s13 + $0x70] sm:$0xf]  ;;  %v3839_v31 = vld [vmem:[%s5566_s1 + $0x62] ss:$0 sm:$0xff] }
 0x13a   : > { %v2231_v55 = vadd.f32 %v2227_v41, %v2214_v62  ;;  %v2243_v57 = vmul.f32 %v3819_v47, %v3816_v37  ;;  %v2232_v61 = vadd.f32 %v2228_v45, %v2215_v40  ;;  %v2244_v63 = vmul.f32 %v3819_v47, %v3817_v42  ;;  %v3836_v34 = vld [vmem:[%s4262_s13 + $0x40] sm:$0xf]  ;;  %v3838_v62 = vld [vmem:[%s4262_s13 + $0x50] sm:$0xf]  ;;  %v3841_v45 = vld [vmem:[%s4262_s13 + $0x7a] sm:$0xf] }
 0x13b   : > { %v5158_v60 = vadd.f32 %v2093_v44, %v5003_v26  ;;  %v2245_v0 = vmul.f32 %v3819_v47, %v3818_v43  ;;  %v2111_v6 = vadd.f32 %v2110_v54, %v2109_v39  ;;  %v2246_v4 = vadd.f32 %v2242_v56, %v2229_v49  ;;  %v3827_v26 = vld [vmem:[%s4262_s13 + $0x49] sm:$0xf]  ;;  %v3840_v44 = vld [vmem:[%s4262_s13 + $0x72] sm:$0xf]  ;;  %v3844_v49 = vld [vmem:[%s5566_s1 + $0x1e] ss:$0 sm:$0xff] }
 0x13c   : > { %v2247_v7 = vadd.f32 %v2243_v57, %v2230_v51  ;;  %v2259_v8 = vmul.f32 %v3824_v53, %v3820_v5  ;;  %v2248_v11 = vadd.f32 %v2244_v63, %v2231_v55  ;;  %v2260_v27 = vmul.f32 %v3824_v53, %v3821_v58  ;;  %v3842_v55 = vld [vmem:[%s4262_s13 + $0x82] sm:$0xf]  ;;  %v3849_v57 = vld [vmem:[%s5566_s1 + $0x20] ss:$0 sm:$0xff]  ;;  %v3846_v63 = vld [vmem:[%s4262_s13 + $0x4a] sm:$0xf] }
 0x13d   : > { %v2249_v13 = vadd.f32 %v2245_v0, %v2232_v61  ;;  %v2261_v15 = vmul.f32 %v3824_v53, %v3822_v59  ;;  %v5173_v18 = vadd.f32 %v2111_v6, %v5016_v52  ;;  %v2262_v19 = vmul.f32 %v3824_v53, %v3823_v14  ;;  %v3845_v56 = vld [vmem:[%s4262_s13 + $0x42] sm:$0xf]  ;;  %v3847_v0 = vld [vmem:[%s4262_s13 + $0x52] sm:$0xf] }
 0x13e   : > { %v2263_v20 = vadd.f32 %v2259_v8, %v2246_v4  ;;  %v2276_v21 = vmul.f32 %v3829_v2, %v3825_v1  ;;  %v2264_v24 = vadd.f32 %v2260_v27, %v2247_v7  ;;  %v2277_v38 = vmul.f32 %v3829_v2, %v3826_v9  ;;  %v3848_v7 = vld [vmem:[%s4262_s13 + $0x5a] sm:$0xf]  ;;  %v5202_v9 = vld [vmem:[%s5567_s2] ss:$0 sm:$0xff] }
 0x13f   : > { %v2265_v25 = vadd.f32 %v2261_v15, %v2248_v11  ;;  %v2278_v28 = vmul.f32 %v3829_v2, %v3827_v26  ;;  %v2266_v52 = vadd.f32 %v2262_v19, %v2249_v13  ;;  %v2279_v46 = vmul.f32 %v3829_v2, %v3828_v48  ;;  %v3843_v2 = vld [vmem:[%s4262_s13 + $0x8a] sm:$0xf] }
 0x140   : > { %v2280_v32 = vadd.f32 %v2276_v21, %v2263_v20  ;;  %v2293_v33 = vmul.f32 %v3834_v17, %v3830_v16  ;;  %v2281_v36 = vadd.f32 %v2277_v38, %v2264_v24  ;;  %v2294_v47 = vmul.f32 %v3834_v17, %v3831_v22  ;;  %v3850_v21 = vld [vmem:[%s4262_s13 + $0x12] sm:$0xf]  ;;  %v3854_v22 = vld [vmem:[%s5566_s1 + $0x22] ss:$0 sm:$0xff]  ;;  %v3851_v24 = vld [vmem:[%s4262_s13 + $0x1a] sm:$0xf] }
 0x141   : > { %v2282_v37 = vadd.f32 %v2278_v28, %v2265_v25  ;;  %v2295_v39 = vmul.f32 %v3834_v17, %v3832_v23  ;;  %v2283_v40 = vadd.f32 %v2279_v46, %v2266_v52  ;;  %v2296_v41 = vmul.f32 %v3834_v17, %v3833_v29  ;;  %v3852_v25 = vld [vmem:[%s4262_s13 + $0x22] sm:$0xf]  ;;  %v3853_v38 = vld [vmem:[%s4262_s13 + $0x2a] sm:$0xf]  ;;  %v3859_v52 = vld [vmem:[%s5566_s1 + $0x28] ss:$0 sm:$0xff] }
 0x142   : > { %v2297_v42 = vadd.f32 %v2293_v33, %v2280_v32  ;;  %v2310_v43 = vmul.f32 %v3839_v31, %v3835_v30  ;;  %v2298_v51 = vadd.f32 %v2294_v47, %v2281_v36  ;;  %v2311_v53 = vmul.f32 %v3839_v31, %v3836_v34  ;;  %v3855_v30 = vld [vmem:[%s4262_s13 + $0x71] sm:$0xf]  ;;  %v3857_v36 = vld [vmem:[%s4262_s13 + $0x81] sm:$0xf] }
 0x143   : > { %v2299_v5 = vadd.f32 %v2295_v39, %v2282_v37  ;;  %v2312_v54 = vmul.f32 %v3839_v31, %v3837_v35  ;;  %v2300_v58 = vadd.f32 %v2296_v41, %v2283_v40  ;;  %v2313_v59 = vmul.f32 %v3839_v31, %v3838_v62  ;;  %v3856_v31 = vld [vmem:[%s4262_s13 + $0x79] sm:$0xf]  ;;  %v3858_v37 = vld [vmem:[%s4262_s13 + $0x89] sm:$0xf]  ;;  %v3860_v41 = vld [vmem:[%s4262_s13 + $0x41] sm:$0xf] }
 0x144   : > { %v2314_v61 = vadd.f32 %v2310_v43, %v2297_v42  ;;  %v2315_v14 = vadd.f32 %v2311_v53, %v2298_v51  ;;  %v2373_v6 = vmul.f32 %v3844_v49, %v3840_v44  ;;  %v2374_v4 = vmul.f32 %v3844_v49, %v3841_v45  ;;  %v3864_v42 = vld [vmem:[%s5566_s1 + $0x2a] ss:$0 sm:$0xff]  ;;  %v3862_v51 = vld [vmem:[%s4262_s13 + $0x51] sm:$0xf] }
 0x145   : > { %v2316_v1 = vadd.f32 %v2312_v54, %v2299_v5  ;;  %v2317_v8 = vadd.f32 %v2313_v59, %v2300_v58  ;;  %v2375_v11 = vmul.f32 %v3844_v49, %v3842_v55  ;;  %v2386_v13 = vmul.f32 %v3849_v57, %v3845_v56  ;;  %v3863_v56 = vld [vmem:[%s4262_s13 + $0x59] sm:$0xf] }
 0x146   : > { %v2318_v26 = vadd.f32 %v5202_v9, %v2314_v61  ;;  %v2319_v27 = vadd.f32 %v5202_v9, %v2315_v14  ;;  %v2387_v48 = vmul.f32 %v3849_v57, %v3846_v63  ;;  %v2388_v16 = vmul.f32 %v3849_v57, %v3847_v0  ;;  %v3866_v0 = vld [vmem:[%s4262_s13 + $0x19] sm:$0xf]  ;;  %v3869_v14 = vld [vmem:[%s5566_s1 + $0x2c] ss:$0 sm:$0xff] }
 0x147   : > { %v2320_v15 = vadd.f32 %v5202_v9, %v2316_v1  ;;  %v2321_v17 = vadd.f32 %v5202_v9, %v2317_v8  ;;  %v2376_v19 = vmul.f32 %v3844_v49, %v3843_v2  ;;  %v2389_v20 = vmul.f32 %v3849_v57, %v3848_v7  ;;  %v3861_v49 = vld [vmem:[%s4262_s13 + $0x49] sm:$0xf]  ;;  %v3865_v57 = vld [vmem:[%s4262_s13 + $0x11] sm:$0xf]  ;;  %v3867_v7 = vld [vmem:[%s4262_s13 + $0x21] sm:$0xf] }
 0x148   : > { %2360 = vst.msk [vmem:[#allocation2 + $0x50] sm:$0xf] %vm779_vm0, %v2318_v26  ;;  %2361 = vst.msk [vmem:[#allocation2 + $0x54] sm:$0xf] %vm779_vm0, %v2319_v27  ;;  %v2390_v23 = vadd.f32 %v2386_v13, %v2373_v6  ;;  %v2391_v28 = vadd.f32 %v2387_v48, %v2374_v4  ;;  %v2392_v29 = vadd.f32 %v2388_v16, %v2375_v11  ;;  %v2323_v33 = vsel %vm4627_vm3, %v2318_v26, 0.0 }
 0x149   : > { %2362 = vst.msk [vmem:[#allocation2 + $0x58] sm:$0xf] %vm779_vm0, %v2320_v15  ;;  %2363 = vst.msk [vmem:[#allocation2 + $0x5c] sm:$0xf] %vm779_vm0, %v2321_v17  ;;  %v2393_v46 = vadd.f32 %v2389_v20, %v2376_v19  ;;  %v2403_v32 = vmul.f32 %v3854_v22, %v3850_v21  ;;  %v2404_v34 = vmul.f32 %v3854_v22, %v3851_v24  ;;  %v2324_v43 = vsel %vm4627_vm3, %v2319_v27, 0.0 }
 0x14a   : > { %v2405_v35 = vmul.f32 %v3854_v22, %v3852_v25  ;;  %v2406_v47 = vmul.f32 %v3854_v22, %v3853_v38  ;;  %v2420_v62 = vmul.f32 %v3859_v52, %v3855_v30  ;;  %v2421_v40 = vmul.f32 %v3859_v52, %v3856_v31  ;;  %v3868_v8 = vld [vmem:[%s4262_s13 + $0x29] sm:$0xf]  ;;  %v3871_v20 = vld [vmem:[%s4262_s13 + $0x72] sm:$0xf]  ;;  %v3872_v25 = vld [vmem:[%s4262_s13 + $0x7a] sm:$0xf] }
 0x14b   : > { %v2407_v39 = vadd.f32 %v2403_v32, %v2390_v23  ;;  %v2408_v44 = vadd.f32 %v2404_v34, %v2391_v28  ;;  %v2422_v53 = vmul.f32 %v3859_v52, %v3857_v36  ;;  %v2423_v54 = vmul.f32 %v3859_v52, %v3858_v37  ;;  %v3870_v27 = vld [vmem:[%s4262_s13 + $0x6a] sm:$0xf]  ;;  %v3873_v38 = vld [vmem:[%s4262_s13 + $0x82] sm:$0xf]  ;;  %v3875_v52 = vld [vmem:[%s4262_s13 + $0x3a] sm:$0xf] }
 0x14c   : > { %v2409_v45 = vadd.f32 %v2405_v35, %v2392_v29  ;;  %v2410_v5 = vadd.f32 %v2406_v47, %v2393_v46  ;;  %v2325_v58 = vsel %vm4627_vm3, %v2320_v15, 0.0  ;;  %v2327_v59 = vsel %vm779_vm0, %v2323_v33, 0.0  ;;  %v3874_v15 = vld [vmem:[%s5566_s1 + $0x50] ss:$0 sm:$0xff]  ;;  %v3879_v46 = vld [vmem:[%s5566_s1 + $0x52] ss:$0 sm:$0xff] }
 0x14d   : > { %v2424_v55 = vadd.f32 %v2420_v62, %v2407_v39  ;;  %v2425_v61 = vadd.f32 %v2421_v40, %v2408_v44  ;;  %v2437_v63 = vmul.f32 %v3864_v42, %v3860_v41  ;;  %v2438_v6 = vmul.f32 %v3864_v42, %v3861_v49  ;;  %v3876_v36 = vld [vmem:[%s4262_s13 + $0x42] sm:$0xf]  ;;  %v3877_v37 = vld [vmem:[%s4262_s13 + $0x4a] sm:$0xf]  ;;  %v3878_v41 = vld [vmem:[%s4262_s13 + $0x52] sm:$0xf] }
 0x14e   : > { %v2426_v1 = vadd.f32 %v2422_v53, %v2409_v45  ;;  %v2427_v2 = vadd.f32 %v2423_v54, %v2410_v5  ;;  %v2439_v4 = vmul.f32 %v3864_v42, %v3862_v51  ;;  %v2328_v12 = vsel %vm779_vm0, %v2324_v43, 0.0  ;;  %v3881_v51 = vld [vmem:[%s4262_s13 + $0x12] sm:$0xf] }
 0x14f   : > { %v2341_v26 = vmul.f32 %v2323_v33, %v2323_v33  ;;  %v2440_v11 = vmul.f32 %v3864_v42, %v3863_v56  ;;  %v2441_v13 = vadd.f32 %v2437_v63, %v2424_v55  ;;  %v2442_v48 = vadd.f32 %v2438_v6, %v2425_v61  ;;  %v3880_v42 = vld [vmem:[%s4262_s13 + $0xa] sm:$0xf]  ;;  %v3884_v5 = vld [vmem:[%s5566_s1 + $0x54] ss:$0 sm:$0xff] }
 0x150   : > { %v2443_v16 = vadd.f32 %v2439_v4, %v2426_v1  ;;  %v2454_v17 = vmul.f32 %v3869_v14, %v3865_v57  ;;  %v2455_v19 = vmul.f32 %v3869_v14, %v3866_v0  ;;  %v2330_v21 = vsel %vm779_vm0, %v2325_v58, 0.0  ;;  %v3882_v57 = vld [vmem:[%s4262_s13 + $0x1a] sm:$0xf]  ;;  %v3886_v1 = vld [vmem:[%s4262_s13 + $0x71] sm:$0xf] }
 0x151   : > { %v2342_v22 = vmul.f32 %v2324_v43, %v2324_v43  ;;  %v2444_v23 = vadd.f32 %v2440_v11, %v2427_v2  ;;  %v2456_v24 = vmul.f32 %v3869_v14, %v3867_v7  ;;  %v2457_v28 = vmul.f32 %v3869_v14, %v3868_v8  ;;  %v3889_v2 = vld [vmem:[%s5566_s1 + $0x5a] ss:$0 sm:$0xff] }
 0x152   : > { %v2458_v29 = vadd.f32 %v2454_v17, %v2441_v13  ;;  %v2459_v30 = vadd.f32 %v2455_v19, %v2442_v48  ;;  %v2471_v31 = vmul.f32 %v3874_v15, %v3870_v27  ;;  %v2329_v32 = vadd.f32 %v2328_v12, %v2327_v59  ;;  %v3885_v59 = vld [vmem:[%s4262_s13 + $0x69] sm:$0xf]  ;;  %v3887_v12 = vld [vmem:[%s4262_s13 + $0x79] sm:$0xf] }
 0x153   : > { %v2343_v33 = vmul.f32 %v2325_v58, %v2325_v58  ;;  %v2460_v34 = vadd.f32 %v2456_v24, %v2443_v16  ;;  %v2472_v35 = vmul.f32 %v3874_v15, %v3871_v20  ;;  %v2461_v47 = vadd.f32 %v2457_v28, %v2444_v23  ;;  %v3883_v58 = vld [vmem:[%s4262_s13 + $0x22] sm:$0xf]  ;;  %v3890_v48 = vld [vmem:[%s4262_s13 + $0x39] sm:$0xf]  ;;  %v3892_v23 = vld [vmem:[%s4262_s13 + $0x49] sm:$0xf] }
 0x154   : > { %v2473_v39 = vmul.f32 %v3874_v15, %v3872_v25  ;;  %v2474_v62 = vmul.f32 %v3874_v15, %v3873_v38  ;;  %v2475_v40 = vadd.f32 %v2471_v31, %v2458_v29  ;;  %v2345_v43 = vsel %vm779_vm0, %v2341_v26, 0.0  ;;  %v3888_v26 = vld [vmem:[%s4262_s13 + $0x81] sm:$0xf]  ;;  %v3894_v17 = vld [vmem:[%s5566_s1 + $0x5c] ss:$0 sm:$0xff] }
 0x155   : > { %v2346_v44 = vsel %vm779_vm0, %v2342_v22, 0.0  ;;  %v2476_v45 = vadd.f32 %v2472_v35, %v2459_v30  ;;  %v2488_v49 = vmul.f32 %v3879_v46, %v3875_v52  ;;  %v2489_v55 = vmul.f32 %v3879_v46, %v3876_v36  ;;  %v3891_v16 = vld [vmem:[%s4262_s13 + $0x41] sm:$0xf]  ;;  %v3893_v24 = vld [vmem:[%s4262_s13 + $0x51] sm:$0xf] }
 0x156   : > { %v2477_v53 = vadd.f32 %v2473_v39, %v2460_v34  ;;  %v2478_v54 = vadd.f32 %v2474_v62, %v2461_v47  ;;  %v2490_v56 = vmul.f32 %v3879_v46, %v3877_v37  ;;  %v5273_v61 = vadd.f32 %v2330_v21, %v2329_v32  ;;  %v3895_v30 = vld [vmem:[%s4262_s13 + $0x9] sm:$0xf]  ;;  %v3896_v31 = vld [vmem:[%s4262_s13 + $0x11] sm:$0xf]  ;;  %v3899_v52 = vld [vmem:[%s5566_s1 + $0x5e] ss:$0 sm:$0xff] }
 0x157   : > { %v5276_v63 = vsel %vm779_vm0, %v2343_v33, 0.0  ;;  %v2491_v0 = vmul.f32 %v3879_v46, %v3878_v41  ;;  %v2492_v14 = vadd.f32 %v2488_v49, %v2475_v40  ;;  %v2493_v6 = vadd.f32 %v2489_v55, %v2476_v45  ;;  %v3897_v35 = vld [vmem:[%s4262_s13 + $0x19] sm:$0xf]  ;;  %v3898_v36 = vld [vmem:[%s4262_s13 + $0x21] sm:$0xf] }
 0x158   : > { %v2494_v4 = vadd.f32 %v2490_v56, %v2477_v53  ;;  %v2505_v7 = vmul.f32 %v3884_v5, %v3880_v42  ;;  %v2506_v8 = vmul.f32 %v3884_v5, %v3881_v51  ;;  %v5284_v11 = vadd.f32 %v2346_v44, %v2345_v43  ;;  %v3900_v40 = vld [vmem:[%s4262_s13 + $0x72] sm:$0xf]  ;;  %v3901_v41 = vld [vmem:[%s4262_s13 + $0x7a] sm:$0xf]  ;;  %v3904_v42 = vld [vmem:[%s5566_s1 + $0x1f] ss:$0 sm:$0xff] }
 0x159   : > { %v2495_v13 = vadd.f32 %v2491_v0, %v2478_v54  ;;  %v2507_v27 = vmul.f32 %v3884_v5, %v3882_v57  ;;  %v2508_v15 = vmul.f32 %v3884_v5, %v3883_v58  ;;  %v2522_v21 = vmul.f32 %v3889_v2, %v3885_v59  ;;  %v3902_v51 = vld [vmem:[%s4262_s13 + $0x82] sm:$0xf]  ;;  %v3903_v5 = vld [vmem:[%s4262_s13 + $0x8a] sm:$0xf]  ;;  %v3909_v59 = vld [vmem:[%s5566_s1 + $0x21] ss:$0 sm:$0xff] }
 0x15a   : > { %v2509_v19 = vadd.f32 %v2505_v7, %v2492_v14  ;;  %v2510_v20 = vadd.f32 %v2506_v8, %v2493_v6  ;;  %v2523_v22 = vmul.f32 %v3889_v2, %v3886_v1  ;;  %v2524_v28 = vmul.f32 %v3889_v2, %v3887_v12  ;;  %v3905_v57 = vld [vmem:[%s4262_s13 + $0x42] sm:$0xf]  ;;  %v3906_v58 = vld [vmem:[%s4262_s13 + $0x4a] sm:$0xf]  ;;  %v3907_v6 = vld [vmem:[%s4262_s13 + $0x52] sm:$0xf] }
 0x15b   : > { %v2511_v25 = vadd.f32 %v2507_v27, %v2494_v4  ;;  %v2512_v38 = vadd.f32 %v2508_v15, %v2495_v13  ;;  %v2525_v29 = vmul.f32 %v3889_v2, %v3888_v26  ;;  %v2539_v33 = vmul.f32 %v3894_v17, %v3890_v48  ;;  %v3908_v4 = vld [vmem:[%s4262_s13 + $0x5a] sm:$0xf] }
 0x15c   : > { %v2526_v46 = vadd.f32 %v2522_v21, %v2509_v19  ;;  %v2527_v32 = vadd.f32 %v2523_v22, %v2510_v20  ;;  %v2540_v34 = vmul.f32 %v3894_v17, %v3891_v16  ;;  %v2541_v39 = vmul.f32 %v3894_v17, %v3892_v23  ;;  %v3910_v21 = vld [vmem:[%s4262_s13 + $0x71] sm:$0xf] }
 0x15d   : > { %v2528_v37 = vadd.f32 %v2524_v28, %v2511_v25  ;;  %v2529_v47 = vadd.f32 %v2525_v29, %v2512_v38  ;;  %v2542_v62 = vmul.f32 %v3894_v17, %v3893_v24  ;;  %v2556_v45 = vmul.f32 %v3899_v52, %v3895_v30  ;;  %v3914_v38 = vld [vmem:[%s5566_s1 + $0x29] ss:$0 sm:$0xff] }
 0x15e   : > { %v2543_v43 = vadd.f32 %v2539_v33, %v2526_v46  ;;  %v2544_v44 = vadd.f32 %v2540_v34, %v2527_v32  ;;  %v2557_v49 = vmul.f32 %v3899_v52, %v3896_v31  ;;  %v2558_v55 = vmul.f32 %v3899_v52, %v3897_v35  ;;  %v3912_v34 = vld [vmem:[%s4262_s13 + $0x81] sm:$0xf]  ;;  %v3913_v35 = vld [vmem:[%s4262_s13 + $0x89] sm:$0xf] }
 0x15f   : > { %v2545_v53 = vadd.f32 %v2541_v39, %v2528_v37  ;;  %v2546_v54 = vadd.f32 %v2542_v62, %v2529_v47  ;;  %v2559_v56 = vmul.f32 %v3899_v52, %v3898_v36  ;;  %v2620_v1 = vmul.f32 %v3904_v42, %v3900_v40  ;;  %v3911_v52 = vld [vmem:[%s4262_s13 + $0x79] sm:$0xf]  ;;  %v3915_v36 = vld [vmem:[%s4262_s13 + $0x41] sm:$0xf]  ;;  %v3916_v40 = vld [vmem:[%s4262_s13 + $0x49] sm:$0xf] }
 0x160   : > { %v2560_v0 = vadd.f32 %v2556_v45, %v2543_v43  ;;  %v2561_v14 = vadd.f32 %v2557_v49, %v2544_v44  ;;  %v2621_v2 = vmul.f32 %v3904_v42, %v3901_v41  ;;  %v2622_v12 = vmul.f32 %v3904_v42, %v3902_v51  ;;  %v3917_v44 = vld [vmem:[%s4262_s13 + $0x51] sm:$0xf] }
 0x161   : > { %v2562_v7 = vadd.f32 %v2558_v55, %v2545_v53  ;;  %v2563_v8 = vadd.f32 %v2559_v56, %v2546_v54  ;;  %v2623_v26 = vmul.f32 %v3904_v42, %v3903_v5  ;;  %v2633_v15 = vmul.f32 %v3909_v59, %v3905_v57  ;;  %v3918_v53 = vld [vmem:[%s4262_s13 + $0x59] sm:$0xf] }
 0x162   : > { %v2564_v13 = vadd.f32 %v5202_v9, %v2560_v0  ;;  %v2565_v27 = vadd.f32 %v5202_v9, %v2561_v14  ;;  %v2634_v48 = vmul.f32 %v3909_v59, %v3906_v58  ;;  %v2635_v19 = vmul.f32 %v3909_v59, %v3907_v6  ;;  %v3920_v58 = vld [vmem:[%s4262_s13 + $0x6a] sm:$0xf]  ;;  %v3924_v0 = vld [vmem:[%s5566_s1 + $0x51] ss:$0 sm:$0xff]  ;;  %v3922_v6 = vld [vmem:[%s4262_s13 + $0x7a] sm:$0xf] }
 0x163   : > { %v2566_v16 = vadd.f32 %v5202_v9, %v2562_v7  ;;  %v2567_v17 = vadd.f32 %v5202_v9, %v2563_v8  ;;  %v2636_v20 = vmul.f32 %v3909_v59, %v3908_v4  ;;  %v2334_v22 = vrot.slane %v5273_v61, 4  ;;  %v3921_v59 = vld [vmem:[%s4262_s13 + $0x72] sm:$0xf]  ;;  %v3923_v4 = vld [vmem:[%s4262_s13 + $0x82] sm:$0xf] }
 0x164   : > { %v2570_v23 = vsel %vm4799_vm6, %v2564_v13, 0.0  ;;  %v2571_v24 = vsel %vm4799_vm6, %v2565_v27, 0.0  ;;  %2607 = vst.msk [vmem:[#allocation2 + $0x60] sm:$0xf] %vm779_vm0, %v2564_v13  ;;  %2608 = vst.msk [vmem:[#allocation2 + $0x64] sm:$0xf] %vm779_vm0, %v2565_v27  ;;  %v2637_v25 = vadd.f32 %v2633_v15, %v2620_v1  ;;  %v5338_v46 = vadd.f32 %v5276_v63, %v5284_v11 }
 0x165   : > { %v2572_v28 = vsel %vm4799_vm6, %v2566_v16, 0.0  ;;  %v2574_v29 = vsel %vm779_vm0, %v2570_v23, 0.0  ;;  %v2575_v30 = vsel %vm779_vm0, %v2571_v24, 0.0  ;;  %v2588_v31 = vmul.f32 %v2570_v23, %v2570_v23  ;;  %2609 = vst.msk [vmem:[#allocation2 + $0x68] sm:$0xf] %vm779_vm0, %v2566_v16 }
 0x166   : > { %2610 = vst.msk [vmem:[#allocation2 + $0x6c] sm:$0xf] %vm779_vm0, %v2567_v17  ;;  %v2576_v32 = vadd.f32 %v2575_v30, %v2574_v29  ;;  %v2589_v33 = vmul.f32 %v2571_v24, %v2571_v24  ;;  %v2638_v50 = vadd.f32 %v2634_v48, %v2621_v2  ;;  %v2577_v37 = vsel %vm779_vm0, %v2572_v28, 0.0  ;;  %v3919_v63 = vld [vmem:[%s5566_s1 + $0x2b] ss:$0 sm:$0xff] }
 0x167   : > { %v2639_v47 = vadd.f32 %v2635_v19, %v2622_v12  ;;  %v2640_v39 = vadd.f32 %v2636_v20, %v2623_v26  ;;  %v2650_v62 = vmul.f32 %v3914_v38, %v3910_v21  ;;  %v2590_v11 = vmul.f32 %v2572_v28, %v2572_v28  ;;  %v3925_v13 = vld [vmem:[%s4262_s13 + $0x3a] sm:$0xf]  ;;  %v3929_v27 = vld [vmem:[%s5566_s1 + $0x53] ss:$0 sm:$0xff]  ;;  %v3926_v19 = vld [vmem:[%s4262_s13 + $0x42] sm:$0xf] }
 0x168   : > { %v2592_v41 = vsel %vm779_vm0, %v2588_v31, 0.0  ;;  %v2593_v42 = vsel %vm779_vm0, %v2589_v33, 0.0  ;;  %v2651_v43 = vmul.f32 %v3914_v38, %v3911_v52  ;;  %v5352_v45 = vadd.f32 %v2334_v22, %v5273_v61  ;;  %v3927_v24 = vld [vmem:[%s4262_s13 + $0x4a] sm:$0xf]  ;;  %v3931_v52 = vld [vmem:[%s4262_s13 + $0x71] sm:$0xf] }
 0x169   : > { %v2652_v49 = vmul.f32 %v3914_v38, %v3912_v34  ;;  %v2653_v51 = vmul.f32 %v3914_v38, %v3913_v35  ;;  %v2654_v5 = vadd.f32 %v2650_v62, %v2637_v25  ;;  %v2578_v54 = vadd.f32 %v2577_v37, %v2576_v32  ;;  %v3928_v25 = vld [vmem:[%s4262_s13 + $0x52] sm:$0xf]  ;;  %v3930_v31 = vld [vmem:[%s4262_s13 + $0x69] sm:$0xf]  ;;  %v3934_v32 = vld [vmem:[%s5566_s1 + $0x5b] ss:$0 sm:$0xff] }
 0x16a   : > { %v2655_v55 = vadd.f32 %v2651_v43, %v2638_v50  ;;  %v2667_v56 = vmul.f32 %v3919_v63, %v3915_v36  ;;  %v2668_v57 = vmul.f32 %v3919_v63, %v3916_v40  ;;  %v2594_v14 = vadd.f32 %v2593_v42, %v2592_v41  ;;  %v3932_v36 = vld [vmem:[%s4262_s13 + $0x79] sm:$0xf]  ;;  %v3933_v40 = vld [vmem:[%s4262_s13 + $0x81] sm:$0xf] }
 0x16b   : > { %v2656_v61 = vadd.f32 %v2652_v49, %v2639_v47  ;;  %v2657_v1 = vadd.f32 %v2653_v51, %v2640_v39  ;;  %v2669_v2 = vmul.f32 %v3919_v63, %v3917_v44  ;;  %v2595_v7 = vsel %vm779_vm0, %v2590_v11, 0.0  ;;  %v3935_v43 = vld [vmem:[%s4262_s13 + $0x39] sm:$0xf]  ;;  %v3936_v44 = vld [vmem:[%s4262_s13 + $0x41] sm:$0xf] }
 0x16c   : > { %v2670_v8 = vmul.f32 %v3919_v63, %v3918_v53  ;;  %v2671_v12 = vadd.f32 %v2667_v56, %v2654_v5  ;;  %v2672_v26 = vadd.f32 %v2668_v57, %v2655_v55  ;;  %v2352_v15 = vrot.slane %v5338_v46, 4  ;;  %v3939_v49 = vld [vmem:[%s5566_s1 + $0x5d] ss:$0 sm:$0xff]  ;;  %v3937_v55 = vld [vmem:[%s4262_s13 + $0x49] sm:$0xf] }
 0x16d   : > { %v2673_v48 = vadd.f32 %v2669_v2, %v2656_v61  ;;  %v2684_v16 = vmul.f32 %v3924_v0, %v3920_v58  ;;  %v2685_v17 = vmul.f32 %v3924_v0, %v3921_v59  ;;  %v2581_v20 = vrot.slane %v2578_v54, 4  ;;  %v3938_v56 = vld [vmem:[%s4262_s13 + $0x51] sm:$0xf]  ;;  %v2790_v2 = vld [vmem:[%s5570_s5 + $0x8] sm:$0xff] }
 0x16e   : > { %v2674_v21 = vadd.f32 %v2670_v8, %v2657_v1  ;;  %v2686_v22 = vmul.f32 %v3924_v0, %v3922_v6  ;;  %v2687_v23 = vmul.f32 %v3924_v0, %v3923_v4  ;;  %v2596_v38 = vadd.f32 %v2595_v7, %v2594_v14  ;;  %v2789_v1 = vld [vmem:[%s5570_s5] sm:$0xff] }
 0x16f   : > { %v2688_v28 = vadd.f32 %v2684_v16, %v2671_v12  ;;  %v2689_v29 = vadd.f32 %v2685_v17, %v2672_v26  ;;  %v2701_v30 = vmul.f32 %v3929_v27, %v3925_v13  ;;  %v2336_v33 = vrot.slane %v5352_v45, 2 }
 0x170   : > { %v2690_v50 = vadd.f32 %v2686_v22, %v2673_v48  ;;  %v2691_v34 = vadd.f32 %v2687_v23, %v2674_v21  ;;  %v2702_v35 = vmul.f32 %v3929_v27, %v3926_v19  ;;  %v2353_v37 = vadd.f32 %v2352_v15, %v5338_v46 }
 0x171   : > { %v2703_v47 = vmul.f32 %v3929_v27, %v3927_v24  ;;  %v2704_v39 = vmul.f32 %v3929_v27, %v3928_v25  ;;  %v2705_v62 = vadd.f32 %v2701_v30, %v2688_v28  ;;  %v2582_v63 = vadd.f32 %v2581_v20, %v2578_v54 }
 0x172   : > { %v2706_v11 = vadd.f32 %v2702_v35, %v2689_v29  ;;  %v2718_v41 = vmul.f32 %v3934_v32, %v3930_v31  ;;  %v2719_v42 = vmul.f32 %v3934_v32, %v3931_v52  ;;  %v2599_v51 = vrot.slane %v2596_v38, 4 }
 0x173   : > { %v2707_v5 = vadd.f32 %v2703_v47, %v2690_v50  ;;  %v2708_v53 = vadd.f32 %v2704_v39, %v2691_v34  ;;  %v2720_v46 = vmul.f32 %v3934_v32, %v3932_v36  ;;  %v2721_v57 = vmul.f32 %v3934_v32, %v3933_v40 }
 0x174   : > { %v2722_v58 = vadd.f32 %v2718_v41, %v2705_v62  ;;  %v2723_v59 = vadd.f32 %v2719_v42, %v2706_v11  ;;  %v2337_v54 = vadd.f32 %v2336_v33, %v5352_v45  ;;  %v2735_v14 = vmul.f32 %v3939_v49, %v3935_v43 }
 0x175   : > { %v2724_v0 = vadd.f32 %v2720_v46, %v2707_v5  ;;  %v2736_v61 = vmul.f32 %v3939_v49, %v3936_v44  ;;  %v2354_v6 = vrot.slane %v2353_v37, 2  ;;  %v2725_v4 = vadd.f32 %v2721_v57, %v2708_v53 }
 0x176   : > { %v2737_v7 = vmul.f32 %v3939_v49, %v3937_v55  ;;  %v2738_v8 = vmul.f32 %v3939_v49, %v3938_v56  ;;  %v2583_v12 = vrot.slane %v2582_v63, 2  ;;  %v2600_v26 = vadd.f32 %v2599_v51, %v2596_v38 }
 0x177   : > { %v2739_v13 = vadd.f32 %v2735_v14, %v2722_v58  ;;  %v2740_v27 = vadd.f32 %v2736_v61, %v2723_v59  ;;  %v4012_v48 = vpack.c.bf16 %v2790_v2, %v2789_v1  ;;  %v2338_v16 = vrot.slane %v2337_v54, 1 }
 0x178   : > { %v2741_v45 = vadd.f32 %v2737_v7, %v2724_v0  ;;  %v2742_v15 = vadd.f32 %v2738_v8, %v2725_v4  ;;  %v4128_v20 = vmov 0.0|0.0   ;;  %v2355_v21 = vadd.f32 %v2354_v6, %v2353_v37 }
 0x179   : > { %v2743_v17 = vadd.f32 %v5202_v9, %v2739_v13  ;;  %v2744_v19 = vadd.f32 %v5202_v9, %v2740_v27  ;;  %4011 = vmatprep.subr.bf16.mxu0 %v4128_v20  ;;  %4014 = vmatprep.subr.bf16.mxu1 %v4128_v20  ;;  %v2584_v24 = vadd.f32 %v2583_v12, %v2582_v63  ;;  %v2601_v25 = vrot.slane %v2600_v26, 2  ;;  %v2947_v20 = vld [vmem:[#allocation5] sm:$0x1] }
 0x17a   : > { %v2745_v22 = vadd.f32 %v5202_v9, %v2741_v45  ;;  %v2746_v23 = vadd.f32 %v5202_v9, %v2742_v15  ;;  %4013 = vmatpush3.bf16.msra.mxu0 %v4012_v48  ;;  %4016 = vmatpush3.bf16.msra.mxu1 %v4012_v48  ;;  %v4130_v29 = vmov 0.0   ;;  %v2356_v47 = vrot.slane %v2355_v21, 1 }
 0x17b   : > { %v2748_v38 = vsel %vm4921_vm7, %v2743_v17, 0.0  ;;  %v2749_v28 = vsel %vm4921_vm7, %v2744_v19, 0.0  ;;  %2785 = vst.msk [vmem:[#allocation2 + $0x70] sm:$0xf] %vm779_vm0, %v2743_v17  ;;  %2786 = vst.msk [vmem:[#allocation2 + $0x74] sm:$0xf] %vm779_vm0, %v2744_v19  ;;  %3991 = vmatprep.mubr.msk.f32.mxu0 %vm4129_vm9, %v4130_v29  ;;  %3998 = vmatprep.mubr.msk.f32.mxu1 %vm4129_vm9, %v4130_v29  ;;  %v2602_v39 = vadd.f32 %v2601_v25, %v2600_v26 }
 0x17c   : > { %v2750_v9 = vsel %vm4921_vm7, %v2745_v22, 0.0  ;;  %v2752_v30 = vsel %vm779_vm0, %v2748_v38, 0.0  ;;  %v2753_v31 = vsel %vm779_vm0, %v2749_v28, 0.0  ;;  %v2766_v52 = vmul.f32 %v2748_v38, %v2748_v38  ;;  %2787 = vst.msk [vmem:[#allocation2 + $0x78] sm:$0xf] %vm779_vm0, %v2745_v22  ;;  %4001 = vmatprep.subr.mxu0 %v4130_v29  ;;  %4006 = vmatprep.subr.mxu1 %v4130_v29 }
 0x17d   : > { %2788 = vst.msk [vmem:[#allocation2 + $0x7c] sm:$0xf] %vm779_vm0, %v2746_v23  ;;  %v2754_v32 = vadd.f32 %v2753_v31, %v2752_v30  ;;  %v2755_v33 = vsel %vm779_vm0, %v2750_v9, 0.0  ;;  %v2767_v50 = vmul.f32 %v2749_v28, %v2749_v28  ;;  %v2768_v34 = vmul.f32 %v2750_v9, %v2750_v9  ;;  %v3103_v25 = vld [vmem:[#allocation2 + $0x4] sm:$0xf] }
 0x17e   : > { %v2770_v35 = vsel %vm779_vm0, %v2766_v52, 0.0  ;;  %v2339_v40 = vadd.f32 %v2338_v16, %v2337_v54  ;;  %v2585_v63 = vrot.slane %v2584_v24, 1  ;;  %v2357_v43 = vadd.f32 %v2356_v47, %v2355_v21  ;;  %v2945_v16 = vld [vmem:[#allocation3] sm:$0x1]  ;;  %v3104_v38 = vld [vmem:[#allocation2 + $0x8] sm:$0xf] }
 0x17f   : > { %v2756_v10 = vadd.f32 %v2755_v33, %v2754_v32  ;;  %v2771_v36 = vsel %vm779_vm0, %v2767_v50, 0.0  ;;  %v2773_v37 = vsel %vm779_vm0, %v2768_v34, 0.0  ;;  %v2603_v44 = vrot.slane %v2602_v39, 1  ;;  %v3105_v28 = vld [vmem:[#allocation2 + $0xc] sm:$0xf] }
 0x180   : > { %v2772_v62 = vadd.f32 %v2771_v36, %v2770_v35  ;;  %v2340_v51 = vadd.f32 %v2339_v40, %v5158_v60  ;;  %v2586_v5 = vadd.f32 %v2585_v63, %v2584_v24  ;;  %v2358_v56 = vadd.f32 %v2357_v43, %v5173_v18  ;;  %v2950_v60 = vld [vmem:[%s5571_s6] sm:$0xf]  ;;  %v3127_v30 = vld [vmem:[#allocation2 + $0x14] sm:$0xf]  ;;  %v3128_v31 = vld [vmem:[#allocation2 + $0x18] sm:$0xf] }
 0x181   : > { %v2759_v11 = vrot.slane %v2756_v10, 4  ;;  %v2604_v57 = vadd.f32 %v2603_v44, %v2602_v39  ;;  %v3108_v23 = vsub.s32 0, %v4266_v3  ;;  %v3102_v24 = vld [vmem:[#allocation2] sm:$0xf]  ;;  %v3129_v33 = vld [vmem:[#allocation2 + $0x1c] sm:$0xf] }
 0x182   : > { %v2774_v41 = vadd.f32 %v2773_v37, %v2772_v62  ;;  %v2587_v59 = vadd.f32 %v2586_v5, %v2340_v51  ;;  %v3143_v50 = vld [vmem:[#allocation2 + $0x20] sm:$0xf]  ;;  %v3144_v34 = vld [vmem:[#allocation2 + $0x24] sm:$0xf]  ;;  %v3145_v35 = vld [vmem:[#allocation2 + $0x28] sm:$0xf] }
 0x183   : > { %v2760_v42 = vadd.f32 %v2759_v11, %v2756_v10  ;;  %v2605_v61 = vadd.f32 %v2604_v57, %v2358_v56  ;;  %v3146_v10 = vld [vmem:[#allocation2 + $0x2c] sm:$0xf]  ;;  %v3160_v39 = vld [vmem:[#allocation2 + $0x30] sm:$0xf]  ;;  %v3161_v62 = vld [vmem:[#allocation2 + $0x34] sm:$0xf] }
 0x184   : > { %v2777_v49 = vrot.slane %v2774_v41, 4  ;;  %v3162_v40 = vld [vmem:[#allocation2 + $0x38] sm:$0xf] }
 0x185   : > { %v2761_v53 = vrot.slane %v2760_v42, 2 }
 0x186   : > { %v2778_v46 = vadd.f32 %v2777_v49, %v2774_v41 }
 0x187   : > { %v2762_v55 = vadd.f32 %v2761_v53, %v2760_v42 }
 0x188   : > { %v2779_v58 = vrot.slane %v2778_v46, 2 }
 0x189   : > { %v2763_v0 = vrot.slane %v2762_v55, 1 }
 0x18a   : > { %v2780_v54 = vadd.f32 %v2779_v58, %v2778_v46 }
 0x18b   : > { %v2764_v14 = vadd.f32 %v2763_v0, %v2762_v55 }
 0x18c   : > { %v2781_v1 = vrot.slane %v2780_v54, 1 }
 0x18d   : > { %v2765_v2 = vadd.f32 %v2764_v14, %v2587_v59  ;;  %v3163_v14 = vld [vmem:[#allocation2 + $0x3c] sm:$0xf] }
 0x18e   : > { %v2782_v6 = vadd.f32 %v2781_v1, %v2780_v54 }
 0x18f   : > { %3992 = vmatmul.mubr.msk.f32.vlgmr.msra.gmra.mrb[0].mxu0 %vm2791_vm10, %v2765_v2 }
 0x190   : > { %v2783_v4 = vadd.f32 %v2782_v6, %v2605_v61  ;;  %4003 = vmatprep.mubr.msk.f32.mxu0 %vm4129_vm9, %v4130_v29  ;;  %4002 = vmatpush3.msk.msra.mxu0 %vm2955_vm11, %v2950_v60  ;;  %v3177_v61 = vld [vmem:[#allocation2 + $0x40] sm:$0xf] }
 0x192   : > { %3999 = vmatmul.mubr.msk.f32.vlgmr.msra.gmra.mrb[0].mxu1 %vm2791_vm10, %v2783_v4 }
 0x193   : > { %4008 = vmatprep.mubr.msk.f32.mxu1 %vm4129_vm9, %v4130_v29  ;;  %4007 = vmatpush3.msk.msra.mxu1 %vm2955_vm11, %v2950_v60  ;;  %v3126_v29 = vld [vmem:[#allocation2 + $0x10] sm:$0xf]  ;;  %v3178_v60 = vld [vmem:[#allocation2 + $0x44] sm:$0xf] }
 0x262   : > { %v2861_v18 = vpop.f32.mrb[0].mxu0 }
 0x263   : > { %v2865_v7 = vmul.f32 0.002915452, %v2861_v18  ;;  %v3993_v8 = vpop.f32.mrb[1].mxu0  ;;  %v3179_v18 = vld [vmem:[#allocation2 + $0x48] sm:$0xf] }
 0x265   : > { %v2935_v12 = vpop.f32.mrb[0].mxu1  ;;  %v2940_v26 = vmul.f32 %v2865_v7, %v2865_v7 }
 0x266   : > { %v4000_v13 = vpop.f32.mrb[1].mxu1  ;;  %v2939_v27 = vmul.f32 0.002915452, %v2935_v12 }
 0x268   : > { %v2941_v45 = vsub.f32 %v2939_v27, %v2940_v26  ;;  %v3194_v27 = vld [vmem:[#allocation2 + $0x50] sm:$0xf] }
 0x26a   : > { %v2942_v15 = vmax.f32 %v2941_v45, 0.0  ;;  %v3195_v45 = vld [vmem:[#allocation2 + $0x54] sm:$0xf] }
 0x26c   : > { %v2943_v48 = vadd.f32 1e-05, %v2942_v15  ;;  %v3196_v15 = vld [vmem:[#allocation2 + $0x58] sm:$0xf] }
 0x26e   : > { %4050 = vrsqrt.f32 %v2943_v48 }
 0x278   : > { %v4051_v17 = vpop.eup %4050 }
 0x279   : > { %v2946_v19 = vmul.f32 %v4051_v17, %v2945_v16 }
 0x27b   : > { %v2948_v21 = vmul.f32 %v2946_v19, %v2865_v7  ;;  %4004 = vmatmul.mubr.msk.f32.vlgmr.msra.gmra.mrb[2].mxu0 %vm2951_vm12, %v2946_v19  ;;  %v3180_v7 = vld [vmem:[#allocation2 + $0x4c] sm:$0xf] }
 0x27d   : > { %v2949_v22 = vsub.f32 %v2947_v20, %v2948_v21 }
 0x27f   : > { %4009 = vmatmul.mubr.msk.f32.vlgmr.msra.gmra.mrb[2].mxu1 %vm2951_vm12, %v2949_v22 }
 0x34e   : > { %v3025_v9 = vpop.f32.mrb[2].mxu0 }
 0x34f   : > { %v4005_v52 = vpop.f32.mrb[3].mxu0  ;;  %v5425_v32 = vrot.slane %v3025_v9, %v3108_v23 }
 0x350   : > { %v3214_v52 = vld [vmem:[#allocation2 + $0x6c] sm:$0xf] }
 0x351   : > { %v3110_v36 = vmul.f32 %v5425_v32, %v3102_v24  ;;  %v3111_v3 = vmul.f32 %v5425_v32, %v3103_v25  ;;  %v3112_v37 = vmul.f32 %v5425_v32, %v3104_v38  ;;  %v3113_v47 = vmul.f32 %v5425_v32, %v3105_v28  ;;  %v3197_v24 = vld [vmem:[#allocation2 + $0x5c] sm:$0xf]  ;;  %v3211_v25 = vld [vmem:[#allocation2 + $0x60] sm:$0xf] }
 0x352   : > { %v3098_v63 = vpop.f32.mrb[2].mxu1  ;;  %v3130_v11 = vmul.f32 %v3126_v29, %v5425_v32  ;;  %v3131_v41 = vmul.f32 %v3127_v30, %v5425_v32  ;;  %v3132_v42 = vmul.f32 %v3128_v31, %v5425_v32  ;;  %v3133_v43 = vmul.f32 %v3129_v33, %v5425_v32  ;;  %v3212_v30 = vld [vmem:[#allocation2 + $0x64] sm:$0xf]  ;;  %v3213_v31 = vld [vmem:[#allocation2 + $0x68] sm:$0xf] }
 0x353   : > { %v4010_v44 = vpop.f32.mrb[3].mxu1  ;;  %v5435_v49 = vrot.slane %v3098_v63, %v3108_v23  ;;  %v3147_v51 = vmul.f32 %v3143_v50, %v5425_v32  ;;  %v3148_v5 = vmul.f32 %v3144_v34, %v5425_v32  ;;  %v3149_v53 = vmul.f32 %v3145_v35, %v5425_v32 }
 0x354   : > { %v3150_v46 = vmul.f32 %v3146_v10, %v5425_v32  ;;  %v3164_v55 = vmul.f32 %v3160_v39, %v5425_v32  ;;  %v3165_v56 = vmul.f32 %v3161_v62, %v5425_v32  ;;  %v3166_v57 = vmul.f32 %v3162_v40, %v5425_v32  ;;  %v3228_v10 = vld [vmem:[#allocation2 + $0x70] sm:$0xf] }
 0x355   : > { %v3118_v58 = vadd.f32 %v5435_v49, %v3110_v36  ;;  %v3119_v59 = vadd.f32 %v5435_v49, %v3111_v3  ;;  %v3120_v0 = vadd.f32 %v5435_v49, %v3112_v37  ;;  %v3121_v54 = vadd.f32 %v5435_v49, %v3113_v47  ;;  %v3229_v36 = vld [vmem:[#allocation2 + $0x74] sm:$0xf]  ;;  %v3230_v3 = vld [vmem:[#allocation2 + $0x78] sm:$0xf] }
 0x356   : > { %v3134_v1 = vadd.f32 %v3130_v11, %v5435_v49  ;;  %v3135_v2 = vadd.f32 %v3131_v41, %v5435_v49  ;;  %v3136_v6 = vadd.f32 %v3132_v42, %v5435_v49  ;;  %v3137_v4 = vadd.f32 %v3133_v43, %v5435_v49  ;;  %v3231_v42 = vld [vmem:[#allocation2 + $0x7c] sm:$0xf] }
 0x357   : > { %3122 = vst.msk [vmem:[%s5443_s17] sm:$0xf] %vm779_vm0, %v3118_v58  ;;  %3123 = vst.msk [vmem:[%s5443_s17 + $0x4] sm:$0xf] %vm779_vm0, %v3119_v59  ;;  %v3151_v8 = vadd.f32 %v3147_v51, %v5435_v49  ;;  %v3152_v12 = vadd.f32 %v3148_v5, %v5435_v49  ;;  %v3153_v26 = vadd.f32 %v3149_v53, %v5435_v49 }
 0x358   : > { %3124 = vst.msk [vmem:[%s5443_s17 + $0x8] sm:$0xf] %vm779_vm0, %v3120_v0  ;;  %3125 = vst.msk [vmem:[%s5443_s17 + $0xc] sm:$0xf] %vm779_vm0, %v3121_v54  ;;  %v3154_v13 = vadd.f32 %v3150_v46, %v5435_v49  ;;  %v3167_v48 = vmul.f32 %v3163_v14, %v5425_v32  ;;  %v3168_v16 = vadd.f32 %v3164_v55, %v5435_v49 }
 0x359   : > { %3946 = vst.msk [vmem:[%s5443_s17 + $0x10] sm:$0xf] %vm779_vm0, %v3134_v1  ;;  %3947 = vst.msk [vmem:[%s5443_s17 + $0x14] sm:$0xf] %vm779_vm0, %v3135_v2  ;;  %v3169_v17 = vadd.f32 %v3165_v56, %v5435_v49  ;;  %v3170_v19 = vadd.f32 %v3166_v57, %v5435_v49  ;;  %v3181_v20 = vmul.f32 %v3177_v61, %v5425_v32 }
 0x35a   : > { %3948 = vst.msk [vmem:[%s5443_s17 + $0x18] sm:$0xf] %vm779_vm0, %v3136_v6  ;;  %3949 = vst.msk [vmem:[%s5443_s17 + $0x1c] sm:$0xf] %vm779_vm0, %v3137_v4  ;;  %v3182_v21 = vmul.f32 %v3178_v60, %v5425_v32  ;;  %v3183_v22 = vmul.f32 %v3179_v18, %v5425_v32  ;;  %v3184_v23 = vmul.f32 %v3180_v7, %v5425_v32 }
 0x35b   : > { %3950 = vst.msk [vmem:[%s5443_s17 + $0x20] sm:$0xf] %vm779_vm0, %v3151_v8  ;;  %3951 = vst.msk [vmem:[%s5443_s17 + $0x24] sm:$0xf] %vm779_vm0, %v3152_v12  ;;  %v3171_v38 = vadd.f32 %v3167_v48, %v5435_v49  ;;  %v3198_v28 = vmul.f32 %v3194_v27, %v5425_v32  ;;  %v3199_v29 = vmul.f32 %v3195_v45, %v5425_v32 }
 0x35c   : > { %3952 = vst.msk [vmem:[%s5443_s17 + $0x28] sm:$0xf] %vm779_vm0, %v3153_v26  ;;  %3953 = vst.msk [vmem:[%s5443_s17 + $0x2c] sm:$0xf] %vm779_vm0, %v3154_v13  ;;  %v3200_v9 = vmul.f32 %v3196_v15, %v5425_v32  ;;  %v3185_v33 = vadd.f32 %v3181_v20, %v5435_v49  ;;  %v3186_v50 = vadd.f32 %v3182_v21, %v5435_v49 }
 0x35d   : > { %3954 = vst.msk [vmem:[%s5443_s17 + $0x30] sm:$0xf] %vm779_vm0, %v3168_v16  ;;  %3955 = vst.msk [vmem:[%s5443_s17 + $0x34] sm:$0xf] %vm779_vm0, %v3169_v17  ;;  %v3187_v34 = vadd.f32 %v3183_v22, %v5435_v49  ;;  %v3188_v35 = vadd.f32 %v3184_v23, %v5435_v49  ;;  %v3201_v37 = vmul.f32 %v3197_v24, %v5425_v32 }
 0x35e   : > { %3956 = vst.msk [vmem:[%s5443_s17 + $0x38] sm:$0xf] %vm779_vm0, %v3170_v19  ;;  %3957 = vst.msk [vmem:[%s5443_s17 + $0x3c] sm:$0xf] %vm779_vm0, %v3171_v38  ;;  %v3202_v47 = vadd.f32 %v3198_v28, %v5435_v49  ;;  %v3203_v39 = vadd.f32 %v3199_v29, %v5435_v49  ;;  %v3204_v62 = vadd.f32 %v3200_v9, %v5435_v49 }
 0x35f   : > { %3958 = vst.msk [vmem:[%s5443_s17 + $0x40] sm:$0xf] %vm779_vm0, %v3185_v33  ;;  %3959 = vst.msk [vmem:[%s5443_s17 + $0x44] sm:$0xf] %vm779_vm0, %v3186_v50  ;;  %v3215_v40 = vmul.f32 %v3211_v25, %v5425_v32  ;;  %v3216_v63 = vmul.f32 %v3212_v30, %v5425_v32  ;;  %v3217_v11 = vmul.f32 %v3213_v31, %v5425_v32 }
 0x360   : > { %3960 = vst.msk [vmem:[%s5443_s17 + $0x48] sm:$0xf] %vm779_vm0, %v3187_v34  ;;  %3961 = vst.msk [vmem:[%s5443_s17 + $0x4c] sm:$0xf] %vm779_vm0, %v3188_v35  ;;  %v3218_v41 = vmul.f32 %v3214_v52, %v5425_v32  ;;  %v3205_v43 = vadd.f32 %v3201_v37, %v5435_v49  ;;  %v3232_v44 = vmul.f32 %v3228_v10, %v5425_v32 }
 0x361   : > { %3962 = vst.msk [vmem:[%s5443_s17 + $0x50] sm:$0xf] %vm779_vm0, %v3202_v47  ;;  %3963 = vst.msk [vmem:[%s5443_s17 + $0x54] sm:$0xf] %vm779_vm0, %v3203_v39  ;;  %v3233_v51 = vmul.f32 %v3229_v36, %v5425_v32  ;;  %v3234_v5 = vmul.f32 %v3230_v3, %v5425_v32  ;;  %v3219_v53 = vadd.f32 %v3215_v40, %v5435_v49 }
 0x362   : > { %3964 = vst.msk [vmem:[%s5443_s17 + $0x58] sm:$0xf] %vm779_vm0, %v3204_v62  ;;  %v3220_v46 = vadd.f32 %v3216_v63, %v5435_v49  ;;  %v3221_v55 = vadd.f32 %v3217_v11, %v5435_v49  ;;  %v3222_v56 = vadd.f32 %v3218_v41, %v5435_v49  ;;  %3965 = vst.msk [vmem:[%s5443_s17 + $0x5c] sm:$0xf] %vm779_vm0, %v3205_v43 }
 0x363   : > { %v3235_v57 = vmul.f32 %v3231_v42, %v5425_v32  ;;  %v3236_v58 = vadd.f32 %v3232_v44, %v5435_v49  ;;  %v3237_v59 = vadd.f32 %v3233_v51, %v5435_v49  ;;  %v3238_v0 = vadd.f32 %v3234_v5, %v5435_v49  ;;  %3966 = vst.msk [vmem:[%s5443_s17 + $0x60] sm:$0xf] %vm779_vm0, %v3219_v53 }
 0x364   : > { %3967 = vst.msk [vmem:[%s5443_s17 + $0x64] sm:$0xf] %vm779_vm0, %v3220_v46  ;;  %3968 = vst.msk [vmem:[%s5443_s17 + $0x68] sm:$0xf] %vm779_vm0, %v3221_v55 }
 0x365   : > { %3969 = vst.msk [vmem:[%s5443_s17 + $0x6c] sm:$0xf] %vm779_vm0, %v3222_v56  ;;  %v3239_v54 = vadd.f32 %v3235_v57, %v5435_v49  ;;  %3970 = vst.msk [vmem:[%s5443_s17 + $0x70] sm:$0xf] %vm779_vm0, %v3236_v58 }
 0x366   : > { %3971 = vst.msk [vmem:[%s5443_s17 + $0x74] sm:$0xf] %vm779_vm0, %v3237_v59  ;;  %3972 = vst.msk [vmem:[%s5443_s17 + $0x78] sm:$0xf] %vm779_vm0, %v3238_v0 }
 0x367   : > { %3973 = vst.msk [vmem:[%s5443_s17 + $0x7c] sm:$0xf] %vm779_vm0, %v3239_v54 }
 0x368 PF: > { %s19_s24 = sadd.s32 1, %s4124_s24  }
 0x369   : > { %p16_p5 = scmp.ge.s32.totalorder %s19_s24, 4  }
 0x36b   :  { %18 = sbr.rel (!%p16_p5) target bundleno = 2 (0x2), region = 109 }
 0x372   :  { %3266 = vsyncpa [#allocation4], 1 }
 0x373   :  { %3268 = vsyncpa [#allocation4 + $0x1], 1 }
 0x374   :  { %3269 = vsyncpa [#allocation6], 1 }

// kernel: mednext_up_block_forward.3
= control target key start
LH: loop header
LB: loop body
LE: loop exit
PB: predicated region body
PF: predicated region fallthrough
CT: control target
= control target key end

     0   :  { %s3125_s1 = inlined_call_operand.vmem [shape: f32[256,1024], index: 1, kind: input, shape index: {}]   ;;  %s3126_s0 = inlined_call_operand.vmem [shape: f32[16,256], index: 0, kind: input, shape index: {}]   ;;  %s3127_s3 = inlined_call_operand.vmem [shape: f32[1024,128], index: 3, kind: input, shape index: {}]   ;;  %s3128_s2 = inlined_call_operand.vmem [shape: f32[1,1024], index: 2, kind: input, shape index: {}]   ;;  %s3129_s4 = inlined_call_operand.vmem [shape: f32[1,128], index: 4, kind: input, shape index: {}]   ;;  %s3130_s5 = inlined_call_operand.vmem [shape: f32[16,128], index: 5, kind: output, shape index: {}]  }
   0x1   :  { %v25_v0 = vld [vmem:[%s3125_s1 + $0x8] sm:$0xff]  ;;  %v27_v2 = vld [vmem:[%s3125_s1 + $0x18] sm:$0xff]  ;;  %v24_v5 = vld [vmem:[%s3125_s1] sm:$0xff] }
   0x2   :  { %v33_v1 = vld [vmem:[%s3125_s1 + $0x48] sm:$0xff]  ;;  %v35_v4 = vld [vmem:[%s3125_s1 + $0x58] sm:$0xff]  ;;  %v32_v6 = vld [vmem:[%s3125_s1 + $0x40] sm:$0xff] }
   0x3   :  { %v1368_v3 = vpack.c.bf16 %v33_v1, %v25_v0  ;;  %v1432_v7 = vpack.c.bf16 %v35_v4, %v27_v2  ;;  %v1370_v8 = vpack.c.bf16 %v32_v6, %v24_v5  ;;  %v26_v9 = vld [vmem:[%s3125_s1 + $0x10] sm:$0xff]  ;;  %v41_v11 = vld [vmem:[%s3125_s1 + $0x88] sm:$0xff]  ;;  %v43_v14 = vld [vmem:[%s3125_s1 + $0x98] sm:$0xff] }
   0x4   :  { %v34_v10 = vld [vmem:[%s3125_s1 + $0x50] sm:$0xff]  ;;  %v49_v13 = vld [vmem:[%s3125_s1 + $0xc8] sm:$0xff]  ;;  %v51_v15 = vld [vmem:[%s3125_s1 + $0xd8] sm:$0xff] }
   0x5   :  { %1369 = vmatprep.subr.bf16.mxu0 %v1368_v3  ;;  %v1434_v12 = vpack.c.bf16 %v34_v10, %v26_v9  ;;  %1433 = vmatprep.subr.bf16.mxu1 %v1432_v7  ;;  %v1372_v16 = vpack.c.bf16 %v49_v13, %v41_v11  ;;  %v1436_v17 = vpack.c.bf16 %v51_v15, %v43_v14  ;;  %v40_v18 = vld [vmem:[%s3125_s1 + $0x80] sm:$0xff]  ;;  %v42_v20 = vld [vmem:[%s3125_s1 + $0x90] sm:$0xff]  ;;  %v57_v23 = vld [vmem:[%s3125_s1 + $0x108] sm:$0xff] }
   0x6   :  { %1371 = vmatpush1.bf16.msra.mxu0 %v1370_v8  ;;  %v48_v19 = vld [vmem:[%s3125_s1 + $0xc0] sm:$0xff]  ;;  %v50_v22 = vld [vmem:[%s3125_s1 + $0xd0] sm:$0xff]  ;;  %v65_v24 = vld [vmem:[%s3125_s1 + $0x148] sm:$0xff] }
   0x7   :  { %1435 = vmatpush1.bf16.msra.mxu1 %v1434_v12  ;;  %v1374_v21 = vpack.c.bf16 %v48_v19, %v40_v18  ;;  %1373 = vmatprep.subr.bf16.mxu0 %v1372_v16  ;;  %v1438_v25 = vpack.c.bf16 %v50_v22, %v42_v20  ;;  %v1376_v26 = vpack.c.bf16 %v65_v24, %v57_v23  ;;  %v59_v27 = vld [vmem:[%s3125_s1 + $0x118] sm:$0xff]  ;;  %v56_v29 = vld [vmem:[%s3125_s1 + $0x100] sm:$0xff]  ;;  %v58_v32 = vld [vmem:[%s3125_s1 + $0x110] sm:$0xff] }
   0x8   :  { %1437 = vmatprep.subr.bf16.mxu1 %v1436_v17  ;;  %v67_v28 = vld [vmem:[%s3125_s1 + $0x158] sm:$0xff]  ;;  %v64_v31 = vld [vmem:[%s3125_s1 + $0x140] sm:$0xff]  ;;  %v66_v33 = vld [vmem:[%s3125_s1 + $0x150] sm:$0xff] }
   0x9   :  { %v1440_v30 = vpack.c.bf16 %v67_v28, %v59_v27  ;;  %v1378_v34 = vpack.c.bf16 %v64_v31, %v56_v29  ;;  %v73_v35 = vld [vmem:[%s3125_s1 + $0x188] sm:$0xff]  ;;  %v75_v37 = vld [vmem:[%s3125_s1 + $0x198] sm:$0xff]  ;;  %v1442_v38 = vpack.c.bf16 %v66_v33, %v58_v32  ;;  %v72_v41 = vld [vmem:[%s3125_s1 + $0x180] sm:$0xff] }
   0xa   :  { %1375 = vmatpush1.bf16.msra.mxu0 %v1374_v21  ;;  %v81_v36 = vld [vmem:[%s3125_s1 + $0x1c8] sm:$0xff]  ;;  %v83_v40 = vld [vmem:[%s3125_s1 + $0x1d8] sm:$0xff]  ;;  %v80_v42 = vld [vmem:[%s3125_s1 + $0x1c0] sm:$0xff] }
   0xb   :  { %1439 = vmatpush1.bf16.msra.mxu1 %v1438_v25  ;;  %1377 = vmatprep.subr.bf16.mxu0 %v1376_v26  ;;  %v1380_v39 = vpack.c.bf16 %v81_v36, %v73_v35  ;;  %v1444_v43 = vpack.c.bf16 %v83_v40, %v75_v37  ;;  %v74_v44 = vld [vmem:[%s3125_s1 + $0x190] sm:$0xff]  ;;  %v89_v46 = vld [vmem:[%s3125_s1 + $0x208] sm:$0xff]  ;;  %v91_v48 = vld [vmem:[%s3125_s1 + $0x218] sm:$0xff]  ;;  %v1382_v50 = vpack.c.bf16 %v80_v42, %v72_v41 }
   0xc   :  { %1441 = vmatprep.subr.bf16.mxu1 %v1440_v30  ;;  %v82_v45 = vld [vmem:[%s3125_s1 + $0x1d0] sm:$0xff]  ;;  %v97_v47 = vld [vmem:[%s3125_s1 + $0x248] sm:$0xff]  ;;  %v99_v49 = vld [vmem:[%s3125_s1 + $0x258] sm:$0xff] }
   0xd   :  { %v1446_v51 = vpack.c.bf16 %v82_v45, %v74_v44  ;;  %v1384_v52 = vpack.c.bf16 %v97_v47, %v89_v46  ;;  %v88_v53 = vld [vmem:[%s3125_s1 + $0x200] sm:$0xff]  ;;  %v90_v55 = vld [vmem:[%s3125_s1 + $0x210] sm:$0xff]  ;;  %v1448_v56 = vpack.c.bf16 %v99_v49, %v91_v48  ;;  %v105_v58 = vld [vmem:[%s3125_s1 + $0x288] sm:$0xff] }
   0xe   :  { %1379 = vmatpush1.bf16.msra.mxu0 %v1378_v34  ;;  %v96_v54 = vld [vmem:[%s3125_s1 + $0x240] sm:$0xff]  ;;  %v98_v57 = vld [vmem:[%s3125_s1 + $0x250] sm:$0xff]  ;;  %v113_v59 = vld [vmem:[%s3125_s1 + $0x2c8] sm:$0xff] }
   0xf   :  { %1443 = vmatpush1.bf16.msra.mxu1 %v1442_v38  ;;  %1381 = vmatprep.subr.bf16.mxu0 %v1380_v39  ;;  %v107_v60 = vld [vmem:[%s3125_s1 + $0x298] sm:$0xff]  ;;  %v1386_v62 = vpack.c.bf16 %v96_v54, %v88_v53  ;;  %v1450_v63 = vpack.c.bf16 %v98_v57, %v90_v55  ;;  %v1388_v0 = vpack.c.bf16 %v113_v59, %v105_v58  ;;  %v104_v1 = vld [vmem:[%s3125_s1 + $0x280] sm:$0xff]  ;;  %v106_v3 = vld [vmem:[%s3125_s1 + $0x290] sm:$0xff] }
  0x10   :  { %1445 = vmatprep.subr.bf16.mxu1 %v1444_v43  ;;  %v115_v61 = vld [vmem:[%s3125_s1 + $0x2d8] sm:$0xff]  ;;  %v112_v2 = vld [vmem:[%s3125_s1 + $0x2c0] sm:$0xff]  ;;  %v114_v5 = vld [vmem:[%s3125_s1 + $0x2d0] sm:$0xff] }
  0x11   :  { %v1452_v4 = vpack.c.bf16 %v115_v61, %v107_v60  ;;  %v121_v6 = vld [vmem:[%s3125_s1 + $0x308] sm:$0xff]  ;;  %v123_v8 = vld [vmem:[%s3125_s1 + $0x318] sm:$0xff]  ;;  %v1390_v10 = vpack.c.bf16 %v112_v2, %v104_v1  ;;  %v1454_v11 = vpack.c.bf16 %v114_v5, %v106_v3  ;;  %v120_v13 = vld [vmem:[%s3125_s1 + $0x300] sm:$0xff] }
  0x12   :  { %1383 = vmatpush1.bf16.msra.mxu0 %v1382_v50  ;;  %v129_v7 = vld [vmem:[%s3125_s1 + $0x348] sm:$0xff]  ;;  %v131_v9 = vld [vmem:[%s3125_s1 + $0x358] sm:$0xff]  ;;  %v128_v14 = vld [vmem:[%s3125_s1 + $0x340] sm:$0xff] }
  0x13   :  { %1447 = vmatpush1.bf16.msra.mxu1 %v1446_v51  ;;  %1385 = vmatprep.subr.bf16.mxu0 %v1384_v52  ;;  %v1392_v12 = vpack.c.bf16 %v129_v7, %v121_v6  ;;  %v122_v15 = vld [vmem:[%s3125_s1 + $0x310] sm:$0xff]  ;;  %v1456_v16 = vpack.c.bf16 %v131_v9, %v123_v8  ;;  %v137_v18 = vld [vmem:[%s3125_s1 + $0x388] sm:$0xff]  ;;  %v139_v20 = vld [vmem:[%s3125_s1 + $0x398] sm:$0xff]  ;;  %v1394_v22 = vpack.c.bf16 %v128_v14, %v120_v13 }
  0x14   :  { %1449 = vmatprep.subr.bf16.mxu1 %v1448_v56  ;;  %v130_v17 = vld [vmem:[%s3125_s1 + $0x350] sm:$0xff]  ;;  %v145_v19 = vld [vmem:[%s3125_s1 + $0x3c8] sm:$0xff]  ;;  %v147_v21 = vld [vmem:[%s3125_s1 + $0x3d8] sm:$0xff] }
  0x15   :  { %v1458_v23 = vpack.c.bf16 %v130_v17, %v122_v15  ;;  %v1396_v24 = vpack.c.bf16 %v145_v19, %v137_v18  ;;  %v136_v25 = vld [vmem:[%s3125_s1 + $0x380] sm:$0xff]  ;;  %v138_v27 = vld [vmem:[%s3125_s1 + $0x390] sm:$0xff]  ;;  %v1460_v28 = vpack.c.bf16 %v147_v21, %v139_v20  ;;  %v153_v30 = vld [vmem:[%s3125_s1 + $0x408] sm:$0xff] }
  0x16   :  { %1387 = vmatpush1.bf16.msra.mxu0 %v1386_v62  ;;  %v144_v26 = vld [vmem:[%s3125_s1 + $0x3c0] sm:$0xff]  ;;  %v146_v29 = vld [vmem:[%s3125_s1 + $0x3d0] sm:$0xff]  ;;  %v161_v31 = vld [vmem:[%s3125_s1 + $0x448] sm:$0xff] }
  0x17   :  { %1451 = vmatpush1.bf16.msra.mxu1 %v1450_v63  ;;  %1389 = vmatprep.subr.bf16.mxu0 %v1388_v0  ;;  %v155_v32 = vld [vmem:[%s3125_s1 + $0x418] sm:$0xff]  ;;  %v1398_v34 = vpack.c.bf16 %v144_v26, %v136_v25  ;;  %v1462_v35 = vpack.c.bf16 %v146_v29, %v138_v27  ;;  %v1400_v36 = vpack.c.bf16 %v161_v31, %v153_v30  ;;  %v152_v37 = vld [vmem:[%s3125_s1 + $0x400] sm:$0xff]  ;;  %v154_v39 = vld [vmem:[%s3125_s1 + $0x410] sm:$0xff] }
  0x18   :  { %1453 = vmatprep.subr.bf16.mxu1 %v1452_v4  ;;  %v163_v33 = vld [vmem:[%s3125_s1 + $0x458] sm:$0xff]  ;;  %v160_v38 = vld [vmem:[%s3125_s1 + $0x440] sm:$0xff]  ;;  %v162_v41 = vld [vmem:[%s3125_s1 + $0x450] sm:$0xff] }
  0x19   :  { %v1464_v40 = vpack.c.bf16 %v163_v33, %v155_v32  ;;  %v169_v42 = vld [vmem:[%s3125_s1 + $0x488] sm:$0xff]  ;;  %v171_v44 = vld [vmem:[%s3125_s1 + $0x498] sm:$0xff]  ;;  %v1402_v46 = vpack.c.bf16 %v160_v38, %v152_v37  ;;  %v1466_v47 = vpack.c.bf16 %v162_v41, %v154_v39  ;;  %v168_v49 = vld [vmem:[%s3125_s1 + $0x480] sm:$0xff] }
  0x1a   :  { %1391 = vmatpush1.bf16.msra.mxu0 %v1390_v10  ;;  %v177_v43 = vld [vmem:[%s3125_s1 + $0x4c8] sm:$0xff]  ;;  %v179_v45 = vld [vmem:[%s3125_s1 + $0x4d8] sm:$0xff]  ;;  %v176_v50 = vld [vmem:[%s3125_s1 + $0x4c0] sm:$0xff] }
  0x1b   :  { %1455 = vmatpush1.bf16.msra.mxu1 %v1454_v11  ;;  %1393 = vmatprep.subr.bf16.mxu0 %v1392_v12  ;;  %v1404_v48 = vpack.c.bf16 %v177_v43, %v169_v42  ;;  %v170_v51 = vld [vmem:[%s3125_s1 + $0x490] sm:$0xff]  ;;  %v1468_v52 = vpack.c.bf16 %v179_v45, %v171_v44  ;;  %v185_v54 = vld [vmem:[%s3125_s1 + $0x508] sm:$0xff]  ;;  %v187_v56 = vld [vmem:[%s3125_s1 + $0x518] sm:$0xff]  ;;  %v1406_v58 = vpack.c.bf16 %v176_v50, %v168_v49 }
  0x1c   :  { %1457 = vmatprep.subr.bf16.mxu1 %v1456_v16  ;;  %v178_v53 = vld [vmem:[%s3125_s1 + $0x4d0] sm:$0xff]  ;;  %v193_v55 = vld [vmem:[%s3125_s1 + $0x548] sm:$0xff]  ;;  %v195_v57 = vld [vmem:[%s3125_s1 + $0x558] sm:$0xff] }
  0x1d   :  { %v1470_v59 = vpack.c.bf16 %v178_v53, %v170_v51  ;;  %v1408_v60 = vpack.c.bf16 %v193_v55, %v185_v54  ;;  %v184_v61 = vld [vmem:[%s3125_s1 + $0x500] sm:$0xff]  ;;  %v186_v63 = vld [vmem:[%s3125_s1 + $0x510] sm:$0xff]  ;;  %v1472_v0 = vpack.c.bf16 %v195_v57, %v187_v56  ;;  %v201_v2 = vld [vmem:[%s3125_s1 + $0x588] sm:$0xff] }
  0x1e   :  { %1395 = vmatpush1.bf16.msra.mxu0 %v1394_v22  ;;  %v192_v62 = vld [vmem:[%s3125_s1 + $0x540] sm:$0xff]  ;;  %v194_v1 = vld [vmem:[%s3125_s1 + $0x550] sm:$0xff]  ;;  %v209_v3 = vld [vmem:[%s3125_s1 + $0x5c8] sm:$0xff] }
  0x1f   :  { %1459 = vmatpush1.bf16.msra.mxu1 %v1458_v23  ;;  %1397 = vmatprep.subr.bf16.mxu0 %v1396_v24  ;;  %v203_v4 = vld [vmem:[%s3125_s1 + $0x598] sm:$0xff]  ;;  %v1410_v6 = vpack.c.bf16 %v192_v62, %v184_v61  ;;  %v200_v7 = vld [vmem:[%s3125_s1 + $0x580] sm:$0xff]  ;;  %v1474_v8 = vpack.c.bf16 %v194_v1, %v186_v63  ;;  %v1412_v9 = vpack.c.bf16 %v209_v3, %v201_v2  ;;  %v202_v11 = vld [vmem:[%s3125_s1 + $0x590] sm:$0xff] }
  0x20   :  { %1461 = vmatprep.subr.bf16.mxu1 %v1460_v28  ;;  %v211_v5 = vld [vmem:[%s3125_s1 + $0x5d8] sm:$0xff]  ;;  %v208_v10 = vld [vmem:[%s3125_s1 + $0x5c0] sm:$0xff]  ;;  %v210_v12 = vld [vmem:[%s3125_s1 + $0x5d0] sm:$0xff] }
  0x21   :  { %v1476_v13 = vpack.c.bf16 %v211_v5, %v203_v4  ;;  %v217_v14 = vld [vmem:[%s3125_s1 + $0x608] sm:$0xff]  ;;  %v219_v17 = vld [vmem:[%s3125_s1 + $0x618] sm:$0xff]  ;;  %v1414_v19 = vpack.c.bf16 %v208_v10, %v200_v7  ;;  %v1478_v20 = vpack.c.bf16 %v210_v12, %v202_v11  ;;  %v216_v22 = vld [vmem:[%s3125_s1 + $0x600] sm:$0xff] }
  0x22   :  { %1399 = vmatpush1.bf16.msra.mxu0 %v1398_v34  ;;  %v225_v15 = vld [vmem:[%s3125_s1 + $0x648] sm:$0xff]  ;;  %v227_v18 = vld [vmem:[%s3125_s1 + $0x658] sm:$0xff]  ;;  %v224_v23 = vld [vmem:[%s3125_s1 + $0x640] sm:$0xff] }
  0x23   :  { %1463 = vmatpush1.bf16.msra.mxu1 %v1462_v35  ;;  %1401 = vmatprep.subr.bf16.mxu0 %v1400_v36  ;;  %v2111_v16 = vld [vmem:[%s3126_s0 + $0x8] sm:$0xff]  ;;  %v1416_v21 = vpack.c.bf16 %v225_v15, %v217_v14  ;;  %v218_v24 = vld [vmem:[%s3125_s1 + $0x610] sm:$0xff]  ;;  %v1480_v25 = vpack.c.bf16 %v227_v18, %v219_v17  ;;  %v235_v29 = vld [vmem:[%s3125_s1 + $0x698] sm:$0xff]  ;;  %v1418_v31 = vpack.c.bf16 %v224_v23, %v216_v22 }
  0x24   :  { %1465 = vmatprep.subr.bf16.mxu1 %v1464_v40  ;;  %386 = vmatprep.mubr.f32.mxu0 %v2111_v16  ;;  %v226_v26 = vld [vmem:[%s3125_s1 + $0x650] sm:$0xff]  ;;  %v233_v27 = vld [vmem:[%s3125_s1 + $0x688] sm:$0xff]  ;;  %v243_v30 = vld [vmem:[%s3125_s1 + $0x6d8] sm:$0xff] }
  0x25   :  { %463 = vmatprep.mubr.f32.mxu1 %v2111_v16  ;;  %v241_v28 = vld [vmem:[%s3125_s1 + $0x6c8] sm:$0xff]  ;;  %v1482_v32 = vpack.c.bf16 %v226_v26, %v218_v24  ;;  %v232_v34 = vld [vmem:[%s3125_s1 + $0x680] sm:$0xff]  ;;  %v234_v36 = vld [vmem:[%s3125_s1 + $0x690] sm:$0xff]  ;;  %v1484_v37 = vpack.c.bf16 %v243_v30, %v235_v29 }
  0x26   :  { %1403 = vmatpush1.bf16.msra.mxu0 %v1402_v46  ;;  %v1420_v33 = vpack.c.bf16 %v241_v28, %v233_v27  ;;  %v240_v35 = vld [vmem:[%s3125_s1 + $0x6c0] sm:$0xff]  ;;  %v242_v38 = vld [vmem:[%s3125_s1 + $0x6d0] sm:$0xff]  ;;  %v249_v39 = vld [vmem:[%s3125_s1 + $0x708] sm:$0xff] }
  0x27   :  { %1467 = vmatpush1.bf16.msra.mxu1 %v1466_v47  ;;  %1405 = vmatprep.subr.bf16.mxu0 %v1404_v48  ;;  %v257_v40 = vld [vmem:[%s3125_s1 + $0x748] sm:$0xff]  ;;  %v251_v41 = vld [vmem:[%s3125_s1 + $0x718] sm:$0xff]  ;;  %v1422_v43 = vpack.c.bf16 %v240_v35, %v232_v34  ;;  %v1486_v44 = vpack.c.bf16 %v242_v38, %v234_v36  ;;  %v248_v46 = vld [vmem:[%s3125_s1 + $0x700] sm:$0xff] }
  0x28   :  { %1469 = vmatprep.subr.bf16.mxu1 %v1468_v52  ;;  %v259_v42 = vld [vmem:[%s3125_s1 + $0x758] sm:$0xff]  ;;  %v1424_v45 = vpack.c.bf16 %v257_v40, %v249_v39  ;;  %v256_v47 = vld [vmem:[%s3125_s1 + $0x740] sm:$0xff]  ;;  %v250_v48 = vld [vmem:[%s3125_s1 + $0x710] sm:$0xff] }
  0x29   :  { %v1488_v49 = vpack.c.bf16 %v259_v42, %v251_v41  ;;  %v258_v50 = vld [vmem:[%s3125_s1 + $0x750] sm:$0xff]  ;;  %v265_v51 = vld [vmem:[%s3125_s1 + $0x788] sm:$0xff]  ;;  %v267_v53 = vld [vmem:[%s3125_s1 + $0x798] sm:$0xff]  ;;  %v1426_v55 = vpack.c.bf16 %v256_v47, %v248_v46 }
  0x2a   :  { %1407 = vmatpush1.bf16.msra.mxu0 %v1406_v58  ;;  %v273_v52 = vld [vmem:[%s3125_s1 + $0x7c8] sm:$0xff]  ;;  %v275_v54 = vld [vmem:[%s3125_s1 + $0x7d8] sm:$0xff]  ;;  %v1490_v56 = vpack.c.bf16 %v258_v50, %v250_v48  ;;  %v264_v58 = vld [vmem:[%s3125_s1 + $0x780] sm:$0xff] }
  0x2b   :  { %1471 = vmatpush1.bf16.msra.mxu1 %v1470_v59  ;;  %1409 = vmatprep.subr.bf16.mxu0 %v1408_v60  ;;  %v1428_v57 = vpack.c.bf16 %v273_v52, %v265_v51  ;;  %v272_v59 = vld [vmem:[%s3125_s1 + $0x7c0] sm:$0xff]  ;;  %v266_v60 = vld [vmem:[%s3125_s1 + $0x790] sm:$0xff]  ;;  %v1492_v61 = vpack.c.bf16 %v275_v54, %v267_v53  ;;  %v29_v63 = vld [vmem:[%s3125_s1 + $0x28] sm:$0xff] }
  0x2c   :  { %1473 = vmatprep.subr.bf16.mxu1 %v1472_v0  ;;  %v274_v62 = vld [vmem:[%s3125_s1 + $0x7d0] sm:$0xff]  ;;  %v37_v0 = vld [vmem:[%s3125_s1 + $0x68] sm:$0xff]  ;;  %v31_v1 = vld [vmem:[%s3125_s1 + $0x38] sm:$0xff]  ;;  %v1430_v3 = vpack.c.bf16 %v272_v59, %v264_v58 }
  0x2d   :  { %v39_v2 = vld [vmem:[%s3125_s1 + $0x78] sm:$0xff]  ;;  %v1494_v4 = vpack.c.bf16 %v274_v62, %v266_v60  ;;  %v1496_v5 = vpack.c.bf16 %v37_v0, %v29_v63  ;;  %v36_v7 = vld [vmem:[%s3125_s1 + $0x60] sm:$0xff]  ;;  %v38_v10 = vld [vmem:[%s3125_s1 + $0x70] sm:$0xff] }
  0x2e   :  { %1411 = vmatpush1.bf16.msra.mxu0 %v1410_v6  ;;  %v28_v6 = vld [vmem:[%s3125_s1 + $0x20] sm:$0xff]  ;;  %v45_v11 = vld [vmem:[%s3125_s1 + $0xa8] sm:$0xff]  ;;  %v55_v14 = vld [vmem:[%s3125_s1 + $0xf8] sm:$0xff] }
  0x2f   :  { %1475 = vmatpush1.bf16.msra.mxu1 %v1474_v8  ;;  %1413 = vmatprep.subr.bf16.mxu0 %v1412_v9  ;;  %v30_v8 = vld [vmem:[%s3125_s1 + $0x30] sm:$0xff]  ;;  %v1560_v9 = vpack.c.bf16 %v39_v2, %v31_v1  ;;  %v53_v12 = vld [vmem:[%s3125_s1 + $0xe8] sm:$0xff]  ;;  %v2244_v15 = vld [vmem:[%s3126_s0] sm:$0xff]  ;;  %v1498_v17 = vpack.c.bf16 %v36_v7, %v28_v6 }
  0x30   :  { %1477 = vmatprep.subr.bf16.mxu1 %v1476_v13  ;;  %v47_v13 = vld [vmem:[%s3125_s1 + $0xb8] sm:$0xff]  ;;  %v1562_v18 = vpack.c.bf16 %v38_v10, %v30_v8  ;;  %v46_v22 = vld [vmem:[%s3125_s1 + $0xb0] sm:$0xff]  ;;  %v69_v26 = vld [vmem:[%s3125_s1 + $0x168] sm:$0xff] }
  0x31   :  { %v1564_v23 = vpack.c.bf16 %v55_v14, %v47_v13  ;;  %v54_v24 = vld [vmem:[%s3125_s1 + $0xf0] sm:$0xff]  ;;  %v63_v27 = vld [vmem:[%s3125_s1 + $0x138] sm:$0xff]  ;;  %v60_v34 = vld [vmem:[%s3125_s1 + $0x120] sm:$0xff] }
  0x32   :  { %1415 = vmatpush1.bf16.msra.mxu0 %v1414_v19  ;;  %v1500_v19 = vpack.c.bf16 %v53_v12, %v45_v11  ;;  %v71_v28 = vld [vmem:[%s3125_s1 + $0x178] sm:$0xff]  ;;  %v68_v35 = vld [vmem:[%s3125_s1 + $0x160] sm:$0xff]  ;;  %v62_v36 = vld [vmem:[%s3125_s1 + $0x130] sm:$0xff] }
  0x33   :  { %1479 = vmatpush1.bf16.msra.mxu1 %v1478_v20  ;;  %1417 = vmatprep.subr.bf16.mxu0 %v1416_v21  ;;  %v44_v20 = vld [vmem:[%s3125_s1 + $0xa0] sm:$0xff]  ;;  %v2274_v29 = vld [vmem:[%s3126_s0 + $0x18] sm:$0xff]  ;;  %v70_v38 = vld [vmem:[%s3125_s1 + $0x170] sm:$0xff] }
  0x34   :  { %1481 = vmatprep.subr.bf16.mxu1 %v1480_v25  ;;  %v52_v21 = vld [vmem:[%s3125_s1 + $0xe0] sm:$0xff]  ;;  %v61_v25 = vld [vmem:[%s3125_s1 + $0x128] sm:$0xff]  ;;  %v79_v41 = vld [vmem:[%s3125_s1 + $0x1b8] sm:$0xff] }
  0x35   :  { %v1502_v30 = vpack.c.bf16 %v52_v21, %v44_v20  ;;  %v77_v39 = vld [vmem:[%s3125_s1 + $0x1a8] sm:$0xff]  ;;  %v87_v42 = vld [vmem:[%s3125_s1 + $0x1f8] sm:$0xff]  ;;  %v76_v46 = vld [vmem:[%s3125_s1 + $0x1a0] sm:$0xff] }
  0x36   :  { %1419 = vmatpush1.bf16.msra.mxu0 %v1418_v31  ;;  %v2280_v31 = vld [vmem:[%s3126_s0 + $0x10] sm:$0xff]  ;;  %v85_v40 = vld [vmem:[%s3125_s1 + $0x1e8] sm:$0xff]  ;;  %v84_v47 = vld [vmem:[%s3125_s1 + $0x1e0] sm:$0xff] }
  0x37   :  { %1483 = vmatpush1.bf16.msra.mxu1 %v1482_v32  ;;  %1421 = vmatprep.subr.bf16.mxu0 %v1420_v33  ;;  %v1566_v32 = vpack.c.bf16 %v54_v24, %v46_v22  ;;  %v1504_v33 = vpack.c.bf16 %v69_v26, %v61_v25  ;;  %v78_v48 = vld [vmem:[%s3125_s1 + $0x1b0] sm:$0xff]  ;;  %v93_v51 = vld [vmem:[%s3125_s1 + $0x228] sm:$0xff]  ;;  %v95_v53 = vld [vmem:[%s3125_s1 + $0x238] sm:$0xff] }
  0x38   :  { %1485 = vmatprep.subr.bf16.mxu1 %v1484_v37  ;;  %v1568_v37 = vpack.c.bf16 %v71_v28, %v63_v27  ;;  %v86_v50 = vld [vmem:[%s3125_s1 + $0x1f0] sm:$0xff]  ;;  %v101_v52 = vld [vmem:[%s3125_s1 + $0x268] sm:$0xff]  ;;  %v103_v54 = vld [vmem:[%s3125_s1 + $0x278] sm:$0xff] }
  0x39   :  { %v92_v58 = vld [vmem:[%s3125_s1 + $0x220] sm:$0xff]  ;;  %v94_v60 = vld [vmem:[%s3125_s1 + $0x230] sm:$0xff]  ;;  %v109_v62 = vld [vmem:[%s3125_s1 + $0x2a8] sm:$0xff] }
  0x3a   :  { %1423 = vmatpush1.bf16.msra.mxu0 %v1422_v43  ;;  %v1506_v43 = vpack.c.bf16 %v68_v35, %v60_v34  ;;  %v100_v59 = vld [vmem:[%s3125_s1 + $0x260] sm:$0xff]  ;;  %v117_v63 = vld [vmem:[%s3125_s1 + $0x2e8] sm:$0xff]  ;;  %v111_v0 = vld [vmem:[%s3125_s1 + $0x2b8] sm:$0xff] }
  0x3b   :  { %1487 = vmatpush1.bf16.msra.mxu1 %v1486_v44  ;;  %1425 = vmatprep.subr.bf16.mxu0 %v1424_v45  ;;  %v1570_v44 = vpack.c.bf16 %v70_v38, %v62_v36  ;;  %v1508_v45 = vpack.c.bf16 %v85_v40, %v77_v39  ;;  %v119_v1 = vld [vmem:[%s3125_s1 + $0x2f8] sm:$0xff]  ;;  %v1514_v2 = vpack.c.bf16 %v100_v59, %v92_v58  ;;  %v116_v6 = vld [vmem:[%s3125_s1 + $0x2e0] sm:$0xff]  ;;  %v110_v7 = vld [vmem:[%s3125_s1 + $0x2b0] sm:$0xff] }
  0x3c   :  { %1489 = vmatprep.subr.bf16.mxu1 %v1488_v49  ;;  %v1572_v49 = vpack.c.bf16 %v87_v42, %v79_v41  ;;  %v1580_v8 = vpack.c.bf16 %v119_v1, %v111_v0  ;;  %v125_v10 = vld [vmem:[%s3125_s1 + $0x328] sm:$0xff]  ;;  %v127_v12 = vld [vmem:[%s3125_s1 + $0x338] sm:$0xff]  ;;  %v132_v20 = vld [vmem:[%s3125_s1 + $0x360] sm:$0xff] }
  0x3d   :  { %v133_v11 = vld [vmem:[%s3125_s1 + $0x368] sm:$0xff]  ;;  %v135_v13 = vld [vmem:[%s3125_s1 + $0x378] sm:$0xff]  ;;  %v126_v21 = vld [vmem:[%s3125_s1 + $0x330] sm:$0xff] }
  0x3e   :  { %1427 = vmatpush1.bf16.msra.mxu0 %v1426_v55  ;;  %v1510_v55 = vpack.c.bf16 %v84_v47, %v76_v46  ;;  %v1584_v22 = vpack.c.bf16 %v135_v13, %v127_v12  ;;  %v141_v24 = vld [vmem:[%s3125_s1 + $0x3a8] sm:$0xff]  ;;  %v143_v26 = vld [vmem:[%s3125_s1 + $0x3b8] sm:$0xff]  ;;  %v148_v34 = vld [vmem:[%s3125_s1 + $0x3e0] sm:$0xff] }
  0x3f   :  { %1491 = vmatpush1.bf16.msra.mxu1 %v1490_v56  ;;  %1429 = vmatprep.subr.bf16.mxu0 %v1428_v57  ;;  %v1574_v56 = vpack.c.bf16 %v86_v50, %v78_v48  ;;  %v1512_v57 = vpack.c.bf16 %v101_v52, %v93_v51  ;;  %v149_v25 = vld [vmem:[%s3125_s1 + $0x3e8] sm:$0xff]  ;;  %v151_v27 = vld [vmem:[%s3125_s1 + $0x3f8] sm:$0xff]  ;;  %v142_v35 = vld [vmem:[%s3125_s1 + $0x3b0] sm:$0xff] }
  0x40   :  { %1493 = vmatprep.subr.bf16.mxu1 %v1492_v61  ;;  %v102_v61 = vld [vmem:[%s3125_s1 + $0x270] sm:$0xff]  ;;  %v1588_v36 = vpack.c.bf16 %v151_v27, %v143_v26  ;;  %v157_v38 = vld [vmem:[%s3125_s1 + $0x428] sm:$0xff]  ;;  %v159_v40 = vld [vmem:[%s3125_s1 + $0x438] sm:$0xff] }
  0x41   :  { %v165_v39 = vld [vmem:[%s3125_s1 + $0x468] sm:$0xff]  ;;  %v167_v41 = vld [vmem:[%s3125_s1 + $0x478] sm:$0xff]  ;;  %v164_v46 = vld [vmem:[%s3125_s1 + $0x460] sm:$0xff] }
  0x42   :  { %1431 = vmatpush1.bf16.msra.mxu0 %v1430_v3  ;;  %v1578_v3 = vpack.c.bf16 %v102_v61, %v94_v60  ;;  %v158_v47 = vld [vmem:[%s3125_s1 + $0x430] sm:$0xff]  ;;  %v1592_v48 = vpack.c.bf16 %v167_v41, %v159_v40  ;;  %v173_v50 = vld [vmem:[%s3125_s1 + $0x4a8] sm:$0xff]  ;;  %v175_v52 = vld [vmem:[%s3125_s1 + $0x4b8] sm:$0xff] }
  0x43   :  { %1495 = vmatpush1.bf16.msra.mxu1 %v1494_v4  ;;  %1497 = vmatprep.subr.bf16.mxu0 %v1496_v5  ;;  %v1516_v4 = vpack.c.bf16 %v117_v63, %v109_v62  ;;  %v108_v5 = vld [vmem:[%s3125_s1 + $0x2a0] sm:$0xff]  ;;  %v181_v51 = vld [vmem:[%s3125_s1 + $0x4e8] sm:$0xff]  ;;  %v174_v59 = vld [vmem:[%s3125_s1 + $0x4b0] sm:$0xff] }
  0x44   :  { %1561 = vmatprep.subr.bf16.mxu1 %v1560_v9  ;;  %v118_v9 = vld [vmem:[%s3125_s1 + $0x2f0] sm:$0xff]  ;;  %v1518_v14 = vpack.c.bf16 %v116_v6, %v108_v5  ;;  %v180_v58 = vld [vmem:[%s3125_s1 + $0x4e0] sm:$0xff]  ;;  %v189_v61 = vld [vmem:[%s3125_s1 + $0x528] sm:$0xff] }
  0x45   :  { %387 = vmatmul.mubr.f32.vlgmr.msra.gmra.mrb[0].mxu0 %v2244_v15  ;;  %v197_v62 = vld [vmem:[%s3125_s1 + $0x568] sm:$0xff]  ;;  %v191_v63 = vld [vmem:[%s3125_s1 + $0x538] sm:$0xff]  ;;  %v196_v5 = vld [vmem:[%s3125_s1 + $0x560] sm:$0xff] }
  0x46   :  { %464 = vmatmul.mubr.f32.vlgmr.msra.gmra.mrb[0].mxu1 %v2244_v15  ;;  %1499 = vmatpush1.bf16.msra.mxu0 %v1498_v17  ;;  %v1582_v17 = vpack.c.bf16 %v118_v9, %v110_v7  ;;  %v199_v0 = vld [vmem:[%s3125_s1 + $0x578] sm:$0xff]  ;;  %v190_v6 = vld [vmem:[%s3125_s1 + $0x530] sm:$0xff]  ;;  %v205_v9 = vld [vmem:[%s3125_s1 + $0x5a8] sm:$0xff] }
  0x47   :  { %1563 = vmatpush1.bf16.msra.mxu1 %v1562_v18  ;;  %1501 = vmatprep.subr.bf16.mxu0 %v1500_v19  ;;  %v1520_v18 = vpack.c.bf16 %v133_v11, %v125_v10  ;;  %v124_v19 = vld [vmem:[%s3125_s1 + $0x320] sm:$0xff]  ;;  %v1600_v7 = vpack.c.bf16 %v199_v0, %v191_v63  ;;  %v213_v10 = vld [vmem:[%s3125_s1 + $0x5e8] sm:$0xff]  ;;  %v207_v11 = vld [vmem:[%s3125_s1 + $0x5b8] sm:$0xff] }
  0x48   :  { %1565 = vmatprep.subr.bf16.mxu1 %v1564_v23  ;;  %392 = vmatprep.mubr.f32.mxu0 %v2274_v29  ;;  %v134_v23 = vld [vmem:[%s3125_s1 + $0x370] sm:$0xff]  ;;  %v1522_v28 = vpack.c.bf16 %v132_v20, %v124_v19  ;;  %v215_v12 = vld [vmem:[%s3125_s1 + $0x5f8] sm:$0xff]  ;;  %v212_v19 = vld [vmem:[%s3125_s1 + $0x5e0] sm:$0xff] }
  0x49   :  { %393 = vmatmul.mubr.f32.gmra.mrb[2].mxu0 %v2280_v31  ;;  %469 = vmatprep.mubr.f32.mxu1 %v2274_v29  ;;  %v206_v20 = vld [vmem:[%s3125_s1 + $0x5b0] sm:$0xff]  ;;  %v231_v26 = vld [vmem:[%s3125_s1 + $0x678] sm:$0xff] }
  0x4a   :  { %1503 = vmatpush1.bf16.msra.mxu0 %v1502_v30  ;;  %470 = vmatmul.mubr.f32.gmra.mrb[2].mxu1 %v2280_v31  ;;  %v1586_v30 = vpack.c.bf16 %v134_v23, %v126_v21  ;;  %v1604_v21 = vpack.c.bf16 %v215_v12, %v207_v11  ;;  %v221_v23 = vld [vmem:[%s3125_s1 + $0x628] sm:$0xff]  ;;  %v247_v40 = vld [vmem:[%s3125_s1 + $0x6f8] sm:$0xff] }
  0x4b   :  { %1567 = vmatpush1.bf16.msra.mxu1 %v1566_v32  ;;  %1505 = vmatprep.subr.bf16.mxu0 %v1504_v33  ;;  %v1524_v32 = vpack.c.bf16 %v149_v25, %v141_v24  ;;  %v140_v33 = vld [vmem:[%s3125_s1 + $0x3a0] sm:$0xff]  ;;  %v229_v24 = vld [vmem:[%s3125_s1 + $0x668] sm:$0xff]  ;;  %v223_v25 = vld [vmem:[%s3125_s1 + $0x638] sm:$0xff] }
  0x4c   :  { %1569 = vmatprep.subr.bf16.mxu1 %v1568_v37  ;;  %540 = vmatprep.mubr.f32.mxu0 %v2111_v16  ;;  %v150_v37 = vld [vmem:[%s3125_s1 + $0x3f0] sm:$0xff]  ;;  %v1526_v42 = vpack.c.bf16 %v148_v34, %v140_v33  ;;  %v228_v33 = vld [vmem:[%s3125_s1 + $0x660] sm:$0xff]  ;;  %v279_v63 = vld [vmem:[%s3125_s1 + $0x7f8] sm:$0xff] }
  0x4d   :  { %617 = vmatprep.mubr.f32.mxu1 %v2111_v16  ;;  %v1576_v16 = vpack.c.bf16 %v103_v54, %v95_v53  ;;  %v183_v53 = vld [vmem:[%s3125_s1 + $0x4f8] sm:$0xff]  ;;  %v222_v34 = vld [vmem:[%s3125_s1 + $0x630] sm:$0xff]  ;;  %v823_v11 = vld [vmem:[%s3127_s3 + $0x188] sm:$0xff] }
  0x4e   :  { %1507 = vmatpush1.bf16.msra.mxu0 %v1506_v43  ;;  %v1590_v43 = vpack.c.bf16 %v150_v37, %v142_v35  ;;  %v1596_v60 = vpack.c.bf16 %v183_v53, %v175_v52  ;;  %v1608_v35 = vpack.c.bf16 %v231_v26, %v223_v25  ;;  %v237_v37 = vld [vmem:[%s3125_s1 + $0x6a8] sm:$0xff]  ;;  %v263_v52 = vld [vmem:[%s3125_s1 + $0x778] sm:$0xff] }
  0x4f   :  { %1571 = vmatpush1.bf16.msra.mxu1 %v1570_v44  ;;  %1509 = vmatprep.subr.bf16.mxu0 %v1508_v45  ;;  %v1528_v44 = vpack.c.bf16 %v165_v39, %v157_v38  ;;  %v156_v45 = vld [vmem:[%s3125_s1 + $0x420] sm:$0xff]  ;;  %v245_v38 = vld [vmem:[%s3125_s1 + $0x6e8] sm:$0xff]  ;;  %v239_v39 = vld [vmem:[%s3125_s1 + $0x6b8] sm:$0xff] }
  0x50   :  { %1573 = vmatprep.subr.bf16.mxu1 %v1572_v49  ;;  %v166_v49 = vld [vmem:[%s3125_s1 + $0x470] sm:$0xff]  ;;  %v1530_v54 = vpack.c.bf16 %v164_v46, %v156_v45  ;;  %v244_v45 = vld [vmem:[%s3125_s1 + $0x6e0] sm:$0xff]  ;;  %v793_v25 = vld [vmem:[%s3127_s3 + $0x98] sm:$0xff] }
  0x51   :  { %v238_v46 = vld [vmem:[%s3125_s1 + $0x6b0] sm:$0xff] }
  0x52   :  { %1511 = vmatpush1.bf16.msra.mxu0 %v1510_v55  ;;  %v1594_v55 = vpack.c.bf16 %v166_v49, %v158_v47  ;;  %v1612_v47 = vpack.c.bf16 %v247_v40, %v239_v39  ;;  %v253_v49 = vld [vmem:[%s3125_s1 + $0x728] sm:$0xff]  ;;  %v778_v40 = vld [vmem:[%s3127_s3 + $0x20] sm:$0xff] }
  0x53   :  { %1575 = vmatpush1.bf16.msra.mxu1 %v1574_v56  ;;  %1513 = vmatprep.subr.bf16.mxu0 %v1512_v57  ;;  %v1532_v56 = vpack.c.bf16 %v181_v51, %v173_v50  ;;  %v172_v57 = vld [vmem:[%s3125_s1 + $0x4a0] sm:$0xff]  ;;  %v261_v50 = vld [vmem:[%s3125_s1 + $0x768] sm:$0xff]  ;;  %v255_v51 = vld [vmem:[%s3125_s1 + $0x738] sm:$0xff] }
  0x54   :  { %1577 = vmatprep.subr.bf16.mxu1 %v1576_v16  ;;  %v182_v16 = vld [vmem:[%s3125_s1 + $0x4f0] sm:$0xff]  ;;  %v1534_v1 = vpack.c.bf16 %v180_v58, %v172_v57  ;;  %v260_v57 = vld [vmem:[%s3125_s1 + $0x760] sm:$0xff]  ;;  %v827_v39 = vld [vmem:[%s3127_s3 + $0x1a8] sm:$0xff] }
  0x55   :  { %v254_v58 = vld [vmem:[%s3125_s1 + $0x730] sm:$0xff] }
  0x56   :  { %1515 = vmatpush1.bf16.msra.mxu0 %v1514_v2  ;;  %v1598_v2 = vpack.c.bf16 %v182_v16, %v174_v59  ;;  %v1616_v59 = vpack.c.bf16 %v263_v52, %v255_v51  ;;  %v269_v16 = vld [vmem:[%s3125_s1 + $0x7a8] sm:$0xff]  ;;  %v829_v51 = vld [vmem:[%s3127_s3 + $0x1b8] sm:$0xff]  ;;  %v780_v52 = vld [vmem:[%s3127_s3 + $0x30] sm:$0xff] }
  0x57   :  { %1579 = vmatpush1.bf16.msra.mxu1 %v1578_v3  ;;  %1517 = vmatprep.subr.bf16.mxu0 %v1516_v4  ;;  %v1536_v3 = vpack.c.bf16 %v197_v62, %v189_v61  ;;  %v188_v4 = vld [vmem:[%s3125_s1 + $0x520] sm:$0xff]  ;;  %v277_v61 = vld [vmem:[%s3125_s1 + $0x7e8] sm:$0xff]  ;;  %v271_v62 = vld [vmem:[%s3125_s1 + $0x7b8] sm:$0xff] }
  0x58   :  { %1581 = vmatprep.subr.bf16.mxu1 %v1580_v8  ;;  %v198_v8 = vld [vmem:[%s3125_s1 + $0x570] sm:$0xff]  ;;  %v1538_v13 = vpack.c.bf16 %v196_v5, %v188_v4  ;;  %v276_v4 = vld [vmem:[%s3125_s1 + $0x7e0] sm:$0xff] }
  0x59   :  { %v270_v5 = vld [vmem:[%s3125_s1 + $0x7b0] sm:$0xff] }
  0x5a   :  { %1519 = vmatpush1.bf16.msra.mxu0 %v1518_v14  ;;  %v1602_v14 = vpack.c.bf16 %v198_v8, %v190_v6  ;;  %v1620_v6 = vpack.c.bf16 %v279_v63, %v271_v62  ;;  %v790_v8 = vld [vmem:[%s3127_s3 + $0x80] sm:$0xff]  ;;  %v831_v62 = vld [vmem:[%s3127_s3 + $0x1c8] sm:$0xff] }
  0x5b   :  { %1583 = vmatpush1.bf16.msra.mxu1 %v1582_v17  ;;  %1521 = vmatprep.subr.bf16.mxu0 %v1520_v18  ;;  %v1540_v17 = vpack.c.bf16 %v213_v10, %v205_v9  ;;  %v204_v18 = vld [vmem:[%s3125_s1 + $0x5a0] sm:$0xff]  ;;  %v791_v9 = vld [vmem:[%s3127_s3 + $0x88] sm:$0xff] }
  0x5c   :  { %1585 = vmatprep.subr.bf16.mxu1 %v1584_v22  ;;  %v214_v22 = vld [vmem:[%s3125_s1 + $0x5f0] sm:$0xff]  ;;  %v1542_v27 = vpack.c.bf16 %v212_v19, %v204_v18  ;;  %v822_v10 = vld [vmem:[%s3127_s3 + $0x180] sm:$0xff]  ;;  %v775_v19 = vld [vmem:[%s3127_s3 + $0x8] sm:$0xff] }
  0x5d   :  { %v774_v18 = vld [vmem:[%s3127_s3] sm:$0xff] }
  0x5e   :  { %1523 = vmatpush1.bf16.msra.mxu0 %v1522_v28  ;;  %v1606_v28 = vpack.c.bf16 %v214_v22, %v206_v20  ;;  %v806_v20 = vld [vmem:[%s3127_s3 + $0x100] sm:$0xff]  ;;  %v1626_v22 = vpack.c.bf16 %v775_v19, %v774_v18  ;;  %v817_v18 = vld [vmem:[%s3127_s3 + $0x158] sm:$0xff] }
  0x5f   :  { %1587 = vmatpush1.bf16.msra.mxu1 %v1586_v30  ;;  %1525 = vmatprep.subr.bf16.mxu0 %v1524_v32  ;;  %v1544_v30 = vpack.c.bf16 %v229_v24, %v221_v23  ;;  %v220_v32 = vld [vmem:[%s3125_s1 + $0x620] sm:$0xff]  ;;  %v792_v24 = vld [vmem:[%s3127_s3 + $0x90] sm:$0xff] }
  0x60   :  { %1589 = vmatprep.subr.bf16.mxu1 %v1588_v36  ;;  %v230_v36 = vld [vmem:[%s3125_s1 + $0x670] sm:$0xff]  ;;  %v1546_v41 = vpack.c.bf16 %v228_v33, %v220_v32  ;;  %v1628_v26 = vpack.c.bf16 %v793_v25, %v792_v24  ;;  %v809_v33 = vld [vmem:[%s3127_s3 + $0x118] sm:$0xff]  ;;  %v782_v63 = vld [vmem:[%s3127_s3 + $0x40] sm:$0xff] }
  0x61   :  { %v808_v32 = vld [vmem:[%s3127_s3 + $0x110] sm:$0xff]  ;;  %v802_v19 = vld [vmem:[%s3127_s3 + $0xe0] sm:$0xff]  ;;  %v835_v24 = vld [vmem:[%s3127_s3 + $0x1e8] sm:$0xff] }
  0x62   :  { %1527 = vmatpush1.bf16.msra.mxu0 %v1526_v42  ;;  %v1610_v42 = vpack.c.bf16 %v230_v36, %v222_v34  ;;  %v1662_v34 = vpack.c.bf16 %v809_v33, %v808_v32  ;;  %v795_v36 = vld [vmem:[%s3127_s3 + $0xa8] sm:$0xff]  ;;  %v786_v25 = vld [vmem:[%s3127_s3 + $0x60] sm:$0xff]  ;;  %v836_v32 = vld [vmem:[%s3127_s3 + $0x1f0] sm:$0xff] }
  0x63   :  { %1591 = vmatpush1.bf16.msra.mxu1 %v1590_v43  ;;  %1529 = vmatprep.subr.bf16.mxu0 %v1528_v44  ;;  %v1548_v43 = vpack.c.bf16 %v245_v38, %v237_v37  ;;  %v236_v44 = vld [vmem:[%s3125_s1 + $0x6a0] sm:$0xff] }
  0x64   :  { %1593 = vmatprep.subr.bf16.mxu1 %v1592_v48  ;;  %v246_v48 = vld [vmem:[%s3125_s1 + $0x6f0] sm:$0xff]  ;;  %v1550_v53 = vpack.c.bf16 %v244_v45, %v236_v44  ;;  %v826_v37 = vld [vmem:[%s3127_s3 + $0x1a0] sm:$0xff]  ;;  %v811_v45 = vld [vmem:[%s3127_s3 + $0x128] sm:$0xff] }
  0x65   :  { %v810_v44 = vld [vmem:[%s3127_s3 + $0x120] sm:$0xff] }
  0x66   :  { %1531 = vmatpush1.bf16.msra.mxu0 %v1530_v54  ;;  %v1614_v54 = vpack.c.bf16 %v246_v48, %v238_v46  ;;  %v1666_v46 = vpack.c.bf16 %v811_v45, %v810_v44  ;;  %v797_v48 = vld [vmem:[%s3127_s3 + $0xb8] sm:$0xff]  ;;  %v855_v44 = vld [vmem:[%s3127_s3 + $0x288] sm:$0xff]  ;;  %v886_v45 = vld [vmem:[%s3127_s3 + $0x380] sm:$0xff] }
  0x67   :  { %1595 = vmatpush1.bf16.msra.mxu1 %v1594_v55  ;;  %1533 = vmatprep.subr.bf16.mxu0 %v1532_v56  ;;  %v1552_v55 = vpack.c.bf16 %v261_v50, %v253_v49  ;;  %v252_v56 = vld [vmem:[%s3125_s1 + $0x720] sm:$0xff]  ;;  %v828_v49 = vld [vmem:[%s3127_s3 + $0x1b0] sm:$0xff] }
  0x68   :  { %1597 = vmatprep.subr.bf16.mxu1 %v1596_v60  ;;  %v262_v60 = vld [vmem:[%s3125_s1 + $0x770] sm:$0xff]  ;;  %v1554_v0 = vpack.c.bf16 %v260_v57, %v252_v56  ;;  %v813_v57 = vld [vmem:[%s3127_s3 + $0x138] sm:$0xff] }
  0x69   :  { %v812_v56 = vld [vmem:[%s3127_s3 + $0x130] sm:$0xff] }
  0x6a   :  { %1535 = vmatpush1.bf16.msra.mxu0 %v1534_v1  ;;  %v1618_v1 = vpack.c.bf16 %v262_v60, %v254_v58  ;;  %v1670_v58 = vpack.c.bf16 %v813_v57, %v812_v56  ;;  %v799_v60 = vld [vmem:[%s3127_s3 + $0xc8] sm:$0xff] }
  0x6b   :  { %1599 = vmatpush1.bf16.msra.mxu1 %v1598_v2  ;;  %1537 = vmatprep.subr.bf16.mxu0 %v1536_v3  ;;  %v1556_v2 = vpack.c.bf16 %v277_v61, %v269_v16  ;;  %v268_v3 = vld [vmem:[%s3125_s1 + $0x7a0] sm:$0xff] }
  0x6c   :  { %1601 = vmatprep.subr.bf16.mxu1 %v1600_v7  ;;  %v278_v7 = vld [vmem:[%s3125_s1 + $0x7f0] sm:$0xff]  ;;  %v1558_v12 = vpack.c.bf16 %v276_v4, %v268_v3  ;;  %v830_v16 = vld [vmem:[%s3127_s3 + $0x1c0] sm:$0xff]  ;;  %v815_v4 = vld [vmem:[%s3127_s3 + $0x148] sm:$0xff] }
  0x6d   :  { %v814_v3 = vld [vmem:[%s3127_s3 + $0x140] sm:$0xff] }
  0x6e   :  { %1539 = vmatpush1.bf16.msra.mxu0 %v1538_v13  ;;  %v1622_v13 = vpack.c.bf16 %v278_v7, %v270_v5  ;;  %v800_v5 = vld [vmem:[%s3127_s3 + $0xd0] sm:$0xff]  ;;  %v801_v7 = vld [vmem:[%s3127_s3 + $0xd8] sm:$0xff] }
  0x6f   :  { %1603 = vmatpush1.bf16.msra.mxu1 %v1602_v14  ;;  %1541 = vmatprep.subr.bf16.mxu0 %v1540_v17  ;;  %v1624_v14 = vpack.c.bf16 %v791_v9, %v790_v8  ;;  %v1656_v17 = vpack.c.bf16 %v823_v11, %v822_v10  ;;  %v832_v8 = vld [vmem:[%s3127_s3 + $0x1d0] sm:$0xff]  ;;  %v833_v9 = vld [vmem:[%s3127_s3 + $0x1d8] sm:$0xff]  ;;  %v1644_v10 = vpack.c.bf16 %v801_v7, %v800_v5 }
  0x70   :  { %1605 = vmatprep.subr.bf16.mxu1 %v1604_v21  ;;  %v807_v21 = vld [vmem:[%s3127_s3 + $0x108] sm:$0xff]  ;;  %v1676_v11 = vpack.c.bf16 %v833_v9, %v832_v8 }
  0x71   :  { %v1658_v23 = vpack.c.bf16 %v807_v21, %v806_v20  ;;  %v803_v20 = vld [vmem:[%s3127_s3 + $0xe8] sm:$0xff] }
  0x72   :  { %1543 = vmatpush1.bf16.msra.mxu0 %v1542_v27  ;;  %v777_v27 = vld [vmem:[%s3127_s3 + $0x18] sm:$0xff] }
  0x73   :  { %1607 = vmatpush1.bf16.msra.mxu1 %v1606_v28  ;;  %1545 = vmatprep.subr.bf16.mxu0 %v1544_v30 }
  0x74   :  { %1609 = vmatprep.subr.bf16.mxu1 %v1608_v35  ;;  %v794_v35 = vld [vmem:[%s3127_s3 + $0xa0] sm:$0xff] }
  0x75   :  { %v1632_v38 = vpack.c.bf16 %v795_v36, %v794_v35  ;;  %v837_v35 = vld [vmem:[%s3127_s3 + $0x1f8] sm:$0xff]  ;;  %v788_v36 = vld [vmem:[%s3127_s3 + $0x70] sm:$0xff] }
  0x76   :  { %1547 = vmatpush1.bf16.msra.mxu0 %v1546_v41  ;;  %v779_v41 = vld [vmem:[%s3127_s3 + $0x28] sm:$0xff] }
  0x77   :  { %1611 = vmatpush1.bf16.msra.mxu1 %v1610_v42  ;;  %1549 = vmatprep.subr.bf16.mxu0 %v1548_v43  ;;  %v1664_v42 = vpack.c.bf16 %v827_v39, %v826_v37  ;;  %v1634_v43 = vpack.c.bf16 %v779_v41, %v778_v40  ;;  %v789_v37 = vld [vmem:[%s3127_s3 + $0x78] sm:$0xff]  ;;  %v820_v39 = vld [vmem:[%s3127_s3 + $0x170] sm:$0xff] }
  0x78   :  { %1613 = vmatprep.subr.bf16.mxu1 %v1612_v47  ;;  %v796_v47 = vld [vmem:[%s3127_s3 + $0xb0] sm:$0xff]  ;;  %v821_v40 = vld [vmem:[%s3127_s3 + $0x178] sm:$0xff]  ;;  %v1654_v41 = vpack.c.bf16 %v789_v37, %v788_v36 }
  0x79   :  { %v1636_v50 = vpack.c.bf16 %v797_v48, %v796_v47  ;;  %v887_v47 = vld [vmem:[%s3127_s3 + $0x388] sm:$0xff] }
  0x7a   :  { %1551 = vmatpush1.bf16.msra.mxu0 %v1550_v53  ;;  %v781_v53 = vld [vmem:[%s3127_s3 + $0x38] sm:$0xff]  ;;  %v1720_v48 = vpack.c.bf16 %v887_v47, %v886_v45 }
  0x7b   :  { %1615 = vmatpush1.bf16.msra.mxu1 %v1614_v54  ;;  %1553 = vmatprep.subr.bf16.mxu0 %v1552_v55  ;;  %v1668_v54 = vpack.c.bf16 %v829_v51, %v828_v49  ;;  %v1638_v55 = vpack.c.bf16 %v781_v53, %v780_v52  ;;  %v282_v49 = vlaneseq  ;;  %v2828_v52 = vld [vmem:[%s3128_s2] sm:$0xff] }
  0x7c   :  { %1617 = vmatprep.subr.bf16.mxu1 %v1616_v59  ;;  %v798_v59 = vld [vmem:[%s3127_s3 + $0xc0] sm:$0xff] }
  0x7d   :  { %v1640_v61 = vpack.c.bf16 %v799_v60, %v798_v59 }
  0x7e   :  { %1555 = vmatpush1.bf16.msra.mxu0 %v1554_v0  ;;  %v783_v0 = vld [vmem:[%s3127_s3 + $0x48] sm:$0xff] }
  0x7f   :  { %1619 = vmatpush1.bf16.msra.mxu1 %v1618_v1  ;;  %1557 = vmatprep.subr.bf16.mxu0 %v1556_v2  ;;  %v1672_v1 = vpack.c.bf16 %v831_v62, %v830_v16  ;;  %v1642_v2 = vpack.c.bf16 %v783_v0, %v782_v63 }
  0x80   :  { %1621 = vmatprep.subr.bf16.mxu1 %v1620_v6  ;;  %v1674_v6 = vpack.c.bf16 %v815_v4, %v814_v3 }
  0x82   :  { %1559 = vmatpush1.bf16.msra.mxu0 %v1558_v12  ;;  %v784_v12 = vld [vmem:[%s3127_s3 + $0x50] sm:$0xff] }
  0x83   :  { %1623 = vmatpush1.bf16.msra.mxu1 %v1622_v13  ;;  %1625 = vmatprep.subr.bf16.mxu0 %v1624_v14  ;;  %v785_v13 = vld [vmem:[%s3127_s3 + $0x58] sm:$0xff]  ;;  %v816_v14 = vld [vmem:[%s3127_s3 + $0x150] sm:$0xff] }
  0x84   :  { %1657 = vmatprep.subr.bf16.mxu1 %v1656_v17  ;;  %v1646_v17 = vpack.c.bf16 %v785_v13, %v784_v12  ;;  %v1678_v21 = vpack.c.bf16 %v817_v18, %v816_v14 }
  0x85   :  { %541 = vmatmul.mubr.f32.vlgmr.msra.gmra.mrb[4].mxu0 %v2244_v15 }
  0x86   :  { %618 = vmatmul.mubr.f32.vlgmr.msra.gmra.mrb[4].mxu1 %v2244_v15  ;;  %546 = vmatprep.mubr.f32.mxu0 %v2274_v29  ;;  %v824_v15 = vld [vmem:[%s3127_s3 + $0x190] sm:$0xff] }
  0x87   :  { %623 = vmatprep.mubr.f32.mxu1 %v2274_v29  ;;  %1627 = vmatpush3.bf16.msra.mxu0 %v1626_v22  ;;  %v825_v29 = vld [vmem:[%s3127_s3 + $0x198] sm:$0xff]  ;;  %v1648_v22 = vpack.c.bf16 %v803_v20, %v802_v19 }
  0x88   :  { %1659 = vmatpush3.bf16.msra.mxu1 %v1658_v23  ;;  %v1660_v28 = vpack.c.bf16 %v825_v29, %v824_v15  ;;  %1629 = vmatprep.subr.bf16.mxu0 %v1628_v26  ;;  %v834_v23 = vld [vmem:[%s3127_s3 + $0x1e0] sm:$0xff]  ;;  %v787_v26 = vld [vmem:[%s3127_s3 + $0x68] sm:$0xff] }
  0x89   :  { %547 = vmatmul.mubr.f32.gmra.mrb[6].mxu0 %v2280_v31  ;;  %v1680_v15 = vpack.c.bf16 %v835_v24, %v834_v23  ;;  %v818_v29 = vld [vmem:[%s3127_s3 + $0x160] sm:$0xff] }
  0x8a   :  { %624 = vmatmul.mubr.f32.gmra.mrb[6].mxu1 %v2280_v31  ;;  %v776_v31 = vld [vmem:[%s3127_s3 + $0x10] sm:$0xff]  ;;  %1661 = vmatprep.subr.bf16.mxu1 %v1660_v28 }
  0x8b   :  { %v1630_v30 = vpack.c.bf16 %v777_v27, %v776_v31  ;;  %v819_v31 = vld [vmem:[%s3127_s3 + $0x168] sm:$0xff]  ;;  %v1650_v27 = vpack.c.bf16 %v787_v26, %v786_v25  ;;  %v804_v28 = vld [vmem:[%s3127_s3 + $0xf0] sm:$0xff] }
  0x8c   :  { %1663 = vmatpush3.bf16.msra.mxu1 %v1662_v34  ;;  %v1682_v33 = vpack.c.bf16 %v819_v31, %v818_v29 }
  0x8d   :  { %1631 = vmatpush3.bf16.msra.mxu0 %v1630_v30  ;;  %1665 = vmatprep.subr.bf16.mxu1 %v1664_v42  ;;  %v805_v30 = vld [vmem:[%s3127_s3 + $0xf8] sm:$0xff]  ;;  %v1686_v42 = vpack.c.bf16 %v821_v40, %v820_v39 }
  0x8e   :  { %1633 = vmatprep.subr.bf16.mxu0 %v1632_v38  ;;  %v1652_v34 = vpack.c.bf16 %v805_v30, %v804_v28  ;;  %v1684_v38 = vpack.c.bf16 %v837_v35, %v836_v32 }
  0x90   :  { %1667 = vmatpush3.bf16.msra.mxu1 %v1666_v46 }
  0x91   :  { %1635 = vmatpush3.bf16.msra.mxu0 %v1634_v43  ;;  %1669 = vmatprep.subr.bf16.mxu1 %v1668_v54  ;;  %v854_v43 = vld [vmem:[%s3127_s3 + $0x280] sm:$0xff] }
  0x92   :  { %1637 = vmatprep.subr.bf16.mxu0 %v1636_v50  ;;  %v1688_v46 = vpack.c.bf16 %v855_v44, %v854_v43  ;;  %v2822_v50 = vshrl.u32 %v282_v49, 7 }
  0x94   :  { %1671 = vmatpush3.bf16.msra.mxu1 %v1670_v58  ;;  %v284_v51 = vsub.s32 0, %v2822_v50  ;;  %v292_v53 = vsub.s32 2, %v2822_v50  ;;  %v288_v54 = vsub.s32 1, %v2822_v50 }
  0x95   :  { %1639 = vmatpush3.bf16.msra.mxu0 %v1638_v55  ;;  %1673 = vmatprep.subr.bf16.mxu1 %v1672_v1  ;;  %v296_v55 = vsub.s32 3, %v2822_v50 }
  0x96   :  { %1641 = vmatprep.subr.bf16.mxu0 %v1640_v61  ;;  %v285_v56 = vrot.slane %v2828_v52, %v284_v51  ;;  %v293_v57 = vrot.slane %v2828_v52, %v292_v53  ;;  %v289_v58 = vrot.slane %v2828_v52, %v288_v54 }
  0x97   :  { %v297_v59 = vrot.slane %v2828_v52, %v296_v55 }
  0x98   :  { %1675 = vmatpush3.bf16.msra.mxu1 %v1674_v6 }
  0x99   :  { %1643 = vmatpush3.bf16.msra.mxu0 %v1642_v2  ;;  %1677 = vmatprep.subr.bf16.mxu1 %v1676_v11 }
  0x9a   :  { %1645 = vmatprep.subr.bf16.mxu0 %v1644_v10 }
  0x9c   :  { %1679 = vmatpush3.bf16.msra.mxu1 %v1678_v21 }
  0x9d   :  { %1647 = vmatpush3.bf16.msra.mxu0 %v1646_v17  ;;  %1681 = vmatprep.subr.bf16.mxu1 %v1680_v15 }
  0x9e   :  { %1649 = vmatprep.subr.bf16.mxu0 %v1648_v22 }
  0xa0   :  { %1683 = vmatpush3.bf16.msra.mxu1 %v1682_v33 }
  0xa1   :  { %1651 = vmatpush3.bf16.msra.mxu0 %v1650_v27  ;;  %1685 = vmatprep.subr.bf16.mxu1 %v1684_v38 }
  0xa2   :  { %1653 = vmatprep.subr.bf16.mxu0 %v1652_v34 }
  0xa4   :  { %1687 = vmatpush3.bf16.msra.mxu1 %v1686_v42 }
  0xa5   :  { %1655 = vmatpush3.bf16.msra.mxu0 %v1654_v41  ;;  %1721 = vmatprep.subr.bf16.mxu1 %v1720_v48 }
  0xa6   :  { %1689 = vmatprep.subr.bf16.mxu0 %v1688_v46 }
 0x118   :  { %v388_v60 = vpop.f32.mrb[0].mxu0 }
 0x119   :  { %v2837_v16 = vadd.f32 %v388_v60, %v285_v56  ;;  %v465_v61 = vpop.f32.mrb[0].mxu1  ;;  %v390_v62 = vpop.f32.mrb[1].mxu0  ;;  %v870_v60 = vld [vmem:[%s3127_s3 + $0x300] sm:$0xff] }
 0x11a   :  { %v2839_v63 = vadd.f32 %v465_v61, %v293_v57  ;;  %v2841_v0 = vadd.f32 %v390_v62, %v289_v58  ;;  %v467_v1 = vpop.f32.mrb[1].mxu1  ;;  %v871_v61 = vld [vmem:[%s3127_s3 + $0x308] sm:$0xff] }
 0x11b   :  { %v646_v2 = vmul.f32 0.044715, %v2837_v16  ;;  %v2844_v3 = vadd.f32 %v467_v1, %v297_v59 }
 0x11c   :  { %v648_v4 = vmul.f32 0.044715, %v2839_v63  ;;  %v647_v5 = vmul.f32 0.044715, %v2841_v0  ;;  %v394_v8 = vpop.f32.mrb[2].mxu0  ;;  %v631_v1 = vmul.f32 0.5, %v2841_v0 }
 0x11d   :  { %v662_v6 = vmul.f32 %v646_v2, %v2837_v16  ;;  %v649_v7 = vmul.f32 0.044715, %v2844_v3  ;;  %v471_v9 = vpop.f32.mrb[2].mxu1  ;;  %v2852_v12 = vadd.f32 %v394_v8, %v285_v56  ;;  %v396_v13 = vpop.f32.mrb[3].mxu0  ;;  %v838_v56 = vld [vmem:[%s3127_s3 + $0x200] sm:$0xff]  ;;  %v633_v8 = vmul.f32 0.5, %v2844_v3 }
 0x11e   :  { %v664_v10 = vmul.f32 %v648_v4, %v2839_v63  ;;  %v663_v11 = vmul.f32 %v647_v5, %v2841_v0  ;;  %v2854_v14 = vadd.f32 %v471_v9, %v293_v57  ;;  %v473_v17 = vpop.f32.mrb[3].mxu1  ;;  %v2858_v20 = vadd.f32 %v396_v13, %v289_v58  ;;  %v839_v57 = vld [vmem:[%s3127_s3 + $0x208] sm:$0xff]  ;;  %v856_v5 = vld [vmem:[%s3127_s3 + $0x290] sm:$0xff] }
 0x11f   :  { %v678_v18 = vmul.f32 %v662_v6, %v2837_v16  ;;  %v665_v19 = vmul.f32 %v649_v7, %v2844_v3  ;;  %v2860_v21 = vadd.f32 %v473_v17, %v297_v59  ;;  %v654_v24 = vmul.f32 0.044715, %v2852_v12  ;;  %v857_v6 = vld [vmem:[%s3127_s3 + $0x298] sm:$0xff] }
 0x120   :  { %v680_v22 = vmul.f32 %v664_v10, %v2839_v63  ;;  %v679_v23 = vmul.f32 %v663_v11, %v2841_v0  ;;  %v656_v25 = vmul.f32 0.044715, %v2854_v14  ;;  %v655_v29 = vmul.f32 0.044715, %v2858_v20  ;;  %v889_v11 = vld [vmem:[%s3127_s3 + $0x398] sm:$0xff] }
 0x121   :  { %v694_v15 = vadd.f32 %v678_v18, %v2837_v16  ;;  %v681_v26 = vmul.f32 %v665_v19, %v2844_v3  ;;  %v657_v31 = vmul.f32 0.044715, %v2860_v21  ;;  %v670_v30 = vmul.f32 %v654_v24, %v2852_v12 }
 0x122   :  { %v696_v27 = vadd.f32 %v680_v22, %v2839_v63  ;;  %v695_v28 = vadd.f32 %v679_v23, %v2841_v0  ;;  %v672_v32 = vmul.f32 %v656_v25, %v2854_v14  ;;  %v671_v35 = vmul.f32 %v655_v29, %v2858_v20  ;;  %v888_v0 = vld [vmem:[%s3127_s3 + $0x390] sm:$0xff] }
 0x123   :  { %v710_v33 = vmul.f32 0.7978846, %v694_v15  ;;  %v697_v34 = vadd.f32 %v681_v26, %v2844_v3  ;;  %v673_v36 = vmul.f32 %v657_v31, %v2860_v21  ;;  %v686_v41 = vmul.f32 %v670_v30, %v2852_v12  ;;  %v840_v25 = vld [vmem:[%s3127_s3 + $0x210] sm:$0xff]  ;;  %v841_v15 = vld [vmem:[%s3127_s3 + $0x218] sm:$0xff]  ;;  %v859_v30 = vld [vmem:[%s3127_s3 + $0x2a8] sm:$0xff] }
 0x124   :  { %v712_v37 = vmul.f32 0.7978846, %v696_v27  ;;  %v711_v38 = vmul.f32 0.7978846, %v695_v28  ;;  %v687_v40 = vmul.f32 %v671_v35, %v2858_v20  ;;  %v688_v45 = vmul.f32 %v672_v32, %v2854_v14  ;;  %v873_v27 = vld [vmem:[%s3127_s3 + $0x318] sm:$0xff]  ;;  %v858_v28 = vld [vmem:[%s3127_s3 + $0x2a0] sm:$0xff] }
 0x125   :  { %1752 = vtanh.f32 %v710_v33  ;;  %v713_v39 = vmul.f32 0.7978846, %v697_v34  ;;  %v689_v42 = vmul.f32 %v673_v36, %v2860_v21  ;;  %v702_v44 = vadd.f32 %v686_v41, %v2852_v12  ;;  %v891_v35 = vld [vmem:[%s3127_s3 + $0x3a8] sm:$0xff] }
 0x126   :  { %1754 = vtanh.f32 %v712_v37  ;;  %v703_v43 = vadd.f32 %v687_v40, %v2858_v20  ;;  %v704_v49 = vadd.f32 %v688_v45, %v2854_v14  ;;  %v630_v7 = vmul.f32 0.5, %v2837_v16  ;;  %v874_v45 = vld [vmem:[%s3127_s3 + $0x320] sm:$0xff] }
 0x127   :  { %1756 = vtanh.f32 %v711_v38  ;;  %v705_v46 = vadd.f32 %v689_v42, %v2860_v21  ;;  %v718_v48 = vmul.f32 0.7978846, %v702_v44  ;;  %v1690_v10 = vpack.c.bf16 %v839_v57, %v838_v56  ;;  %v843_v44 = vld [vmem:[%s3127_s3 + $0x228] sm:$0xff] }
 0x128   :  { %1758 = vtanh.f32 %v713_v39  ;;  %v719_v47 = vmul.f32 0.7978846, %v703_v43  ;;  %v720_v53 = vmul.f32 0.7978846, %v704_v49  ;;  %v632_v13 = vmul.f32 0.5, %v2839_v63  ;;  %v872_v63 = vld [vmem:[%s3127_s3 + $0x310] sm:$0xff] }
 0x129   :  { %v721_v51 = vmul.f32 0.7978846, %v705_v46  ;;  %v1722_v18 = vpack.c.bf16 %v871_v61, %v870_v60  ;;  %v639_v19 = vmul.f32 0.5, %v2858_v20  ;;  %v638_v3 = vmul.f32 0.5, %v2852_v12  ;;  %v842_v43 = vld [vmem:[%s3127_s3 + $0x220] sm:$0xff]  ;;  %v860_v49 = vld [vmem:[%s3127_s3 + $0x2b0] sm:$0xff] }
 0x12a   :  { %1760 = vtanh.f32 %v719_v47  ;;  %v1692_v24 = vpack.c.bf16 %v857_v6, %v856_v5  ;;  %v1724_v31 = vpack.c.bf16 %v889_v11, %v888_v0  ;;  %v641_v12 = vmul.f32 0.5, %v2860_v21  ;;  %v890_v21 = vld [vmem:[%s3127_s3 + $0x3a0] sm:$0xff]  ;;  %v845_v60 = vld [vmem:[%s3127_s3 + $0x238] sm:$0xff]  ;;  %v876_v61 = vld [vmem:[%s3127_s3 + $0x330] sm:$0xff] }
 0x12b   :  { %1762 = vtanh.f32 %v718_v48  ;;  %v640_v34 = vmul.f32 0.5, %v2854_v14  ;;  %v1694_v39 = vpack.c.bf16 %v841_v15, %v840_v25  ;;  %v1726_v41 = vpack.c.bf16 %v873_v27, %v872_v63  ;;  %v875_v48 = vld [vmem:[%s3127_s3 + $0x328] sm:$0xff]  ;;  %v894_v5 = vld [vmem:[%s3127_s3 + $0x3c0] sm:$0xff]  ;;  %v848_v25 = vld [vmem:[%s3127_s3 + $0x250] sm:$0xff] }
 0x12c   :  { %1764 = vtanh.f32 %v721_v51  ;;  %v1696_v14 = vpack.c.bf16 %v859_v30, %v858_v28  ;;  %v1728_v47 = vpack.c.bf16 %v891_v35, %v890_v21  ;;  %v861_v51 = vld [vmem:[%s3127_s3 + $0x2b8] sm:$0xff]  ;;  %v1698_v56 = vpack.c.bf16 %v843_v44, %v842_v43  ;;  %v895_v6 = vld [vmem:[%s3127_s3 + $0x3c8] sm:$0xff]  ;;  %v878_v11 = vld [vmem:[%s3127_s3 + $0x340] sm:$0xff] }
 0x12d   :  { %1766 = vtanh.f32 %v720_v53  ;;  %v1730_v57 = vpack.c.bf16 %v875_v48, %v874_v45  ;;  %v847_v0 = vld [vmem:[%s3127_s3 + $0x248] sm:$0xff]  ;;  %v849_v15 = vld [vmem:[%s3127_s3 + $0x258] sm:$0xff]  ;;  %v880_v63 = vld [vmem:[%s3127_s3 + $0x350] sm:$0xff] }
 0x12e   :  { %v899_v27 = vld [vmem:[%s3127_s3 + $0x3e8] sm:$0xff]  ;;  %v1710_v28 = vpack.c.bf16 %v849_v15, %v848_v25  ;;  %v882_v21 = vld [vmem:[%s3127_s3 + $0x360] sm:$0xff]  ;;  %v852_v43 = vld [vmem:[%s3127_s3 + $0x270] sm:$0xff] }
 0x12f   :  { %v1753_v54 = vpop.eup %1752  ;;  %v853_v44 = vld [vmem:[%s3127_s3 + $0x278] sm:$0xff] }
 0x130   :  { %v1755_v55 = vpop.eup %1754  ;;  %v742_v59 = vadd.f32 1.0, %v1753_v54  ;;  %v892_v54 = vld [vmem:[%s3127_s3 + $0x3b0] sm:$0xff]  ;;  %v1718_v48 = vpack.c.bf16 %v853_v44, %v852_v43 }
 0x131   :  { %v1757_v58 = vpop.eup %1756  ;;  %v744_v4 = vadd.f32 1.0, %v1755_v55  ;;  %v893_v55 = vld [vmem:[%s3127_s3 + $0x3b8] sm:$0xff] }
 0x132   :  { %v1759_v62 = vpop.eup %1758  ;;  %v743_v2 = vadd.f32 1.0, %v1757_v58  ;;  %v758_v23 = vmul.f32 %v742_v59, %v630_v7  ;;  %v1700_v58 = vpack.c.bf16 %v861_v51, %v860_v49  ;;  %v844_v59 = vld [vmem:[%s3127_s3 + $0x230] sm:$0xff]  ;;  %v300_v49 = vsub.s32 4, %v2822_v50 }
 0x133   :  { %v745_v9 = vadd.f32 1.0, %v1759_v62  ;;  %v760_v20 = vmul.f32 %v744_v4, %v632_v13  ;;  %v1732_v62 = vpack.c.bf16 %v893_v55, %v892_v54  ;;  %v863_v4 = vld [vmem:[%s3127_s3 + $0x2c8] sm:$0xff]  ;;  %v1702_v7 = vpack.c.bf16 %v845_v60, %v844_v59 }
 0x134   :  { %v759_v17 = vmul.f32 %v743_v2, %v631_v1  ;;  %v1761_v22 = vpop.eup %1760  ;;  %v877_v1 = vld [vmem:[%s3127_s3 + $0x338] sm:$0xff]  ;;  %v862_v2 = vld [vmem:[%s3127_s3 + $0x2c0] sm:$0xff]  ;;  %v1736_v13 = vpack.c.bf16 %v895_v6, %v894_v5  ;;  %v304_v54 = vsub.s32 5, %v2822_v50  ;;  %v312_v55 = vsub.s32 7, %v2822_v50 }
 0x135   :  { %v761_v16 = vmul.f32 %v745_v9, %v633_v8  ;;  %v1763_v26 = vpop.eup %1762  ;;  %v751_v29 = vadd.f32 1.0, %v1761_v22  ;;  %v1734_v8 = vpack.c.bf16 %v877_v1, %v876_v61  ;;  %v1704_v9 = vpack.c.bf16 %v863_v4, %v862_v2  ;;  %v896_v22 = vld [vmem:[%s3127_s3 + $0x3d0] sm:$0xff] }
 0x136   :  { %973 = vmatprep.mubr.f32.mxu0 %v759_v17  ;;  %v1765_v32 = vpop.eup %1764  ;;  %v750_v33 = vadd.f32 1.0, %v1763_v26  ;;  %v879_v17 = vld [vmem:[%s3127_s3 + $0x348] sm:$0xff]  ;;  %v313_v59 = vrot.slane %v2828_v52, %v312_v55 }
 0x137   :  { %1048 = vmatprep.mubr.f32.mxu1 %v761_v16  ;;  %974 = vmatmul.mubr.f32.vlgmr.msra.gmra.mrb[8].mxu0 %v758_v23  ;;  %v1767_v36 = vpop.eup %1766  ;;  %v767_v37 = vmul.f32 %v751_v29, %v639_v19  ;;  %v753_v38 = vadd.f32 1.0, %v1765_v32  ;;  %v865_v19 = vld [vmem:[%s3127_s3 + $0x2d8] sm:$0xff]  ;;  %v866_v29 = vld [vmem:[%s3127_s3 + $0x2e0] sm:$0xff] }
 0x138   :  { %1049 = vmatmul.mubr.f32.vlgmr.msra.gmra.mrb[8].mxu1 %v760_v20  ;;  %1691 = vmatpush3.bf16.msra.mxu0 %v1690_v10  ;;  %v766_v40 = vmul.f32 %v750_v33, %v638_v3  ;;  %v752_v42 = vadd.f32 1.0, %v1767_v36  ;;  %v846_v10 = vld [vmem:[%s3127_s3 + $0x240] sm:$0xff]  ;;  %v897_v16 = vld [vmem:[%s3127_s3 + $0x3d8] sm:$0xff]  ;;  %v1738_v3 = vpack.c.bf16 %v879_v17, %v878_v11  ;;  %v883_v36 = vld [vmem:[%s3127_s3 + $0x368] sm:$0xff] }
 0x139   :  { %1723 = vmatpush3.bf16.msra.mxu1 %v1722_v18  ;;  %1693 = vmatprep.subr.bf16.mxu0 %v1692_v24  ;;  %v769_v46 = vmul.f32 %v753_v38, %v641_v12  ;;  %v864_v18 = vld [vmem:[%s3127_s3 + $0x2d0] sm:$0xff]  ;;  %v1706_v23 = vpack.c.bf16 %v847_v0, %v846_v10  ;;  %v1740_v26 = vpack.c.bf16 %v897_v16, %v896_v22  ;;  %v881_v20 = vld [vmem:[%s3127_s3 + $0x358] sm:$0xff]  ;;  %v898_v12 = vld [vmem:[%s3127_s3 + $0x3e0] sm:$0xff] }
 0x13a   :  { %978 = vmatprep.mubr.f32.mxu0 %v767_v37  ;;  %1725 = vmatprep.subr.bf16.mxu1 %v1724_v31  ;;  %v768_v53 = vmul.f32 %v752_v42, %v640_v34  ;;  %v1708_v24 = vpack.c.bf16 %v865_v19, %v864_v18  ;;  %v867_v31 = vld [vmem:[%s3127_s3 + $0x2e8] sm:$0xff]  ;;  %v1742_v30 = vpack.c.bf16 %v881_v20, %v880_v63  ;;  %v850_v33 = vld [vmem:[%s3127_s3 + $0x260] sm:$0xff]  ;;  %v868_v37 = vld [vmem:[%s3127_s3 + $0x2f0] sm:$0xff] }
 0x13b   :  { %979 = vmatmul.mubr.f32.gmra.mrb[10].mxu0 %v766_v40  ;;  %1053 = vmatprep.mubr.f32.mxu1 %v769_v46  ;;  %v1712_v32 = vpack.c.bf16 %v867_v31, %v866_v29  ;;  %v851_v34 = vld [vmem:[%s3127_s3 + $0x268] sm:$0xff]  ;;  %v1744_v35 = vpack.c.bf16 %v899_v27, %v898_v12  ;;  %v869_v38 = vld [vmem:[%s3127_s3 + $0x2f8] sm:$0xff]  ;;  %v1746_v42 = vpack.c.bf16 %v883_v36, %v882_v21  ;;  %v884_v46 = vld [vmem:[%s3127_s3 + $0x370] sm:$0xff] }
 0x13c   :  { %1695 = vmatpush3.bf16.msra.mxu0 %v1694_v39  ;;  %1054 = vmatmul.mubr.f32.gmra.mrb[10].mxu1 %v768_v53  ;;  %v900_v39 = vld [vmem:[%s3127_s3 + $0x3f0] sm:$0xff]  ;;  %v901_v40 = vld [vmem:[%s3127_s3 + $0x3f8] sm:$0xff]  ;;  %v308_v53 = vsub.s32 6, %v2822_v50 }
 0x13d   :  { %1727 = vmatpush3.bf16.msra.mxu1 %v1726_v41  ;;  %1697 = vmatprep.subr.bf16.mxu0 %v1696_v14  ;;  %v1714_v41 = vpack.c.bf16 %v851_v34, %v850_v33  ;;  %v1716_v14 = vpack.c.bf16 %v869_v38, %v868_v37  ;;  %v1748_v45 = vpack.c.bf16 %v901_v40, %v900_v39 }
 0x13e   :  { %1729 = vmatprep.subr.bf16.mxu1 %v1728_v47  ;;  %v885_v47 = vld [vmem:[%s3127_s3 + $0x378] sm:$0xff] }
 0x13f   :  { %v1750_v51 = vpack.c.bf16 %v885_v47, %v884_v46 }
 0x140   :  { %1699 = vmatpush3.bf16.msra.mxu0 %v1698_v56  ;;  %v301_v56 = vrot.slane %v2828_v52, %v300_v49 }
 0x141   :  { %1731 = vmatpush3.bf16.msra.mxu1 %v1730_v57  ;;  %1701 = vmatprep.subr.bf16.mxu0 %v1700_v58  ;;  %v309_v57 = vrot.slane %v2828_v52, %v308_v53  ;;  %v305_v58 = vrot.slane %v2828_v52, %v304_v54 }
 0x142   :  { %1733 = vmatprep.subr.bf16.mxu1 %v1732_v62 }
 0x144   :  { %1703 = vmatpush3.bf16.msra.mxu0 %v1702_v7 }
 0x145   :  { %1735 = vmatpush3.bf16.msra.mxu1 %v1734_v8  ;;  %1705 = vmatprep.subr.bf16.mxu0 %v1704_v9 }
 0x146   :  { %1737 = vmatprep.subr.bf16.mxu1 %v1736_v13 }
 0x148   :  { %1707 = vmatpush3.bf16.msra.mxu0 %v1706_v23 }
 0x149   :  { %1739 = vmatpush3.bf16.msra.mxu1 %v1738_v3  ;;  %1709 = vmatprep.subr.bf16.mxu0 %v1708_v24 }
 0x14a   :  { %1741 = vmatprep.subr.bf16.mxu1 %v1740_v26 }
 0x14c   :  { %1711 = vmatpush3.bf16.msra.mxu0 %v1710_v28 }
 0x14d   :  { %1743 = vmatpush3.bf16.msra.mxu1 %v1742_v30  ;;  %1713 = vmatprep.subr.bf16.mxu0 %v1712_v32 }
 0x14e   :  { %1745 = vmatprep.subr.bf16.mxu1 %v1744_v35 }
 0x150   :  { %1715 = vmatpush3.bf16.msra.mxu0 %v1714_v41 }
 0x151   :  { %1747 = vmatpush3.bf16.msra.mxu1 %v1746_v42  ;;  %1717 = vmatprep.subr.bf16.mxu0 %v1716_v14 }
 0x152   :  { %1749 = vmatprep.subr.bf16.mxu1 %v1748_v45 }
 0x154   :  { %1719 = vmatpush3.bf16.msra.mxu0 %v1718_v48 }
 0x155   :  { %1751 = vmatpush3.bf16.msra.mxu1 %v1750_v51 }
 0x158   :  { %v542_v60 = vpop.f32.mrb[4].mxu0 }
 0x159   :  { %v3081_v61 = vadd.f32 %v542_v60, %v301_v56  ;;  %v619_v62 = vpop.f32.mrb[4].mxu1  ;;  %v544_v1 = vpop.f32.mrb[5].mxu0 }
 0x15a   :  { %v3083_v2 = vadd.f32 %v619_v62, %v309_v57  ;;  %v545_v4 = vadd.f32 %v544_v1, %v305_v58  ;;  %v621_v5 = vpop.f32.mrb[5].mxu1 }
 0x15b   :  { %v650_v50 = vmul.f32 0.044715, %v3081_v61  ;;  %v3086_v6 = vadd.f32 %v621_v5, %v313_v59 }
 0x15c   :  { %v652_v7 = vmul.f32 0.044715, %v3083_v2  ;;  %v651_v8 = vmul.f32 0.044715, %v545_v4  ;;  %v548_v9 = vpop.f32.mrb[6].mxu0 }
 0x15d   :  { %v666_v10 = vmul.f32 %v650_v50, %v3081_v61  ;;  %v653_v52 = vmul.f32 0.044715, %v3086_v6  ;;  %v3091_v0 = vadd.f32 %v548_v9, %v301_v56  ;;  %v625_v11 = vpop.f32.mrb[6].mxu1  ;;  %v550_v13 = vpop.f32.mrb[7].mxu0  ;;  %v635_v56 = vmul.f32 0.5, %v545_v4 }
 0x15e   :  { %v668_v17 = vmul.f32 %v652_v7, %v3083_v2  ;;  %v667_v18 = vmul.f32 %v651_v8, %v545_v4  ;;  %v3094_v19 = vadd.f32 %v625_v11, %v309_v57  ;;  %v551_v22 = vadd.f32 %v550_v13, %v305_v58  ;;  %v627_v16 = vpop.f32.mrb[7].mxu1 }
 0x15f   :  { %v682_v23 = vmul.f32 %v666_v10, %v3081_v61  ;;  %v669_v3 = vmul.f32 %v653_v52, %v3086_v6  ;;  %v658_v24 = vmul.f32 0.044715, %v3091_v0  ;;  %v628_v25 = vadd.f32 %v627_v16, %v313_v59 }
 0x160   :  { %v684_v15 = vmul.f32 %v668_v17, %v3083_v2  ;;  %v660_v63 = vmul.f32 0.044715, %v3094_v19  ;;  %v659_v26 = vmul.f32 0.044715, %v551_v22  ;;  %v683_v20 = vmul.f32 %v667_v18, %v545_v4 }
 0x161   :  { %v698_v29 = vadd.f32 %v682_v23, %v3081_v61  ;;  %v661_v31 = vmul.f32 0.044715, %v628_v25  ;;  %v674_v27 = vmul.f32 %v658_v24, %v3091_v0  ;;  %v685_v21 = vmul.f32 %v669_v3, %v3086_v6 }
 0x162   :  { %v700_v12 = vadd.f32 %v684_v15, %v3083_v2  ;;  %v675_v28 = vmul.f32 %v659_v26, %v551_v22  ;;  %v699_v30 = vadd.f32 %v683_v20, %v545_v4  ;;  %v676_v33 = vmul.f32 %v660_v63, %v3094_v19  ;;  %v1215_v26 = vld [vmem:[%s3129_s4] ss:$0 sm:$0xff] }
 0x163   :  { %v714_v32 = vmul.f32 0.7978846, %v698_v29  ;;  %v677_v34 = vmul.f32 %v661_v31, %v628_v25  ;;  %v701_v38 = vadd.f32 %v685_v21, %v3086_v6  ;;  %v690_v41 = vmul.f32 %v674_v27, %v3091_v0 }
 0x164   :  { %v716_v35 = vmul.f32 0.7978846, %v700_v12  ;;  %v715_v36 = vmul.f32 0.7978846, %v699_v30  ;;  %v691_v37 = vmul.f32 %v675_v28, %v551_v22  ;;  %v692_v43 = vmul.f32 %v676_v33, %v3094_v19 }
 0x165   :  { %1768 = vtanh.f32 %v714_v32  ;;  %v693_v39 = vmul.f32 %v677_v34, %v628_v25  ;;  %v717_v42 = vmul.f32 0.7978846, %v701_v38  ;;  %v706_v45 = vadd.f32 %v690_v41, %v3091_v0 }
 0x166   :  { %1770 = vtanh.f32 %v716_v35  ;;  %v707_v40 = vadd.f32 %v691_v37, %v551_v22  ;;  %v708_v47 = vadd.f32 %v692_v43, %v3094_v19  ;;  %v634_v59 = vmul.f32 0.5, %v3081_v61 }
 0x167   :  { %1772 = vtanh.f32 %v715_v36  ;;  %v709_v14 = vadd.f32 %v693_v39, %v628_v25  ;;  %v722_v48 = vmul.f32 0.7978846, %v706_v45  ;;  %v637_v5 = vmul.f32 0.5, %v3086_v6 }
 0x168   :  { %v723_v44 = vmul.f32 0.7978846, %v707_v40  ;;  %1774 = vtanh.f32 %v717_v42  ;;  %v724_v49 = vmul.f32 0.7978846, %v708_v47  ;;  %v636_v8 = vmul.f32 0.5, %v3083_v2 }
 0x169   :  { %v725_v46 = vmul.f32 0.7978846, %v709_v14  ;;  %v643_v10 = vmul.f32 0.5, %v551_v22  ;;  %v645_v4 = vmul.f32 0.5, %v628_v25  ;;  %v642_v23 = vmul.f32 0.5, %v3091_v0 }
 0x16a   :  { %1776 = vtanh.f32 %v723_v44  ;;  %v644_v22 = vmul.f32 0.5, %v3094_v19 }
 0x16b   :  { %1778 = vtanh.f32 %v725_v46 }
 0x16c   :  { %1780 = vtanh.f32 %v722_v48 }
 0x16d   :  { %1782 = vtanh.f32 %v724_v49 }
 0x16f   :  { %v1769_v51 = vpop.eup %1768 }
 0x170   :  { %v1771_v53 = vpop.eup %1770  ;;  %v746_v55 = vadd.f32 1.0, %v1769_v51 }
 0x171   :  { %v1773_v54 = vpop.eup %1772  ;;  %v748_v60 = vadd.f32 1.0, %v1771_v53 }
 0x172   :  { %v747_v57 = vadd.f32 1.0, %v1773_v54  ;;  %v1775_v58 = vpop.eup %1774  ;;  %v762_v9 = vmul.f32 %v746_v55, %v634_v59 }
 0x173   :  { %v749_v50 = vadd.f32 1.0, %v1775_v58  ;;  %v764_v61 = vmul.f32 %v748_v60, %v636_v8 }
 0x174   :  { %v1777_v62 = vpop.eup %1776  ;;  %v763_v1 = vmul.f32 %v747_v57, %v635_v56 }
 0x175   :  { %v1779_v7 = vpop.eup %1778  ;;  %v755_v52 = vadd.f32 1.0, %v1777_v62  ;;  %v765_v13 = vmul.f32 %v749_v50, %v637_v5 }
 0x176   :  { %v1781_v11 = vpop.eup %1780  ;;  %1123 = vmatprep.mubr.f32.mxu0 %v763_v1  ;;  %v757_v17 = vadd.f32 1.0, %v1779_v7 }
 0x177   :  { %v1783_v18 = vpop.eup %1782  ;;  %1124 = vmatmul.mubr.f32.vlgmr.msra.gmra.mrb[12].mxu0 %v762_v9  ;;  %v771_v16 = vmul.f32 %v755_v52, %v643_v10  ;;  %v754_v3 = vadd.f32 1.0, %v1781_v11  ;;  %1198 = vmatprep.mubr.f32.mxu1 %v765_v13 }
 0x178   :  { %v773_v6 = vmul.f32 %v757_v17, %v645_v4  ;;  %v756_v24 = vadd.f32 1.0, %v1783_v18  ;;  %1199 = vmatmul.mubr.f32.vlgmr.msra.gmra.mrb[12].mxu1 %v764_v61 }
 0x179   :  { %1128 = vmatprep.mubr.f32.mxu0 %v771_v16  ;;  %v770_v2 = vmul.f32 %v754_v3, %v642_v23 }
 0x17a   :  { %1203 = vmatprep.mubr.f32.mxu1 %v773_v6  ;;  %v772_v15 = vmul.f32 %v756_v24, %v644_v22 }
 0x17b   :  { %1129 = vmatmul.mubr.f32.gmra.mrb[14].mxu0 %v770_v2 }
 0x17c   :  { %1204 = vmatmul.mubr.f32.gmra.mrb[14].mxu1 %v772_v15 }
 0x20a   :  { %v1248_v25 = vpop.f32.mrb[8].mxu0 }
 0x20b   :  { %v1286_v63 = vpop.f32.mrb[8].mxu1  ;;  %v1249_v0 = vpop.f32.mrb[9].mxu0 }
 0x20c   :  { %v1250_v20 = vadd.f32 %v1249_v0, %v1248_v25  ;;  %v1287_v29 = vpop.f32.mrb[9].mxu1 }
 0x20d   :  { %v1288_v31 = vadd.f32 %v1287_v29, %v1286_v63 }
 0x20e   :  { %v976_v12 = vadd.f32 %v1250_v20, %v1215_v26  ;;  %v1251_v27 = vpop.f32.mrb[10].mxu0 }
 0x20f   :  { %v1252_v28 = vpop.f32.mrb[11].mxu0  ;;  %v1289_v19 = vpop.f32.mrb[10].mxu1 }
 0x210   :  { %v1051_v30 = vadd.f32 %v1288_v31, %v976_v12  ;;  %v1253_v32 = vadd.f32 %v1252_v28, %v1251_v27  ;;  %v1290_v34 = vpop.f32.mrb[11].mxu1 }
 0x211   :  { %v1291_v21 = vadd.f32 %v1290_v34, %v1289_v19 }
 0x212   :  { %v981_v33 = vadd.f32 %v1253_v32, %v1215_v26 }
 0x214   :  { %v1056_v35 = vadd.f32 %v1291_v21, %v981_v33 }
 0x24a   :  { %v1324_v36 = vpop.f32.mrb[12].mxu0 }
 0x24b   :  { %v1325_v37 = vpop.f32.mrb[13].mxu0  ;;  %v1362_v38 = vpop.f32.mrb[12].mxu1 }
 0x24c   :  { %v1326_v39 = vadd.f32 %v1325_v37, %v1324_v36  ;;  %v1363_v40 = vpop.f32.mrb[13].mxu1 }
 0x24d   :  { %v1364_v42 = vadd.f32 %v1363_v40, %v1362_v38 }
 0x24e   :  { %v1126_v41 = vadd.f32 %v1326_v39, %v1051_v30  ;;  %v1327_v14 = vpop.f32.mrb[14].mxu0 }
 0x24f   :  { %v1328_v43 = vpop.f32.mrb[15].mxu0  ;;  %v1365_v45 = vpop.f32.mrb[14].mxu1 }
 0x250   :  { %v1201_v44 = vadd.f32 %v1364_v42, %v1126_v41  ;;  %v1329_v46 = vadd.f32 %v1328_v43, %v1327_v14  ;;  %v1366_v47 = vpop.f32.mrb[15].mxu1 }
 0x251   :  { %v1367_v49 = vadd.f32 %v1366_v47, %v1365_v45 }
 0x252   :  { %1209 = vst [vmem:[%s3130_s5] sm:$0xff] %v1201_v44  ;;  %v1131_v48 = vadd.f32 %v1329_v46, %v1056_v35 }
 0x254   :  { %v1206_v51 = vadd.f32 %v1367_v49, %v1131_v48 }
 0x256   :  { %1210 = vst [vmem:[%s3130_s5 + $0x8] sm:$0xff] %v1206_v51 }

</bundles_post_ra>
